<compile_context>
chip_gen: v7x
topology: tpu7x:2x2x1
jax: 0.10.0
libtpu: 0.0.40
codegen_flags: <defaults>
</compile_context>

<pallas_src>
import functools

import jax
import jax.numpy as jnp
from jax.experimental import pallas as pl
from jax.experimental.pallas import tpu as pltpu

SELU_ALPHA = 1.6732632423543772
SELU_SCALE = 1.0507009873554805
BN_EPS = 1e-5
LANE = 128


# ----------------------------------------------------------------------------
# Pallas kernel: entire forward pass fused
# ----------------------------------------------------------------------------
def _selu(x):
    neg = SELU_ALPHA * (jnp.exp(jnp.minimum(x, 0.0)) - 1.0)
    return SELU_SCALE * jnp.where(x > 0, x, neg)


def _fused_forward_kernel(*refs, acts, n_ch, chan_w, out_pad):
    """refs = (x, W_1..W_n, b_1..b_n, out). Activations stay on-chip."""
    n = len(acts)
    x_ref = refs[0]
    w_refs = refs[1:1 + n]
    b_refs = refs[1 + n:1 + 2 * n]
    o_ref = refs[1 + 2 * n]

    h = x_ref[...]                                   # (B, in_pad) f32
    for i in range(n):
        # bf16 x bf16 -> f32 on the MXU; bias + SELU epilogue in f32.
        y = jnp.dot(h.astype(jnp.bfloat16), w_refs[i][...],
                    preferred_element_type=jnp.float32)
        y = y + b_refs[i][...]
        if acts[i]:
            y = _selu(y)
        h = y                                        # (B, d_out_pad) f32

    # Double L2 normalisation over the channel axis.  Channel c occupies the
    # column block [c*chan_w, (c+1)*chan_w) of the head output (channel-major).
    blocks = [h[:, c * chan_w:(c + 1) * chan_w] for c in range(n_ch)]
    sq = blocks[0] * blocks[0]
    for c in range(1, n_ch):
        sq = sq + blocks[c] * blocks[c]
    inv1 = jax.lax.rsqrt(sq)                         # EUP, no divide
    z = [b * inv1 + 1e-07 for b in blocks]           # out/||out|| + 1e-7
    sq2 = z[0] * z[0]
    for c in range(1, n_ch):
        sq2 = sq2 + z[c] * z[c]
    inv2 = jax.lax.rsqrt(sq2)
    out_blocks = [zc * inv2 + 1e-07 for zc in z]     # second normalisation

    res = jnp.concatenate(out_blocks, axis=1)        # (B, n_ch*chan_w)
    pad = out_pad - n_ch * chan_w
    if pad > 0:
        res = jnp.concatenate(
            [res, jnp.zeros((res.shape[0], pad), res.dtype)], axis=1)
    o_ref[...] = res                                 # single lane-dense store


def forward(x, params):
    B, C, L = x.shape
    size = params["size"]
    weights, biases, acts = params["weights"], params["biases"], params["acts"]
    in_pad, out_pad = params["in_pad"], params["out_pad"]

    h = x.reshape(B, C * L).astype(jnp.float32)      # (B, C*L), channel-major
    if in_pad > C * L:
        h = jnp.pad(h, ((0, 0), (0, in_pad - C * L)))

    vmem = pl.BlockSpec(memory_space=pltpu.MemorySpace.VMEM)
    n_in = 1 + 2 * len(weights)
    out = pl.pallas_call(
        functools.partial(_fused_forward_kernel, acts=acts, n_ch=C,
                          chan_w=size, out_pad=out_pad),
        out_shape=jax.ShapeDtypeStruct((B, out_pad), jnp.float32),
        in_specs=[vmem] * n_in,
        out_specs=vmem,
        compiler_params=pltpu.CompilerParams(
            vmem_limit_bytes=48 * 1024 * 1024),      # safe on v5e/v6e/v7x
    )(h, *weights, *biases)
    return out[:, :C * size].reshape(B, C, size)     # free reshape, no transpose


# ----------------------------------------------------------------------------
# Parameter setup (plain JAX glue): fold convs + BN into padded dense matrices
# ----------------------------------------------------------------------------
def _pad_to_lane(n):
    return ((n + LANE - 1) // LANE) * LANE


def conv1d_dense(w, l_in, pad):
    """Conv1d (stride=1, dilation=1) -> dense (C_in*L_in, C_out*L_out)."""
    c_out, c_in, K = w.shape
    l_out = l_in + 2 * pad - (K - 1)
    i = jnp.arange(l_in)[:, None]
    j = jnp.arange(l_out)[None, :]
    k = i + pad - j
    valid = (k >= 0) & (k < K)
    g = w[:, :, jnp.clip(k, 0, K - 1)]               # (c_out, c_in, l_in, l_out)
    g = jnp.where(valid[None, None], g, 0.0)
    M = jnp.transpose(g, (1, 2, 0, 3)).reshape(c_in * l_in, c_out * l_out)
    return M, int(l_out)


def convT1d_dense(w, l_in):
    """ConvTranspose1d (stride=1, pad=0) -> dense (C_in*L_in, C_out*L_out)."""
    c_in, c_out, K = w.shape
    l_out = l_in + K - 1
    i = jnp.arange(l_in)[:, None]
    j = jnp.arange(l_out)[None, :]
    k = j - i
    valid = (k >= 0) & (k < K)
    g = w[:, :, jnp.clip(k, 0, K - 1)]               # (c_in, c_out, l_in, l_out)
    g = jnp.where(valid[None, None], g, 0.0)
    M = jnp.transpose(g, (0, 2, 1, 3)).reshape(c_in * l_in, c_out * l_out)
    return M, int(l_out)


def build_params(key, in_channels=2, encoding_len=10, size=64):
    ks = jax.random.split(key, 64)
    idx = iter(range(64))

    def nrm(shape, s=0.1):
        return s * jax.random.normal(ks[next(idx)], shape, dtype=jnp.float32)

    def bn_fold(c):
        gamma = 1.0 + nrm((c,))
        beta = nrm((c,))
        mean = nrm((c,))
        var = 1.0 + jnp.abs(nrm((c,)))
        s = gamma / jnp.sqrt(var + BN_EPS)
        sh = beta - mean * s
        return s, sh

    weights, biases, acts = [], [], []
    d_in = in_channels * size
    d_in_pad = _pad_to_lane(d_in)
    in_pad = d_in_pad

    def add(M, b_flat, act):
        """Pad weight/bias to lane multiples; padded cols stay inert (0)."""
        nonlocal d_in, d_in_pad
        d_out = M.shape[1]
        d_out_pad = _pad_to_lane(d_out)
        Wp = jnp.pad(M, ((0, d_in_pad - M.shape[0]), (0, d_out_pad - d_out)))
        bp = jnp.pad(b_flat, (0, d_out_pad - d_out))[None, :]
        weights.append(Wp.astype(jnp.bfloat16))
        biases.append(bp.astype(jnp.float32))
        acts.append(act)
        d_in, d_in_pad = d_out, d_out_pad

    # ------------------------- encoder -------------------------
    l = size
    w, b = nrm((5, in_channels, 10)), nrm((5,))      # conv1 + SELU
    M, l = conv1d_dense(w, l, 9)
    add(M, jnp.repeat(b, l), True)

    w = nrm((10, 5, 10))                             # conv2 (no bias) + BN + SELU
    M, l = conv1d_dense(w, l, 9)
    s, sh = bn_fold(10)
    add(M * jnp.repeat(s, l)[None, :], jnp.repeat(sh, l), True)

    w, b = nrm((10, 10, 10)), nrm((10,))             # conv3 + SELU
    M, l = conv1d_dense(w, l, 9)
    add(M, jnp.repeat(b, l), True)

    w = nrm((10, 10, 10))                            # conv4 (no bias) + BN + SELU
    M, l = conv1d_dense(w, l, 9)
    s, sh = bn_fold(10)
    add(M * jnp.repeat(s, l)[None, :], jnp.repeat(sh, l), True)

    w, b = nrm((1, 10, 10)), nrm((1,))               # conv5 + SELU
    M, l = conv1d_dense(w, l, 9)
    add(M, jnp.repeat(b, l), True)

    W, b = nrm((l, encoding_len)), nrm((encoding_len,))   # Linear, no act
    add(W, b, False)

    # ------------------------- decoder -------------------------
    l = encoding_len
    w, b = nrm((1, 5, 10)), nrm((5,))                # dconv1 + SELU
    M, l = convT1d_dense(w, l)
    add(M, jnp.repeat(b, l), True)

    w = nrm((5, 10, 10))                             # dconv2 (no bias) + BN + SELU
    M, l = convT1d_dense(w, l)
    s, sh = bn_fold(10)
    add(M * jnp.repeat(s, l)[None, :], jnp.repeat(sh, l), True)

    w, b = nrm((10, 10, 10)), nrm((10,))             # dconv3 + SELU
    M, l = convT1d_dense(w, l)
    add(M, jnp.repeat(b, l), True)

    w = nrm((10, 5, 10))                             # dconv4 (no bias) + BN + SELU
    M, l = convT1d_dense(w, l)
    s, sh = bn_fold(5)
    add(M * jnp.repeat(s, l)[None, :], jnp.repeat(sh, l), True)

    w, b = nrm((5, 5, 10)), nrm((5,))                # dconv5 + SELU
    M, l = convT1d_dense(w, l)
    add(M, jnp.repeat(b, l), True)

    w, b = nrm((5, in_channels, 10)), nrm((in_channels,))  # dconv6 + SELU
    M, l = convT1d_dense(w, l)
    add(M, jnp.repeat(b, l), True)

    dec_size = l

    # -------- head: per-channel Linear(dec_size, size) as block-diag matmul --
    head_w = [nrm((dec_size, size)) for _ in range(in_channels)]
    head_b = [nrm((size,)) for _ in range(in_channels)]
    Wbd = jnp.zeros((in_channels * dec_size, in_channels * size), jnp.float32)
    for c in range(in_channels):
        Wbd = Wbd.at[c * dec_size:(c + 1) * dec_size,
                     c * size:(c + 1) * size].set(head_w[c])
    bbd = jnp.concatenate(head_b)
    add(Wbd, bbd, False)

    return dict(weights=weights, biases=biases, acts=tuple(acts),
                in_pad=in_pad, out_pad=d_in_pad,
                in_channels=in_channels, size=size, dec_size=dec_size)


# ----------------------------------------------------------------------------
if __name__ == "__main__":
    key = jax.random.PRNGKey(0)
    kx, kp = jax.random.split(key)

    B, IN_CH, SIZE, ENC_LEN = 2, 2, 64, 10
    x = jax.random.normal(kx, (B, IN_CH, SIZE), dtype=jnp.float32)

    params = build_params(kp, in_channels=IN_CH, encoding_len=ENC_LEN, size=SIZE)

    fwd = jax.jit(lambda xx: forward(xx, params))
    out = jax.block_until_ready(fwd(x))

    assert out.shape == (B, IN_CH, SIZE), out.shape
    assert out.dtype == jnp.float32
    assert bool(jnp.all(jnp.isfinite(out)))
    print("KERNEL_OK")
</pallas_src>

<mosaic_0001>
module attributes {stable_mosaic.version = 11 : i64} {
  func.func @_fused_forward_kernel(%arg0: memref<2x128xf32, #tpu.memory_space<vmem>>, %arg1: memref<128x384xbf16, #tpu.memory_space<vmem>>, %arg2: memref<384x896xbf16, #tpu.memory_space<vmem>>, %arg3: memref<896x1024xbf16, #tpu.memory_space<vmem>>, %arg4: memref<1024x1024xbf16, #tpu.memory_space<vmem>>, %arg5: memref<1024x128xbf16, #tpu.memory_space<vmem>>, %arg6: memref<128x128xbf16, #tpu.memory_space<vmem>>, %arg7: memref<128x128xbf16, #tpu.memory_space<vmem>>, %arg8: memref<128x384xbf16, #tpu.memory_space<vmem>>, %arg9: memref<384x384xbf16, #tpu.memory_space<vmem>>, %arg10: memref<384x256xbf16, #tpu.memory_space<vmem>>, %arg11: memref<256x384xbf16, #tpu.memory_space<vmem>>, %arg12: memref<384x128xbf16, #tpu.memory_space<vmem>>, %arg13: memref<128x128xbf16, #tpu.memory_space<vmem>>, %arg14: memref<1x384xf32, #tpu.memory_space<vmem>>, %arg15: memref<1x896xf32, #tpu.memory_space<vmem>>, %arg16: memref<1x1024xf32, #tpu.memory_space<vmem>>, %arg17: memref<1x1024xf32, #tpu.memory_space<vmem>>, %arg18: memref<1x128xf32, #tpu.memory_space<vmem>>, %arg19: memref<1x128xf32, #tpu.memory_space<vmem>>, %arg20: memref<1x128xf32, #tpu.memory_space<vmem>>, %arg21: memref<1x384xf32, #tpu.memory_space<vmem>>, %arg22: memref<1x384xf32, #tpu.memory_space<vmem>>, %arg23: memref<1x256xf32, #tpu.memory_space<vmem>>, %arg24: memref<1x384xf32, #tpu.memory_space<vmem>>, %arg25: memref<1x128xf32, #tpu.memory_space<vmem>>, %arg26: memref<1x128xf32, #tpu.memory_space<vmem>>, %arg27: memref<2x128xf32, #tpu.memory_space<vmem>>) attributes {dimension_semantics = [], scalar_prefetch = 0 : i64, scratch_operands = 0 : i64, tpu.core_type = #tpu.core_type<tc>} {
    %c0 = arith.constant 0 : index
    %c0_0 = arith.constant 0 : index
    %0 = vector.load %arg0[%c0, %c0_0] : memref<2x128xf32, #tpu.memory_space<vmem>>, vector<2x128xf32>
    %1 = arith.truncf %0 : vector<2x128xf32> to vector<2x128xbf16>
    %c0_1 = arith.constant 0 : index
    %c0_2 = arith.constant 0 : index
    %2 = vector.load %arg1[%c0_1, %c0_2] : memref<128x384xbf16, #tpu.memory_space<vmem>>, vector<128x384xbf16>
    %cst = arith.constant dense<0.000000e+00> : vector<2x384xf32>
    %3 = tpu.matmul %1, %2, %cst {dimension_numbers = #tpu.dot_dimension_numbers<[1], [0], [0], [1], [0, 0, 1, 1], [], []>} : vector<2x128xbf16>, vector<128x384xbf16>, vector<2x384xf32> -> vector<2x384xf32>
    %c0_3 = arith.constant 0 : index
    %c0_4 = arith.constant 0 : index
    %4 = vector.load %arg14[%c0_3, %c0_4] : memref<1x384xf32, #tpu.memory_space<vmem>>, vector<1x384xf32>
    %5 = vector.broadcast %4 : vector<1x384xf32> to vector<2x384xf32>
    %6 = arith.addf %3, %5 : vector<2x384xf32>
    %cst_5 = arith.constant 0.000000e+00 : f32
    %7 = vector.broadcast %cst_5 : f32 to vector<2x384xf32>
    %8 = arith.minimumf %6, %7 : vector<2x384xf32>
    %9 = math.exp %8 : vector<2x384xf32>
    %cst_6 = arith.constant 1.000000e+00 : f32
    %10 = vector.broadcast %cst_6 : f32 to vector<2x384xf32>
    %11 = arith.subf %9, %10 : vector<2x384xf32>
    %cst_7 = arith.constant 1.67326319 : f32
    %12 = vector.broadcast %cst_7 : f32 to vector<2x384xf32>
    %13 = arith.mulf %12, %11 : vector<2x384xf32>
    %cst_8 = arith.constant 0.000000e+00 : f32
    %14 = vector.broadcast %cst_8 : f32 to vector<2x384xf32>
    %15 = arith.cmpf ogt, %6, %14 : vector<2x384xf32>
    %16 = arith.select %15, %6, %13 : vector<2x384xi1>, vector<2x384xf32>
    %cst_9 = arith.constant 1.05070102 : f32
    %17 = vector.broadcast %cst_9 : f32 to vector<2x384xf32>
    %18 = arith.mulf %17, %16 : vector<2x384xf32>
    %19 = arith.truncf %18 : vector<2x384xf32> to vector<2x384xbf16>
    %c0_10 = arith.constant 0 : index
    %c0_11 = arith.constant 0 : index
    %20 = vector.load %arg2[%c0_10, %c0_11] : memref<384x896xbf16, #tpu.memory_space<vmem>>, vector<384x896xbf16>
    %cst_12 = arith.constant dense<0.000000e+00> : vector<2x896xf32>
    %21 = tpu.matmul %19, %20, %cst_12 {dimension_numbers = #tpu.dot_dimension_numbers<[1], [0], [0], [1], [0, 0, 1, 1], [], []>} : vector<2x384xbf16>, vector<384x896xbf16>, vector<2x896xf32> -> vector<2x896xf32>
    %c0_13 = arith.constant 0 : index
    %c0_14 = arith.constant 0 : index
    %22 = vector.load %arg15[%c0_13, %c0_14] : memref<1x896xf32, #tpu.memory_space<vmem>>, vector<1x896xf32>
    %23 = vector.broadcast %22 : vector<1x896xf32> to vector<2x896xf32>
    %24 = arith.addf %21, %23 : vector<2x896xf32>
    %cst_15 = arith.constant 0.000000e+00 : f32
    %25 = vector.broadcast %cst_15 : f32 to vector<2x896xf32>
    %26 = arith.minimumf %24, %25 : vector<2x896xf32>
    %27 = math.exp %26 : vector<2x896xf32>
    %cst_16 = arith.constant 1.000000e+00 : f32
    %28 = vector.broadcast %cst_16 : f32 to vector<2x896xf32>
    %29 = arith.subf %27, %28 : vector<2x896xf32>
    %cst_17 = arith.constant 1.67326319 : f32
    %30 = vector.broadcast %cst_17 : f32 to vector<2x896xf32>
    %31 = arith.mulf %30, %29 : vector<2x896xf32>
    %cst_18 = arith.constant 0.000000e+00 : f32
    %32 = vector.broadcast %cst_18 : f32 to vector<2x896xf32>
    %33 = arith.cmpf ogt, %24, %32 : vector<2x896xf32>
    %34 = arith.select %33, %24, %31 : vector<2x896xi1>, vector<2x896xf32>
    %cst_19 = arith.constant 1.05070102 : f32
    %35 = vector.broadcast %cst_19 : f32 to vector<2x896xf32>
    %36 = arith.mulf %35, %34 : vector<2x896xf32>
    %37 = arith.truncf %36 : vector<2x896xf32> to vector<2x896xbf16>
    %c0_20 = arith.constant 0 : index
    %c0_21 = arith.constant 0 : index
    %38 = vector.load %arg3[%c0_20, %c0_21] : memref<896x1024xbf16, #tpu.memory_space<vmem>>, vector<896x1024xbf16>
    %cst_22 = arith.constant dense<0.000000e+00> : vector<2x1024xf32>
    %39 = tpu.matmul %37, %38, %cst_22 {dimension_numbers = #tpu.dot_dimension_numbers<[1], [0], [0], [1], [0, 0, 1, 1], [], []>} : vector<2x896xbf16>, vector<896x1024xbf16>, vector<2x1024xf32> -> vector<2x1024xf32>
    %c0_23 = arith.constant 0 : index
    %c0_24 = arith.constant 0 : index
    %40 = vector.load %arg16[%c0_23, %c0_24] : memref<1x1024xf32, #tpu.memory_space<vmem>>, vector<1x1024xf32>
    %41 = vector.broadcast %40 : vector<1x1024xf32> to vector<2x1024xf32>
    %42 = arith.addf %39, %41 : vector<2x1024xf32>
    %cst_25 = arith.constant 0.000000e+00 : f32
    %43 = vector.broadcast %cst_25 : f32 to vector<2x1024xf32>
    %44 = arith.minimumf %42, %43 : vector<2x1024xf32>
    %45 = math.exp %44 : vector<2x1024xf32>
    %cst_26 = arith.constant 1.000000e+00 : f32
    %46 = vector.broadcast %cst_26 : f32 to vector<2x1024xf32>
    %47 = arith.subf %45, %46 : vector<2x1024xf32>
    %cst_27 = arith.constant 1.67326319 : f32
    %48 = vector.broadcast %cst_27 : f32 to vector<2x1024xf32>
    %49 = arith.mulf %48, %47 : vector<2x1024xf32>
    %cst_28 = arith.constant 0.000000e+00 : f32
    %50 = vector.broadcast %cst_28 : f32 to vector<2x1024xf32>
    %51 = arith.cmpf ogt, %42, %50 : vector<2x1024xf32>
    %52 = arith.select %51, %42, %49 : vector<2x1024xi1>, vector<2x1024xf32>
    %cst_29 = arith.constant 1.05070102 : f32
    %53 = vector.broadcast %cst_29 : f32 to vector<2x1024xf32>
    %54 = arith.mulf %53, %52 : vector<2x1024xf32>
    %55 = arith.truncf %54 : vector<2x1024xf32> to vector<2x1024xbf16>
    %c0_30 = arith.constant 0 : index
    %c0_31 = arith.constant 0 : index
    %56 = vector.load %arg4[%c0_30, %c0_31] : memref<1024x1024xbf16, #tpu.memory_space<vmem>>, vector<1024x1024xbf16>
    %cst_32 = arith.constant dense<0.000000e+00> : vector<2x1024xf32>
    %57 = tpu.matmul %55, %56, %cst_32 {dimension_numbers = #tpu.dot_dimension_numbers<[1], [0], [0], [1], [0, 0, 1, 1], [], []>} : vector<2x1024xbf16>, vector<1024x1024xbf16>, vector<2x1024xf32> -> vector<2x1024xf32>
    %c0_33 = arith.constant 0 : index
    %c0_34 = arith.constant 0 : index
    %58 = vector.load %arg17[%c0_33, %c0_34] : memref<1x1024xf32, #tpu.memory_space<vmem>>, vector<1x1024xf32>
    %59 = vector.broadcast %58 : vector<1x1024xf32> to vector<2x1024xf32>
    %60 = arith.addf %57, %59 : vector<2x1024xf32>
    %cst_35 = arith.constant 0.000000e+00 : f32
    %61 = vector.broadcast %cst_35 : f32 to vector<2x1024xf32>
    %62 = arith.minimumf %60, %61 : vector<2x1024xf32>
    %63 = math.exp %62 : vector<2x1024xf32>
    %cst_36 = arith.constant 1.000000e+00 : f32
    %64 = vector.broadcast %cst_36 : f32 to vector<2x1024xf32>
    %65 = arith.subf %63, %64 : vector<2x1024xf32>
    %cst_37 = arith.constant 1.67326319 : f32
    %66 = vector.broadcast %cst_37 : f32 to vector<2x1024xf32>
    %67 = arith.mulf %66, %65 : vector<2x1024xf32>
    %cst_38 = arith.constant 0.000000e+00 : f32
    %68 = vector.broadcast %cst_38 : f32 to vector<2x1024xf32>
    %69 = arith.cmpf ogt, %60, %68 : vector<2x1024xf32>
    %70 = arith.select %69, %60, %67 : vector<2x1024xi1>, vector<2x1024xf32>
    %cst_39 = arith.constant 1.05070102 : f32
    %71 = vector.broadcast %cst_39 : f32 to vector<2x1024xf32>
    %72 = arith.mulf %71, %70 : vector<2x1024xf32>
    %73 = arith.truncf %72 : vector<2x1024xf32> to vector<2x1024xbf16>
    %c0_40 = arith.constant 0 : index
    %c0_41 = arith.constant 0 : index
    %74 = vector.load %arg5[%c0_40, %c0_41] : memref<1024x128xbf16, #tpu.memory_space<vmem>>, vector<1024x128xbf16>
    %cst_42 = arith.constant dense<0.000000e+00> : vector<2x128xf32>
    %75 = tpu.matmul %73, %74, %cst_42 {dimension_numbers = #tpu.dot_dimension_numbers<[1], [0], [0], [1], [0, 0, 1, 1], [], []>} : vector<2x1024xbf16>, vector<1024x128xbf16>, vector<2x128xf32> -> vector<2x128xf32>
    %c0_43 = arith.constant 0 : index
    %c0_44 = arith.constant 0 : index
    %76 = vector.load %arg18[%c0_43, %c0_44] : memref<1x128xf32, #tpu.memory_space<vmem>>, vector<1x128xf32>
    %77 = vector.broadcast %76 : vector<1x128xf32> to vector<2x128xf32>
    %78 = arith.addf %75, %77 : vector<2x128xf32>
    %cst_45 = arith.constant 0.000000e+00 : f32
    %79 = vector.broadcast %cst_45 : f32 to vector<2x128xf32>
    %80 = arith.minimumf %78, %79 : vector<2x128xf32>
    %81 = math.exp %80 : vector<2x128xf32>
    %cst_46 = arith.constant 1.000000e+00 : f32
    %82 = vector.broadcast %cst_46 : f32 to vector<2x128xf32>
    %83 = arith.subf %81, %82 : vector<2x128xf32>
    %cst_47 = arith.constant 1.67326319 : f32
    %84 = vector.broadcast %cst_47 : f32 to vector<2x128xf32>
    %85 = arith.mulf %84, %83 : vector<2x128xf32>
    %cst_48 = arith.constant 0.000000e+00 : f32
    %86 = vector.broadcast %cst_48 : f32 to vector<2x128xf32>
    %87 = arith.cmpf ogt, %78, %86 : vector<2x128xf32>
    %88 = arith.select %87, %78, %85 : vector<2x128xi1>, vector<2x128xf32>
    %cst_49 = arith.constant 1.05070102 : f32
    %89 = vector.broadcast %cst_49 : f32 to vector<2x128xf32>
    %90 = arith.mulf %89, %88 : vector<2x128xf32>
    %91 = arith.truncf %90 : vector<2x128xf32> to vector<2x128xbf16>
    %c0_50 = arith.constant 0 : index
    %c0_51 = arith.constant 0 : index
    %92 = vector.load %arg6[%c0_50, %c0_51] : memref<128x128xbf16, #tpu.memory_space<vmem>>, vector<128x128xbf16>
    %cst_52 = arith.constant dense<0.000000e+00> : vector<2x128xf32>
    %93 = tpu.matmul %91, %92, %cst_52 {dimension_numbers = #tpu.dot_dimension_numbers<[1], [0], [0], [1], [0, 0, 1, 1], [], []>} : vector<2x128xbf16>, vector<128x128xbf16>, vector<2x128xf32> -> vector<2x128xf32>
    %c0_53 = arith.constant 0 : index
    %c0_54 = arith.constant 0 : index
    %94 = vector.load %arg19[%c0_53, %c0_54] : memref<1x128xf32, #tpu.memory_space<vmem>>, vector<1x128xf32>
    %95 = vector.broadcast %94 : vector<1x128xf32> to vector<2x128xf32>
    %96 = arith.addf %93, %95 : vector<2x128xf32>
    %97 = arith.truncf %96 : vector<2x128xf32> to vector<2x128xbf16>
    %c0_55 = arith.constant 0 : index
    %c0_56 = arith.constant 0 : index
    %98 = vector.load %arg7[%c0_55, %c0_56] : memref<128x128xbf16, #tpu.memory_space<vmem>>, vector<128x128xbf16>
    %cst_57 = arith.constant dense<0.000000e+00> : vector<2x128xf32>
    %99 = tpu.matmul %97, %98, %cst_57 {dimension_numbers = #tpu.dot_dimension_numbers<[1], [0], [0], [1], [0, 0, 1, 1], [], []>} : vector<2x128xbf16>, vector<128x128xbf16>, vector<2x128xf32> -> vector<2x128xf32>
    %c0_58 = arith.constant 0 : index
    %c0_59 = arith.constant 0 : index
    %100 = vector.load %arg20[%c0_58, %c0_59] : memref<1x128xf32, #tpu.memory_space<vmem>>, vector<1x128xf32>
    %101 = vector.broadcast %100 : vector<1x128xf32> to vector<2x128xf32>
    %102 = arith.addf %99, %101 : vector<2x128xf32>
    %cst_60 = arith.constant 0.000000e+00 : f32
    %103 = vector.broadcast %cst_60 : f32 to vector<2x128xf32>
    %104 = arith.minimumf %102, %103 : vector<2x128xf32>
    %105 = math.exp %104 : vector<2x128xf32>
    %cst_61 = arith.constant 1.000000e+00 : f32
    %106 = vector.broadcast %cst_61 : f32 to vector<2x128xf32>
    %107 = arith.subf %105, %106 : vector<2x128xf32>
    %cst_62 = arith.constant 1.67326319 : f32
    %108 = vector.broadcast %cst_62 : f32 to vector<2x128xf32>
    %109 = arith.mulf %108, %107 : vector<2x128xf32>
    %cst_63 = arith.constant 0.000000e+00 : f32
    %110 = vector.broadcast %cst_63 : f32 to vector<2x128xf32>
    %111 = arith.cmpf ogt, %102, %110 : vector<2x128xf32>
    %112 = arith.select %111, %102, %109 : vector<2x128xi1>, vector<2x128xf32>
    %cst_64 = arith.constant 1.05070102 : f32
    %113 = vector.broadcast %cst_64 : f32 to vector<2x128xf32>
    %114 = arith.mulf %113, %112 : vector<2x128xf32>
    %115 = arith.truncf %114 : vector<2x128xf32> to vector<2x128xbf16>
    %c0_65 = arith.constant 0 : index
    %c0_66 = arith.constant 0 : index
    %116 = vector.load %arg8[%c0_65, %c0_66] : memref<128x384xbf16, #tpu.memory_space<vmem>>, vector<128x384xbf16>
    %cst_67 = arith.constant dense<0.000000e+00> : vector<2x384xf32>
    %117 = tpu.matmul %115, %116, %cst_67 {dimension_numbers = #tpu.dot_dimension_numbers<[1], [0], [0], [1], [0, 0, 1, 1], [], []>} : vector<2x128xbf16>, vector<128x384xbf16>, vector<2x384xf32> -> vector<2x384xf32>
    %c0_68 = arith.constant 0 : index
    %c0_69 = arith.constant 0 : index
    %118 = vector.load %arg21[%c0_68, %c0_69] : memref<1x384xf32, #tpu.memory_space<vmem>>, vector<1x384xf32>
    %119 = vector.broadcast %118 : vector<1x384xf32> to vector<2x384xf32>
    %120 = arith.addf %117, %119 : vector<2x384xf32>
    %cst_70 = arith.constant 0.000000e+00 : f32
    %121 = vector.broadcast %cst_70 : f32 to vector<2x384xf32>
    %122 = arith.minimumf %120, %121 : vector<2x384xf32>
    %123 = math.exp %122 : vector<2x384xf32>
    %cst_71 = arith.constant 1.000000e+00 : f32
    %124 = vector.broadcast %cst_71 : f32 to vector<2x384xf32>
    %125 = arith.subf %123, %124 : vector<2x384xf32>
    %cst_72 = arith.constant 1.67326319 : f32
    %126 = vector.broadcast %cst_72 : f32 to vector<2x384xf32>
    %127 = arith.mulf %126, %125 : vector<2x384xf32>
    %cst_73 = arith.constant 0.000000e+00 : f32
    %128 = vector.broadcast %cst_73 : f32 to vector<2x384xf32>
    %129 = arith.cmpf ogt, %120, %128 : vector<2x384xf32>
    %130 = arith.select %129, %120, %127 : vector<2x384xi1>, vector<2x384xf32>
    %cst_74 = arith.constant 1.05070102 : f32
    %131 = vector.broadcast %cst_74 : f32 to vector<2x384xf32>
    %132 = arith.mulf %131, %130 : vector<2x384xf32>
    %133 = arith.truncf %132 : vector<2x384xf32> to vector<2x384xbf16>
    %c0_75 = arith.constant 0 : index
    %c0_76 = arith.constant 0 : index
    %134 = vector.load %arg9[%c0_75, %c0_76] : memref<384x384xbf16, #tpu.memory_space<vmem>>, vector<384x384xbf16>
    %cst_77 = arith.constant dense<0.000000e+00> : vector<2x384xf32>
    %135 = tpu.matmul %133, %134, %cst_77 {dimension_numbers = #tpu.dot_dimension_numbers<[1], [0], [0], [1], [0, 0, 1, 1], [], []>} : vector<2x384xbf16>, vector<384x384xbf16>, vector<2x384xf32> -> vector<2x384xf32>
    %c0_78 = arith.constant 0 : index
    %c0_79 = arith.constant 0 : index
    %136 = vector.load %arg22[%c0_78, %c0_79] : memref<1x384xf32, #tpu.memory_space<vmem>>, vector<1x384xf32>
    %137 = vector.broadcast %136 : vector<1x384xf32> to vector<2x384xf32>
    %138 = arith.addf %135, %137 : vector<2x384xf32>
    %cst_80 = arith.constant 0.000000e+00 : f32
    %139 = vector.broadcast %cst_80 : f32 to vector<2x384xf32>
    %140 = arith.minimumf %138, %139 : vector<2x384xf32>
    %141 = math.exp %140 : vector<2x384xf32>
    %cst_81 = arith.constant 1.000000e+00 : f32
    %142 = vector.broadcast %cst_81 : f32 to vector<2x384xf32>
    %143 = arith.subf %141, %142 : vector<2x384xf32>
    %cst_82 = arith.constant 1.67326319 : f32
    %144 = vector.broadcast %cst_82 : f32 to vector<2x384xf32>
    %145 = arith.mulf %144, %143 : vector<2x384xf32>
    %cst_83 = arith.constant 0.000000e+00 : f32
    %146 = vector.broadcast %cst_83 : f32 to vector<2x384xf32>
    %147 = arith.cmpf ogt, %138, %146 : vector<2x384xf32>
    %148 = arith.select %147, %138, %145 : vector<2x384xi1>, vector<2x384xf32>
    %cst_84 = arith.constant 1.05070102 : f32
    %149 = vector.broadcast %cst_84 : f32 to vector<2x384xf32>
    %150 = arith.mulf %149, %148 : vector<2x384xf32>
    %151 = arith.truncf %150 : vector<2x384xf32> to vector<2x384xbf16>
    %c0_85 = arith.constant 0 : index
    %c0_86 = arith.constant 0 : index
    %152 = vector.load %arg10[%c0_85, %c0_86] : memref<384x256xbf16, #tpu.memory_space<vmem>>, vector<384x256xbf16>
    %cst_87 = arith.constant dense<0.000000e+00> : vector<2x256xf32>
    %153 = tpu.matmul %151, %152, %cst_87 {dimension_numbers = #tpu.dot_dimension_numbers<[1], [0], [0], [1], [0, 0, 1, 1], [], []>} : vector<2x384xbf16>, vector<384x256xbf16>, vector<2x256xf32> -> vector<2x256xf32>
    %c0_88 = arith.constant 0 : index
    %c0_89 = arith.constant 0 : index
    %154 = vector.load %arg23[%c0_88, %c0_89] : memref<1x256xf32, #tpu.memory_space<vmem>>, vector<1x256xf32>
    %155 = vector.broadcast %154 : vector<1x256xf32> to vector<2x256xf32>
    %156 = arith.addf %153, %155 : vector<2x256xf32>
    %cst_90 = arith.constant 0.000000e+00 : f32
    %157 = vector.broadcast %cst_90 : f32 to vector<2x256xf32>
    %158 = arith.minimumf %156, %157 : vector<2x256xf32>
    %159 = math.exp %158 : vector<2x256xf32>
    %cst_91 = arith.constant 1.000000e+00 : f32
    %160 = vector.broadcast %cst_91 : f32 to vector<2x256xf32>
    %161 = arith.subf %159, %160 : vector<2x256xf32>
    %cst_92 = arith.constant 1.67326319 : f32
    %162 = vector.broadcast %cst_92 : f32 to vector<2x256xf32>
    %163 = arith.mulf %162, %161 : vector<2x256xf32>
    %cst_93 = arith.constant 0.000000e+00 : f32
    %164 = vector.broadcast %cst_93 : f32 to vector<2x256xf32>
    %165 = arith.cmpf ogt, %156, %164 : vector<2x256xf32>
    %166 = arith.select %165, %156, %163 : vector<2x256xi1>, vector<2x256xf32>
    %cst_94 = arith.constant 1.05070102 : f32
    %167 = vector.broadcast %cst_94 : f32 to vector<2x256xf32>
    %168 = arith.mulf %167, %166 : vector<2x256xf32>
    %169 = arith.truncf %168 : vector<2x256xf32> to vector<2x256xbf16>
    %c0_95 = arith.constant 0 : index
    %c0_96 = arith.constant 0 : index
    %170 = vector.load %arg11[%c0_95, %c0_96] : memref<256x384xbf16, #tpu.memory_space<vmem>>, vector<256x384xbf16>
    %cst_97 = arith.constant dense<0.000000e+00> : vector<2x384xf32>
    %171 = tpu.matmul %169, %170, %cst_97 {dimension_numbers = #tpu.dot_dimension_numbers<[1], [0], [0], [1], [0, 0, 1, 1], [], []>} : vector<2x256xbf16>, vector<256x384xbf16>, vector<2x384xf32> -> vector<2x384xf32>
    %c0_98 = arith.constant 0 : index
    %c0_99 = arith.constant 0 : index
    %172 = vector.load %arg24[%c0_98, %c0_99] : memref<1x384xf32, #tpu.memory_space<vmem>>, vector<1x384xf32>
    %173 = vector.broadcast %172 : vector<1x384xf32> to vector<2x384xf32>
    %174 = arith.addf %171, %173 : vector<2x384xf32>
    %cst_100 = arith.constant 0.000000e+00 : f32
    %175 = vector.broadcast %cst_100 : f32 to vector<2x384xf32>
    %176 = arith.minimumf %174, %175 : vector<2x384xf32>
    %177 = math.exp %176 : vector<2x384xf32>
    %cst_101 = arith.constant 1.000000e+00 : f32
    %178 = vector.broadcast %cst_101 : f32 to vector<2x384xf32>
    %179 = arith.subf %177, %178 : vector<2x384xf32>
    %cst_102 = arith.constant 1.67326319 : f32
    %180 = vector.broadcast %cst_102 : f32 to vector<2x384xf32>
    %181 = arith.mulf %180, %179 : vector<2x384xf32>
    %cst_103 = arith.constant 0.000000e+00 : f32
    %182 = vector.broadcast %cst_103 : f32 to vector<2x384xf32>
    %183 = arith.cmpf ogt, %174, %182 : vector<2x384xf32>
    %184 = arith.select %183, %174, %181 : vector<2x384xi1>, vector<2x384xf32>
    %cst_104 = arith.constant 1.05070102 : f32
    %185 = vector.broadcast %cst_104 : f32 to vector<2x384xf32>
    %186 = arith.mulf %185, %184 : vector<2x384xf32>
    %187 = arith.truncf %186 : vector<2x384xf32> to vector<2x384xbf16>
    %c0_105 = arith.constant 0 : index
    %c0_106 = arith.constant 0 : index
    %188 = vector.load %arg12[%c0_105, %c0_106] : memref<384x128xbf16, #tpu.memory_space<vmem>>, vector<384x128xbf16>
    %cst_107 = arith.constant dense<0.000000e+00> : vector<2x128xf32>
    %189 = tpu.matmul %187, %188, %cst_107 {dimension_numbers = #tpu.dot_dimension_numbers<[1], [0], [0], [1], [0, 0, 1, 1], [], []>} : vector<2x384xbf16>, vector<384x128xbf16>, vector<2x128xf32> -> vector<2x128xf32>
    %c0_108 = arith.constant 0 : index
    %c0_109 = arith.constant 0 : index
    %190 = vector.load %arg25[%c0_108, %c0_109] : memref<1x128xf32, #tpu.memory_space<vmem>>, vector<1x128xf32>
    %191 = vector.broadcast %190 : vector<1x128xf32> to vector<2x128xf32>
    %192 = arith.addf %189, %191 : vector<2x128xf32>
    %cst_110 = arith.constant 0.000000e+00 : f32
    %193 = vector.broadcast %cst_110 : f32 to vector<2x128xf32>
    %194 = arith.minimumf %192, %193 : vector<2x128xf32>
    %195 = math.exp %194 : vector<2x128xf32>
    %cst_111 = arith.constant 1.000000e+00 : f32
    %196 = vector.broadcast %cst_111 : f32 to vector<2x128xf32>
    %197 = arith.subf %195, %196 : vector<2x128xf32>
    %cst_112 = arith.constant 1.67326319 : f32
    %198 = vector.broadcast %cst_112 : f32 to vector<2x128xf32>
    %199 = arith.mulf %198, %197 : vector<2x128xf32>
    %cst_113 = arith.constant 0.000000e+00 : f32
    %200 = vector.broadcast %cst_113 : f32 to vector<2x128xf32>
    %201 = arith.cmpf ogt, %192, %200 : vector<2x128xf32>
    %202 = arith.select %201, %192, %199 : vector<2x128xi1>, vector<2x128xf32>
    %cst_114 = arith.constant 1.05070102 : f32
    %203 = vector.broadcast %cst_114 : f32 to vector<2x128xf32>
    %204 = arith.mulf %203, %202 : vector<2x128xf32>
    %205 = arith.truncf %204 : vector<2x128xf32> to vector<2x128xbf16>
    %c0_115 = arith.constant 0 : index
    %c0_116 = arith.constant 0 : index
    %206 = vector.load %arg13[%c0_115, %c0_116] : memref<128x128xbf16, #tpu.memory_space<vmem>>, vector<128x128xbf16>
    %cst_117 = arith.constant dense<0.000000e+00> : vector<2x128xf32>
    %207 = tpu.matmul %205, %206, %cst_117 {dimension_numbers = #tpu.dot_dimension_numbers<[1], [0], [0], [1], [0, 0, 1, 1], [], []>} : vector<2x128xbf16>, vector<128x128xbf16>, vector<2x128xf32> -> vector<2x128xf32>
    %c0_118 = arith.constant 0 : index
    %c0_119 = arith.constant 0 : index
    %208 = vector.load %arg26[%c0_118, %c0_119] : memref<1x128xf32, #tpu.memory_space<vmem>>, vector<1x128xf32>
    %209 = vector.broadcast %208 : vector<1x128xf32> to vector<2x128xf32>
    %210 = arith.addf %207, %209 : vector<2x128xf32>
    %211 = vector.extract_strided_slice %210 {offsets = [0, 0], sizes = [2, 64], strides = [1, 1]} : vector<2x128xf32> to vector<2x64xf32>
    %212 = vector.extract_strided_slice %210 {offsets = [0, 64], sizes = [2, 64], strides = [1, 1]} : vector<2x128xf32> to vector<2x64xf32>
    %213 = arith.mulf %211, %211 : vector<2x64xf32>
    %214 = arith.mulf %212, %212 : vector<2x64xf32>
    %215 = arith.addf %213, %214 : vector<2x64xf32>
    %216 = math.rsqrt %215 : vector<2x64xf32>
    %217 = arith.mulf %211, %216 : vector<2x64xf32>
    %cst_120 = arith.constant 1.000000e-07 : f32
    %218 = vector.broadcast %cst_120 : f32 to vector<2x64xf32>
    %219 = arith.addf %217, %218 : vector<2x64xf32>
    %220 = arith.mulf %212, %216 : vector<2x64xf32>
    %cst_121 = arith.constant 1.000000e-07 : f32
    %221 = vector.broadcast %cst_121 : f32 to vector<2x64xf32>
    %222 = arith.addf %220, %221 : vector<2x64xf32>
    %223 = arith.mulf %219, %219 : vector<2x64xf32>
    %224 = arith.mulf %222, %222 : vector<2x64xf32>
    %225 = arith.addf %223, %224 : vector<2x64xf32>
    %226 = math.rsqrt %225 : vector<2x64xf32>
    %227 = arith.mulf %219, %226 : vector<2x64xf32>
    %cst_122 = arith.constant 1.000000e-07 : f32
    %228 = vector.broadcast %cst_122 : f32 to vector<2x64xf32>
    %229 = arith.addf %227, %228 : vector<2x64xf32>
    %230 = arith.mulf %222, %226 : vector<2x64xf32>
    %cst_123 = arith.constant 1.000000e-07 : f32
    %231 = vector.broadcast %cst_123 : f32 to vector<2x64xf32>
    %232 = arith.addf %230, %231 : vector<2x64xf32>
    %233 = tpu.concatenate %229, %232 in 1 : vector<2x64xf32>, vector<2x64xf32> -> vector<2x128xf32>
    %c0_124 = arith.constant 0 : index
    %c0_125 = arith.constant 0 : index
    %234 = vector.load %arg27[%c0_124, %c0_125] : memref<2x128xf32, #tpu.memory_space<vmem>>, vector<2x128xf32>
    tpu.vector_store %arg27[%c0_124, %c0_125], %233 {strides = array<i32>} : memref<2x128xf32, #tpu.memory_space<vmem>>, vector<2x128xf32>,
    return
  }
}

</mosaic_0001>

<bundles_post_ra>
// kernel: _lambda_.1
= control target key start
LH: loop header
LB: loop body
LE: loop exit
PB: predicated region body
PF: predicated region fallthrough
CT: control target
= control target key end

     0   :  { %v15117_v1 = vmov 0.0   ;;  %v15118_v2 = vmov 0   ;;  %vm15119_vm0 = vmmov 0   ;;  %s20115_s1 = inlined_call_operand.vmem [shape: bf16[128,384], index: 1, kind: input, shape index: {}]   ;;  %s20116_s2 = inlined_call_operand.vmem [shape: bf16[384,896], index: 2, kind: input, shape index: {}]   ;;  %s20117_s0 = inlined_call_operand.vmem [shape: f32[2,128], index: 0, kind: input, shape index: {}]   ;;  %s20118_s14 = inlined_call_operand.vmem [shape: f32[1,384], index: 14, kind: input, shape index: {}]   ;;  %s20119_s3 = inlined_call_operand.vmem [shape: bf16[896,1024], index: 3, kind: input, shape index: {}]   ;;  %s20120_s15 = inlined_call_operand.vmem [shape: f32[1,896], index: 15, kind: input, shape index: {}]   ;;  %s20121_s16 = inlined_call_operand.vmem [shape: f32[1,1024], index: 16, kind: input, shape index: {}]   ;;  %s20122_s4 = inlined_call_operand.vmem [shape: bf16[1024,1024], index: 4, kind: input, shape index: {}]   ;;  %s20123_s5 = inlined_call_operand.vmem [shape: bf16[1024,128], index: 5, kind: input, shape index: {}]   ;;  %s20124_s17 = inlined_call_operand.vmem [shape: f32[1,1024], index: 17, kind: input, shape index: {}]   ;;  %s20125_s18 = inlined_call_operand.vmem [shape: f32[1,128], index: 18, kind: input, shape index: {}]   ;;  %s20126_s6 = inlined_call_operand.vmem [shape: bf16[128,128], index: 6, kind: input, shape index: {}]   ;;  %s20127_s7 = inlined_call_operand.vmem [shape: bf16[128,128], index: 7, kind: input, shape index: {}]   ;;  %s20128_s8 = inlined_call_operand.vmem [shape: bf16[128,384], index: 8, kind: input, shape index: {}]   ;;  %s20129_s19 = inlined_call_operand.vmem [shape: f32[1,128], index: 19, kind: input, shape index: {}]   ;;  %s20130_s9 = inlined_call_operand.vmem [shape: bf16[384,384], index: 9, kind: input, shape index: {}]   ;;  %s20131_s20 = inlined_call_operand.vmem [shape: f32[1,128], index: 20, kind: input, shape index: {}]   ;;  %s20132_s10 = inlined_call_operand.vmem [shape: bf16[384,256], index: 10, kind: input, shape index: {}]   ;;  %s20133_s21 = inlined_call_operand.vmem [shape: f32[1,384], index: 21, kind: input, shape index: {}]   ;;  %s20134_s11 = inlined_call_operand.vmem [shape: bf16[256,384], index: 11, kind: input, shape index: {}]   ;;  %s20135_s22 = inlined_call_operand.vmem [shape: f32[1,384], index: 22, kind: input, shape index: {}]   ;;  %s20136_s12 = inlined_call_operand.vmem [shape: bf16[384,128], index: 12, kind: input, shape index: {}]   ;;  %s20137_s23 = inlined_call_operand.vmem [shape: f32[1,256], index: 23, kind: input, shape index: {}]   ;;  %s20138_s24 = inlined_call_operand.vmem [shape: f32[1,384], index: 24, kind: input, shape index: {}]   ;;  %s20139_s13 = inlined_call_operand.vmem [shape: bf16[128,128], index: 13, kind: input, shape index: {}]   ;;  %s20140_s25 = inlined_call_operand.vmem [shape: f32[1,128], index: 25, kind: input, shape index: {}]   ;;  %s20141_s26 = inlined_call_operand.vmem [shape: f32[1,128], index: 26, kind: input, shape index: {}]   ;;  %s20142_s27 = inlined_call_operand.vmem [shape: f32[2,128], index: 27, kind: output, shape index: {}]  }
   0x1   :  { %20150 = sst [smem:[#allocation2_spill]] %s20115_s1  ;;  %14078 = vmatprep.subr.bf16.mxu1 %v15117_v1  ;;  %298 = vmatprep.mubr.bf16.mxu0 %v15118_v2 }
   0x2   :  { %20151 = sst [smem:[#allocation3_spill]] %s20116_s2  ;;  %14094 = vmatprep.mubr.msk.bf16.mxu1 %vm15119_vm0, %v15117_v1 }
   0x3   :  { %20152 = sst [smem:[#allocation4_spill]] %s20117_s0  ;;  %s20164_s2 = sld [smem:[#allocation3_spill]] }
   0x4   :  { %20153 = sst [smem:[#allocation5_spill]] %s20118_s14 }
   0x5   :  { %20154 = sst [smem:[#allocation6_spill]] %s20119_s3 }
   0x6   :  { %20155 = sst [smem:[#allocation7_spill]] %s20120_s15  ;;  %s20163_s15 = sld [smem:[#allocation4_spill]] }
   0x7   :  { %20156 = sst [smem:[#allocation8_spill]] %s20121_s16  ;;  %s20166_s1 = sld [smem:[#allocation6_spill]] }
   0x8   :  { %20157 = sst [smem:[#allocation9_spill]] %s20122_s4 }
   0x9   :  { %20158 = sst [smem:[#allocation10_spill]] %s20123_s5  ;;  %v14418_v26 = vld [vmem:[%s20164_s2 + $0x4] ss:$28 sps:$4 sm:$0xff]   ;;  %v14424_v30 = vld [vmem:[%s20164_s2 + $0x3c] ss:$28 sps:$4 sm:$0xff]   ;;  %s20169_s14 = sld [smem:[#allocation9_spill]] }
   0xa   :  { %20159 = sst [smem:[#allocation11_spill]] %s20124_s17  ;;  %s20162_s5 = sld [smem:[#allocation2_spill]]  ;;  %v14416_v29 = vld [vmem:[%s20164_s2] ss:$28 sps:$4 sm:$0xff]   ;;  %v14421_v31 = vld [vmem:[%s20164_s2 + $0xc] ss:$28 sps:$4 sm:$0xff]  }
   0xb   :  { %20160 = sst [smem:[#allocation12_spill]] %s20125_s18  ;;  %v14419_v32 = vld [vmem:[%s20164_s2 + $0x8] ss:$28 sps:$4 sm:$0xff]   ;;  %v14422_v33 = vld [vmem:[%s20164_s2 + $0x38] ss:$28 sps:$4 sm:$0xff]   ;;  %s20167_s17 = sld [smem:[#allocation7_spill]] }
   0xc   :  { %20161 = sst [smem:[#allocation13_spill]] %s20126_s6  ;;  %v87_v24 = vld [vmem:[%s20163_s15] sm:$0x3]  ;;  %v14430_v34 = vld [vmem:[%s20164_s2 + $0x74] ss:$28 sps:$4 sm:$0xff]   ;;  %s20168_s18 = sld [smem:[#allocation8_spill]] }
   0xd   :  { %v88_v27 = vpack.c.bf16 %v87_v24, %v87_v24  ;;  %v14427_v35 = vld [vmem:[%s20164_s2 + $0x44] ss:$28 sps:$4 sm:$0xff]   ;;  %v14428_v37 = vld [vmem:[%s20164_s2 + $0x70] ss:$28 sps:$4 sm:$0xff]   ;;  %v14433_v39 = vld [vmem:[%s20164_s2 + $0x7c] ss:$28 sps:$4 sm:$0xff]  }
   0xe   :  { %v14425_v36 = vld [vmem:[%s20164_s2 + $0x40] ss:$28 sps:$4 sm:$0xff]   ;;  %v14436_v38 = vld [vmem:[%s20164_s2 + $0xac] ss:$28 sps:$4 sm:$0xff]   ;;  %v14431_v40 = vld [vmem:[%s20164_s2 + $0x78] ss:$28 sps:$4 sm:$0xff]  }
   0xf   :  { %v14434_v41 = vld [vmem:[%s20164_s2 + $0xa8] ss:$28 sps:$4 sm:$0xff]   ;;  %v14439_v42 = vld [vmem:[%s20164_s2 + $0xb4] ss:$28 sps:$4 sm:$0xff]   ;;  %v14440_v44 = vld [vmem:[%s20164_s2 + $0xe0] ss:$28 sps:$4 sm:$0xff]  }
  0x10   :  { %v14384_v0 = vld [vmem:[%s20162_s5 + $0x4] ss:$12 sps:$4 sm:$0xff]   ;;  %v14386_v3 = vld [vmem:[%s20162_s5] ss:$12 sps:$4 sm:$0xff]   ;;  %v14387_v4 = vld [vmem:[%s20162_s5 + $0x1c] ss:$12 sps:$4 sm:$0xff]  }
  0x11   :  { %266 = vmatprep.subr.bf16.mxu0 %v14384_v0  ;;  %v14389_v5 = vld [vmem:[%s20162_s5 + $0x18] ss:$12 sps:$4 sm:$0xff]   ;;  %v14390_v6 = vld [vmem:[%s20162_s5 + $0x34] ss:$12 sps:$4 sm:$0xff]   ;;  %v14392_v8 = vld [vmem:[%s20162_s5 + $0x30] ss:$12 sps:$4 sm:$0xff]  }
  0x12   :  { %267 = vmatpush1.bf16.msra.mxu0 %v14386_v3  ;;  %v14396_v7 = vld [vmem:[%s20162_s5 + $0x8] ss:$12 sps:$4 sm:$0xff]   ;;  %v14393_v9 = vld [vmem:[%s20162_s5 + $0x4c] ss:$12 sps:$4 sm:$0xff]   ;;  %v14397_v12 = vld [vmem:[%s20162_s5 + $0x64] ss:$12 sps:$4 sm:$0xff]  }
  0x13   :  { %268 = vmatprep.subr.bf16.mxu0 %v14387_v4  ;;  %14079 = vmatpush3.bf16.msra.mxu1 %v14396_v7  ;;  %v14400_v10 = vld [vmem:[%s20162_s5 + $0x20] ss:$12 sps:$4 sm:$0xff]   ;;  %v14395_v11 = vld [vmem:[%s20162_s5 + $0x48] ss:$12 sps:$4 sm:$0xff]   ;;  %v14404_v13 = vld [vmem:[%s20162_s5 + $0x38] ss:$12 sps:$4 sm:$0xff]  }
  0x14   :  { %14080 = vmatprep.subr.bf16.mxu1 %v15117_v1  ;;  %v14399_v14 = vld [vmem:[%s20162_s5 + $0x60] ss:$12 sps:$4 sm:$0xff]   ;;  %v14401_v15 = vld [vmem:[%s20162_s5 + $0x7c] ss:$12 sps:$4 sm:$0xff]   ;;  %v14403_v17 = vld [vmem:[%s20162_s5 + $0x78] ss:$12 sps:$4 sm:$0xff]  }
  0x15   :  { %v14408_v16 = vld [vmem:[%s20162_s5 + $0x50] ss:$12 sps:$4 sm:$0xff]   ;;  %v14405_v18 = vld [vmem:[%s20162_s5 + $0x94] ss:$12 sps:$4 sm:$0xff]   ;;  %v14409_v21 = vld [vmem:[%s20162_s5 + $0xac] ss:$12 sps:$4 sm:$0xff]  }
  0x16   :  { %269 = vmatpush1.bf16.msra.mxu0 %v14389_v5  ;;  %v14412_v19 = vld [vmem:[%s20162_s5 + $0x68] ss:$12 sps:$4 sm:$0xff]   ;;  %v14407_v20 = vld [vmem:[%s20162_s5 + $0x90] ss:$12 sps:$4 sm:$0xff]   ;;  %v14413_v22 = vld [vmem:[%s20162_s5 + $0x80] ss:$12 sps:$4 sm:$0xff]  }
  0x17   :  { %270 = vmatprep.subr.bf16.mxu0 %v14390_v6  ;;  %14081 = vmatpush3.bf16.msra.mxu1 %v14400_v10  ;;  %v14411_v23 = vld [vmem:[%s20162_s5 + $0xa8] ss:$12 sps:$4 sm:$0xff]   ;;  %v14414_v25 = vld [vmem:[%s20162_s5 + $0x98] ss:$12 sps:$4 sm:$0xff]   ;;  %v14415_v28 = vld [vmem:[%s20162_s5 + $0xb0] ss:$12 sps:$4 sm:$0xff]  }
  0x18   :  { %14082 = vmatprep.subr.bf16.mxu1 %v15117_v1  ;;  %v14442_v43 = vld [vmem:[%s20164_s2 + $0xe4] ss:$28 sps:$4 sm:$0xff]   ;;  %v14437_v45 = vld [vmem:[%s20164_s2 + $0xb0] ss:$28 sps:$4 sm:$0xff]   ;;  %v14448_v46 = vld [vmem:[%s20164_s2 + $0x11c] ss:$28 sps:$4 sm:$0xff]  }
  0x19   :  { %v14445_v47 = vld [vmem:[%s20164_s2 + $0xec] ss:$28 sps:$4 sm:$0xff]   ;;  %v14446_v48 = vld [vmem:[%s20164_s2 + $0x118] ss:$28 sps:$4 sm:$0xff]   ;;  %v14451_v51 = vld [vmem:[%s20164_s2 + $0x124] ss:$28 sps:$4 sm:$0xff]  }
  0x1a   :  { %271 = vmatpush1.bf16.msra.mxu0 %v14392_v8  ;;  %v14443_v49 = vld [vmem:[%s20164_s2 + $0xe8] ss:$28 sps:$4 sm:$0xff]   ;;  %v14454_v50 = vld [vmem:[%s20164_s2 + $0x154] ss:$28 sps:$4 sm:$0xff]   ;;  %v14449_v53 = vld [vmem:[%s20164_s2 + $0x120] ss:$28 sps:$4 sm:$0xff]  }
  0x1b   :  { %272 = vmatprep.subr.bf16.mxu0 %v14393_v9  ;;  %14083 = vmatpush3.bf16.msra.mxu1 %v14404_v13  ;;  %v14452_v52 = vld [vmem:[%s20164_s2 + $0x150] ss:$28 sps:$4 sm:$0xff]   ;;  %v14457_v55 = vld [vmem:[%s20164_s2 + $0x15c] ss:$28 sps:$4 sm:$0xff]   ;;  %v14458_v56 = vld [vmem:[%s20164_s2 + $0x188] ss:$28 sps:$4 sm:$0xff]  }
  0x1c   :  { %14084 = vmatprep.subr.bf16.mxu1 %v15117_v1  ;;  %v14460_v54 = vld [vmem:[%s20164_s2 + $0x18c] ss:$28 sps:$4 sm:$0xff]   ;;  %v14455_v57 = vld [vmem:[%s20164_s2 + $0x158] ss:$28 sps:$4 sm:$0xff]   ;;  %v14466_v58 = vld [vmem:[%s20164_s2 + $0x1c4] ss:$28 sps:$4 sm:$0xff]  }
  0x1d   :  { %v14463_v59 = vld [vmem:[%s20164_s2 + $0x194] ss:$28 sps:$4 sm:$0xff]   ;;  %v14464_v60 = vld [vmem:[%s20164_s2 + $0x1c0] ss:$28 sps:$4 sm:$0xff]   ;;  %v14469_v62 = vld [vmem:[%s20164_s2 + $0x1cc] ss:$28 sps:$4 sm:$0xff]  }
  0x1e   :  { %273 = vmatpush1.bf16.msra.mxu0 %v14395_v11  ;;  %v14461_v61 = vld [vmem:[%s20164_s2 + $0x190] ss:$28 sps:$4 sm:$0xff]   ;;  %v14467_v63 = vld [vmem:[%s20164_s2 + $0x1c8] ss:$28 sps:$4 sm:$0xff]   ;;  %v14472_v0 = vld [vmem:[%s20164_s2 + $0x1fc] ss:$28 sps:$4 sm:$0xff]  }
  0x1f   :  { %274 = vmatprep.subr.bf16.mxu0 %v14397_v12  ;;  %14085 = vmatpush3.bf16.msra.mxu1 %v14408_v16  ;;  %v14475_v3 = vld [vmem:[%s20164_s2 + $0x204] ss:$28 sps:$4 sm:$0xff]   ;;  %v14470_v4 = vld [vmem:[%s20164_s2 + $0x1f8] ss:$28 sps:$4 sm:$0xff]   ;;  %v14476_v8 = vld [vmem:[%s20164_s2 + $0x230] ss:$28 sps:$4 sm:$0xff]  }
  0x20   :  { %14086 = vmatprep.subr.bf16.mxu1 %v15117_v1  ;;  %v14473_v5 = vld [vmem:[%s20164_s2 + $0x200] ss:$28 sps:$4 sm:$0xff]   ;;  %v14478_v6 = vld [vmem:[%s20164_s2 + $0x234] ss:$28 sps:$4 sm:$0xff]   ;;  %v14484_v10 = vld [vmem:[%s20164_s2 + $0x26c] ss:$28 sps:$4 sm:$0xff]  }
  0x21   :  { %v14481_v7 = vld [vmem:[%s20164_s2 + $0x23c] ss:$28 sps:$4 sm:$0xff]   ;;  %v14487_v11 = vld [vmem:[%s20164_s2 + $0x274] ss:$28 sps:$4 sm:$0xff]   ;;  %v14482_v12 = vld [vmem:[%s20164_s2 + $0x268] ss:$28 sps:$4 sm:$0xff]  }
  0x22   :  { %275 = vmatpush1.bf16.msra.mxu0 %v14399_v14  ;;  %v14479_v9 = vld [vmem:[%s20164_s2 + $0x238] ss:$28 sps:$4 sm:$0xff]   ;;  %v14485_v13 = vld [vmem:[%s20164_s2 + $0x270] ss:$28 sps:$4 sm:$0xff]   ;;  %v14490_v14 = vld [vmem:[%s20164_s2 + $0x2a4] ss:$28 sps:$4 sm:$0xff]  }
  0x23   :  { %276 = vmatprep.subr.bf16.mxu0 %v14401_v15  ;;  %14087 = vmatpush3.bf16.msra.mxu1 %v14412_v19  ;;  %v14493_v15 = vld [vmem:[%s20164_s2 + $0x2ac] ss:$28 sps:$4 sm:$0xff]   ;;  %v14488_v16 = vld [vmem:[%s20164_s2 + $0x2a0] ss:$28 sps:$4 sm:$0xff]   ;;  %s20165_s15 = sld [smem:[#allocation5_spill]]  ;;  %s20172_s16 = sld [smem:[#allocation12_spill]] }
  0x24   :  { %14088 = vmatprep.subr.bf16.mxu1 %v15117_v1  ;;  %v14499_v19 = vld [vmem:[%s20164_s2 + $0x2e4] ss:$28 sps:$4 sm:$0xff]   ;;  %v14500_v24 = vld [vmem:[%s20164_s2 + $0x310] ss:$28 sps:$4 sm:$0xff]   ;;  %s20173_s0 = sld [smem:[#allocation13_spill]] }
  0x26   :  { %277 = vmatpush1.bf16.msra.mxu0 %v14403_v17  ;;  %v14491_v17 = vld [vmem:[%s20164_s2 + $0x2a8] ss:$28 sps:$4 sm:$0xff]  }
  0x27   :  { %278 = vmatprep.subr.bf16.mxu0 %v14405_v18  ;;  %14089 = vmatpush3.bf16.msra.mxu1 %v14413_v22  ;;  %v14496_v18 = vld [vmem:[%s20164_s2 + $0x2dc] ss:$28 sps:$4 sm:$0xff]   ;;  %v14502_v22 = vld [vmem:[%s20164_s2 + $0x314] ss:$28 sps:$4 sm:$0xff]  }
  0x28   :  { %14090 = vmatprep.subr.bf16.mxu1 %v15117_v1 }
  0x2a   :  { %279 = vmatpush1.bf16.msra.mxu0 %v14407_v20  ;;  %v14494_v20 = vld [vmem:[%s20164_s2 + $0x2d8] ss:$28 sps:$4 sm:$0xff]  }
  0x2b   :  { %280 = vmatprep.subr.bf16.mxu0 %v14409_v21  ;;  %14091 = vmatpush3.bf16.msra.mxu1 %v14414_v25  ;;  %v14497_v21 = vld [vmem:[%s20164_s2 + $0x2e0] ss:$28 sps:$4 sm:$0xff]   ;;  %v14503_v25 = vld [vmem:[%s20164_s2 + $0x318] ss:$28 sps:$4 sm:$0xff]  }
  0x2c   :  { %14092 = vmatprep.subr.bf16.mxu1 %v15117_v1 }
  0x2e   :  { %281 = vmatpush1.bf16.msra.mxu0 %v14411_v23  ;;  %v14505_v23 = vld [vmem:[%s20164_s2 + $0x31c] ss:$28 sps:$4 sm:$0xff]  }
  0x2f   :  { %1467 = vmatprep.subr.bf16.mxu0 %v14418_v26  ;;  %14093 = vmatpush3.bf16.msra.mxu1 %v14415_v28  ;;  %v14508_v26 = vld [vmem:[%s20164_s2 + $0x34c] ss:$28 sps:$4 sm:$0xff]  }
  0x30   :  { %1549 = vmatprep.subr.bf16.mxu1 %v14421_v31  ;;  %v14506_v28 = vld [vmem:[%s20164_s2 + $0x348] ss:$28 sps:$4 sm:$0xff]  }
  0x31   :  { %299 = vmatmul.mubr.bf16.vlgmr.msra.gmra.mrb[0].mxu0 %v88_v27  ;;  %v14517_v31 = vld [vmem:[%s20164_s2 + $0x38c] ss:$28 sps:$4 sm:$0xff]  }
  0x32   :  { %1468 = vmatpush1.bf16.msra.mxu0 %v14416_v29  ;;  %14095 = vmatmul.mubr.bf16.vlgmr.msra.gmra.mrb[0].mxu1 %v88_v27  ;;  %v14511_v27 = vld [vmem:[%s20164_s2 + $0x354] ss:$28 sps:$4 sm:$0xff]  }
  0x33   :  { %1469 = vmatprep.subr.bf16.mxu0 %v14424_v30  ;;  %1550 = vmatpush1.bf16.msra.mxu1 %v14419_v32  ;;  %v14509_v29 = vld [vmem:[%s20164_s2 + $0x350] ss:$28 sps:$4 sm:$0xff]   ;;  %v14514_v30 = vld [vmem:[%s20164_s2 + $0x384] ss:$28 sps:$4 sm:$0xff]   ;;  %v123_v32 = vlaneseq }
  0x34   :  { %1551 = vmatprep.subr.bf16.mxu1 %v14427_v35  ;;  %v121_v35 = vld [vmem:[%s20165_s15] sm:$0x7] }
  0x36   :  { %1470 = vmatpush1.bf16.msra.mxu0 %v14422_v33  ;;  %v15545_v33 = vshrl.u32 %v123_v32, 7  ;;  %v14550_v32 = vld [vmem:[%s20164_s2 + $0x4d4] ss:$28 sps:$4 sm:$0xff]  }
  0x37   :  { %1471 = vmatprep.subr.bf16.mxu0 %v14430_v34  ;;  %1552 = vmatpush1.bf16.msra.mxu1 %v14425_v36 }
  0x38   :  { %1553 = vmatprep.subr.bf16.mxu1 %v14433_v39  ;;  %v15548_v34 = vsub.s32 0, %v15545_v33  ;;  %v15554_v36 = vsub.s32 1, %v15545_v33 }
  0x3a   :  { %1472 = vmatpush1.bf16.msra.mxu0 %v14428_v37  ;;  %v126_v37 = vrot.slane %v121_v35, %v15548_v34 }
  0x3b   :  { %1473 = vmatprep.subr.bf16.mxu0 %v14436_v38  ;;  %1554 = vmatpush1.bf16.msra.mxu1 %v14431_v40  ;;  %v130_v38 = vrot.slane %v121_v35, %v15554_v36 }
  0x3c   :  { %1555 = vmatprep.subr.bf16.mxu1 %v14439_v42 }
  0x3e   :  { %1474 = vmatpush1.bf16.msra.mxu0 %v14434_v41 }
  0x3f   :  { %1475 = vmatprep.subr.bf16.mxu0 %v14442_v43  ;;  %1556 = vmatpush1.bf16.msra.mxu1 %v14437_v45 }
  0x40   :  { %1557 = vmatprep.subr.bf16.mxu1 %v14445_v47 }
  0x42   :  { %1476 = vmatpush1.bf16.msra.mxu0 %v14440_v44 }
  0x43   :  { %1477 = vmatprep.subr.bf16.mxu0 %v14448_v46  ;;  %1558 = vmatpush1.bf16.msra.mxu1 %v14443_v49 }
  0x44   :  { %1559 = vmatprep.subr.bf16.mxu1 %v14451_v51 }
  0x46   :  { %1478 = vmatpush1.bf16.msra.mxu0 %v14446_v48 }
  0x47   :  { %1479 = vmatprep.subr.bf16.mxu0 %v14454_v50  ;;  %1560 = vmatpush1.bf16.msra.mxu1 %v14449_v53  ;;  %v15559_v53 = vsub.s32 2, %v15545_v33 }
  0x48   :  { %1561 = vmatprep.subr.bf16.mxu1 %v14457_v55 }
  0x4a   :  { %1480 = vmatpush1.bf16.msra.mxu0 %v14452_v52 }
  0x4b   :  { %1481 = vmatprep.subr.bf16.mxu0 %v14460_v54  ;;  %1562 = vmatpush1.bf16.msra.mxu1 %v14455_v57  ;;  %v134_v54 = vrot.slane %v121_v35, %v15559_v53  ;;  %v14553_v35 = vld [vmem:[%s20164_s2 + $0x4dc] ss:$28 sps:$4 sm:$0xff]  }
  0x4c   :  { %1563 = vmatprep.subr.bf16.mxu1 %v14463_v59 }
  0x4e   :  { %1482 = vmatpush1.bf16.msra.mxu0 %v14458_v56 }
  0x4f   :  { %1483 = vmatprep.subr.bf16.mxu0 %v14466_v58  ;;  %1564 = vmatpush1.bf16.msra.mxu1 %v14461_v61 }
  0x50   :  { %1565 = vmatprep.subr.bf16.mxu1 %v14469_v62 }
  0x52   :  { %1484 = vmatpush1.bf16.msra.mxu0 %v14464_v60 }
  0x53   :  { %1566 = vmatpush1.bf16.msra.mxu1 %v14467_v63  ;;  %1485 = vmatprep.subr.bf16.mxu0 %v14472_v0 }
  0x54   :  { %1567 = vmatprep.subr.bf16.mxu1 %v14475_v3 }
  0x56   :  { %1486 = vmatpush1.bf16.msra.mxu0 %v14470_v4 }
  0x57   :  { %1568 = vmatpush1.bf16.msra.mxu1 %v14473_v5  ;;  %1487 = vmatprep.subr.bf16.mxu0 %v14478_v6  ;;  %v14512_v6 = vld [vmem:[%s20164_s2 + $0x380] ss:$28 sps:$4 sm:$0xff]  }
  0x58   :  { %1569 = vmatprep.subr.bf16.mxu1 %v14481_v7  ;;  %v14515_v7 = vld [vmem:[%s20164_s2 + $0x388] ss:$28 sps:$4 sm:$0xff]  }
  0x5a   :  { %1488 = vmatpush1.bf16.msra.mxu0 %v14476_v8 }
  0x5b   :  { %1570 = vmatpush1.bf16.msra.mxu1 %v14479_v9  ;;  %1489 = vmatprep.subr.bf16.mxu0 %v14484_v10  ;;  %v14520_v10 = vld [vmem:[%s20164_s2 + $0x3bc] ss:$28 sps:$4 sm:$0xff]  }
  0x5c   :  { %1571 = vmatprep.subr.bf16.mxu1 %v14487_v11  ;;  %v14523_v11 = vld [vmem:[%s20164_s2 + $0x3c4] ss:$28 sps:$4 sm:$0xff]  }
  0x5e   :  { %1490 = vmatpush1.bf16.msra.mxu0 %v14482_v12  ;;  %v14518_v12 = vld [vmem:[%s20164_s2 + $0x3b8] ss:$28 sps:$4 sm:$0xff]  }
  0x5f   :  { %1572 = vmatpush1.bf16.msra.mxu1 %v14485_v13  ;;  %1491 = vmatprep.subr.bf16.mxu0 %v14490_v14  ;;  %v14521_v13 = vld [vmem:[%s20164_s2 + $0x3c0] ss:$28 sps:$4 sm:$0xff]   ;;  %v14526_v14 = vld [vmem:[%s20164_s2 + $0x3f4] ss:$28 sps:$4 sm:$0xff]  }
  0x60   :  { %1573 = vmatprep.subr.bf16.mxu1 %v14493_v15  ;;  %v14529_v15 = vld [vmem:[%s20164_s2 + $0x3fc] ss:$28 sps:$4 sm:$0xff]  }
  0x62   :  { %1492 = vmatpush1.bf16.msra.mxu0 %v14488_v16  ;;  %v14524_v16 = vld [vmem:[%s20164_s2 + $0x3f0] ss:$28 sps:$4 sm:$0xff]  }
  0x63   :  { %1574 = vmatpush1.bf16.msra.mxu1 %v14491_v17  ;;  %1493 = vmatprep.subr.bf16.mxu0 %v14496_v18  ;;  %v14527_v17 = vld [vmem:[%s20164_s2 + $0x3f8] ss:$28 sps:$4 sm:$0xff]   ;;  %v14532_v18 = vld [vmem:[%s20164_s2 + $0x42c] ss:$28 sps:$4 sm:$0xff]  }
  0x64   :  { %1575 = vmatprep.subr.bf16.mxu1 %v14499_v19  ;;  %v14535_v19 = vld [vmem:[%s20164_s2 + $0x434] ss:$28 sps:$4 sm:$0xff]  }
  0x66   :  { %1494 = vmatpush1.bf16.msra.mxu0 %v14494_v20  ;;  %v14530_v20 = vld [vmem:[%s20164_s2 + $0x428] ss:$28 sps:$4 sm:$0xff]  }
  0x67   :  { %1576 = vmatpush1.bf16.msra.mxu1 %v14497_v21  ;;  %1495 = vmatprep.subr.bf16.mxu0 %v14502_v22  ;;  %v14533_v21 = vld [vmem:[%s20164_s2 + $0x430] ss:$28 sps:$4 sm:$0xff]   ;;  %v14538_v22 = vld [vmem:[%s20164_s2 + $0x464] ss:$28 sps:$4 sm:$0xff]  }
  0x68   :  { %1577 = vmatprep.subr.bf16.mxu1 %v14505_v23  ;;  %v14541_v23 = vld [vmem:[%s20164_s2 + $0x46c] ss:$28 sps:$4 sm:$0xff]  }
  0x6a   :  { %1496 = vmatpush1.bf16.msra.mxu0 %v14500_v24 }
  0x6b   :  { %1578 = vmatpush1.bf16.msra.mxu1 %v14503_v25  ;;  %1497 = vmatprep.subr.bf16.mxu0 %v14508_v26  ;;  %v14536_v25 = vld [vmem:[%s20164_s2 + $0x460] ss:$28 sps:$4 sm:$0xff]   ;;  %v14539_v26 = vld [vmem:[%s20164_s2 + $0x468] ss:$28 sps:$4 sm:$0xff]  }
  0x6c   :  { %1579 = vmatprep.subr.bf16.mxu1 %v14511_v27  ;;  %v14544_v27 = vld [vmem:[%s20164_s2 + $0x49c] ss:$28 sps:$4 sm:$0xff]  }
  0x6e   :  { %1498 = vmatpush1.bf16.msra.mxu0 %v14506_v28  ;;  %v14547_v28 = vld [vmem:[%s20164_s2 + $0x4a4] ss:$28 sps:$4 sm:$0xff]  }
  0x6f   :  { %1580 = vmatpush1.bf16.msra.mxu1 %v14509_v29  ;;  %1508 = vmatprep.subr.bf16.mxu0 %v14514_v30  ;;  %v14542_v30 = vld [vmem:[%s20164_s2 + $0x498] ss:$28 sps:$4 sm:$0xff]  }
  0x70   :  { %1590 = vmatprep.subr.bf16.mxu1 %v14517_v31  ;;  %v14545_v31 = vld [vmem:[%s20164_s2 + $0x4a0] ss:$28 sps:$4 sm:$0xff]  }
 0x104   :  { %v300_v39 = vpop.f32.mrb[0].mxu0 }
 0x105   :  { %v301_v40 = vadd.f32 %v300_v39, %v126_v37  ;;  %v302_v41 = vpop.f32.mrb[1].mxu0  ;;  %v341_v48 = vpop.f32.mrb[0].mxu1  ;;  %v14551_v39 = vld [vmem:[%s20164_s2 + $0x4d8] ss:$28 sps:$4 sm:$0xff]  }
 0x106   :  { %v303_v42 = vadd.f32 %v302_v41, %v130_v38  ;;  %v304_v43 = vpop.f32.mrb[2].mxu0  ;;  %v14096_v50 = vpop.f32.mrb[1].mxu1  ;;  %v15562_v59 = vadd.f32 %v341_v48, %v134_v54  ;;  %v14548_v38 = vld [vmem:[%s20164_s2 + $0x4d0] ss:$28 sps:$4 sm:$0xff]   ;;  %v14565_v54 = vld [vmem:[%s20164_s2 + $0x48] ss:$28 sps:$4 sm:$0xff]  }
 0x107   :  { %v347_v44 = vmin.f32 %v301_v40, 0.0  ;;  %v305_v45 = vpop.f32.mrb[3].mxu0  ;;  %v344_v51 = vpop.f32.mrb[2].mxu1  ;;  %vm362_vm1 = vcmp.gt.f32.partialorder %v301_v40, 0.0  ;;  %v14559_v41 = vld [vmem:[%s20164_s2 + $0x514] ss:$28 sps:$4 sm:$0xff]  }
 0x108   :  { %v348_v46 = vmin.f32 %v303_v42, 0.0  ;;  %v14097_v52 = vpop.f32.mrb[3].mxu1  ;;  %vm363_vm2 = vcmp.gt.f32.partialorder %v303_v42, 0.0  ;;  %v349_v3 = vmin.f32 %v15562_v59, 0.0  ;;  %vm364_vm3 = vcmp.gt.f32.partialorder %v15562_v59, 0.0 }
 0x109   :  { %v350_v47 = vmul.f32 1.442695, %v347_v44  ;;  %v14554_v43 = vld [vmem:[%s20164_s2 + $0x508] ss:$28 sps:$4 sm:$0xff]   ;;  %v14557_v44 = vld [vmem:[%s20164_s2 + $0x510] ss:$28 sps:$4 sm:$0xff]  }
 0x10a   :  { %v352_v49 = vmul.f32 1.442695, %v348_v46  ;;  %v354_v9 = vmul.f32 1.442695, %v349_v3  ;;  %v14562_v46 = vld [vmem:[%s20164_s2 + $0x14] ss:$28 sps:$4 sm:$0xff]  }
 0x10b   :  { %15032 = vpow2.f32 %v350_v47  ;;  %v14563_v47 = vld [vmem:[%s20164_s2 + $0x1d8] ss:$28 sps:$4 sm:$0xff]   ;;  %v14560_v48 = vld [vmem:[%s20164_s2 + $0x10] ss:$28 sps:$4 sm:$0xff]  }
 0x10c   :  { %15034 = vpow2.f32 %v352_v49  ;;  %v14564_v50 = vld [vmem:[%s20164_s2 + $0x18] ss:$28 sps:$4 sm:$0xff]   ;;  %v14567_v51 = vld [vmem:[%s20164_s2 + $0x4c] ss:$28 sps:$4 sm:$0xff]  }
 0x10d   :  { %15036 = vpow2.f32 %v354_v9  ;;  %v14568_v52 = vld [vmem:[%s20164_s2 + $0x210] ss:$28 sps:$4 sm:$0xff]   ;;  %v14583_v3 = vld [vmem:[%s20164_s2 + $0x2b8] ss:$28 sps:$4 sm:$0xff]   ;;  %v14585_v9 = vld [vmem:[%s20164_s2 + $0x128] ss:$28 sps:$4 sm:$0xff]  }
 0x115   :  { %v15033_v55 = vpop.eup %15032 }
 0x116   :  { %v15035_v56 = vpop.eup %15034  ;;  %v12353_v57 = vadd.f32 -1.0, %v15033_v55  ;;  %v14569_v55 = vld [vmem:[%s20164_s2 + $0x50] ss:$28 sps:$4 sm:$0xff]  }
 0x117   :  { %v12354_v58 = vadd.f32 -1.0, %v15035_v56  ;;  %v15037_v24 = vpop.eup %15036  ;;  %v14572_v56 = vld [vmem:[%s20164_s2 + $0x84] ss:$28 sps:$4 sm:$0xff]  }
 0x118   :  { %v359_v60 = vmul.f32 1.6732632, %v12353_v57  ;;  %v12355_v29 = vadd.f32 -1.0, %v15037_v24  ;;  %v14573_v57 = vld [vmem:[%s20164_s2 + $0x248] ss:$28 sps:$4 sm:$0xff]  }
 0x119   :  { %v360_v61 = vmul.f32 1.6732632, %v12354_v58  ;;  %v14570_v58 = vld [vmem:[%s20164_s2 + $0x80] ss:$28 sps:$4 sm:$0xff]   ;;  %v14607_v24 = vld [vmem:[%s20164_s2 + $0x3d0] ss:$28 sps:$4 sm:$0xff]  }
 0x11a   :  { %v365_v62 = vsel %vm362_vm1, %v301_v40, %v359_v60  ;;  %v361_v37 = vmul.f32 1.6732632, %v12355_v29  ;;  %v14556_v40 = vld [vmem:[%s20164_s2 + $0x50c] ss:$28 sps:$4 sm:$0xff]   ;;  %v14577_v60 = vld [vmem:[%s20164_s2 + $0xbc] ss:$28 sps:$4 sm:$0xff]  }
 0x11b   :  { %v368_v63 = vmul.f32 1.050701, %v365_v62  ;;  %v366_v0 = vsel %vm363_vm2, %v303_v42, %v360_v61  ;;  %v14578_v61 = vld [vmem:[%s20164_s2 + $0x280] ss:$28 sps:$4 sm:$0xff]   ;;  %v14575_v62 = vld [vmem:[%s20164_s2 + $0xb8] ss:$28 sps:$4 sm:$0xff]  }
 0x11c   :  { %v369_v4 = vmul.f32 1.050701, %v366_v0  ;;  %v367_v42 = vsel %vm364_vm3, %v15562_v59, %v361_v37  ;;  %v14574_v59 = vld [vmem:[%s20164_s2 + $0x88] ss:$28 sps:$4 sm:$0xff]   ;;  %v14582_v0 = vld [vmem:[%s20164_s2 + $0xf4] ss:$28 sps:$4 sm:$0xff]  }
 0x11d   :  { %v15573_v8 = vpack.c.bf16 %v368_v63, %v368_v63  ;;  %v370_v45 = vmul.f32 1.050701, %v367_v42  ;;  %v14579_v63 = vld [vmem:[%s20164_s2 + $0xc0] ss:$28 sps:$4 sm:$0xff]   ;;  %v14612_v29 = vld [vmem:[%s20164_s2 + $0x278] ss:$28 sps:$4 sm:$0xff]  }
 0x11e   :  { %v15565_v5 = vpack.c.bf16 %v369_v4, %v369_v4  ;;  %v14580_v4 = vld [vmem:[%s20164_s2 + $0xf0] ss:$28 sps:$4 sm:$0xff]   ;;  %v14627_v42 = vld [vmem:[%s20164_s2 + $0x4e8] ss:$28 sps:$4 sm:$0xff]  }
 0x11f   :  { %v15676_v49 = vpack.c.bf16 %v370_v45, %v370_v45  ;;  %v14622_v37 = vld [vmem:[%s20164_s2 + $0x2ec] ss:$28 sps:$4 sm:$0xff]   ;;  %v1860_v45 = vld [vmem:[%s20166_s1 + $0x20] sm:$0xff] }
 0x120   :  { %1499 = vmatprep.mubr.bf16.mxu0 %v15565_v5  ;;  %1581 = vmatprep.mubr.bf16.mxu1 %v15565_v5 }
 0x121   :  { %1500 = vmatmul.mubr.bf16.vlgmr.msra.gmra.mrb[4].mxu0 %v15573_v8  ;;  %1582 = vmatmul.mubr.bf16.vlgmr.msra.gmra.mrb[4].mxu1 %v15573_v8 }
 0x122   :  { %1509 = vmatpush1.bf16.msra.mxu0 %v14512_v6  ;;  %1591 = vmatpush1.bf16.msra.mxu1 %v14515_v7  ;;  %v14587_v6 = vld [vmem:[%s20164_s2 + $0x12c] ss:$28 sps:$4 sm:$0xff]  }
 0x123   :  { %1510 = vmatprep.subr.bf16.mxu0 %v14520_v10  ;;  %1592 = vmatprep.subr.bf16.mxu1 %v14523_v11  ;;  %v14588_v7 = vld [vmem:[%s20164_s2 + $0x2f0] ss:$28 sps:$4 sm:$0xff]   ;;  %v14592_v11 = vld [vmem:[%s20164_s2 + $0x164] ss:$28 sps:$4 sm:$0xff]  }
 0x124   :  { %1540 = vmatprep.mubr.bf16.mxu0 %v15118_v2  ;;  %1622 = vmatprep.mubr.bf16.mxu1 %v15118_v2  ;;  %v14589_v10 = vld [vmem:[%s20164_s2 + $0x130] ss:$28 sps:$4 sm:$0xff]  }
 0x126   :  { %1511 = vmatpush1.bf16.msra.mxu0 %v14518_v12  ;;  %1593 = vmatpush1.bf16.msra.mxu1 %v14521_v13  ;;  %v14593_v12 = vld [vmem:[%s20164_s2 + $0x328] ss:$28 sps:$4 sm:$0xff]   ;;  %v14590_v13 = vld [vmem:[%s20164_s2 + $0x160] ss:$28 sps:$4 sm:$0xff]  }
 0x127   :  { %1512 = vmatprep.subr.bf16.mxu0 %v14526_v14  ;;  %1594 = vmatprep.subr.bf16.mxu1 %v14529_v15  ;;  %v14594_v14 = vld [vmem:[%s20164_s2 + $0x168] ss:$28 sps:$4 sm:$0xff]   ;;  %v14597_v15 = vld [vmem:[%s20164_s2 + $0x19c] ss:$28 sps:$4 sm:$0xff]  }
 0x12a   :  { %1513 = vmatpush1.bf16.msra.mxu0 %v14524_v16  ;;  %1595 = vmatpush1.bf16.msra.mxu1 %v14527_v17  ;;  %v14598_v16 = vld [vmem:[%s20164_s2 + $0x360] ss:$28 sps:$4 sm:$0xff]   ;;  %v14595_v17 = vld [vmem:[%s20164_s2 + $0x198] ss:$28 sps:$4 sm:$0xff]  }
 0x12b   :  { %1514 = vmatprep.subr.bf16.mxu0 %v14532_v18  ;;  %1596 = vmatprep.subr.bf16.mxu1 %v14535_v19  ;;  %v14599_v18 = vld [vmem:[%s20164_s2 + $0x1a0] ss:$28 sps:$4 sm:$0xff]   ;;  %v14602_v19 = vld [vmem:[%s20164_s2 + $0x1d4] ss:$28 sps:$4 sm:$0xff]  }
 0x12e   :  { %1515 = vmatpush1.bf16.msra.mxu0 %v14530_v20  ;;  %1597 = vmatpush1.bf16.msra.mxu1 %v14533_v21  ;;  %v14600_v20 = vld [vmem:[%s20164_s2 + $0x1d0] ss:$28 sps:$4 sm:$0xff]   ;;  %v14603_v21 = vld [vmem:[%s20164_s2 + $0x398] ss:$28 sps:$4 sm:$0xff]  }
 0x12f   :  { %1516 = vmatprep.subr.bf16.mxu0 %v14538_v22  ;;  %1598 = vmatprep.subr.bf16.mxu1 %v14541_v23  ;;  %v14606_v22 = vld [vmem:[%s20164_s2 + $0x20c] ss:$28 sps:$4 sm:$0xff]  }
 0x130   :  { %v14604_v23 = vld [vmem:[%s20164_s2 + $0x208] ss:$28 sps:$4 sm:$0xff]  }
 0x132   :  { %1517 = vmatpush1.bf16.msra.mxu0 %v14536_v25  ;;  %1599 = vmatpush1.bf16.msra.mxu1 %v14539_v26  ;;  %v14610_v25 = vld [vmem:[%s20164_s2 + $0x244] ss:$28 sps:$4 sm:$0xff]  }
 0x133   :  { %1518 = vmatprep.subr.bf16.mxu0 %v14544_v27  ;;  %1600 = vmatprep.subr.bf16.mxu1 %v14547_v28  ;;  %v14608_v26 = vld [vmem:[%s20164_s2 + $0x240] ss:$28 sps:$4 sm:$0xff]   ;;  %v14611_v27 = vld [vmem:[%s20164_s2 + $0x408] ss:$28 sps:$4 sm:$0xff]  }
 0x134   :  { %v14614_v28 = vld [vmem:[%s20164_s2 + $0x27c] ss:$28 sps:$4 sm:$0xff]  }
 0x136   :  { %1519 = vmatpush1.bf16.msra.mxu0 %v14542_v30  ;;  %1601 = vmatpush1.bf16.msra.mxu1 %v14545_v31  ;;  %v14615_v30 = vld [vmem:[%s20164_s2 + $0x440] ss:$28 sps:$4 sm:$0xff]   ;;  %v14618_v31 = vld [vmem:[%s20164_s2 + $0x2b4] ss:$28 sps:$4 sm:$0xff]  }
 0x137   :  { %1520 = vmatprep.subr.bf16.mxu0 %v14550_v32  ;;  %1602 = vmatprep.subr.bf16.mxu1 %v14553_v35  ;;  %v14616_v32 = vld [vmem:[%s20164_s2 + $0x2b0] ss:$28 sps:$4 sm:$0xff]   ;;  %v14619_v35 = vld [vmem:[%s20164_s2 + $0x478] ss:$28 sps:$4 sm:$0xff]  }
 0x13a   :  { %1521 = vmatpush1.bf16.msra.mxu0 %v14548_v38  ;;  %1603 = vmatpush1.bf16.msra.mxu1 %v14551_v39  ;;  %v14620_v38 = vld [vmem:[%s20164_s2 + $0x2e8] ss:$28 sps:$4 sm:$0xff]   ;;  %v14623_v39 = vld [vmem:[%s20164_s2 + $0x4b0] ss:$28 sps:$4 sm:$0xff]  }
 0x13b   :  { %1522 = vmatprep.subr.bf16.mxu0 %v14556_v40  ;;  %1604 = vmatprep.subr.bf16.mxu1 %v14559_v41  ;;  %v14626_v40 = vld [vmem:[%s20164_s2 + $0x324] ss:$28 sps:$4 sm:$0xff]  }
 0x13c   :  { %v14624_v41 = vld [vmem:[%s20164_s2 + $0x320] ss:$28 sps:$4 sm:$0xff]  }
 0x13e   :  { %1523 = vmatpush1.bf16.msra.mxu0 %v14554_v43  ;;  %1605 = vmatpush1.bf16.msra.mxu1 %v14557_v44  ;;  %v14630_v43 = vld [vmem:[%s20164_s2 + $0x35c] ss:$28 sps:$4 sm:$0xff]   ;;  %v1856_v44 = vld [vmem:[%s20166_s1] sm:$0xff] }
 0x13f   :  { %1631 = vmatprep.subr.bf16.mxu0 %v14562_v46  ;;  %13839 = vmatprep.subr.bf16.mxu1 %v14563_v47  ;;  %v14628_v46 = vld [vmem:[%s20164_s2 + $0x358] ss:$28 sps:$4 sm:$0xff]   ;;  %v14631_v47 = vld [vmem:[%s20164_s2 + $0x520] ss:$28 sps:$4 sm:$0xff]  }
 0x141   :  { %1541 = vmatmul.mubr.bf16.vlgmr.msra.gmra.mrb[4].mxu0 %v15676_v49  ;;  %1623 = vmatmul.mubr.bf16.vlgmr.msra.gmra.mrb[4].mxu1 %v15676_v49 }
 0x142   :  { %1632 = vmatpush1.bf16.msra.mxu0 %v14560_v48  ;;  %1663 = vmatprep.mubr.bf16.mxu0 %v15565_v5  ;;  %v14634_v48 = vld [vmem:[%s20164_s2 + $0x394] ss:$28 sps:$4 sm:$0xff]  }
 0x143   :  { %13840 = vmatpush3.bf16.msra.mxu1 %v14564_v50  ;;  %1745 = vmatprep.mubr.bf16.mxu1 %v15565_v5  ;;  %v14584_v5 = vld [vmem:[%s20164_s2 + $0xf8] ss:$28 sps:$4 sm:$0xff]   ;;  %v12532_v50 = vcombine.high %v1856_v44, %v1860_v45 }
 0x144   :  { %1633 = vmatprep.subr.bf16.mxu0 %v14567_v51  ;;  %13841 = vmatprep.subr.bf16.mxu1 %v14568_v52  ;;  %v14632_v51 = vld [vmem:[%s20164_s2 + $0x390] ss:$28 sps:$4 sm:$0xff]   ;;  %v1864_v52 = vld [vmem:[%s20166_s1 + $0x40] sm:$0xff] }
 0x146   :  { %1634 = vmatpush1.bf16.msra.mxu0 %v14565_v54  ;;  %v1868_v54 = vld [vmem:[%s20166_s1 + $0x60] sm:$0xff] }
 0x147   :  { %13842 = vmatpush3.bf16.msra.mxu1 %v14569_v55  ;;  %1635 = vmatprep.subr.bf16.mxu0 %v14572_v56  ;;  %v14637_v55 = vld [vmem:[%s20164_s2 + $0x3cc] ss:$28 sps:$4 sm:$0xff]   ;;  %v12531_v56 = vcombine.low %v1856_v44, %v1860_v45 }
 0x148   :  { %13843 = vmatprep.subr.bf16.mxu1 %v14573_v57  ;;  %v12540_v57 = vcombine.high %v1864_v52, %v1868_v54 }
 0x14a   :  { %1636 = vmatpush1.bf16.msra.mxu0 %v14570_v58  ;;  %v14635_v58 = vld [vmem:[%s20164_s2 + $0x3c8] ss:$28 sps:$4 sm:$0xff]  }
 0x14b   :  { %13844 = vmatpush3.bf16.msra.mxu1 %v14574_v59  ;;  %1637 = vmatprep.subr.bf16.mxu0 %v14577_v60  ;;  %v1872_v59 = vld [vmem:[%s20166_s1 + $0x80] sm:$0xff] }
 0x14c   :  { %13845 = vmatprep.subr.bf16.mxu1 %v14578_v61  ;;  %v1876_v60 = vld [vmem:[%s20166_s1 + $0xa0] sm:$0xff]  ;;  %v12539_v61 = vcombine.low %v1864_v52, %v1868_v54 }
 0x14e   :  { %1638 = vmatpush1.bf16.msra.mxu0 %v14575_v62  ;;  %v12548_v62 = vcombine.high %v1872_v59, %v1876_v60 }
 0x14f   :  { %13846 = vmatpush3.bf16.msra.mxu1 %v14579_v63  ;;  %1639 = vmatprep.subr.bf16.mxu0 %v14582_v0  ;;  %v14638_v63 = vld [vmem:[%s20164_s2 + $0x400] ss:$28 sps:$4 sm:$0xff]  }
 0x150   :  { %13847 = vmatprep.subr.bf16.mxu1 %v14583_v3  ;;  %v1880_v0 = vld [vmem:[%s20166_s1 + $0xc0] sm:$0xff] }
 0x151   :  { %v1884_v3 = vld [vmem:[%s20166_s1 + $0xe0] sm:$0xff] }
 0x152   :  { %1640 = vmatpush1.bf16.msra.mxu0 %v14580_v4  ;;  %v14643_v4 = vld [vmem:[%s20164_s2 + $0x43c] ss:$28 sps:$4 sm:$0xff]  }
 0x153   :  { %13848 = vmatpush3.bf16.msra.mxu1 %v14584_v5  ;;  %1641 = vmatprep.subr.bf16.mxu0 %v14587_v6  ;;  %v12547_v5 = vcombine.low %v1872_v59, %v1876_v60  ;;  %v12556_v6 = vcombine.high %v1880_v0, %v1884_v3  ;;  %v1881_v59 = vld [vmem:[%s20166_s1 + $0xc8] sm:$0xff] }
 0x154   :  { %13849 = vmatprep.subr.bf16.mxu1 %v14588_v7  ;;  %v14641_v7 = vld [vmem:[%s20164_s2 + $0x438] ss:$28 sps:$4 sm:$0xff]  }
 0x156   :  { %1642 = vmatpush1.bf16.msra.mxu0 %v14585_v9  ;;  %v1888_v9 = vld [vmem:[%s20166_s1 + $0x100] sm:$0xff] }
 0x157   :  { %13850 = vmatpush3.bf16.msra.mxu1 %v14589_v10  ;;  %1643 = vmatprep.subr.bf16.mxu0 %v14592_v11  ;;  %v1892_v10 = vld [vmem:[%s20166_s1 + $0x120] sm:$0xff]  ;;  %v14646_v11 = vld [vmem:[%s20164_s2 + $0x474] ss:$28 sps:$4 sm:$0xff]  }
 0x158   :  { %13851 = vmatprep.subr.bf16.mxu1 %v14593_v12  ;;  %v12555_v12 = vcombine.low %v1880_v0, %v1884_v3  ;;  %v1889_v3 = vld [vmem:[%s20166_s1 + $0x108] sm:$0xff] }
 0x15a   :  { %1644 = vmatpush1.bf16.msra.mxu0 %v14590_v13  ;;  %v12564_v13 = vcombine.high %v1888_v9, %v1892_v10 }
 0x15b   :  { %13852 = vmatpush3.bf16.msra.mxu1 %v14594_v14  ;;  %1645 = vmatprep.subr.bf16.mxu0 %v14597_v15  ;;  %v14644_v14 = vld [vmem:[%s20164_s2 + $0x470] ss:$28 sps:$4 sm:$0xff]   ;;  %v1896_v15 = vld [vmem:[%s20166_s1 + $0x140] sm:$0xff] }
 0x15c   :  { %13853 = vmatprep.subr.bf16.mxu1 %v14598_v16  ;;  %v1900_v16 = vld [vmem:[%s20166_s1 + $0x160] sm:$0xff] }
 0x15e   :  { %1646 = vmatpush1.bf16.msra.mxu0 %v14595_v17  ;;  %v14649_v17 = vld [vmem:[%s20164_s2 + $0x4ac] ss:$28 sps:$4 sm:$0xff]  }
 0x15f   :  { %13854 = vmatpush3.bf16.msra.mxu1 %v14599_v18  ;;  %1647 = vmatprep.subr.bf16.mxu0 %v14602_v19  ;;  %v12563_v18 = vcombine.low %v1888_v9, %v1892_v10  ;;  %v12572_v19 = vcombine.high %v1896_v15, %v1900_v16  ;;  %v1952_v9 = vld [vmem:[%s20166_s1 + $0x300] sm:$0xff] }
 0x160   :  { %14098 = vmatprep.subr.bf16.mxu1 %v15117_v1  ;;  %v1956_v10 = vld [vmem:[%s20166_s1 + $0x320] sm:$0xff] }
 0x162   :  { %1746 = vmatmul.mubr.bf16.vlgmr.msra.gmra.mrb[8].mxu1 %v15573_v8  ;;  %1648 = vmatpush1.bf16.msra.mxu0 %v14600_v20  ;;  %v14647_v20 = vld [vmem:[%s20164_s2 + $0x4a8] ss:$28 sps:$4 sm:$0xff]  }
 0x163   :  { %14099 = vmatpush3.bf16.msra.mxu1 %v14603_v21  ;;  %1649 = vmatprep.subr.bf16.mxu0 %v14606_v22  ;;  %v1904_v21 = vld [vmem:[%s20166_s1 + $0x180] sm:$0xff] }
 0x164   :  { %14100 = vmatprep.subr.bf16.mxu1 %v15117_v1  ;;  %14114 = vmatprep.mubr.msk.bf16.mxu1 %vm15119_vm0, %v15117_v1  ;;  %v1908_v22 = vld [vmem:[%s20166_s1 + $0x1a0] sm:$0xff] }
 0x166   :  { %1650 = vmatpush1.bf16.msra.mxu0 %v14604_v23  ;;  %v14652_v23 = vld [vmem:[%s20164_s2 + $0x4e4] ss:$28 sps:$4 sm:$0xff]  }
 0x167   :  { %14101 = vmatpush3.bf16.msra.mxu1 %v14607_v24  ;;  %1651 = vmatprep.subr.bf16.mxu0 %v14610_v25  ;;  %v12571_v24 = vcombine.low %v1896_v15, %v1900_v16  ;;  %v12580_v25 = vcombine.high %v1904_v21, %v1908_v22  ;;  %v12628_v15 = vcombine.high %v1952_v9, %v1956_v10 }
 0x168   :  { %14102 = vmatprep.subr.bf16.mxu1 %v15117_v1 }
 0x16a   :  { %1652 = vmatpush1.bf16.msra.mxu0 %v14608_v26  ;;  %v14650_v26 = vld [vmem:[%s20164_s2 + $0x4e0] ss:$28 sps:$4 sm:$0xff]  }
 0x16b   :  { %14103 = vmatpush3.bf16.msra.mxu1 %v14611_v27  ;;  %1653 = vmatprep.subr.bf16.mxu0 %v14614_v28  ;;  %v1912_v27 = vld [vmem:[%s20166_s1 + $0x1c0] sm:$0xff] }
 0x16c   :  { %14104 = vmatprep.subr.bf16.mxu1 %v15117_v1  ;;  %v1916_v28 = vld [vmem:[%s20166_s1 + $0x1e0] sm:$0xff] }
 0x16e   :  { %1654 = vmatpush1.bf16.msra.mxu0 %v14612_v29  ;;  %v14655_v29 = vld [vmem:[%s20164_s2 + $0x51c] ss:$28 sps:$4 sm:$0xff]  }
 0x16f   :  { %14105 = vmatpush3.bf16.msra.mxu1 %v14615_v30  ;;  %1655 = vmatprep.subr.bf16.mxu0 %v14618_v31  ;;  %v1857_v30 = vld [vmem:[%s20166_s1 + $0x8] sm:$0xff] }
 0x170   :  { %14106 = vmatprep.subr.bf16.mxu1 %v15117_v1  ;;  %v1861_v31 = vld [vmem:[%s20166_s1 + $0x28] sm:$0xff] }
 0x171   :  { %v12533_v45 = vcombine.low %v1857_v30, %v1861_v31 }
 0x172   :  { %1656 = vmatpush1.bf16.msra.mxu0 %v14616_v32  ;;  %v12579_v32 = vcombine.low %v1904_v21, %v1908_v22  ;;  %v16032_v21 = vld [vmem:[%s20166_s1 + $0x420] sm:$0xff]  ;;  %v16037_v22 = vld [vmem:[%s20166_s1 + $0x408] sm:$0xff] }
 0x173   :  { %14107 = vmatpush3.bf16.msra.mxu1 %v14619_v35  ;;  %1657 = vmatprep.subr.bf16.mxu0 %v14622_v37  ;;  %v12588_v35 = vcombine.high %v1912_v27, %v1916_v28  ;;  %v14653_v37 = vld [vmem:[%s20164_s2 + $0x518] ss:$28 sps:$4 sm:$0xff]  }
 0x174   :  { %14108 = vmatprep.subr.bf16.mxu1 %v15117_v1 }
 0x176   :  { %1658 = vmatpush1.bf16.msra.mxu0 %v14620_v38  ;;  %v1920_v38 = vld [vmem:[%s20166_s1 + $0x200] sm:$0xff] }
 0x177   :  { %14109 = vmatpush3.bf16.msra.mxu1 %v14623_v39  ;;  %1659 = vmatprep.subr.bf16.mxu0 %v14626_v40  ;;  %v1924_v39 = vld [vmem:[%s20166_s1 + $0x220] sm:$0xff]  ;;  %v12534_v40 = vcombine.high %v1857_v30, %v1861_v31 }
 0x178   :  { %14110 = vmatprep.subr.bf16.mxu1 %v15117_v1  ;;  %v12596_v44 = vcombine.high %v1920_v38, %v1924_v39  ;;  %v12595_v52 = vcombine.low %v1920_v38, %v1924_v39  ;;  %v1968_v31 = vld [vmem:[%s20166_s1 + $0x380] sm:$0xff]  ;;  %v1917_v38 = vld [vmem:[%s20166_s1 + $0x1e8] sm:$0xff] }
 0x17a   :  { %1660 = vmatpush1.bf16.msra.mxu0 %v14624_v41  ;;  %v1865_v41 = vld [vmem:[%s20166_s1 + $0x48] sm:$0xff] }
 0x17b   :  { %14111 = vmatpush3.bf16.msra.mxu1 %v14627_v42  ;;  %1661 = vmatprep.subr.bf16.mxu0 %v14630_v43  ;;  %v1869_v42 = vld [vmem:[%s20166_s1 + $0x68] sm:$0xff]  ;;  %v12587_v43 = vcombine.low %v1912_v27, %v1916_v28 }
 0x17c   :  { %14112 = vmatprep.subr.bf16.mxu1 %v15117_v1 }
 0x17e   :  { %1662 = vmatpush1.bf16.msra.mxu0 %v14628_v46  ;;  %v1928_v46 = vld [vmem:[%s20166_s1 + $0x240] sm:$0xff] }
 0x17f   :  { %14113 = vmatpush3.bf16.msra.mxu1 %v14631_v47  ;;  %1672 = vmatprep.subr.bf16.mxu0 %v14634_v48  ;;  %v1932_v47 = vld [vmem:[%s20166_s1 + $0x260] sm:$0xff]  ;;  %v12542_v48 = vcombine.high %v1865_v41, %v1869_v42 }
 0x180   :  { %4586 = vmatprep.subr.bf16.mxu1 %v12532_v50  ;;  %v1873_v50 = vld [vmem:[%s20166_s1 + $0x88] sm:$0xff]  ;;  %v12604_v54 = vcombine.high %v1928_v46, %v1932_v47  ;;  %v12603_v60 = vcombine.low %v1928_v46, %v1932_v47 }
 0x181   :  { %1664 = vmatmul.mubr.bf16.vlgmr.msra.gmra.mrb[8].mxu0 %v15573_v8  ;;  %v14640_v8 = vld [vmem:[%s20164_s2 + $0x404] ss:$28 sps:$4 sm:$0xff]   ;;  %v1925_v46 = vld [vmem:[%s20166_s1 + $0x228] sm:$0xff]  ;;  %s20171_s2 = sld [smem:[#allocation10_spill]] }
 0x182   :  { %14115 = vmatmul.mubr.bf16.vlgmr.msra.gmra.mrb[12].mxu1 %v15676_v49  ;;  %1673 = vmatpush1.bf16.msra.mxu0 %v14632_v51  ;;  %v1877_v51 = vld [vmem:[%s20166_s1 + $0xa8] sm:$0xff] }
 0x183   :  { %1674 = vmatprep.subr.bf16.mxu0 %v14637_v55  ;;  %1704 = vmatprep.mubr.bf16.mxu0 %v15118_v2  ;;  %v12541_v55 = vcombine.low %v1865_v41, %v1869_v42  ;;  %v1976_v42 = vld [vmem:[%s20166_s1 + $0x3c0] sm:$0xff] }
 0x184   :  { %4587 = vmatpush1.bf16.msra.mxu1 %v12531_v56  ;;  %v1936_v56 = vld [vmem:[%s20166_s1 + $0x280] sm:$0xff] }
 0x185   :  { %4588 = vmatprep.subr.bf16.mxu1 %v12540_v57  ;;  %v1940_v57 = vld [vmem:[%s20166_s1 + $0x2a0] sm:$0xff] }
 0x186   :  { %1675 = vmatpush1.bf16.msra.mxu0 %v14635_v58  ;;  %v12550_v58 = vcombine.high %v1873_v50, %v1877_v51 }
 0x187   :  { %1676 = vmatprep.subr.bf16.mxu0 %v14640_v8  ;;  %v12612_v8 = vcombine.high %v1936_v56, %v1940_v57 }
 0x188   :  { %4589 = vmatpush1.bf16.msra.mxu1 %v12539_v61  ;;  %v12549_v61 = vcombine.low %v1873_v50, %v1877_v51 }
 0x189   :  { %4590 = vmatprep.subr.bf16.mxu1 %v12548_v62  ;;  %v1944_v62 = vld [vmem:[%s20166_s1 + $0x2c0] sm:$0xff] }
 0x18a   :  { %1677 = vmatpush1.bf16.msra.mxu0 %v14638_v63  ;;  %v1948_v63 = vld [vmem:[%s20166_s1 + $0x2e0] sm:$0xff] }
 0x18b   :  { %1678 = vmatprep.subr.bf16.mxu0 %v14643_v4  ;;  %v1893_v4 = vld [vmem:[%s20166_s1 + $0x128] sm:$0xff] }
 0x18c   :  { %4591 = vmatpush1.bf16.msra.mxu1 %v12547_v5  ;;  %v12611_v5 = vcombine.low %v1936_v56, %v1940_v57  ;;  %v12565_v16 = vcombine.low %v1889_v3, %v1893_v4 }
 0x18d   :  { %4592 = vmatprep.subr.bf16.mxu1 %v12556_v6  ;;  %v12620_v6 = vcombine.high %v1944_v62, %v1948_v63 }
 0x18e   :  { %1679 = vmatpush1.bf16.msra.mxu0 %v14641_v7 }
 0x18f   :  { %1680 = vmatprep.subr.bf16.mxu0 %v14646_v11  ;;  %v12566_v11 = vcombine.high %v1889_v3, %v1893_v4  ;;  %v1953_v3 = vld [vmem:[%s20166_s1 + $0x308] sm:$0xff] }
 0x190   :  { %4593 = vmatpush1.bf16.msra.mxu1 %v12555_v12  ;;  %v1897_v12 = vld [vmem:[%s20166_s1 + $0x148] sm:$0xff] }
 0x191   :  { %4594 = vmatprep.subr.bf16.mxu1 %v12564_v13  ;;  %v1901_v13 = vld [vmem:[%s20166_s1 + $0x168] sm:$0xff] }
 0x192   :  { %1681 = vmatpush1.bf16.msra.mxu0 %v14644_v14  ;;  %v12619_v14 = vcombine.low %v1944_v62, %v1948_v63  ;;  %v12573_v30 = vcombine.low %v1897_v12, %v1901_v13  ;;  %v1949_v62 = vld [vmem:[%s20166_s1 + $0x2e8] sm:$0xff] }
 0x193   :  { %1682 = vmatprep.subr.bf16.mxu0 %v14649_v17  ;;  %v1960_v17 = vld [vmem:[%s20166_s1 + $0x340] sm:$0xff]  ;;  %v1957_v4 = vld [vmem:[%s20166_s1 + $0x328] sm:$0xff] }
 0x194   :  { %4595 = vmatpush1.bf16.msra.mxu1 %v12563_v18  ;;  %v1964_v18 = vld [vmem:[%s20166_s1 + $0x360] sm:$0xff] }
 0x195   :  { %4596 = vmatprep.subr.bf16.mxu1 %v12572_v19  ;;  %v12574_v19 = vcombine.high %v1897_v12, %v1901_v13  ;;  %v12636_v27 = vcombine.high %v1960_v17, %v1964_v18  ;;  %v12635_v39 = vcombine.low %v1960_v17, %v1964_v18  ;;  %v1969_v12 = vld [vmem:[%s20166_s1 + $0x388] sm:$0xff] }
 0x196   :  { %1683 = vmatpush1.bf16.msra.mxu0 %v14647_v20  ;;  %v16027_v20 = vld [vmem:[%s20166_s1 + $0x400] sm:$0xff]  ;;  %v1973_v13 = vld [vmem:[%s20166_s1 + $0x3a8] sm:$0xff] }
 0x197   :  { %1684 = vmatprep.subr.bf16.mxu0 %v14652_v23  ;;  %v1905_v23 = vld [vmem:[%s20166_s1 + $0x188] sm:$0xff]  ;;  %v12659_v28 = vcombine.low %v16027_v20, %v16032_v21  ;;  %v12660_v56 = vcombine.high %v16027_v20, %v16032_v21  ;;  %v12645_v18 = vcombine.low %v1969_v12, %v1973_v13  ;;  %v2012_v20 = vld [vmem:[%s20166_s1 + $0x4e0] sm:$0xff] }
 0x198   :  { %4597 = vmatpush1.bf16.msra.mxu1 %v12571_v24  ;;  %v1909_v24 = vld [vmem:[%s20166_s1 + $0x1a8] sm:$0xff] }
 0x199   :  { %4598 = vmatprep.subr.bf16.mxu1 %v12580_v25  ;;  %v12627_v25 = vcombine.low %v1952_v9, %v1956_v10  ;;  %v12581_v41 = vcombine.low %v1905_v23, %v1909_v24  ;;  %v1965_v9 = vld [vmem:[%s20166_s1 + $0x368] sm:$0xff]  ;;  %v12629_v10 = vcombine.low %v1953_v3, %v1957_v4 }
 0x19a   :  { %1685 = vmatpush1.bf16.msra.mxu0 %v14650_v26  ;;  %v16048_v26 = vld [vmem:[%s20166_s1 + $0x428] sm:$0xff] }
 0x19b   :  { %1686 = vmatprep.subr.bf16.mxu0 %v14655_v29  ;;  %v12661_v29 = vcombine.low %v16037_v22, %v16048_v26  ;;  %v1981_v17 = vld [vmem:[%s20166_s1 + $0x3e8] sm:$0xff] }
 0x19c   :  { %4599 = vmatpush1.bf16.msra.mxu1 %v12579_v32  ;;  %v1972_v32 = vld [vmem:[%s20166_s1 + $0x3a0] sm:$0xff]  ;;  %v2009_v21 = vld [vmem:[%s20166_s1 + $0x4c8] sm:$0xff] }
 0x19d   :  { %4600 = vmatprep.subr.bf16.mxu1 %v12588_v35  ;;  %v12582_v35 = vcombine.high %v1905_v23, %v1909_v24  ;;  %v12643_v47 = vcombine.low %v1968_v31, %v1972_v32  ;;  %v12662_v24 = vcombine.high %v16037_v22, %v16048_v26  ;;  %v2013_v22 = vld [vmem:[%s20166_s1 + $0x4e8] sm:$0xff] }
 0x19e   :  { %1687 = vmatpush1.bf16.msra.mxu0 %v14653_v37  ;;  %v1913_v37 = vld [vmem:[%s20166_s1 + $0x1c8] sm:$0xff] }
 0x19f   :  { %4750 = vmatprep.subr.bf16.mxu0 %v12534_v40  ;;  %v12644_v40 = vcombine.high %v1968_v31, %v1972_v32  ;;  %v12589_v50 = vcombine.low %v1913_v37, %v1917_v38 }
 0x1a0   :  { %4601 = vmatpush1.bf16.msra.mxu1 %v12587_v43  ;;  %v1980_v43 = vld [vmem:[%s20166_s1 + $0x3e0] sm:$0xff] }
 0x1a1   :  { %1705 = vmatmul.mubr.bf16.vlgmr.msra.gmra.mrb[8].mxu0 %v15676_v49  ;;  %4602 = vmatprep.subr.bf16.mxu1 %v12596_v44  ;;  %v1885_v49 = vld [vmem:[%s20166_s1 + $0xe8] sm:$0xff]  ;;  %v12590_v44 = vcombine.high %v1913_v37, %v1917_v38 }
 0x1a2   :  { %4751 = vmatpush1.bf16.msra.mxu0 %v12533_v45  ;;  %v12558_v0 = vcombine.high %v1881_v59, %v1885_v49  ;;  %v12557_v7 = vcombine.low %v1881_v59, %v1885_v49  ;;  %v1921_v45 = vld [vmem:[%s20166_s1 + $0x208] sm:$0xff] }
 0x1a3   :  { %4752 = vmatprep.subr.bf16.mxu0 %v12542_v48  ;;  %v12652_v48 = vcombine.high %v1976_v42, %v1980_v43  ;;  %v12598_v51 = vcombine.high %v1921_v45, %v1925_v46  ;;  %v12597_v57 = vcombine.low %v1921_v45, %v1925_v46  ;;  %v1937_v59 = vld [vmem:[%s20166_s1 + $0x288] sm:$0xff] }
 0x1a4   :  { %4603 = vmatpush1.bf16.msra.mxu1 %v12595_v52  ;;  %v1929_v52 = vld [vmem:[%s20166_s1 + $0x248] sm:$0xff] }
 0x1a5   :  { %4604 = vmatprep.subr.bf16.mxu1 %v12604_v54  ;;  %v1933_v54 = vld [vmem:[%s20166_s1 + $0x268] sm:$0xff] }
 0x1a6   :  { %4753 = vmatpush1.bf16.msra.mxu0 %v12541_v55  ;;  %v12651_v55 = vcombine.low %v1976_v42, %v1980_v43  ;;  %v1941_v49 = vld [vmem:[%s20166_s1 + $0x2a8] sm:$0xff] }
 0x1a7   :  { %4754 = vmatprep.subr.bf16.mxu0 %v12550_v58  ;;  %v12606_v58 = vcombine.high %v1929_v52, %v1933_v54  ;;  %v12613_v63 = vcombine.low %v1937_v59, %v1941_v49 }
 0x1a8   :  { %4605 = vmatpush1.bf16.msra.mxu1 %v12603_v60  ;;  %v12605_v60 = vcombine.low %v1929_v52, %v1933_v54 }
 0x1a9   :  { %4606 = vmatprep.subr.bf16.mxu1 %v12612_v8  ;;  %v12614_v8 = vcombine.high %v1937_v59, %v1941_v49 }
 0x1aa   :  { %4755 = vmatpush1.bf16.msra.mxu0 %v12549_v61  ;;  %v1945_v61 = vld [vmem:[%s20166_s1 + $0x2c8] sm:$0xff] }
 0x1ab   :  { %4756 = vmatprep.subr.bf16.mxu0 %v12558_v0  ;;  %v12622_v0 = vcombine.high %v1945_v61, %v1949_v62 }
 0x1ac   :  { %4607 = vmatpush1.bf16.msra.mxu1 %v12611_v5  ;;  %v12621_v5 = vcombine.low %v1945_v61, %v1949_v62 }
 0x1ad   :  { %4608 = vmatprep.subr.bf16.mxu1 %v12620_v6  ;;  %v12630_v6 = vcombine.high %v1953_v3, %v1957_v4 }
 0x1ae   :  { %4757 = vmatpush1.bf16.msra.mxu0 %v12557_v7  ;;  %v1961_v7 = vld [vmem:[%s20166_s1 + $0x348] sm:$0xff] }
 0x1af   :  { %4758 = vmatprep.subr.bf16.mxu0 %v12566_v11  ;;  %v12638_v11 = vcombine.high %v1961_v7, %v1965_v9 }
 0x1b0   :  { %4609 = vmatpush1.bf16.msra.mxu1 %v12619_v14  ;;  %v12637_v14 = vcombine.low %v1961_v7, %v1965_v9  ;;  %v1996_v7 = vld [vmem:[%s20166_s1 + $0x460] sm:$0xff]  ;;  %v1993_v9 = vld [vmem:[%s20166_s1 + $0x448] sm:$0xff] }
 0x1b1   :  { %4610 = vmatprep.subr.bf16.mxu1 %v12628_v15  ;;  %v12646_v15 = vcombine.high %v1969_v12, %v1973_v13  ;;  %v2000_v13 = vld [vmem:[%s20166_s1 + $0x480] sm:$0xff] }
 0x1b2   :  { %4759 = vmatpush1.bf16.msra.mxu0 %v12565_v16  ;;  %v1977_v16 = vld [vmem:[%s20166_s1 + $0x3c8] sm:$0xff] }
 0x1b3   :  { %4760 = vmatprep.subr.bf16.mxu0 %v12574_v19  ;;  %v12654_v19 = vcombine.high %v1977_v16, %v1981_v17  ;;  %v12653_v23 = vcombine.low %v1977_v16, %v1981_v17  ;;  %v2004_v16 = vld [vmem:[%s20166_s1 + $0x4a0] sm:$0xff]  ;;  %v2001_v17 = vld [vmem:[%s20166_s1 + $0x488] sm:$0xff] }
 0x1b4   :  { %4611 = vmatpush1.bf16.msra.mxu1 %v12627_v25  ;;  %v16127_v25 = vld [vmem:[%s20167_s17] sm:$0xff]  ;;  %s20170_s17 = sld [smem:[#allocation11_spill]] }
 0x1b5   :  { %4612 = vmatprep.subr.bf16.mxu1 %v12636_v27  ;;  %v16130_v27 = vsub.s32 3, %v15545_v33  ;;  %v575_v31 = vrot.slane %v16127_v25, %v15554_v36 }
 0x1b6   :  { %4761 = vmatpush1.bf16.msra.mxu0 %v12573_v30  ;;  %v571_v30 = vrot.slane %v16127_v25, %v15548_v34 }
 0x1b7   :  { %4762 = vmatprep.subr.bf16.mxu0 %v12582_v35  ;;  %v583_v32 = vrot.slane %v16127_v25, %v16130_v27 }
 0x1b8   :  { %4613 = vmatpush1.bf16.msra.mxu1 %v12635_v39 }
 0x1b9   :  { %4614 = vmatprep.subr.bf16.mxu1 %v12644_v40 }
 0x1ba   :  { %4763 = vmatpush1.bf16.msra.mxu0 %v12581_v41 }
 0x1bb   :  { %4764 = vmatprep.subr.bf16.mxu0 %v12590_v44 }
 0x1bc   :  { %4615 = vmatpush1.bf16.msra.mxu1 %v12643_v47 }
 0x1bd   :  { %4616 = vmatprep.subr.bf16.mxu1 %v12652_v48 }
 0x1be   :  { %4765 = vmatpush1.bf16.msra.mxu0 %v12589_v50 }
 0x1bf   :  { %4766 = vmatprep.subr.bf16.mxu0 %v12598_v51 }
 0x1c0   :  { %4617 = vmatpush1.bf16.msra.mxu1 %v12651_v55 }
 0x1c1   :  { %4627 = vmatprep.subr.bf16.mxu1 %v12660_v56 }
 0x1c2   :  { %4767 = vmatpush1.bf16.msra.mxu0 %v12597_v57 }
 0x1c3   :  { %4768 = vmatprep.subr.bf16.mxu0 %v12606_v58 }
 0x1c6   :  { %4769 = vmatpush1.bf16.msra.mxu0 %v12605_v60 }
 0x1c7   :  { %4770 = vmatprep.subr.bf16.mxu0 %v12614_v8 }
 0x1ca   :  { %4771 = vmatpush1.bf16.msra.mxu0 %v12613_v63 }
 0x1cb   :  { %4772 = vmatprep.subr.bf16.mxu0 %v12622_v0 }
 0x1ce   :  { %4773 = vmatpush1.bf16.msra.mxu0 %v12621_v5  ;;  %v1992_v5 = vld [vmem:[%s20166_s1 + $0x440] sm:$0xff] }
 0x1cf   :  { %4774 = vmatprep.subr.bf16.mxu0 %v12630_v6 }
 0x1d2   :  { %4775 = vmatpush1.bf16.msra.mxu0 %v12629_v10  ;;  %v1997_v10 = vld [vmem:[%s20166_s1 + $0x468] sm:$0xff] }
 0x1d3   :  { %4776 = vmatprep.subr.bf16.mxu0 %v12638_v11 }
 0x1d6   :  { %4777 = vmatpush1.bf16.msra.mxu0 %v12637_v14  ;;  %v12668_v14 = vcombine.high %v1992_v5, %v1996_v7 }
 0x1d7   :  { %4778 = vmatprep.subr.bf16.mxu0 %v12646_v15  ;;  %v12670_v15 = vcombine.high %v1993_v9, %v1997_v10 }
 0x1da   :  { %4779 = vmatpush1.bf16.msra.mxu0 %v12645_v18  ;;  %v2005_v18 = vld [vmem:[%s20166_s1 + $0x4a8] sm:$0xff] }
 0x1db   :  { %4780 = vmatprep.subr.bf16.mxu0 %v12654_v19 }
 0x1de   :  { %4781 = vmatpush1.bf16.msra.mxu0 %v12653_v23  ;;  %v12667_v23 = vcombine.low %v1992_v5, %v1996_v7  ;;  %v2044_v7 = vld [vmem:[%s20166_s1 + $0x5e0] sm:$0xff] }
 0x1df   :  { %4791 = vmatprep.subr.bf16.mxu0 %v12662_v24  ;;  %v12669_v24 = vcombine.low %v1993_v9, %v1997_v10  ;;  %v2041_v9 = vld [vmem:[%s20166_s1 + $0x5c8] sm:$0xff] }
 0x1e0   :  { %v2045_v10 = vld [vmem:[%s20166_s1 + $0x5e8] sm:$0xff] }
 0x214   :  { %v1542_v35 = vpop.f32.mrb[4].mxu0  ;;  %v16138_v37 = vpop.f32.mrb[4].mxu1 }
 0x215   :  { %v14238_v38 = vadd.f32 %v1542_v35, %v571_v30  ;;  %v1544_v39 = vpop.f32.mrb[5].mxu0  ;;  %v1626_v40 = vpop.f32.mrb[5].mxu1  ;;  %v12676_v30 = vcombine.high %v2000_v13, %v2004_v16 }
 0x216   :  { %v14239_v41 = vadd.f32 %v1544_v39, %v575_v31  ;;  %v14241_v42 = vadd.f32 %v1626_v40, %v583_v32  ;;  %v1546_v43 = vpop.f32.mrb[6].mxu0  ;;  %v1628_v44 = vpop.f32.mrb[6].mxu1  ;;  %v12678_v31 = vcombine.high %v2001_v17, %v2005_v18  ;;  %v2008_v32 = vld [vmem:[%s20166_s1 + $0x4c0] sm:$0xff]  ;;  %v12677_v39 = vcombine.low %v2001_v17, %v2005_v18 }
 0x217   :  { %v1793_v45 = vmin.f32 %v14238_v38, 0.0  ;;  %v1547_v46 = vpop.f32.mrb[7].mxu0  ;;  %v1629_v47 = vpop.f32.mrb[7].mxu1  ;;  %vm1828_vm4 = vcmp.gt.f32.partialorder %v14238_v38, 0.0  ;;  %v2016_v43 = vld [vmem:[%s20166_s1 + $0x500] sm:$0xff]  ;;  %v12718_v17 = vcombine.high %v2041_v9, %v2045_v10 }
 0x218   :  { %v1794_v48 = vmin.f32 %v14239_v41, 0.0  ;;  %v1796_v50 = vmin.f32 %v14241_v42, 0.0  ;;  %vm1829_vm5 = vcmp.gt.f32.partialorder %v14239_v41, 0.0  ;;  %vm1831_vm6 = vcmp.gt.f32.partialorder %v14241_v42, 0.0  ;;  %v2020_v44 = vld [vmem:[%s20166_s1 + $0x520] sm:$0xff]  ;;  %v2021_v46 = vld [vmem:[%s20166_s1 + $0x528] sm:$0xff] }
 0x219   :  { %v1800_v51 = vmul.f32 1.442695, %v1793_v45  ;;  %v2017_v45 = vld [vmem:[%s20166_s1 + $0x508] sm:$0xff]  ;;  %v12683_v47 = vcombine.low %v2008_v32, %v2012_v20  ;;  %v2048_v18 = vld [vmem:[%s20166_s1 + $0x600] sm:$0xff] }
 0x21a   :  { %v1802_v52 = vmul.f32 1.442695, %v1794_v48  ;;  %v1806_v54 = vmul.f32 1.442695, %v1796_v50  ;;  %v12685_v48 = vcombine.low %v2009_v21, %v2013_v22  ;;  %v12692_v50 = vcombine.high %v2016_v43, %v2020_v44 }
 0x21b   :  { %15038 = vpow2.f32 %v1800_v51  ;;  %v12694_v51 = vcombine.high %v2017_v45, %v2021_v46 }
 0x21c   :  { %15040 = vpow2.f32 %v1802_v52  ;;  %v2024_v52 = vld [vmem:[%s20166_s1 + $0x540] sm:$0xff] }
 0x21d   :  { %15042 = vpow2.f32 %v1806_v54  ;;  %v2028_v54 = vld [vmem:[%s20166_s1 + $0x560] sm:$0xff] }
 0x225   :  { %v15039_v55 = vpop.eup %15038 }
 0x226   :  { %v12524_v56 = vadd.f32 -1.0, %v15039_v55  ;;  %v15041_v57 = vpop.eup %15040  ;;  %v2025_v55 = vld [vmem:[%s20166_s1 + $0x548] sm:$0xff] }
 0x227   :  { %v15043_v58 = vpop.eup %15042  ;;  %v12525_v49 = vadd.f32 -1.0, %v15041_v57  ;;  %v12691_v57 = vcombine.low %v2016_v43, %v2020_v44 }
 0x228   :  { %v1821_v59 = vmul.f32 1.6732632, %v12524_v56  ;;  %v12527_v60 = vadd.f32 -1.0, %v15043_v58  ;;  %v2029_v56 = vld [vmem:[%s20166_s1 + $0x568] sm:$0xff]  ;;  %v12693_v58 = vcombine.low %v2017_v45, %v2021_v46  ;;  %v2064_v45 = vld [vmem:[%s20166_s1 + $0x680] sm:$0xff] }
 0x229   :  { %v1822_v61 = vmul.f32 1.6732632, %v12525_v49  ;;  %v12702_v49 = vcombine.high %v2025_v55, %v2029_v56  ;;  %v2068_v46 = vld [vmem:[%s20166_s1 + $0x6a0] sm:$0xff] }
 0x22a   :  { %v1835_v8 = vsel %vm1828_vm4, %v14238_v38, %v1821_v59  ;;  %v1824_v62 = vmul.f32 1.6732632, %v12527_v60  ;;  %v12675_v38 = vcombine.low %v2000_v13, %v2004_v16  ;;  %v12700_v59 = vcombine.high %v2024_v52, %v2028_v54  ;;  %v2032_v60 = vld [vmem:[%s20166_s1 + $0x580] sm:$0xff] }
 0x22b   :  { %v1842_v63 = vmul.f32 1.050701, %v1835_v8  ;;  %v1836_v0 = vsel %vm1829_vm5, %v14239_v41, %v1822_v61  ;;  %v12684_v41 = vcombine.high %v2008_v32, %v2012_v20  ;;  %v2036_v8 = vld [vmem:[%s20166_s1 + $0x5a0] sm:$0xff]  ;;  %v2033_v61 = vld [vmem:[%s20166_s1 + $0x588] sm:$0xff] }
 0x22c   :  { %v1843_v3 = vmul.f32 1.050701, %v1836_v0  ;;  %v1838_v4 = vsel %vm1831_vm6, %v14241_v42, %v1824_v62  ;;  %v12686_v42 = vcombine.high %v2009_v21, %v2013_v22  ;;  %v2037_v62 = vld [vmem:[%s20166_s1 + $0x5a8] sm:$0xff]  ;;  %v12701_v0 = vcombine.low %v2025_v55, %v2029_v56  ;;  %v2056_v22 = vld [vmem:[%s20166_s1 + $0x640] sm:$0xff] }
 0x22d   :  { %v1845_v6 = vmul.f32 1.050701, %v1838_v4  ;;  %v16154_v12 = vpack.c.bf16 %v1842_v63, %v1842_v63  ;;  %v12699_v63 = vcombine.low %v2024_v52, %v2028_v54  ;;  %v12708_v4 = vcombine.high %v2032_v60, %v2036_v8  ;;  %v2072_v56 = vld [vmem:[%s20166_s1 + $0x6c0] sm:$0xff] }
 0x22e   :  { %v16152_v11 = vpack.c.bf16 %v1843_v3, %v1843_v3  ;;  %v579_v3 = vrot.slane %v16127_v25, %v15559_v53  ;;  %v12710_v5 = vcombine.high %v2033_v61, %v2037_v62  ;;  %v12707_v13 = vcombine.low %v2032_v60, %v2036_v8 }
 0x22f   :  { %v16170_v19 = vpack.c.bf16 %v1845_v6, %v1845_v6  ;;  %v2040_v6 = vld [vmem:[%s20166_s1 + $0x5c0] sm:$0xff]  ;;  %v16263_v21 = vsub.s32 6, %v15545_v33  ;;  %v12740_v54 = vcombine.high %v2064_v45, %v2068_v46 }
 0x230   :  { %4618 = vmatprep.mubr.bf16.mxu1 %v16152_v11  ;;  %4782 = vmatprep.mubr.bf16.mxu0 %v16152_v11  ;;  %v12716_v16 = vcombine.high %v2040_v6, %v2044_v7 }
 0x231   :  { %4619 = vmatmul.mubr.bf16.vlgmr.msra.gmra.mrb[16].mxu1 %v16154_v12  ;;  %4783 = vmatmul.mubr.bf16.vlgmr.msra.gmra.mrb[12].mxu0 %v16154_v12 }
 0x232   :  { %4628 = vmatpush1.bf16.msra.mxu1 %v12659_v28  ;;  %4792 = vmatpush1.bf16.msra.mxu0 %v12661_v29 }
 0x233   :  { %4659 = vmatprep.mubr.bf16.mxu1 %v16170_v19  ;;  %4823 = vmatprep.mubr.bf16.mxu0 %v16170_v19 }
 0x234   :  { %4629 = vmatprep.subr.bf16.mxu1 %v12668_v14  ;;  %4793 = vmatprep.subr.bf16.mxu0 %v12670_v15  ;;  %v12709_v14 = vcombine.low %v2033_v61, %v2037_v62  ;;  %v16247_v15 = vadd.f32 %v16138_v37, %v579_v3  ;;  %v2053_v37 = vld [vmem:[%s20166_s1 + $0x628] sm:$0xff]  ;;  %v12739_v61 = vcombine.low %v2064_v45, %v2068_v46 }
 0x235   :  { %v13855_v35 = vpop.f32.mrb[8].mxu1  ;;  %v2105_v45 = vld [vmem:[%s20166_s1 + $0x7c8] sm:$0xff] }
 0x236   :  { %v13856_v26 = vpop.f32.mrb[9].mxu1  ;;  %4630 = vmatpush1.bf16.msra.mxu1 %v12667_v23  ;;  %4794 = vmatpush1.bf16.msra.mxu0 %v12669_v24  ;;  %v2052_v23 = vld [vmem:[%s20166_s1 + $0x620] sm:$0xff]  ;;  %v2049_v24 = vld [vmem:[%s20166_s1 + $0x608] sm:$0xff]  ;;  %v1795_v32 = vmin.f32 %v16247_v15, 0.0  ;;  %vm1830_vm7 = vcmp.gt.f32.partialorder %v16247_v15, 0.0 }
 0x237   :  { %v16194_v28 = vadd.f32 %v13856_v26, %v13855_v35  ;;  %v13858_v29 = vpop.f32.mrb[10].mxu1  ;;  %4631 = vmatprep.subr.bf16.mxu1 %v12676_v30  ;;  %4795 = vmatprep.subr.bf16.mxu0 %v12678_v31  ;;  %v12715_v30 = vcombine.low %v2040_v6, %v2044_v7  ;;  %v12717_v31 = vcombine.low %v2041_v9, %v2045_v10  ;;  %v2060_v26 = vld [vmem:[%s20166_s1 + $0x660] sm:$0xff]  ;;  %v2081_v6 = vld [vmem:[%s20166_s1 + $0x708] sm:$0xff] }
 0x238   :  { %v13859_v40 = vpop.f32.mrb[11].mxu1  ;;  %v12724_v35 = vcombine.high %v2048_v18, %v2052_v23  ;;  %v12726_v20 = vcombine.high %v2049_v24, %v2053_v37  ;;  %v2057_v29 = vld [vmem:[%s20166_s1 + $0x648] sm:$0xff]  ;;  %v12732_v43 = vcombine.high %v2056_v22, %v2060_v26 }
 0x239   :  { %v12725_v40 = vcombine.low %v2049_v24, %v2053_v37  ;;  %v2085_v7 = vld [vmem:[%s20166_s1 + $0x728] sm:$0xff] }
 0x23a   :  { %4632 = vmatpush1.bf16.msra.mxu1 %v12675_v38  ;;  %4796 = vmatpush1.bf16.msra.mxu0 %v12677_v39  ;;  %v2061_v38 = vld [vmem:[%s20166_s1 + $0x668] sm:$0xff]  ;;  %v12723_v39 = vcombine.low %v2048_v18, %v2052_v23 }
 0x23b   :  { %4633 = vmatprep.subr.bf16.mxu1 %v12684_v41  ;;  %4797 = vmatprep.subr.bf16.mxu0 %v12686_v42  ;;  %v1804_v41 = vmul.f32 1.442695, %v1795_v32  ;;  %v595_v42 = vrot.slane %v16127_v25, %v16263_v21  ;;  %v12734_v44 = vcombine.high %v2057_v29, %v2061_v38  ;;  %v2089_v18 = vld [vmem:[%s20166_s1 + $0x748] sm:$0xff] }
 0x23c   :  { %v2093_v23 = vld [vmem:[%s20166_s1 + $0x768] sm:$0xff] }
 0x23d   :  { %15044 = vpow2.f32 %v1804_v41  ;;  %v1748_v52 = vadd.f32 %v16194_v28, %v595_v42  ;;  %v2077_v28 = vld [vmem:[%s20166_s1 + $0x6e8] sm:$0xff]  ;;  %v12766_v32 = vcombine.high %v2089_v18, %v2093_v23  ;;  %v2104_v42 = vld [vmem:[%s20166_s1 + $0x7c0] sm:$0xff] }
 0x23e   :  { %4634 = vmatpush1.bf16.msra.mxu1 %v12683_v47  ;;  %4798 = vmatpush1.bf16.msra.mxu0 %v12685_v48  ;;  %v2065_v47 = vld [vmem:[%s20166_s1 + $0x688] sm:$0xff] }
 0x23f   :  { %4635 = vmatprep.subr.bf16.mxu1 %v12692_v50  ;;  %4799 = vmatprep.subr.bf16.mxu0 %v12694_v51  ;;  %v2069_v48 = vld [vmem:[%s20166_s1 + $0x6a8] sm:$0xff]  ;;  %v12731_v50 = vcombine.low %v2056_v22, %v2060_v26  ;;  %v12733_v51 = vcombine.low %v2057_v29, %v2061_v38  ;;  %v2100_v22 = vld [vmem:[%s20166_s1 + $0x7a0] sm:$0xff] }
 0x240   :  { %v12742_v55 = vcombine.high %v2065_v47, %v2069_v48  ;;  %v12741_v62 = vcombine.low %v2065_v47, %v2069_v48  ;;  %v2097_v26 = vld [vmem:[%s20166_s1 + $0x788] sm:$0xff] }
 0x241   :  { %v2101_v29 = vld [vmem:[%s20166_s1 + $0x7a8] sm:$0xff] }
 0x242   :  { %4636 = vmatpush1.bf16.msra.mxu1 %v12691_v57  ;;  %4800 = vmatpush1.bf16.msra.mxu0 %v12693_v58  ;;  %v2076_v58 = vld [vmem:[%s20166_s1 + $0x6e0] sm:$0xff]  ;;  %v12774_v41 = vcombine.high %v2097_v26, %v2101_v29  ;;  %v2109_v46 = vld [vmem:[%s20166_s1 + $0x7e8] sm:$0xff]  ;;  %v12773_v48 = vcombine.low %v2097_v26, %v2101_v29 }
 0x243   :  { %4637 = vmatprep.subr.bf16.mxu1 %v12700_v59  ;;  %4801 = vmatprep.subr.bf16.mxu0 %v12702_v49  ;;  %v2073_v59 = vld [vmem:[%s20166_s1 + $0x6c8] sm:$0xff]  ;;  %v12747_v9 = vcombine.low %v2072_v56, %v2076_v58 }
 0x244   :  { %v12750_v3 = vcombine.high %v2073_v59, %v2077_v28  ;;  %v12749_v10 = vcombine.low %v2073_v59, %v2077_v28  ;;  %v12781_v59 = vcombine.low %v2105_v45, %v2109_v46 }
 0x246   :  { %4638 = vmatpush1.bf16.msra.mxu1 %v12699_v63  ;;  %4802 = vmatpush1.bf16.msra.mxu0 %v12701_v0  ;;  %v12748_v0 = vcombine.high %v2072_v56, %v2076_v58  ;;  %v2113_v56 = vld [vmem:[%s20166_s1 + $0x808] sm:$0xff] }
 0x247   :  { %4639 = vmatprep.subr.bf16.mxu1 %v12708_v4  ;;  %4803 = vmatprep.subr.bf16.mxu0 %v12710_v5  ;;  %v2080_v4 = vld [vmem:[%s20166_s1 + $0x700] sm:$0xff]  ;;  %v15045_v24 = vpop.eup %15044 }
 0x248   :  { %v2084_v5 = vld [vmem:[%s20166_s1 + $0x720] sm:$0xff] }
 0x249   :  { %v12755_v37 = vcombine.low %v2080_v4, %v2084_v5 }
 0x24a   :  { %4640 = vmatpush1.bf16.msra.mxu1 %v12707_v13  ;;  %4804 = vmatpush1.bf16.msra.mxu0 %v12709_v14  ;;  %v12756_v13 = vcombine.high %v2080_v4, %v2084_v5  ;;  %v12758_v14 = vcombine.high %v2081_v6, %v2085_v7 }
 0x24b   :  { %4641 = vmatprep.subr.bf16.mxu1 %v12716_v16  ;;  %4805 = vmatprep.subr.bf16.mxu0 %v12718_v17  ;;  %v2088_v16 = vld [vmem:[%s20166_s1 + $0x740] sm:$0xff] }
 0x24c   :  { %v2092_v17 = vld [vmem:[%s20166_s1 + $0x760] sm:$0xff] }
 0x24d   :  { %v12763_v38 = vcombine.low %v2088_v16, %v2092_v17 }
 0x24e   :  { %4642 = vmatpush1.bf16.msra.mxu1 %v12715_v30  ;;  %4806 = vmatpush1.bf16.msra.mxu0 %v12717_v31  ;;  %v12757_v30 = vcombine.low %v2081_v6, %v2085_v7  ;;  %v12764_v31 = vcombine.high %v2088_v16, %v2092_v17 }
 0x24f   :  { %4643 = vmatprep.subr.bf16.mxu1 %v12724_v35  ;;  %4807 = vmatprep.subr.bf16.mxu0 %v12726_v20  ;;  %v2096_v35 = vld [vmem:[%s20166_s1 + $0x780] sm:$0xff]  ;;  %v12526_v20 = vadd.f32 -1.0, %v15045_v24 }
 0x250   :  { %v12771_v47 = vcombine.low %v2096_v35, %v2100_v22 }
 0x252   :  { %4644 = vmatpush1.bf16.msra.mxu1 %v12723_v39  ;;  %4808 = vmatpush1.bf16.msra.mxu0 %v12725_v40  ;;  %v12765_v39 = vcombine.low %v2089_v18, %v2093_v23  ;;  %v12772_v40 = vcombine.high %v2096_v35, %v2100_v22  ;;  %v2137_v35 = vld [vmem:[%s20166_s1 + $0x8c8] sm:$0xff] }
 0x253   :  { %4645 = vmatprep.subr.bf16.mxu1 %v12732_v43  ;;  %4809 = vmatprep.subr.bf16.mxu0 %v12734_v44  ;;  %v1823_v43 = vmul.f32 1.6732632, %v12526_v20  ;;  %v2108_v44 = vld [vmem:[%s20166_s1 + $0x7e0] sm:$0xff]  ;;  %v2141_v20 = vld [vmem:[%s20166_s1 + $0x8e8] sm:$0xff] }
 0x254   :  { %v12779_v58 = vcombine.low %v2104_v42, %v2108_v44 }
 0x255   :  { %v1787_v57 = vpop.f32.mrb[12].mxu1 }
 0x256   :  { %v16304_v49 = vadd.f32 %v1787_v57, %v1748_v52  ;;  %v14116_v60 = vpop.f32.mrb[13].mxu1  ;;  %4646 = vmatpush1.bf16.msra.mxu1 %v12731_v50  ;;  %4810 = vmatpush1.bf16.msra.mxu0 %v12733_v51  ;;  %v12780_v50 = vcombine.high %v2104_v42, %v2108_v44  ;;  %v12782_v51 = vcombine.high %v2105_v45, %v2109_v46  ;;  %v2112_v52 = vld [vmem:[%s20166_s1 + $0x800] sm:$0xff]  ;;  %v2117_v57 = vld [vmem:[%s20166_s1 + $0x828] sm:$0xff] }
 0x257   :  { %v1790_v8 = vpop.f32.mrb[14].mxu1  ;;  %4647 = vmatprep.subr.bf16.mxu1 %v12740_v54  ;;  %4811 = vmatprep.subr.bf16.mxu0 %v12742_v55  ;;  %v1837_v54 = vsel %vm1830_vm7, %v16247_v15, %v1823_v43  ;;  %v2116_v55 = vld [vmem:[%s20166_s1 + $0x820] sm:$0xff]  ;;  %v12790_v60 = vcombine.high %v2113_v56, %v2117_v57  ;;  %v12789_v4 = vcombine.low %v2113_v56, %v2117_v57  ;;  %v2145_v45 = vld [vmem:[%s20166_s1 + $0x908] sm:$0xff] }
 0x258   :  { %v14117_v63 = vpop.f32.mrb[15].mxu1  ;;  %v1844_v28 = vmul.f32 1.050701, %v1837_v54  ;;  %v12788_v15 = vcombine.high %v2112_v52, %v2116_v55  ;;  %v2120_v8 = vld [vmem:[%s20166_s1 + $0x840] sm:$0xff]  ;;  %v12814_v42 = vcombine.high %v2137_v35, %v2141_v20  ;;  %v2149_v46 = vld [vmem:[%s20166_s1 + $0x928] sm:$0xff]  ;;  %vm1834_vm10 = vcmp.gt.f32.partialorder %v16304_v49, 0.0 }
 0x259   :  { %v2125_v63 = vld [vmem:[%s20166_s1 + $0x868] sm:$0xff]  ;;  %v2144_v43 = vld [vmem:[%s20166_s1 + $0x900] sm:$0xff] }
 0x25a   :  { %4648 = vmatpush1.bf16.msra.mxu1 %v12739_v61  ;;  %4812 = vmatpush1.bf16.msra.mxu0 %v12741_v62  ;;  %v2124_v61 = vld [vmem:[%s20166_s1 + $0x860] sm:$0xff]  ;;  %v2121_v62 = vld [vmem:[%s20166_s1 + $0x848] sm:$0xff]  ;;  %v16383_v5 = vpack.c.bf16 %v1844_v28, %v1844_v28  ;;  %v16443_v28 = vsub.s32 4, %v15545_v33 }
 0x25b   :  { %4649 = vmatprep.subr.bf16.mxu1 %v12748_v0  ;;  %4813 = vmatprep.subr.bf16.mxu0 %v12750_v3  ;;  %v16381_v0 = vsub.s32 5, %v15545_v33  ;;  %v12787_v3 = vcombine.low %v2112_v52, %v2116_v55  ;;  %v12796_v6 = vcombine.high %v2120_v8, %v2124_v61  ;;  %v12798_v7 = vcombine.high %v2121_v62, %v2125_v63  ;;  %v2148_v44 = vld [vmem:[%s20166_s1 + $0x920] sm:$0xff]  ;;  %v2153_v56 = vld [vmem:[%s20166_s1 + $0x948] sm:$0xff] }
 0x25c   :  { %v12795_v17 = vcombine.low %v2120_v8, %v2124_v61  ;;  %v12797_v18 = vcombine.low %v2121_v62, %v2125_v63  ;;  %v12822_v52 = vcombine.high %v2145_v45, %v2149_v46  ;;  %v2152_v54 = vld [vmem:[%s20166_s1 + $0x940] sm:$0xff]  ;;  %v2157_v57 = vld [vmem:[%s20166_s1 + $0x968] sm:$0xff] }
 0x25d   :  { %v591_v16 = vrot.slane %v16127_v25, %v16381_v0  ;;  %v2156_v55 = vld [vmem:[%s20166_s1 + $0x960] sm:$0xff]  ;;  %v2161_v62 = vld [vmem:[%s20166_s1 + $0x988] sm:$0xff] }
 0x25e   :  { %4650 = vmatpush1.bf16.msra.mxu1 %v12747_v9  ;;  %4814 = vmatpush1.bf16.msra.mxu0 %v12749_v10  ;;  %v2128_v9 = vld [vmem:[%s20166_s1 + $0x880] sm:$0xff]  ;;  %v2165_v63 = vld [vmem:[%s20166_s1 + $0x9a8] sm:$0xff] }
 0x25f   :  { %4651 = vmatprep.subr.bf16.mxu1 %v12756_v13  ;;  %4815 = vmatprep.subr.bf16.mxu0 %v12758_v14  ;;  %v2132_v10 = vld [vmem:[%s20166_s1 + $0x8a0] sm:$0xff]  ;;  %v2129_v13 = vld [vmem:[%s20166_s1 + $0x888] sm:$0xff] }
 0x260   :  { %v2133_v14 = vld [vmem:[%s20166_s1 + $0x8a8] sm:$0xff]  ;;  %v12804_v24 = vcombine.high %v2128_v9, %v2132_v10  ;;  %v2160_v8 = vld [vmem:[%s20166_s1 + $0x980] sm:$0xff] }
 0x261   :  { %v2164_v61 = vld [vmem:[%s20166_s1 + $0x9a0] sm:$0xff] }
 0x262   :  { %4652 = vmatpush1.bf16.msra.mxu1 %v12755_v37  ;;  %4816 = vmatpush1.bf16.msra.mxu0 %v12757_v30  ;;  %v12806_v37 = vcombine.high %v2129_v13, %v2133_v14  ;;  %v2136_v30 = vld [vmem:[%s20166_s1 + $0x8c0] sm:$0xff] }
 0x263   :  { %4653 = vmatprep.subr.bf16.mxu1 %v12764_v31  ;;  %4817 = vmatprep.subr.bf16.mxu0 %v12766_v32  ;;  %v2140_v32 = vld [vmem:[%s20166_s1 + $0x8e0] sm:$0xff] }
 0x266   :  { %4654 = vmatpush1.bf16.msra.mxu1 %v12763_v38  ;;  %4818 = vmatpush1.bf16.msra.mxu0 %v12765_v39  ;;  %v12803_v38 = vcombine.low %v2128_v9, %v2132_v10  ;;  %v12805_v39 = vcombine.low %v2129_v13, %v2133_v14  ;;  %v12838_v9 = vcombine.high %v2161_v62, %v2165_v63  ;;  %v2168_v10 = vld [vmem:[%s20166_s1 + $0x9c0] sm:$0xff]  ;;  %v2169_v14 = vld [vmem:[%s20166_s1 + $0x9c8] sm:$0xff] }
 0x267   :  { %4655 = vmatprep.subr.bf16.mxu1 %v12772_v40  ;;  %4819 = vmatprep.subr.bf16.mxu0 %v12774_v41  ;;  %v12812_v41 = vcombine.high %v2136_v30, %v2140_v32  ;;  %v2172_v13 = vld [vmem:[%s20166_s1 + $0x9e0] sm:$0xff] }
 0x26a   :  { %4656 = vmatpush1.bf16.msra.mxu1 %v12771_v47  ;;  %4820 = vmatpush1.bf16.msra.mxu0 %v12773_v48  ;;  %v12811_v48 = vcombine.low %v2136_v30, %v2140_v32  ;;  %v12844_v30 = vcombine.high %v2168_v10, %v2172_v13 }
 0x26b   :  { %4657 = vmatprep.subr.bf16.mxu1 %v12780_v50  ;;  %4821 = vmatprep.subr.bf16.mxu0 %v12782_v51  ;;  %v12813_v50 = vcombine.low %v2137_v35, %v2141_v20  ;;  %v12820_v51 = vcombine.high %v2144_v43, %v2148_v44  ;;  %v2176_v35 = vld [vmem:[%s20166_s1 + $0xa00] sm:$0xff] }
 0x26c   :  { %v2180_v20 = vld [vmem:[%s20166_s1 + $0xa20] sm:$0xff] }
 0x26e   :  { %4658 = vmatpush1.bf16.msra.mxu1 %v12779_v58  ;;  %4822 = vmatpush1.bf16.msra.mxu0 %v12781_v59  ;;  %v12819_v58 = vcombine.low %v2144_v43, %v2148_v44  ;;  %v12821_v59 = vcombine.low %v2145_v45, %v2149_v46  ;;  %v2184_v43 = vld [vmem:[%s20166_s1 + $0xa40] sm:$0xff]  ;;  %v2189_v46 = vld [vmem:[%s20166_s1 + $0xa68] sm:$0xff] }
 0x26f   :  { %4668 = vmatprep.subr.bf16.mxu1 %v12788_v15  ;;  %4832 = vmatprep.subr.bf16.mxu0 %v12790_v60  ;;  %v12828_v15 = vcombine.high %v2152_v54, %v2156_v55  ;;  %v12830_v60 = vcombine.high %v2153_v56, %v2157_v57  ;;  %v2188_v45 = vld [vmem:[%s20166_s1 + $0xa60] sm:$0xff] }
 0x271   :  { %4660 = vmatmul.mubr.bf16.vlgmr.msra.gmra.mrb[16].mxu1 %v16383_v5  ;;  %4824 = vmatmul.mubr.bf16.vlgmr.msra.gmra.mrb[12].mxu0 %v16383_v5 }
 0x272   :  { %4669 = vmatpush1.bf16.msra.mxu1 %v12787_v3  ;;  %4833 = vmatpush1.bf16.msra.mxu0 %v12789_v4  ;;  %v12827_v3 = vcombine.low %v2152_v54, %v2156_v55  ;;  %v12829_v4 = vcombine.low %v2153_v56, %v2157_v57  ;;  %v2192_v55 = vld [vmem:[%s20166_s1 + $0xa80] sm:$0xff]  ;;  %v2193_v57 = vld [vmem:[%s20166_s1 + $0xa88] sm:$0xff] }
 0x273   :  { %4670 = vmatprep.subr.bf16.mxu1 %v12796_v6  ;;  %4834 = vmatprep.subr.bf16.mxu0 %v12798_v7  ;;  %v587_v6 = vrot.slane %v16127_v25, %v16443_v28  ;;  %v12836_v7 = vcombine.high %v2160_v8, %v2164_v61  ;;  %v2173_v25 = vld [vmem:[%s20166_s1 + $0x9e8] sm:$0xff]  ;;  %v2196_v56 = vld [vmem:[%s20166_s1 + $0xaa0] sm:$0xff] }
 0x274   :  { %v16401_v23 = vpop.f32.mrb[8].mxu0 }
 0x275   :  { %v1708_v31 = vpop.f32.mrb[9].mxu0 }
 0x276   :  { %v16415_v22 = vadd.f32 %v1708_v31, %v591_v16  ;;  %v1710_v26 = vpop.f32.mrb[10].mxu0  ;;  %4671 = vmatpush1.bf16.msra.mxu1 %v12795_v17  ;;  %4835 = vmatpush1.bf16.msra.mxu0 %v12797_v18  ;;  %v12835_v18 = vcombine.low %v2160_v8, %v2164_v61  ;;  %v12846_v31 = vcombine.high %v2169_v14, %v2173_v25  ;;  %v2200_v61 = vld [vmem:[%s20166_s1 + $0xac0] sm:$0xff] }
 0x277   :  { %v1711_v29 = vpop.f32.mrb[11].mxu0  ;;  %4672 = vmatprep.subr.bf16.mxu1 %v12804_v24  ;;  %4836 = vmatprep.subr.bf16.mxu0 %v12806_v37  ;;  %v12837_v24 = vcombine.low %v2161_v62, %v2165_v63  ;;  %v16472_v37 = vadd.f32 %v16401_v23, %v587_v6  ;;  %v2177_v23 = vld [vmem:[%s20166_s1 + $0xa08] sm:$0xff]  ;;  %v2204_v62 = vld [vmem:[%s20166_s1 + $0xae0] sm:$0xff] }
 0x278   :  { %v1798_v40 = vmin.f32 %v16415_v22, 0.0  ;;  %vm1833_vm8 = vcmp.gt.f32.partialorder %v16415_v22, 0.0  ;;  %v2181_v26 = vld [vmem:[%s20166_s1 + $0xa28] sm:$0xff] }
 0x279   :  { %v12854_v44 = vcombine.high %v2177_v23, %v2181_v26  ;;  %v2201_v63 = vld [vmem:[%s20166_s1 + $0xac8] sm:$0xff]  ;;  %vm1832_vm9 = vcmp.gt.f32.partialorder %v16472_v37, 0.0 }
 0x27a   :  { %v1810_v47 = vmul.f32 1.442695, %v1798_v40  ;;  %4673 = vmatpush1.bf16.msra.mxu1 %v12803_v38  ;;  %4837 = vmatpush1.bf16.msra.mxu0 %v12805_v39  ;;  %v12843_v38 = vcombine.low %v2168_v10, %v2172_v13  ;;  %v12845_v39 = vcombine.low %v2169_v14, %v2173_v25  ;;  %v1797_v40 = vmin.f32 %v16472_v37, 0.0  ;;  %v2208_v10 = vld [vmem:[%s20166_s1 + $0xb00] sm:$0xff]  ;;  %v2209_v14 = vld [vmem:[%s20166_s1 + $0xb08] sm:$0xff] }
 0x27b   :  { %4674 = vmatprep.subr.bf16.mxu1 %v12812_v41  ;;  %4838 = vmatprep.subr.bf16.mxu0 %v12814_v42  ;;  %v12852_v42 = vcombine.high %v2176_v35, %v2180_v20  ;;  %v2212_v13 = vld [vmem:[%s20166_s1 + $0xb20] sm:$0xff]  ;;  %v2213_v25 = vld [vmem:[%s20166_s1 + $0xb28] sm:$0xff] }
 0x27c   :  { %15046 = vpow2.f32 %v1810_v47 }
 0x27e   :  { %4675 = vmatpush1.bf16.msra.mxu1 %v12811_v48  ;;  %4839 = vmatpush1.bf16.msra.mxu0 %v12813_v50  ;;  %v12851_v48 = vcombine.low %v2176_v35, %v2180_v20  ;;  %v12853_v50 = vcombine.low %v2177_v23, %v2181_v26  ;;  %v2221_v35 = vld [vmem:[%s20166_s1 + $0xb68] sm:$0xff]  ;;  %v12883_v23 = vcombine.low %v2208_v10, %v2212_v13 }
 0x27f   :  { %4676 = vmatprep.subr.bf16.mxu1 %v12820_v51  ;;  %4840 = vmatprep.subr.bf16.mxu0 %v12822_v52  ;;  %v1808_v51 = vmul.f32 1.442695, %v1797_v40  ;;  %v12860_v52 = vcombine.high %v2184_v43, %v2188_v45  ;;  %v12885_v26 = vcombine.low %v2209_v14, %v2213_v25 }
 0x281   :  { %15048 = vpow2.f32 %v1808_v51  ;;  %v2236_v51 = vld [vmem:[%s20166_s1 + $0xbe0] sm:$0xff] }
 0x282   :  { %4677 = vmatpush1.bf16.msra.mxu1 %v12819_v58  ;;  %4841 = vmatpush1.bf16.msra.mxu0 %v12821_v59  ;;  %v2197_v58 = vld [vmem:[%s20166_s1 + $0xaa8] sm:$0xff]  ;;  %v12859_v59 = vcombine.low %v2184_v43, %v2188_v45 }
 0x283   :  { %4678 = vmatprep.subr.bf16.mxu1 %v12828_v15  ;;  %4842 = vmatprep.subr.bf16.mxu0 %v12830_v60  ;;  %v12868_v60 = vcombine.high %v2192_v55, %v2196_v56  ;;  %v12870_v8 = vcombine.high %v2193_v57, %v2197_v58  ;;  %v12869_v6 = vcombine.low %v2193_v57, %v2197_v58  ;;  %v2229_v43 = vld [vmem:[%s20166_s1 + $0xba8] sm:$0xff] }
 0x286   :  { %v15047_v16 = vpop.eup %15046  ;;  %4679 = vmatpush1.bf16.msra.mxu1 %v12827_v3  ;;  %4843 = vmatpush1.bf16.msra.mxu0 %v12829_v4  ;;  %v2205_v3 = vld [vmem:[%s20166_s1 + $0xae8] sm:$0xff]  ;;  %v12867_v4 = vcombine.low %v2192_v55, %v2196_v56 }
 0x287   :  { %v12529_v17 = vadd.f32 -1.0, %v15047_v16  ;;  %4680 = vmatprep.subr.bf16.mxu1 %v12836_v7  ;;  %4844 = vmatprep.subr.bf16.mxu0 %v12838_v9  ;;  %v12876_v7 = vcombine.high %v2200_v61, %v2204_v62  ;;  %v12878_v9 = vcombine.high %v2201_v63, %v2205_v3  ;;  %v12875_v16 = vcombine.low %v2200_v61, %v2204_v62  ;;  %v2245_v61 = vld [vmem:[%s20166_s1 + $0xc28] sm:$0xff] }
 0x289   :  { %v1826_v32 = vmul.f32 1.6732632, %v12529_v17  ;;  %v12877_v17 = vcombine.low %v2201_v63, %v2205_v3  ;;  %v1799_v3 = vmin.f32 %v16304_v49, 0.0 }
 0x28a   :  { %4681 = vmatpush1.bf16.msra.mxu1 %v12835_v18  ;;  %4845 = vmatpush1.bf16.msra.mxu0 %v12837_v24  ;;  %v12884_v18 = vcombine.high %v2208_v10, %v2212_v13  ;;  %v12886_v24 = vcombine.high %v2209_v14, %v2213_v25  ;;  %v2249_v10 = vld [vmem:[%s20166_s1 + $0xc48] sm:$0xff] }
 0x28b   :  { %v1840_v29 = vsel %vm1833_vm8, %v16415_v22, %v1826_v32  ;;  %4682 = vmatprep.subr.bf16.mxu1 %v12844_v30  ;;  %4846 = vmatprep.subr.bf16.mxu0 %v12846_v31  ;;  %v2185_v22 = vld [vmem:[%s20166_s1 + $0xa48] sm:$0xff]  ;;  %v2216_v30 = vld [vmem:[%s20166_s1 + $0xb40] sm:$0xff]  ;;  %v15049_v20 = vpop.eup %15048 }
 0x28c   :  { %v1847_v41 = vmul.f32 1.050701, %v1840_v29  ;;  %v12862_v54 = vcombine.high %v2185_v22, %v2189_v46  ;;  %v12861_v15 = vcombine.low %v2185_v22, %v2189_v46  ;;  %v2220_v31 = vld [vmem:[%s20166_s1 + $0xb60] sm:$0xff]  ;;  %v2217_v32 = vld [vmem:[%s20166_s1 + $0xb48] sm:$0xff]  ;;  %v12528_v40 = vadd.f32 -1.0, %v15049_v20 }
 0x28d   :  { %v12892_v29 = vcombine.high %v2216_v30, %v2220_v31  ;;  %v12893_v45 = vcombine.low %v2217_v32, %v2221_v35  ;;  %v2253_v13 = vld [vmem:[%s20166_s1 + $0xc68] sm:$0xff] }
 0x28e   :  { %v16501_v47 = vpack.c.bf16 %v1847_v41, %v1847_v41  ;;  %4683 = vmatpush1.bf16.msra.mxu1 %v12843_v38  ;;  %4847 = vmatpush1.bf16.msra.mxu0 %v12845_v39  ;;  %v12894_v38 = vcombine.high %v2217_v32, %v2221_v35  ;;  %v2224_v39 = vld [vmem:[%s20166_s1 + $0xb80] sm:$0xff]  ;;  %v2257_v32 = vld [vmem:[%s20166_s1 + $0xc88] sm:$0xff] }
 0x28f   :  { %4684 = vmatprep.subr.bf16.mxu1 %v12852_v42  ;;  %4848 = vmatprep.subr.bf16.mxu0 %v12854_v44  ;;  %v2228_v41 = vld [vmem:[%s20166_s1 + $0xba0] sm:$0xff]  ;;  %v2225_v42 = vld [vmem:[%s20166_s1 + $0xb88] sm:$0xff]  ;;  %v12891_v44 = vcombine.low %v2216_v30, %v2220_v31 }
 0x290   :  { %4700 = vmatprep.mubr.bf16.mxu1 %v16501_v47  ;;  %4864 = vmatprep.mubr.bf16.mxu0 %v16501_v47  ;;  %v12900_v22 = vcombine.high %v2224_v39, %v2228_v41  ;;  %v12902_v46 = vcombine.high %v2225_v42, %v2229_v43  ;;  %v12899_v55 = vcombine.low %v2224_v39, %v2228_v41  ;;  %v2256_v30 = vld [vmem:[%s20166_s1 + $0xc80] sm:$0xff]  ;;  %v2261_v35 = vld [vmem:[%s20166_s1 + $0xca8] sm:$0xff] }
 0x291   :  { %v12901_v56 = vcombine.low %v2225_v42, %v2229_v43  ;;  %v2260_v31 = vld [vmem:[%s20166_s1 + $0xca0] sm:$0xff]  ;;  %v2269_v41 = vld [vmem:[%s20166_s1 + $0xce8] sm:$0xff]  ;;  %v12933_v43 = vcombine.low %v2257_v32, %v2261_v35 }
 0x292   :  { %4685 = vmatpush1.bf16.msra.mxu1 %v12851_v48  ;;  %4849 = vmatpush1.bf16.msra.mxu0 %v12853_v50  ;;  %v2232_v48 = vld [vmem:[%s20166_s1 + $0xbc0] sm:$0xff]  ;;  %v1825_v50 = vmul.f32 1.6732632, %v12528_v40  ;;  %v2265_v40 = vld [vmem:[%s20166_s1 + $0xcc8] sm:$0xff]  ;;  %v12931_v42 = vcombine.low %v2256_v30, %v2260_v31 }
 0x293   :  { %4686 = vmatprep.subr.bf16.mxu1 %v12860_v52  ;;  %4850 = vmatprep.subr.bf16.mxu0 %v12862_v54  ;;  %v2233_v52 = vld [vmem:[%s20166_s1 + $0xbc8] sm:$0xff]  ;;  %v12908_v57 = vcombine.high %v2232_v48, %v2236_v51  ;;  %v12907_v62 = vcombine.low %v2232_v48, %v2236_v51  ;;  %v2268_v39 = vld [vmem:[%s20166_s1 + $0xce0] sm:$0xff] }
 0x294   :  { %v2237_v54 = vld [vmem:[%s20166_s1 + $0xbe8] sm:$0xff] }
 0x295   :  { %v12910_v58 = vcombine.high %v2233_v52, %v2237_v54  ;;  %v12909_v63 = vcombine.low %v2233_v52, %v2237_v54  ;;  %v2273_v48 = vld [vmem:[%s20166_s1 + $0xd08] sm:$0xff]  ;;  %v12941_v52 = vcombine.low %v2265_v40, %v2269_v41 }
 0x296   :  { %4687 = vmatpush1.bf16.msra.mxu1 %v12859_v59  ;;  %4851 = vmatpush1.bf16.msra.mxu0 %v12861_v15  ;;  %v2240_v59 = vld [vmem:[%s20166_s1 + $0xc00] sm:$0xff]  ;;  %v1839_v15 = vsel %vm1832_vm9, %v16472_v37, %v1825_v50  ;;  %v2277_v50 = vld [vmem:[%s20166_s1 + $0xd28] sm:$0xff] }
 0x297   :  { %4688 = vmatprep.subr.bf16.mxu1 %v12868_v60  ;;  %4852 = vmatprep.subr.bf16.mxu0 %v12870_v8  ;;  %v2244_v60 = vld [vmem:[%s20166_s1 + $0xc20] sm:$0xff]  ;;  %v2241_v8 = vld [vmem:[%s20166_s1 + $0xc08] sm:$0xff] }
 0x298   :  { %v12916_v37 = vcombine.high %v2240_v59, %v2244_v60  ;;  %v12915_v14 = vcombine.low %v2240_v59, %v2244_v60  ;;  %v12917_v25 = vcombine.low %v2241_v8, %v2245_v61  ;;  %v2285_v59 = vld [vmem:[%s20166_s1 + $0xd68] sm:$0xff] }
 0x29a   :  { %4689 = vmatpush1.bf16.msra.mxu1 %v12867_v4  ;;  %4853 = vmatpush1.bf16.msra.mxu0 %v12869_v6  ;;  %v1846_v4 = vmul.f32 1.050701, %v1839_v15  ;;  %v12918_v6 = vcombine.high %v2241_v8, %v2245_v61  ;;  %v12949_v8 = vcombine.low %v2273_v48, %v2277_v50 }
 0x29b   :  { %4690 = vmatprep.subr.bf16.mxu1 %v12876_v7  ;;  %4854 = vmatprep.subr.bf16.mxu0 %v12878_v9  ;;  %v2248_v7 = vld [vmem:[%s20166_s1 + $0xc40] sm:$0xff] }
 0x29c   :  { %v2252_v9 = vld [vmem:[%s20166_s1 + $0xc60] sm:$0xff] }
 0x29d   :  { %v12923_v20 = vcombine.low %v2248_v7, %v2252_v9 }
 0x29e   :  { %4691 = vmatpush1.bf16.msra.mxu1 %v12875_v16  ;;  %4855 = vmatpush1.bf16.msra.mxu0 %v12877_v17  ;;  %v1812_v16 = vmul.f32 1.442695, %v1799_v3  ;;  %v16604_v17 = vpack.c.bf16 %v1846_v4, %v1846_v4  ;;  %v2292_v4 = vld [vmem:[%s20166_s1 + $0xda0] sm:$0xff] }
 0x29f   :  { %4692 = vmatprep.subr.bf16.mxu1 %v12884_v18  ;;  %4856 = vmatprep.subr.bf16.mxu0 %v12886_v24  ;;  %v12924_v18 = vcombine.high %v2248_v7, %v2252_v9  ;;  %v12926_v24 = vcombine.high %v2249_v10, %v2253_v13 }
 0x2a0   :  { %15050 = vpow2.f32 %v1812_v16  ;;  %v2300_v16 = vld [vmem:[%s20166_s1 + $0xde0] sm:$0xff] }
 0x2a2   :  { %4693 = vmatpush1.bf16.msra.mxu1 %v12883_v23  ;;  %4857 = vmatpush1.bf16.msra.mxu0 %v12885_v26  ;;  %v12925_v23 = vcombine.low %v2249_v10, %v2253_v13  ;;  %v12932_v26 = vcombine.high %v2256_v30, %v2260_v31 }
 0x2a3   :  { %4694 = vmatprep.subr.bf16.mxu1 %v12892_v29  ;;  %4858 = vmatprep.subr.bf16.mxu0 %v12894_v38  ;;  %v12934_v29 = vcombine.high %v2257_v32, %v2261_v35  ;;  %v2264_v38 = vld [vmem:[%s20166_s1 + $0xcc0] sm:$0xff] }
 0x2a4   :  { %v12939_v51 = vcombine.low %v2264_v38, %v2268_v39 }
 0x2a6   :  { %4695 = vmatpush1.bf16.msra.mxu1 %v12891_v44  ;;  %4859 = vmatpush1.bf16.msra.mxu0 %v12893_v45  ;;  %v12940_v44 = vcombine.high %v2264_v38, %v2268_v39  ;;  %v12942_v45 = vcombine.high %v2265_v40, %v2269_v41  ;;  %v1863_v38 = vld [vmem:[%s20166_s1 + $0x38] sm:$0xff] }
 0x2a7   :  { %4696 = vmatprep.subr.bf16.mxu1 %v12900_v22  ;;  %4860 = vmatprep.subr.bf16.mxu0 %v12902_v46  ;;  %v2272_v22 = vld [vmem:[%s20166_s1 + $0xd00] sm:$0xff] }
 0x2a8   :  { %v2276_v46 = vld [vmem:[%s20166_s1 + $0xd20] sm:$0xff] }
 0x2a9   :  { %v12948_v54 = vcombine.high %v2272_v22, %v2276_v46  ;;  %v12947_v60 = vcombine.low %v2272_v22, %v2276_v46  ;;  %v1871_v22 = vld [vmem:[%s20166_s1 + $0x78] sm:$0xff] }
 0x2aa   :  { %4697 = vmatpush1.bf16.msra.mxu1 %v12899_v55  ;;  %4861 = vmatpush1.bf16.msra.mxu0 %v12901_v56  ;;  %v12950_v55 = vcombine.high %v2273_v48, %v2277_v50  ;;  %v2280_v56 = vld [vmem:[%s20166_s1 + $0xd40] sm:$0xff]  ;;  %v15051_v15 = vpop.eup %15050 }
 0x2ab   :  { %4698 = vmatprep.subr.bf16.mxu1 %v12908_v57  ;;  %4862 = vmatprep.subr.bf16.mxu0 %v12910_v58  ;;  %v2284_v57 = vld [vmem:[%s20166_s1 + $0xd60] sm:$0xff]  ;;  %v2281_v58 = vld [vmem:[%s20166_s1 + $0xd48] sm:$0xff]  ;;  %v12530_v3 = vadd.f32 -1.0, %v15051_v15 }
 0x2ac   :  { %v12956_v61 = vcombine.high %v2280_v56, %v2284_v57  ;;  %v12955_v7 = vcombine.low %v2280_v56, %v2284_v57  ;;  %v12957_v9 = vcombine.low %v2281_v58, %v2285_v59  ;;  %v1875_v56 = vld [vmem:[%s20166_s1 + $0x98] sm:$0xff] }
 0x2ad   :  { %v1879_v57 = vld [vmem:[%s20166_s1 + $0xb8] sm:$0xff] }
 0x2ae   :  { %4699 = vmatpush1.bf16.msra.mxu1 %v12907_v62  ;;  %4863 = vmatpush1.bf16.msra.mxu0 %v12909_v63  ;;  %v12958_v62 = vcombine.high %v2281_v58, %v2285_v59  ;;  %v2288_v63 = vld [vmem:[%s20166_s1 + $0xd80] sm:$0xff] }
 0x2af   :  { %4709 = vmatprep.subr.bf16.mxu1 %v12916_v37  ;;  %4873 = vmatprep.subr.bf16.mxu0 %v12918_v6  ;;  %v2289_v37 = vld [vmem:[%s20166_s1 + $0xd88] sm:$0xff]  ;;  %v12964_v10 = vcombine.high %v2288_v63, %v2292_v4  ;;  %v12963_v30 = vcombine.low %v2288_v63, %v2292_v4 }
 0x2b0   :  { %v2293_v6 = vld [vmem:[%s20166_s1 + $0xda8] sm:$0xff] }
 0x2b1   :  { %4701 = vmatmul.mubr.bf16.vlgmr.msra.gmra.mrb[16].mxu1 %v16604_v17  ;;  %4865 = vmatmul.mubr.bf16.vlgmr.msra.gmra.mrb[12].mxu0 %v16604_v17  ;;  %v12966_v13 = vcombine.high %v2289_v37, %v2293_v6  ;;  %v12965_v31 = vcombine.low %v2289_v37, %v2293_v6  ;;  %v1890_v6 = vld [vmem:[%s20166_s1 + $0x110] sm:$0xff] }
 0x2b2   :  { %4710 = vmatpush1.bf16.msra.mxu1 %v12915_v14  ;;  %4874 = vmatpush1.bf16.msra.mxu0 %v12917_v25  ;;  %v2296_v14 = vld [vmem:[%s20166_s1 + $0xdc0] sm:$0xff]  ;;  %v1827_v25 = vmul.f32 1.6732632, %v12530_v3  ;;  %v12553_v3 = vcombine.low %v1875_v56, %v1879_v57 }
 0x2b3   :  { %4711 = vmatprep.subr.bf16.mxu1 %v12924_v18  ;;  %4875 = vmatprep.subr.bf16.mxu0 %v12926_v24  ;;  %v2297_v18 = vld [vmem:[%s20166_s1 + $0xdc8] sm:$0xff]  ;;  %v12972_v32 = vcombine.high %v2296_v14, %v2300_v16  ;;  %v12971_v39 = vcombine.low %v2296_v14, %v2300_v16 }
 0x2b4   :  { %4741 = vmatprep.mubr.bf16.mxu1 %v15118_v2  ;;  %4905 = vmatprep.mubr.bf16.mxu0 %v15118_v2  ;;  %v2301_v24 = vld [vmem:[%s20166_s1 + $0xde8] sm:$0xff] }
 0x2b5   :  { %v12974_v35 = vcombine.high %v2297_v18, %v2301_v24  ;;  %v12973_v40 = vcombine.low %v2297_v18, %v2301_v24  ;;  %v1898_v18 = vld [vmem:[%s20166_s1 + $0x150] sm:$0xff] }
 0x2b6   :  { %4712 = vmatpush1.bf16.msra.mxu1 %v12923_v20  ;;  %4876 = vmatpush1.bf16.msra.mxu0 %v12925_v23  ;;  %v1858_v20 = vld [vmem:[%s20166_s1 + $0x10] sm:$0xff]  ;;  %v1841_v23 = vsel %vm1834_vm10, %v16304_v49, %v1827_v25 }
 0x2b7   :  { %4713 = vmatprep.subr.bf16.mxu1 %v12932_v26  ;;  %4877 = vmatprep.subr.bf16.mxu0 %v12934_v29  ;;  %v1862_v26 = vld [vmem:[%s20166_s1 + $0x30] sm:$0xff]  ;;  %v1859_v29 = vld [vmem:[%s20166_s1 + $0x18] sm:$0xff]  ;;  %v1848_v41 = vmul.f32 1.050701, %v1841_v23 }
 0x2b8   :  { %v12536_v49 = vcombine.high %v1858_v20, %v1862_v26  ;;  %v12535_v46 = vcombine.low %v1858_v20, %v1862_v26  ;;  %v12537_v50 = vcombine.low %v1859_v29, %v1863_v38  ;;  %v1902_v24 = vld [vmem:[%s20166_s1 + $0x170] sm:$0xff] }
 0x2b9   :  { %v16708_v48 = vpack.c.bf16 %v1848_v41, %v1848_v41  ;;  %v12576_v20 = vcombine.high %v1898_v18, %v1902_v24  ;;  %v1906_v26 = vld [vmem:[%s20166_s1 + $0x190] sm:$0xff] }
 0x2ba   :  { %4714 = vmatpush1.bf16.msra.mxu1 %v12931_v42  ;;  %4878 = vmatpush1.bf16.msra.mxu0 %v12933_v43  ;;  %v12538_v42 = vcombine.high %v1859_v29, %v1863_v38  ;;  %v1866_v43 = vld [vmem:[%s20166_s1 + $0x50] sm:$0xff]  ;;  %v1907_v38 = vld [vmem:[%s20166_s1 + $0x198] sm:$0xff] }
 0x2bb   :  { %4715 = vmatprep.subr.bf16.mxu1 %v12940_v44  ;;  %4879 = vmatprep.subr.bf16.mxu0 %v12942_v45  ;;  %v1870_v44 = vld [vmem:[%s20166_s1 + $0x70] sm:$0xff]  ;;  %v1867_v45 = vld [vmem:[%s20166_s1 + $0x58] sm:$0xff] }
 0x2bc   :  { %v12543_v58 = vcombine.low %v1866_v43, %v1870_v44  ;;  %v12545_v59 = vcombine.low %v1867_v45, %v1871_v22  ;;  %v1910_v29 = vld [vmem:[%s20166_s1 + $0x1b0] sm:$0xff] }
 0x2be   :  { %4716 = vmatpush1.bf16.msra.mxu1 %v12939_v51  ;;  %4880 = vmatpush1.bf16.msra.mxu0 %v12941_v52  ;;  %v12544_v51 = vcombine.high %v1866_v43, %v1870_v44  ;;  %v12546_v52 = vcombine.high %v1867_v45, %v1871_v22  ;;  %v1914_v43 = vld [vmem:[%s20166_s1 + $0x1d0] sm:$0xff]  ;;  %v1915_v45 = vld [vmem:[%s20166_s1 + $0x1d8] sm:$0xff] }
 0x2bf   :  { %4717 = vmatprep.subr.bf16.mxu1 %v12948_v54  ;;  %4881 = vmatprep.subr.bf16.mxu0 %v12950_v55  ;;  %v1874_v54 = vld [vmem:[%s20166_s1 + $0x90] sm:$0xff]  ;;  %v1919_v22 = vld [vmem:[%s20166_s1 + $0x1f8] sm:$0xff] }
 0x2c0   :  { %v1878_v55 = vld [vmem:[%s20166_s1 + $0xb0] sm:$0xff] }
 0x2c1   :  { %v12552_v15 = vcombine.high %v1874_v54, %v1878_v55  ;;  %v12551_v63 = vcombine.low %v1874_v54, %v1878_v55  ;;  %v1918_v44 = vld [vmem:[%s20166_s1 + $0x1f0] sm:$0xff] }
 0x2c2   :  { %4718 = vmatpush1.bf16.msra.mxu1 %v12947_v60  ;;  %4882 = vmatpush1.bf16.msra.mxu0 %v12949_v8  ;;  %v12554_v60 = vcombine.high %v1875_v56, %v1879_v57  ;;  %v1882_v8 = vld [vmem:[%s20166_s1 + $0xd0] sm:$0xff]  ;;  %v1923_v56 = vld [vmem:[%s20166_s1 + $0x218] sm:$0xff] }
 0x2c3   :  { %4719 = vmatprep.subr.bf16.mxu1 %v12956_v61  ;;  %4883 = vmatprep.subr.bf16.mxu0 %v12958_v62  ;;  %v1886_v61 = vld [vmem:[%s20166_s1 + $0xf0] sm:$0xff]  ;;  %v1883_v62 = vld [vmem:[%s20166_s1 + $0xd8] sm:$0xff] }
 0x2c4   :  { %v12560_v4 = vcombine.high %v1882_v8, %v1886_v61  ;;  %v1922_v54 = vld [vmem:[%s20166_s1 + $0x210] sm:$0xff]  ;;  %v1927_v57 = vld [vmem:[%s20166_s1 + $0x238] sm:$0xff] }
 0x2c5   :  { %v1926_v55 = vld [vmem:[%s20166_s1 + $0x230] sm:$0xff] }
 0x2c6   :  { %4720 = vmatpush1.bf16.msra.mxu1 %v12955_v7  ;;  %4884 = vmatpush1.bf16.msra.mxu0 %v12957_v9  ;;  %v1894_v7 = vld [vmem:[%s20166_s1 + $0x130] sm:$0xff]  ;;  %v1891_v9 = vld [vmem:[%s20166_s1 + $0x118] sm:$0xff] }
 0x2c7   :  { %4721 = vmatprep.subr.bf16.mxu1 %v12964_v10  ;;  %4885 = vmatprep.subr.bf16.mxu0 %v12966_v13  ;;  %v1895_v10 = vld [vmem:[%s20166_s1 + $0x138] sm:$0xff]  ;;  %v12559_v13 = vcombine.low %v1882_v8, %v1886_v61  ;;  %v12568_v25 = vcombine.high %v1890_v6, %v1894_v7  ;;  %v1930_v8 = vld [vmem:[%s20166_s1 + $0x250] sm:$0xff] }
 0x2c8   :  { %v12570_v16 = vcombine.high %v1891_v9, %v1895_v10  ;;  %v1934_v61 = vld [vmem:[%s20166_s1 + $0x270] sm:$0xff] }
 0x2ca   :  { %4722 = vmatpush1.bf16.msra.mxu1 %v12963_v30  ;;  %4886 = vmatpush1.bf16.msra.mxu0 %v12965_v31  ;;  %v1899_v30 = vld [vmem:[%s20166_s1 + $0x158] sm:$0xff] }
 0x2cb   :  { %4723 = vmatprep.subr.bf16.mxu1 %v12972_v32  ;;  %4887 = vmatprep.subr.bf16.mxu0 %v12974_v35  ;;  %v1903_v31 = vld [vmem:[%s20166_s1 + $0x178] sm:$0xff]  ;;  %v12567_v32 = vcombine.low %v1890_v6, %v1894_v7  ;;  %v12569_v35 = vcombine.low %v1891_v9, %v1895_v10  ;;  %v1938_v6 = vld [vmem:[%s20166_s1 + $0x290] sm:$0xff] }
 0x2cc   :  { %v12578_v23 = vcombine.high %v1899_v30, %v1903_v31  ;;  %v12577_v41 = vcombine.low %v1899_v30, %v1903_v31  ;;  %v1942_v7 = vld [vmem:[%s20166_s1 + $0x2b0] sm:$0xff]  ;;  %v1939_v9 = vld [vmem:[%s20166_s1 + $0x298] sm:$0xff] }
 0x2cd   :  { %v1943_v10 = vld [vmem:[%s20166_s1 + $0x2b8] sm:$0xff] }
 0x2ce   :  { %4724 = vmatpush1.bf16.msra.mxu1 %v12971_v39  ;;  %4888 = vmatpush1.bf16.msra.mxu0 %v12973_v40  ;;  %v1911_v39 = vld [vmem:[%s20166_s1 + $0x1b8] sm:$0xff]  ;;  %v12575_v40 = vcombine.low %v1898_v18, %v1902_v24  ;;  %v1946_v18 = vld [vmem:[%s20166_s1 + $0x2d0] sm:$0xff] }
 0x2cf   :  { %4914 = vmatprep.subr.bf16.mxu1 %v12536_v49  ;;  %5078 = vmatprep.subr.bf16.mxu0 %v12538_v42  ;;  %v12584_v49 = vcombine.high %v1906_v26, %v1910_v29  ;;  %v12586_v42 = vcombine.high %v1907_v38, %v1911_v39  ;;  %v1950_v24 = vld [vmem:[%s20166_s1 + $0x2f0] sm:$0xff]  ;;  %v1947_v30 = vld [vmem:[%s20166_s1 + $0x2d8] sm:$0xff] }
 0x2d0   :  { %v1951_v31 = vld [vmem:[%s20166_s1 + $0x2f8] sm:$0xff] }
 0x2d1   :  { %4742 = vmatmul.mubr.bf16.vlgmr.msra.gmra.mrb[16].mxu1 %v16708_v48  ;;  %4906 = vmatmul.mubr.bf16.vlgmr.msra.gmra.mrb[12].mxu0 %v16708_v48 }
 0x2d2   :  { %4915 = vmatpush1.bf16.msra.mxu1 %v12535_v46  ;;  %4946 = vmatprep.mubr.bf16.mxu1 %v16152_v11  ;;  %v12583_v46 = vcombine.low %v1906_v26, %v1910_v29  ;;  %v1954_v26 = vld [vmem:[%s20166_s1 + $0x310] sm:$0xff] }
 0x2d3   :  { %5079 = vmatpush1.bf16.msra.mxu0 %v12537_v50  ;;  %5110 = vmatprep.mubr.bf16.mxu0 %v16152_v11  ;;  %v1887_v11 = vld [vmem:[%s20166_s1 + $0xf8] sm:$0xff]  ;;  %v12585_v50 = vcombine.low %v1907_v38, %v1911_v39  ;;  %v1958_v29 = vld [vmem:[%s20166_s1 + $0x330] sm:$0xff] }
 0x2d4   :  { %4916 = vmatprep.subr.bf16.mxu1 %v12544_v51  ;;  %5080 = vmatprep.subr.bf16.mxu0 %v12546_v52  ;;  %v12562_v37 = vcombine.high %v1883_v62, %v1887_v11  ;;  %v12561_v14 = vcombine.low %v1883_v62, %v1887_v11  ;;  %v12592_v51 = vcombine.high %v1914_v43, %v1918_v44  ;;  %v1931_v62 = vld [vmem:[%s20166_s1 + $0x258] sm:$0xff] }
 0x2d5   :  { %v12594_v52 = vcombine.high %v1915_v45, %v1919_v22  ;;  %v1935_v11 = vld [vmem:[%s20166_s1 + $0x278] sm:$0xff] }
 0x2d6   :  { %4917 = vmatpush1.bf16.msra.mxu1 %v12543_v58  ;;  %v12591_v58 = vcombine.low %v1914_v43, %v1918_v44  ;;  %v1955_v38 = vld [vmem:[%s20166_s1 + $0x318] sm:$0xff]  ;;  %v1962_v43 = vld [vmem:[%s20166_s1 + $0x350] sm:$0xff] }
 0x2d7   :  { %5081 = vmatpush1.bf16.msra.mxu0 %v12545_v59  ;;  %4918 = vmatprep.subr.bf16.mxu1 %v12552_v15  ;;  %v12593_v59 = vcombine.low %v1915_v45, %v1919_v22  ;;  %v12600_v15 = vcombine.high %v1922_v54, %v1926_v55  ;;  %v1959_v39 = vld [vmem:[%s20166_s1 + $0x338] sm:$0xff]  ;;  %v1966_v44 = vld [vmem:[%s20166_s1 + $0x370] sm:$0xff] }
 0x2d8   :  { %5082 = vmatprep.subr.bf16.mxu0 %v12554_v60  ;;  %v12602_v60 = vcombine.high %v1923_v56, %v1927_v57  ;;  %v1963_v45 = vld [vmem:[%s20166_s1 + $0x358] sm:$0xff] }
 0x2d9   :  { %v1967_v22 = vld [vmem:[%s20166_s1 + $0x378] sm:$0xff] }
 0x2da   :  { %4919 = vmatpush1.bf16.msra.mxu1 %v12551_v63  ;;  %v12599_v63 = vcombine.low %v1922_v54, %v1926_v55  ;;  %v1970_v54 = vld [vmem:[%s20166_s1 + $0x390] sm:$0xff] }
 0x2db   :  { %5083 = vmatpush1.bf16.msra.mxu0 %v12553_v3  ;;  %4920 = vmatprep.subr.bf16.mxu1 %v12560_v4  ;;  %v12601_v3 = vcombine.low %v1923_v56, %v1927_v57  ;;  %v12608_v4 = vcombine.high %v1930_v8, %v1934_v61  ;;  %v1974_v55 = vld [vmem:[%s20166_s1 + $0x3b0] sm:$0xff]  ;;  %v1971_v56 = vld [vmem:[%s20166_s1 + $0x398] sm:$0xff] }
 0x2dc   :  { %5084 = vmatprep.subr.bf16.mxu0 %v12562_v37  ;;  %v12610_v37 = vcombine.high %v1931_v62, %v1935_v11  ;;  %v1975_v57 = vld [vmem:[%s20166_s1 + $0x3b8] sm:$0xff] }
 0x2de   :  { %4921 = vmatpush1.bf16.msra.mxu1 %v12559_v13  ;;  %v12607_v13 = vcombine.low %v1930_v8, %v1934_v61  ;;  %v1978_v8 = vld [vmem:[%s20166_s1 + $0x3d0] sm:$0xff] }
 0x2df   :  { %5085 = vmatpush1.bf16.msra.mxu0 %v12561_v14  ;;  %4922 = vmatprep.subr.bf16.mxu1 %v12568_v25  ;;  %v12609_v14 = vcombine.low %v1931_v62, %v1935_v11  ;;  %v12616_v25 = vcombine.high %v1938_v6, %v1942_v7  ;;  %v1982_v61 = vld [vmem:[%s20166_s1 + $0x3f0] sm:$0xff]  ;;  %v1979_v62 = vld [vmem:[%s20166_s1 + $0x3d8] sm:$0xff] }
 0x2e0   :  { %5086 = vmatprep.subr.bf16.mxu0 %v12570_v16  ;;  %v12618_v16 = vcombine.high %v1939_v9, %v1943_v10  ;;  %v1983_v11 = vld [vmem:[%s20166_s1 + $0x3f8] sm:$0xff] }
 0x2e2   :  { %4923 = vmatpush1.bf16.msra.mxu1 %v12567_v32  ;;  %v12615_v32 = vcombine.low %v1938_v6, %v1942_v7  ;;  %v1986_v6 = vld [vmem:[%s20166_s1 + $0x410] sm:$0xff] }
 0x2e3   :  { %5087 = vmatpush1.bf16.msra.mxu0 %v12569_v35  ;;  %4924 = vmatprep.subr.bf16.mxu1 %v12576_v20  ;;  %v12617_v35 = vcombine.low %v1939_v9, %v1943_v10  ;;  %v12624_v20 = vcombine.high %v1946_v18, %v1950_v24  ;;  %v1990_v7 = vld [vmem:[%s20166_s1 + $0x430] sm:$0xff]  ;;  %v1987_v9 = vld [vmem:[%s20166_s1 + $0x418] sm:$0xff] }
 0x2e4   :  { %5088 = vmatprep.subr.bf16.mxu0 %v12578_v23  ;;  %v12626_v23 = vcombine.high %v1947_v30, %v1951_v31  ;;  %v1991_v10 = vld [vmem:[%s20166_s1 + $0x438] sm:$0xff] }
 0x2e6   :  { %4925 = vmatpush1.bf16.msra.mxu1 %v12575_v40  ;;  %v12623_v40 = vcombine.low %v1946_v18, %v1950_v24  ;;  %v1994_v18 = vld [vmem:[%s20166_s1 + $0x450] sm:$0xff] }
 0x2e7   :  { %5089 = vmatpush1.bf16.msra.mxu0 %v12577_v41  ;;  %4926 = vmatprep.subr.bf16.mxu1 %v12584_v49  ;;  %v12625_v41 = vcombine.low %v1947_v30, %v1951_v31  ;;  %v12632_v49 = vcombine.high %v1954_v26, %v1958_v29  ;;  %v1998_v24 = vld [vmem:[%s20166_s1 + $0x470] sm:$0xff]  ;;  %v12663_v30 = vcombine.low %v1986_v6, %v1990_v7  ;;  %v1995_v31 = vld [vmem:[%s20166_s1 + $0x458] sm:$0xff] }
 0x2e8   :  { %5090 = vmatprep.subr.bf16.mxu0 %v12586_v42  ;;  %v12634_v42 = vcombine.high %v1955_v38, %v1959_v39 }
 0x2ea   :  { %4927 = vmatpush1.bf16.msra.mxu1 %v12583_v46  ;;  %v12631_v46 = vcombine.low %v1954_v26, %v1958_v29  ;;  %v2006_v26 = vld [vmem:[%s20166_s1 + $0x4b0] sm:$0xff] }
 0x2eb   :  { %5091 = vmatpush1.bf16.msra.mxu0 %v12585_v50  ;;  %4928 = vmatprep.subr.bf16.mxu1 %v12592_v51  ;;  %v12633_v50 = vcombine.low %v1955_v38, %v1959_v39  ;;  %v12640_v51 = vcombine.high %v1962_v43, %v1966_v44  ;;  %v2003_v38 = vld [vmem:[%s20166_s1 + $0x498] sm:$0xff] }
 0x2ec   :  { %5092 = vmatprep.subr.bf16.mxu0 %v12594_v52  ;;  %v12642_v52 = vcombine.high %v1963_v45, %v1967_v22  ;;  %v2007_v39 = vld [vmem:[%s20166_s1 + $0x4b8] sm:$0xff] }
 0x2ee   :  { %4929 = vmatpush1.bf16.msra.mxu1 %v12591_v58  ;;  %v12639_v58 = vcombine.low %v1962_v43, %v1966_v44  ;;  %v2010_v43 = vld [vmem:[%s20166_s1 + $0x4d0] sm:$0xff] }
 0x2ef   :  { %5093 = vmatpush1.bf16.msra.mxu0 %v12593_v59  ;;  %4930 = vmatprep.subr.bf16.mxu1 %v12600_v15  ;;  %v12641_v59 = vcombine.low %v1963_v45, %v1967_v22  ;;  %v12648_v15 = vcombine.high %v1970_v54, %v1974_v55  ;;  %v2014_v44 = vld [vmem:[%s20166_s1 + $0x4f0] sm:$0xff]  ;;  %v2015_v45 = vld [vmem:[%s20166_s1 + $0x4f8] sm:$0xff]  ;;  %v12681_v22 = vcombine.low %v2003_v38, %v2007_v39 }
 0x2f0   :  { %5094 = vmatprep.subr.bf16.mxu0 %v12602_v60  ;;  %v12650_v60 = vcombine.high %v1971_v56, %v1975_v57 }
 0x2f2   :  { %4931 = vmatpush1.bf16.msra.mxu1 %v12599_v63  ;;  %v12647_v63 = vcombine.low %v1970_v54, %v1974_v55  ;;  %v2019_v54 = vld [vmem:[%s20166_s1 + $0x518] sm:$0xff] }
 0x2f3   :  { %5095 = vmatpush1.bf16.msra.mxu0 %v12601_v3  ;;  %4932 = vmatprep.subr.bf16.mxu1 %v12608_v4  ;;  %v12649_v3 = vcombine.low %v1971_v56, %v1975_v57  ;;  %v12656_v4 = vcombine.high %v1978_v8, %v1982_v61  ;;  %v2023_v55 = vld [vmem:[%s20166_s1 + $0x538] sm:$0xff]  ;;  %v12687_v56 = vcombine.low %v2010_v43, %v2014_v44 }
 0x2f4   :  { %5096 = vmatprep.subr.bf16.mxu0 %v12610_v37  ;;  %v12658_v37 = vcombine.high %v1979_v62, %v1983_v11 }
 0x2f6   :  { %4933 = vmatpush1.bf16.msra.mxu1 %v12607_v13  ;;  %v12655_v13 = vcombine.low %v1978_v8, %v1982_v61  ;;  %v2027_v8 = vld [vmem:[%s20166_s1 + $0x558] sm:$0xff] }
 0x2f7   :  { %5097 = vmatpush1.bf16.msra.mxu0 %v12609_v14  ;;  %4934 = vmatprep.subr.bf16.mxu1 %v12616_v25  ;;  %v12657_v14 = vcombine.low %v1979_v62, %v1983_v11  ;;  %v12664_v25 = vcombine.high %v1986_v6, %v1990_v7  ;;  %v2031_v61 = vld [vmem:[%s20166_s1 + $0x578] sm:$0xff]  ;;  %v12697_v11 = vcombine.low %v2019_v54, %v2023_v55 }
 0x2f8   :  { %5098 = vmatprep.subr.bf16.mxu0 %v12618_v16  ;;  %v12666_v16 = vcombine.high %v1987_v9, %v1991_v10  ;;  %v2035_v6 = vld [vmem:[%s20166_s1 + $0x598] sm:$0xff] }
 0x2f9   :  { %v2039_v7 = vld [vmem:[%s20166_s1 + $0x5b8] sm:$0xff] }
 0x2fa   :  { %4935 = vmatpush1.bf16.msra.mxu1 %v12615_v32  ;;  %v1999_v32 = vld [vmem:[%s20166_s1 + $0x478] sm:$0xff] }
 0x2fb   :  { %5099 = vmatpush1.bf16.msra.mxu0 %v12617_v35  ;;  %4936 = vmatprep.subr.bf16.mxu1 %v12624_v20  ;;  %v12665_v35 = vcombine.low %v1987_v9, %v1991_v10  ;;  %v12672_v20 = vcombine.high %v1994_v18, %v1998_v24  ;;  %v12674_v29 = vcombine.high %v1995_v31, %v1999_v32 }
 0x2fc   :  { %5100 = vmatprep.subr.bf16.mxu0 %v12626_v23  ;;  %v2002_v23 = vld [vmem:[%s20166_s1 + $0x490] sm:$0xff]  ;;  %v12705_v10 = vcombine.low %v2027_v8, %v2031_v61 }
 0x2fe   :  { %4937 = vmatpush1.bf16.msra.mxu1 %v12623_v40  ;;  %v12671_v40 = vcombine.low %v1994_v18, %v1998_v24  ;;  %v2043_v18 = vld [vmem:[%s20166_s1 + $0x5d8] sm:$0xff] }
 0x2ff   :  { %5101 = vmatpush1.bf16.msra.mxu0 %v12625_v41  ;;  %4938 = vmatprep.subr.bf16.mxu1 %v12632_v49  ;;  %v12673_v41 = vcombine.low %v1995_v31, %v1999_v32  ;;  %v12680_v49 = vcombine.high %v2002_v23, %v2006_v26  ;;  %v2047_v24 = vld [vmem:[%s20166_s1 + $0x5f8] sm:$0xff]  ;;  %v12713_v31 = vcombine.low %v2035_v6, %v2039_v7 }
 0x300   :  { %5102 = vmatprep.subr.bf16.mxu0 %v12634_v42  ;;  %v12682_v42 = vcombine.high %v2003_v38, %v2007_v39  ;;  %v12721_v39 = vcombine.low %v2043_v18, %v2047_v24 }
 0x302   :  { %4939 = vmatpush1.bf16.msra.mxu1 %v12631_v46  ;;  %v12688_v46 = vcombine.high %v2010_v43, %v2014_v44  ;;  %v2059_v43 = vld [vmem:[%s20166_s1 + $0x658] sm:$0xff] }
 0x303   :  { %5103 = vmatpush1.bf16.msra.mxu0 %v12633_v50  ;;  %4940 = vmatprep.subr.bf16.mxu1 %v12640_v51  ;;  %v2018_v51 = vld [vmem:[%s20166_s1 + $0x510] sm:$0xff]  ;;  %v2063_v44 = vld [vmem:[%s20166_s1 + $0x678] sm:$0xff] }
 0x304   :  { %5104 = vmatprep.subr.bf16.mxu0 %v12642_v52  ;;  %v2022_v52 = vld [vmem:[%s20166_s1 + $0x530] sm:$0xff] }
 0x305   :  { %v12695_v62 = vcombine.low %v2018_v51, %v2022_v52 }
 0x306   :  { %4941 = vmatpush1.bf16.msra.mxu1 %v12639_v58  ;;  %v12696_v58 = vcombine.high %v2018_v51, %v2022_v52  ;;  %v2067_v51 = vld [vmem:[%s20166_s1 + $0x698] sm:$0xff] }
 0x307   :  { %5105 = vmatpush1.bf16.msra.mxu0 %v12641_v59  ;;  %4942 = vmatprep.subr.bf16.mxu1 %v12648_v15  ;;  %v12698_v59 = vcombine.high %v2019_v54, %v2023_v55  ;;  %v2026_v15 = vld [vmem:[%s20166_s1 + $0x550] sm:$0xff]  ;;  %v2071_v52 = vld [vmem:[%s20166_s1 + $0x6b8] sm:$0xff]  ;;  %v12737_v55 = vcombine.low %v2059_v43, %v2063_v44 }
 0x308   :  { %5106 = vmatprep.subr.bf16.mxu0 %v12650_v60  ;;  %v2030_v60 = vld [vmem:[%s20166_s1 + $0x570] sm:$0xff] }
 0x309   :  { %v12703_v9 = vcombine.low %v2026_v15, %v2030_v60 }
 0x30a   :  { %4943 = vmatpush1.bf16.msra.mxu1 %v12647_v63  ;;  %v12704_v63 = vcombine.high %v2026_v15, %v2030_v60  ;;  %v2075_v15 = vld [vmem:[%s20166_s1 + $0x6d8] sm:$0xff] }
 0x30b   :  { %5107 = vmatpush1.bf16.msra.mxu0 %v12649_v3  ;;  %4944 = vmatprep.subr.bf16.mxu1 %v12656_v4  ;;  %v12706_v3 = vcombine.high %v2027_v8, %v2031_v61  ;;  %v2034_v4 = vld [vmem:[%s20166_s1 + $0x590] sm:$0xff]  ;;  %v2079_v60 = vld [vmem:[%s20166_s1 + $0x6f8] sm:$0xff]  ;;  %v12745_v61 = vcombine.low %v2067_v51, %v2071_v52 }
 0x30c   :  { %5108 = vmatprep.subr.bf16.mxu0 %v12658_v37  ;;  %v2038_v37 = vld [vmem:[%s20166_s1 + $0x5b0] sm:$0xff] }
 0x30e   :  { %4945 = vmatpush1.bf16.msra.mxu1 %v12655_v13  ;;  %v12712_v13 = vcombine.high %v2034_v4, %v2038_v37 }
 0x30f   :  { %5109 = vmatpush1.bf16.msra.mxu0 %v12657_v14  ;;  %4955 = vmatprep.subr.bf16.mxu1 %v12664_v25  ;;  %v12714_v14 = vcombine.high %v2035_v6, %v2039_v7  ;;  %v2042_v25 = vld [vmem:[%s20166_s1 + $0x5d0] sm:$0xff]  ;;  %v12753_v7 = vcombine.low %v2075_v15, %v2079_v60 }
 0x310   :  { %5119 = vmatprep.subr.bf16.mxu0 %v12666_v16  ;;  %v2046_v16 = vld [vmem:[%s20166_s1 + $0x5f0] sm:$0xff] }
 0x311   :  { %4947 = vmatmul.mubr.bf16.vlgmr.msra.gmra.mrb[20].mxu1 %v16154_v12  ;;  %v12720_v32 = vcombine.high %v2042_v25, %v2046_v16  ;;  %v12719_v38 = vcombine.low %v2042_v25, %v2046_v16  ;;  %v2091_v25 = vld [vmem:[%s20166_s1 + $0x758] sm:$0xff] }
 0x312   :  { %5111 = vmatmul.mubr.bf16.vlgmr.msra.gmra.mrb[16].mxu0 %v16154_v12  ;;  %4956 = vmatpush1.bf16.msra.mxu1 %v12663_v30  ;;  %v2011_v12 = vld [vmem:[%s20166_s1 + $0x4d8] sm:$0xff]  ;;  %v12711_v30 = vcombine.low %v2034_v4, %v2038_v37 }
 0x313   :  { %4987 = vmatprep.mubr.bf16.mxu1 %v16170_v19  ;;  %5120 = vmatpush1.bf16.msra.mxu0 %v12665_v35  ;;  %v12690_v50 = vcombine.high %v2011_v12, %v2015_v45  ;;  %v12689_v57 = vcombine.low %v2011_v12, %v2015_v45  ;;  %v12722_v35 = vcombine.high %v2043_v18, %v2047_v24  ;;  %v2083_v4 = vld [vmem:[%s20166_s1 + $0x718] sm:$0xff] }
 0x314   :  { %5151 = vmatprep.mubr.bf16.mxu0 %v16170_v19  ;;  %4957 = vmatprep.subr.bf16.mxu1 %v12672_v20  ;;  %v12679_v19 = vcombine.low %v2002_v23, %v2006_v26  ;;  %v2050_v20 = vld [vmem:[%s20166_s1 + $0x610] sm:$0xff]  ;;  %v2051_v26 = vld [vmem:[%s20166_s1 + $0x618] sm:$0xff] }
 0x315   :  { %5121 = vmatprep.subr.bf16.mxu0 %v12674_v29  ;;  %v2054_v23 = vld [vmem:[%s20166_s1 + $0x630] sm:$0xff]  ;;  %v2055_v29 = vld [vmem:[%s20166_s1 + $0x638] sm:$0xff] }
 0x316   :  { %4958 = vmatpush1.bf16.msra.mxu1 %v12671_v40  ;;  %v12728_v40 = vcombine.high %v2050_v20, %v2054_v23  ;;  %v12727_v12 = vcombine.low %v2050_v20, %v2054_v23  ;;  %v12729_v45 = vcombine.low %v2051_v26, %v2055_v29  ;;  %v2087_v37 = vld [vmem:[%s20166_s1 + $0x738] sm:$0xff] }
 0x317   :  { %5122 = vmatpush1.bf16.msra.mxu0 %v12673_v41  ;;  %4959 = vmatprep.subr.bf16.mxu1 %v12680_v49  ;;  %v12730_v41 = vcombine.high %v2051_v26, %v2055_v29  ;;  %v2058_v49 = vld [vmem:[%s20166_s1 + $0x650] sm:$0xff]  ;;  %v2095_v16 = vld [vmem:[%s20166_s1 + $0x778] sm:$0xff]  ;;  %v12761_v24 = vcombine.low %v2083_v4, %v2087_v37 }
 0x318   :  { %5123 = vmatprep.subr.bf16.mxu0 %v12682_v42  ;;  %v2062_v42 = vld [vmem:[%s20166_s1 + $0x670] sm:$0xff]  ;;  %v2099_v20 = vld [vmem:[%s20166_s1 + $0x798] sm:$0xff]  ;;  %v12769_v29 = vcombine.low %v2091_v25, %v2095_v16 }
 0x319   :  { %v12735_v54 = vcombine.low %v2058_v49, %v2062_v42  ;;  %v2103_v23 = vld [vmem:[%s20166_s1 + $0x7b8] sm:$0xff] }
 0x31a   :  { %4960 = vmatpush1.bf16.msra.mxu1 %v12679_v19  ;;  %v12736_v19 = vcombine.high %v2058_v49, %v2062_v42  ;;  %v2107_v49 = vld [vmem:[%s20166_s1 + $0x7d8] sm:$0xff] }
 0x31b   :  { %5124 = vmatpush1.bf16.msra.mxu0 %v12681_v22  ;;  %4961 = vmatprep.subr.bf16.mxu1 %v12688_v46  ;;  %v12738_v22 = vcombine.high %v2059_v43, %v2063_v44  ;;  %v2066_v46 = vld [vmem:[%s20166_s1 + $0x690] sm:$0xff]  ;;  %v2111_v42 = vld [vmem:[%s20166_s1 + $0x7f8] sm:$0xff]  ;;  %v12777_v44 = vcombine.low %v2099_v20, %v2103_v23 }
 0x31c   :  { %5125 = vmatprep.subr.bf16.mxu0 %v12690_v50  ;;  %v2070_v50 = vld [vmem:[%s20166_s1 + $0x6b0] sm:$0xff] }
 0x31d   :  { %v12743_v8 = vcombine.low %v2066_v46, %v2070_v50 }
 0x31e   :  { %4962 = vmatpush1.bf16.msra.mxu1 %v12687_v56  ;;  %v12744_v56 = vcombine.high %v2066_v46, %v2070_v50  ;;  %v2115_v46 = vld [vmem:[%s20166_s1 + $0x818] sm:$0xff] }
 0x31f   :  { %5126 = vmatpush1.bf16.msra.mxu0 %v12689_v57  ;;  %4963 = vmatprep.subr.bf16.mxu1 %v12696_v58  ;;  %v12746_v57 = vcombine.high %v2067_v51, %v2071_v52  ;;  %v2074_v58 = vld [vmem:[%s20166_s1 + $0x6d0] sm:$0xff]  ;;  %v2119_v50 = vld [vmem:[%s20166_s1 + $0x838] sm:$0xff]  ;;  %v12785_v52 = vcombine.low %v2107_v49, %v2111_v42 }
 0x320   :  { %5127 = vmatprep.subr.bf16.mxu0 %v12698_v59  ;;  %v2078_v59 = vld [vmem:[%s20166_s1 + $0x6f0] sm:$0xff] }
 0x321   :  { %v12751_v6 = vcombine.low %v2074_v58, %v2078_v59 }
 0x322   :  { %4964 = vmatpush1.bf16.msra.mxu1 %v12695_v62  ;;  %v12752_v62 = vcombine.high %v2074_v58, %v2078_v59  ;;  %v2123_v59 = vld [vmem:[%s20166_s1 + $0x858] sm:$0xff] }
 0x323   :  { %5128 = vmatpush1.bf16.msra.mxu0 %v12697_v11  ;;  %4965 = vmatprep.subr.bf16.mxu1 %v12704_v63  ;;  %v12754_v11 = vcombine.high %v2075_v15, %v2079_v60  ;;  %v2082_v63 = vld [vmem:[%s20166_s1 + $0x710] sm:$0xff]  ;;  %v2127_v15 = vld [vmem:[%s20166_s1 + $0x878] sm:$0xff]  ;;  %v12793_v60 = vcombine.low %v2115_v46, %v2119_v50 }
 0x324   :  { %5129 = vmatprep.subr.bf16.mxu0 %v12706_v3  ;;  %v2086_v3 = vld [vmem:[%s20166_s1 + $0x730] sm:$0xff] }
 0x325   :  { %v12759_v18 = vcombine.low %v2082_v63, %v2086_v3 }
 0x326   :  { %4966 = vmatpush1.bf16.msra.mxu1 %v12703_v9  ;;  %v12760_v9 = vcombine.high %v2082_v63, %v2086_v3  ;;  %v2131_v63 = vld [vmem:[%s20166_s1 + $0x898] sm:$0xff] }
 0x327   :  { %5130 = vmatpush1.bf16.msra.mxu0 %v12705_v10  ;;  %4967 = vmatprep.subr.bf16.mxu1 %v12712_v13  ;;  %v12762_v10 = vcombine.high %v2083_v4, %v2087_v37  ;;  %v2090_v13 = vld [vmem:[%s20166_s1 + $0x750] sm:$0xff]  ;;  %v2135_v3 = vld [vmem:[%s20166_s1 + $0x8b8] sm:$0xff]  ;;  %v12801_v37 = vcombine.low %v2123_v59, %v2127_v15 }
 0x328   :  { %5131 = vmatprep.subr.bf16.mxu0 %v12714_v14  ;;  %v2094_v14 = vld [vmem:[%s20166_s1 + $0x770] sm:$0xff] }
 0x329   :  { %v12767_v26 = vcombine.low %v2090_v13, %v2094_v14 }
 0x32a   :  { %4968 = vmatpush1.bf16.msra.mxu1 %v12711_v30  ;;  %v12768_v30 = vcombine.high %v2090_v13, %v2094_v14  ;;  %v2143_v13 = vld [vmem:[%s20166_s1 + $0x8f8] sm:$0xff]  ;;  %v12809_v14 = vcombine.low %v2131_v63, %v2135_v3 }
 0x32b   :  { %5132 = vmatpush1.bf16.msra.mxu0 %v12713_v31  ;;  %4969 = vmatprep.subr.bf16.mxu1 %v12720_v32  ;;  %v12770_v31 = vcombine.high %v2091_v25, %v2095_v16  ;;  %v2098_v32 = vld [vmem:[%s20166_s1 + $0x790] sm:$0xff] }
 0x32c   :  { %5133 = vmatprep.subr.bf16.mxu0 %v12722_v35  ;;  %v2102_v35 = vld [vmem:[%s20166_s1 + $0x7b0] sm:$0xff] }
 0x32d   :  { %v12775_v43 = vcombine.low %v2098_v32, %v2102_v35 }
 0x32e   :  { %4970 = vmatpush1.bf16.msra.mxu1 %v12719_v38  ;;  %v12776_v38 = vcombine.high %v2098_v32, %v2102_v35 }
 0x32f   :  { %5134 = vmatpush1.bf16.msra.mxu0 %v12721_v39  ;;  %4971 = vmatprep.subr.bf16.mxu1 %v12728_v40  ;;  %v12778_v39 = vcombine.high %v2099_v20, %v2103_v23  ;;  %v2106_v40 = vld [vmem:[%s20166_s1 + $0x7d0] sm:$0xff] }
 0x330   :  { %5135 = vmatprep.subr.bf16.mxu0 %v12730_v41  ;;  %v2110_v41 = vld [vmem:[%s20166_s1 + $0x7f0] sm:$0xff] }
 0x331   :  { %v12783_v51 = vcombine.low %v2106_v40, %v2110_v41 }
 0x332   :  { %4972 = vmatpush1.bf16.msra.mxu1 %v12727_v12  ;;  %v12784_v12 = vcombine.high %v2106_v40, %v2110_v41 }
 0x333   :  { %5136 = vmatpush1.bf16.msra.mxu0 %v12729_v45  ;;  %4973 = vmatprep.subr.bf16.mxu1 %v12736_v19  ;;  %v12786_v45 = vcombine.high %v2107_v49, %v2111_v42  ;;  %v2114_v19 = vld [vmem:[%s20166_s1 + $0x810] sm:$0xff] }
 0x334   :  { %5137 = vmatprep.subr.bf16.mxu0 %v12738_v22  ;;  %v2118_v22 = vld [vmem:[%s20166_s1 + $0x830] sm:$0xff] }
 0x335   :  { %v12791_v58 = vcombine.low %v2114_v19, %v2118_v22 }
 0x336   :  { %4974 = vmatpush1.bf16.msra.mxu1 %v12735_v54  ;;  %v12792_v54 = vcombine.high %v2114_v19, %v2118_v22 }
 0x337   :  { %5138 = vmatpush1.bf16.msra.mxu0 %v12737_v55  ;;  %4975 = vmatprep.subr.bf16.mxu1 %v12744_v56  ;;  %v12794_v55 = vcombine.high %v2115_v46, %v2119_v50  ;;  %v2122_v56 = vld [vmem:[%s20166_s1 + $0x850] sm:$0xff] }
 0x338   :  { %5139 = vmatprep.subr.bf16.mxu0 %v12746_v57  ;;  %v2126_v57 = vld [vmem:[%s20166_s1 + $0x870] sm:$0xff] }
 0x339   :  { %v12799_v4 = vcombine.low %v2122_v56, %v2126_v57 }
 0x33a   :  { %4976 = vmatpush1.bf16.msra.mxu1 %v12743_v8  ;;  %v12800_v8 = vcombine.high %v2122_v56, %v2126_v57 }
 0x33b   :  { %5140 = vmatpush1.bf16.msra.mxu0 %v12745_v61  ;;  %4977 = vmatprep.subr.bf16.mxu1 %v12752_v62  ;;  %v2130_v61 = vld [vmem:[%s20166_s1 + $0x890] sm:$0xff] }
 0x33c   :  { %5141 = vmatprep.subr.bf16.mxu0 %v12754_v11  ;;  %v2134_v62 = vld [vmem:[%s20166_s1 + $0x8b0] sm:$0xff]  ;;  %v12802_v11 = vcombine.high %v2123_v59, %v2127_v15 }
 0x33d   :  { %v2178_v15 = vld [vmem:[%s20166_s1 + $0xa10] sm:$0xff] }
 0x33e   :  { %4978 = vmatpush1.bf16.msra.mxu1 %v12751_v6  ;;  %v12808_v6 = vcombine.high %v2130_v61, %v2134_v62 }
 0x33f   :  { %5142 = vmatpush1.bf16.msra.mxu0 %v12753_v7  ;;  %4979 = vmatprep.subr.bf16.mxu1 %v12760_v9  ;;  %v12810_v7 = vcombine.high %v2131_v63, %v2135_v3  ;;  %v2138_v9 = vld [vmem:[%s20166_s1 + $0x8d0] sm:$0xff] }
 0x340   :  { %5143 = vmatprep.subr.bf16.mxu0 %v12762_v10  ;;  %v2142_v10 = vld [vmem:[%s20166_s1 + $0x8f0] sm:$0xff] }
 0x341   :  { %v12816_v25 = vcombine.high %v2138_v9, %v2142_v10  ;;  %v12815_v32 = vcombine.low %v2138_v9, %v2142_v10 }
 0x342   :  { %4980 = vmatpush1.bf16.msra.mxu1 %v12759_v18  ;;  %v2146_v18 = vld [vmem:[%s20166_s1 + $0x910] sm:$0xff] }
 0x343   :  { %5144 = vmatpush1.bf16.msra.mxu0 %v12761_v24  ;;  %4981 = vmatprep.subr.bf16.mxu1 %v12768_v30  ;;  %v2150_v24 = vld [vmem:[%s20166_s1 + $0x930] sm:$0xff]  ;;  %v2147_v30 = vld [vmem:[%s20166_s1 + $0x918] sm:$0xff] }
 0x344   :  { %5145 = vmatprep.subr.bf16.mxu0 %v12770_v31  ;;  %v2151_v31 = vld [vmem:[%s20166_s1 + $0x938] sm:$0xff]  ;;  %v12824_v20 = vcombine.high %v2146_v18, %v2150_v24  ;;  %v12823_v40 = vcombine.low %v2146_v18, %v2150_v24 }
 0x345   :  { %v12826_v23 = vcombine.high %v2147_v30, %v2151_v31  ;;  %v12825_v41 = vcombine.low %v2147_v30, %v2151_v31 }
 0x346   :  { %4982 = vmatpush1.bf16.msra.mxu1 %v12767_v26  ;;  %v2154_v26 = vld [vmem:[%s20166_s1 + $0x950] sm:$0xff] }
 0x347   :  { %5146 = vmatpush1.bf16.msra.mxu0 %v12769_v29  ;;  %4983 = vmatprep.subr.bf16.mxu1 %v12776_v38  ;;  %v2158_v29 = vld [vmem:[%s20166_s1 + $0x970] sm:$0xff]  ;;  %v2155_v38 = vld [vmem:[%s20166_s1 + $0x958] sm:$0xff] }
 0x348   :  { %5147 = vmatprep.subr.bf16.mxu0 %v12778_v39  ;;  %v2159_v39 = vld [vmem:[%s20166_s1 + $0x978] sm:$0xff]  ;;  %v12832_v49 = vcombine.high %v2154_v26, %v2158_v29  ;;  %v12831_v19 = vcombine.low %v2154_v26, %v2158_v29 }
 0x349   :  { %v12834_v42 = vcombine.high %v2155_v38, %v2159_v39  ;;  %v12833_v22 = vcombine.low %v2155_v38, %v2159_v39 }
 0x34a   :  { %4984 = vmatpush1.bf16.msra.mxu1 %v12775_v43  ;;  %v2162_v43 = vld [vmem:[%s20166_s1 + $0x990] sm:$0xff] }
 0x34b   :  { %5148 = vmatpush1.bf16.msra.mxu0 %v12777_v44  ;;  %4985 = vmatprep.subr.bf16.mxu1 %v12784_v12  ;;  %v2166_v44 = vld [vmem:[%s20166_s1 + $0x9b0] sm:$0xff]  ;;  %v2163_v12 = vld [vmem:[%s20166_s1 + $0x998] sm:$0xff] }
 0x34c   :  { %5149 = vmatprep.subr.bf16.mxu0 %v12786_v45  ;;  %v2167_v45 = vld [vmem:[%s20166_s1 + $0x9b8] sm:$0xff]  ;;  %v12840_v46 = vcombine.high %v2162_v43, %v2166_v44  ;;  %v12839_v56 = vcombine.low %v2162_v43, %v2166_v44 }
 0x34d   :  { %v12842_v50 = vcombine.high %v2163_v12, %v2167_v45  ;;  %v12841_v57 = vcombine.low %v2163_v12, %v2167_v45 }
 0x34e   :  { %4986 = vmatpush1.bf16.msra.mxu1 %v12783_v51  ;;  %v2170_v51 = vld [vmem:[%s20166_s1 + $0x9d0] sm:$0xff] }
 0x34f   :  { %5150 = vmatpush1.bf16.msra.mxu0 %v12785_v52  ;;  %4996 = vmatprep.subr.bf16.mxu1 %v12792_v54  ;;  %v2174_v52 = vld [vmem:[%s20166_s1 + $0x9f0] sm:$0xff]  ;;  %v2171_v54 = vld [vmem:[%s20166_s1 + $0x9d8] sm:$0xff] }
 0x350   :  { %5160 = vmatprep.subr.bf16.mxu0 %v12794_v55  ;;  %v2175_v55 = vld [vmem:[%s20166_s1 + $0x9f8] sm:$0xff] }
 0x351   :  { %4988 = vmatmul.mubr.bf16.vlgmr.msra.gmra.mrb[20].mxu1 %v16383_v5  ;;  %v12850_v59 = vcombine.high %v2171_v54, %v2175_v55 }
 0x352   :  { %5152 = vmatmul.mubr.bf16.vlgmr.msra.gmra.mrb[16].mxu0 %v16383_v5  ;;  %4997 = vmatpush1.bf16.msra.mxu1 %v12791_v58  ;;  %v2139_v5 = vld [vmem:[%s20166_s1 + $0x8d8] sm:$0xff]  ;;  %v12848_v58 = vcombine.high %v2170_v51, %v2174_v52 }
 0x353   :  { %5028 = vmatprep.mubr.bf16.mxu1 %v16501_v47  ;;  %5161 = vmatpush1.bf16.msra.mxu0 %v12793_v60  ;;  %v12818_v16 = vcombine.high %v2139_v5, %v2143_v13  ;;  %v12817_v35 = vcombine.low %v2139_v5, %v2143_v13  ;;  %v2182_v60 = vld [vmem:[%s20166_s1 + $0xa30] sm:$0xff] }
 0x354   :  { %5192 = vmatprep.mubr.bf16.mxu0 %v16501_v47  ;;  %4998 = vmatprep.subr.bf16.mxu1 %v12800_v8  ;;  %v12807_v47 = vcombine.low %v2130_v61, %v2134_v62  ;;  %v2179_v8 = vld [vmem:[%s20166_s1 + $0xa18] sm:$0xff]  ;;  %v12847_v62 = vcombine.low %v2170_v51, %v2174_v52  ;;  %v12856_v63 = vcombine.high %v2178_v15, %v2182_v60 }
 0x355   :  { %5162 = vmatprep.subr.bf16.mxu0 %v12802_v11  ;;  %v2183_v61 = vld [vmem:[%s20166_s1 + $0xa38] sm:$0xff]  ;;  %v12849_v11 = vcombine.low %v2171_v54, %v2175_v55  ;;  %v12855_v9 = vcombine.low %v2178_v15, %v2182_v60 }
 0x356   :  { %4999 = vmatpush1.bf16.msra.mxu1 %v12799_v4  ;;  %v12858_v3 = vcombine.high %v2179_v8, %v2183_v61  ;;  %v2186_v4 = vld [vmem:[%s20166_s1 + $0xa50] sm:$0xff]  ;;  %v12857_v10 = vcombine.low %v2179_v8, %v2183_v61 }
 0x357   :  { %5163 = vmatpush1.bf16.msra.mxu0 %v12801_v37  ;;  %5000 = vmatprep.subr.bf16.mxu1 %v12808_v6  ;;  %v2190_v37 = vld [vmem:[%s20166_s1 + $0xa70] sm:$0xff]  ;;  %v2187_v6 = vld [vmem:[%s20166_s1 + $0xa58] sm:$0xff] }
 0x358   :  { %5164 = vmatprep.subr.bf16.mxu0 %v12810_v7  ;;  %v2191_v7 = vld [vmem:[%s20166_s1 + $0xa78] sm:$0xff]  ;;  %v12864_v5 = vcombine.high %v2186_v4, %v2190_v37  ;;  %v12863_v18 = vcombine.low %v2186_v4, %v2190_v37 }
 0x359   :  { %v12866_v13 = vcombine.high %v2187_v6, %v2191_v7  ;;  %v12865_v24 = vcombine.low %v2187_v6, %v2191_v7 }
 0x35a   :  { %5001 = vmatpush1.bf16.msra.mxu1 %v12807_v47  ;;  %v2194_v47 = vld [vmem:[%s20166_s1 + $0xa90] sm:$0xff] }
 0x35b   :  { %5165 = vmatpush1.bf16.msra.mxu0 %v12809_v14  ;;  %5002 = vmatprep.subr.bf16.mxu1 %v12816_v25  ;;  %v2198_v14 = vld [vmem:[%s20166_s1 + $0xab0] sm:$0xff]  ;;  %v2195_v25 = vld [vmem:[%s20166_s1 + $0xa98] sm:$0xff] }
 0x35c   :  { %5166 = vmatprep.subr.bf16.mxu0 %v12818_v16  ;;  %v2199_v16 = vld [vmem:[%s20166_s1 + $0xab8] sm:$0xff]  ;;  %v12872_v30 = vcombine.high %v2194_v47, %v2198_v14  ;;  %v12871_v26 = vcombine.low %v2194_v47, %v2198_v14 }
 0x35d   :  { %v12874_v31 = vcombine.high %v2195_v25, %v2199_v16  ;;  %v12873_v29 = vcombine.low %v2195_v25, %v2199_v16 }
 0x35e   :  { %5003 = vmatpush1.bf16.msra.mxu1 %v12815_v32  ;;  %v2202_v32 = vld [vmem:[%s20166_s1 + $0xad0] sm:$0xff] }
 0x35f   :  { %5167 = vmatpush1.bf16.msra.mxu0 %v12817_v35  ;;  %5004 = vmatprep.subr.bf16.mxu1 %v12824_v20  ;;  %v2206_v35 = vld [vmem:[%s20166_s1 + $0xaf0] sm:$0xff]  ;;  %v2203_v20 = vld [vmem:[%s20166_s1 + $0xad8] sm:$0xff] }
 0x360   :  { %5168 = vmatprep.subr.bf16.mxu0 %v12826_v23  ;;  %v2207_v23 = vld [vmem:[%s20166_s1 + $0xaf8] sm:$0xff]  ;;  %v12880_v38 = vcombine.high %v2202_v32, %v2206_v35  ;;  %v12879_v43 = vcombine.low %v2202_v32, %v2206_v35 }
 0x361   :  { %v12882_v39 = vcombine.high %v2203_v20, %v2207_v23  ;;  %v12881_v44 = vcombine.low %v2203_v20, %v2207_v23 }
 0x362   :  { %5005 = vmatpush1.bf16.msra.mxu1 %v12823_v40  ;;  %v2210_v40 = vld [vmem:[%s20166_s1 + $0xb10] sm:$0xff] }
 0x363   :  { %5169 = vmatpush1.bf16.msra.mxu0 %v12825_v41  ;;  %5006 = vmatprep.subr.bf16.mxu1 %v12832_v49  ;;  %v2214_v41 = vld [vmem:[%s20166_s1 + $0xb30] sm:$0xff]  ;;  %v2211_v49 = vld [vmem:[%s20166_s1 + $0xb18] sm:$0xff] }
 0x364   :  { %5170 = vmatprep.subr.bf16.mxu0 %v12834_v42  ;;  %v2215_v42 = vld [vmem:[%s20166_s1 + $0xb38] sm:$0xff]  ;;  %v12888_v12 = vcombine.high %v2210_v40, %v2214_v41  ;;  %v12887_v51 = vcombine.low %v2210_v40, %v2214_v41 }
 0x365   :  { %v12890_v45 = vcombine.high %v2211_v49, %v2215_v42  ;;  %v12889_v52 = vcombine.low %v2211_v49, %v2215_v42 }
 0x366   :  { %5007 = vmatpush1.bf16.msra.mxu1 %v12831_v19  ;;  %v2218_v19 = vld [vmem:[%s20166_s1 + $0xb50] sm:$0xff] }
 0x367   :  { %5171 = vmatpush1.bf16.msra.mxu0 %v12833_v22  ;;  %5008 = vmatprep.subr.bf16.mxu1 %v12840_v46  ;;  %v2222_v22 = vld [vmem:[%s20166_s1 + $0xb70] sm:$0xff]  ;;  %v2219_v46 = vld [vmem:[%s20166_s1 + $0xb58] sm:$0xff] }
 0x368   :  { %5172 = vmatprep.subr.bf16.mxu0 %v12842_v50  ;;  %v2223_v50 = vld [vmem:[%s20166_s1 + $0xb78] sm:$0xff]  ;;  %v12896_v54 = vcombine.high %v2218_v19, %v2222_v22  ;;  %v12895_v15 = vcombine.low %v2218_v19, %v2222_v22 }
 0x369   :  { %v12898_v55 = vcombine.high %v2219_v46, %v2223_v50  ;;  %v12897_v60 = vcombine.low %v2219_v46, %v2223_v50  ;;  %v2274_v50 = vld [vmem:[%s20166_s1 + $0xd10] sm:$0xff] }
 0x36a   :  { %5009 = vmatpush1.bf16.msra.mxu1 %v12839_v56  ;;  %v2226_v56 = vld [vmem:[%s20166_s1 + $0xb90] sm:$0xff] }
 0x36b   :  { %5173 = vmatpush1.bf16.msra.mxu0 %v12841_v57  ;;  %5010 = vmatprep.subr.bf16.mxu1 %v12848_v58  ;;  %v2230_v57 = vld [vmem:[%s20166_s1 + $0xbb0] sm:$0xff]  ;;  %v2227_v58 = vld [vmem:[%s20166_s1 + $0xb98] sm:$0xff] }
 0x36c   :  { %5174 = vmatprep.subr.bf16.mxu0 %v12850_v59  ;;  %v2231_v59 = vld [vmem:[%s20166_s1 + $0xbb8] sm:$0xff]  ;;  %v12904_v8 = vcombine.high %v2226_v56, %v2230_v57  ;;  %v12903_v4 = vcombine.low %v2226_v56, %v2230_v57 }
 0x36d   :  { %v12906_v61 = vcombine.high %v2227_v58, %v2231_v59  ;;  %v12905_v37 = vcombine.low %v2227_v58, %v2231_v59  ;;  %v2282_v59 = vld [vmem:[%s20166_s1 + $0xd50] sm:$0xff] }
 0x36e   :  { %5011 = vmatpush1.bf16.msra.mxu1 %v12847_v62  ;;  %v2234_v62 = vld [vmem:[%s20166_s1 + $0xbd0] sm:$0xff] }
 0x36f   :  { %5175 = vmatpush1.bf16.msra.mxu0 %v12849_v11  ;;  %5012 = vmatprep.subr.bf16.mxu1 %v12856_v63  ;;  %v2238_v11 = vld [vmem:[%s20166_s1 + $0xbf0] sm:$0xff]  ;;  %v2235_v63 = vld [vmem:[%s20166_s1 + $0xbd8] sm:$0xff] }
 0x370   :  { %5176 = vmatprep.subr.bf16.mxu0 %v12858_v3  ;;  %v2239_v3 = vld [vmem:[%s20166_s1 + $0xbf8] sm:$0xff]  ;;  %v12912_v6 = vcombine.high %v2234_v62, %v2238_v11  ;;  %v12911_v47 = vcombine.low %v2234_v62, %v2238_v11  ;;  %v17353_v11 = vld [vmem:[%s20168_s18] sm:$0xff] }
 0x371   :  { %v12914_v7 = vcombine.high %v2235_v63, %v2239_v3  ;;  %v12913_v14 = vcombine.low %v2235_v63, %v2239_v3 }
 0x372   :  { %5013 = vmatpush1.bf16.msra.mxu1 %v12855_v9  ;;  %v2242_v9 = vld [vmem:[%s20166_s1 + $0xc10] sm:$0xff] }
 0x373   :  { %5177 = vmatpush1.bf16.msra.mxu0 %v12857_v10  ;;  %5014 = vmatprep.subr.bf16.mxu1 %v12864_v5  ;;  %v2246_v10 = vld [vmem:[%s20166_s1 + $0xc30] sm:$0xff]  ;;  %v2243_v5 = vld [vmem:[%s20166_s1 + $0xc18] sm:$0xff] }
 0x374   :  { %5178 = vmatprep.subr.bf16.mxu0 %v12866_v13  ;;  %v2247_v13 = vld [vmem:[%s20166_s1 + $0xc38] sm:$0xff]  ;;  %v12920_v25 = vcombine.high %v2242_v9, %v2246_v10  ;;  %v12919_v32 = vcombine.low %v2242_v9, %v2246_v10  ;;  %v2313_v9 = vrot.slane %v17353_v11, %v15554_v36 }
 0x375   :  { %v12922_v16 = vcombine.high %v2243_v5, %v2247_v13  ;;  %v12921_v35 = vcombine.low %v2243_v5, %v2247_v13 }
 0x376   :  { %5015 = vmatpush1.bf16.msra.mxu1 %v12863_v18  ;;  %v2250_v18 = vld [vmem:[%s20166_s1 + $0xc50] sm:$0xff] }
 0x377   :  { %5179 = vmatpush1.bf16.msra.mxu0 %v12865_v24  ;;  %5016 = vmatprep.subr.bf16.mxu1 %v12872_v30  ;;  %v2254_v24 = vld [vmem:[%s20166_s1 + $0xc70] sm:$0xff]  ;;  %v2251_v30 = vld [vmem:[%s20166_s1 + $0xc58] sm:$0xff] }
 0x378   :  { %5180 = vmatprep.subr.bf16.mxu0 %v12874_v31  ;;  %v2255_v31 = vld [vmem:[%s20166_s1 + $0xc78] sm:$0xff]  ;;  %v12928_v20 = vcombine.high %v2250_v18, %v2254_v24  ;;  %v12927_v40 = vcombine.low %v2250_v18, %v2254_v24  ;;  %v2302_v18 = vld [vmem:[%s20166_s1 + $0xdf0] sm:$0xff] }
 0x379   :  { %v12930_v23 = vcombine.high %v2251_v30, %v2255_v31  ;;  %v12929_v41 = vcombine.low %v2251_v30, %v2255_v31  ;;  %v2299_v31 = vld [vmem:[%s20166_s1 + $0xdd8] sm:$0xff] }
 0x37a   :  { %5017 = vmatpush1.bf16.msra.mxu1 %v12871_v26  ;;  %v2258_v26 = vld [vmem:[%s20166_s1 + $0xc90] sm:$0xff] }
 0x37b   :  { %5181 = vmatpush1.bf16.msra.mxu0 %v12873_v29  ;;  %5018 = vmatprep.subr.bf16.mxu1 %v12880_v38  ;;  %v2262_v29 = vld [vmem:[%s20166_s1 + $0xcb0] sm:$0xff]  ;;  %v2259_v38 = vld [vmem:[%s20166_s1 + $0xc98] sm:$0xff] }
 0x37c   :  { %5182 = vmatprep.subr.bf16.mxu0 %v12882_v39  ;;  %v2263_v39 = vld [vmem:[%s20166_s1 + $0xcb8] sm:$0xff]  ;;  %v12936_v49 = vcombine.high %v2258_v26, %v2262_v29 }
 0x37d   :  { %v12938_v42 = vcombine.high %v2259_v38, %v2263_v39  ;;  %v12937_v19 = vcombine.low %v2259_v38, %v2263_v39 }
 0x37e   :  { %5019 = vmatpush1.bf16.msra.mxu1 %v12879_v43  ;;  %v2266_v43 = vld [vmem:[%s20166_s1 + $0xcd0] sm:$0xff] }
 0x37f   :  { %5183 = vmatpush1.bf16.msra.mxu0 %v12881_v44  ;;  %5020 = vmatprep.subr.bf16.mxu1 %v12888_v12  ;;  %v2270_v44 = vld [vmem:[%s20166_s1 + $0xcf0] sm:$0xff]  ;;  %v2271_v12 = vld [vmem:[%s20166_s1 + $0xcf8] sm:$0xff] }
 0x380   :  { %5184 = vmatprep.subr.bf16.mxu0 %v12890_v45  ;;  %v12935_v45 = vcombine.low %v2258_v26, %v2262_v29  ;;  %v12944_v22 = vcombine.high %v2266_v43, %v2270_v44 }
 0x382   :  { %5021 = vmatpush1.bf16.msra.mxu1 %v12887_v51  ;;  %v2278_v51 = vld [vmem:[%s20166_s1 + $0xd30] sm:$0xff] }
 0x383   :  { %5185 = vmatpush1.bf16.msra.mxu0 %v12889_v52  ;;  %5022 = vmatprep.subr.bf16.mxu1 %v12896_v54  ;;  %v2275_v52 = vld [vmem:[%s20166_s1 + $0xd18] sm:$0xff]  ;;  %v12952_v57 = vcombine.high %v2274_v50, %v2278_v51 }
 0x384   :  { %5186 = vmatprep.subr.bf16.mxu0 %v12898_v55  ;;  %v2279_v54 = vld [vmem:[%s20166_s1 + $0xd38] sm:$0xff]  ;;  %v12943_v55 = vcombine.low %v2266_v43, %v2270_v44  ;;  %v5318_v43 = vld [vmem:[%s20169_s14 + $0x20] sm:$0xff]  ;;  %v5315_v44 = vld [vmem:[%s20169_s14 + $0x8] sm:$0xff] }
 0x385   :  { %v12954_v58 = vcombine.high %v2275_v52, %v2279_v54  ;;  %v12953_v62 = vcombine.low %v2275_v52, %v2279_v54  ;;  %v5323_v52 = vld [vmem:[%s20169_s14 + $0x48] sm:$0xff] }
 0x386   :  { %5023 = vmatpush1.bf16.msra.mxu1 %v12895_v15  ;;  %v2286_v15 = vld [vmem:[%s20166_s1 + $0xd70] sm:$0xff]  ;;  %v5327_v54 = vld [vmem:[%s20169_s14 + $0x68] sm:$0xff] }
 0x387   :  { %5187 = vmatpush1.bf16.msra.mxu0 %v12897_v60  ;;  %5024 = vmatprep.subr.bf16.mxu1 %v12904_v8  ;;  %v2283_v60 = vld [vmem:[%s20166_s1 + $0xd58] sm:$0xff]  ;;  %v12960_v63 = vcombine.high %v2282_v59, %v2286_v15  ;;  %v12959_v10 = vcombine.low %v2282_v59, %v2286_v15  ;;  %v5330_v59 = vld [vmem:[%s20169_s14 + $0x80] sm:$0xff] }
 0x388   :  { %5188 = vmatprep.subr.bf16.mxu0 %v12906_v61  ;;  %v2287_v8 = vld [vmem:[%s20166_s1 + $0xd78] sm:$0xff]  ;;  %v12951_v61 = vcombine.low %v2274_v50, %v2278_v51  ;;  %v5322_v50 = vld [vmem:[%s20169_s14 + $0x40] sm:$0xff] }
 0x389   :  { %v12962_v3 = vcombine.high %v2283_v60, %v2287_v8  ;;  %v12961_v5 = vcombine.low %v2283_v60, %v2287_v8  ;;  %v5326_v51 = vld [vmem:[%s20169_s14 + $0x60] sm:$0xff]  ;;  %v5331_v60 = vld [vmem:[%s20169_s14 + $0x88] sm:$0xff] }
 0x38a   :  { %5025 = vmatpush1.bf16.msra.mxu1 %v12903_v4  ;;  %v2290_v4 = vld [vmem:[%s20166_s1 + $0xd90] sm:$0xff]  ;;  %v5334_v15 = vld [vmem:[%s20169_s14 + $0xa0] sm:$0xff]  ;;  %v5335_v8 = vld [vmem:[%s20169_s14 + $0xa8] sm:$0xff] }
 0x38b   :  { %5189 = vmatpush1.bf16.msra.mxu0 %v12905_v37  ;;  %5026 = vmatprep.subr.bf16.mxu1 %v12912_v6  ;;  %v2294_v37 = vld [vmem:[%s20166_s1 + $0xdb0] sm:$0xff]  ;;  %v2291_v6 = vld [vmem:[%s20166_s1 + $0xd98] sm:$0xff] }
 0x38c   :  { %5190 = vmatprep.subr.bf16.mxu0 %v12914_v7  ;;  %v2295_v7 = vld [vmem:[%s20166_s1 + $0xdb8] sm:$0xff]  ;;  %v12968_v13 = vcombine.high %v2290_v4, %v2294_v37  ;;  %v12967_v26 = vcombine.low %v2290_v4, %v2294_v37  ;;  %v5338_v4 = vld [vmem:[%s20169_s14 + $0xc0] sm:$0xff] }
 0x38d   :  { %v12969_v39 = vcombine.low %v2291_v6, %v2295_v7  ;;  %v5342_v37 = vld [vmem:[%s20169_s14 + $0xe0] sm:$0xff] }
 0x38e   :  { %5027 = vmatpush1.bf16.msra.mxu1 %v12911_v47 }
 0x38f   :  { %5191 = vmatpush1.bf16.msra.mxu0 %v12913_v14  ;;  %5037 = vmatprep.subr.bf16.mxu1 %v12920_v25  ;;  %v12970_v25 = vcombine.high %v2291_v6, %v2295_v7  ;;  %v5343_v6 = vld [vmem:[%s20169_s14 + $0xe8] sm:$0xff]  ;;  %v13003_v7 = vcombine.low %v5330_v59, %v5334_v15 }
 0x390   :  { %5201 = vmatprep.subr.bf16.mxu0 %v12922_v16  ;;  %v2298_v16 = vld [vmem:[%s20166_s1 + $0xdd0] sm:$0xff] }
 0x391   :  { %5029 = vmatmul.mubr.bf16.vlgmr.msra.gmra.mrb[20].mxu1 %v16604_v17 }
 0x392   :  { %5193 = vmatmul.mubr.bf16.vlgmr.msra.gmra.mrb[16].mxu0 %v16604_v17  ;;  %5038 = vmatpush1.bf16.msra.mxu1 %v12919_v32  ;;  %v2267_v17 = vld [vmem:[%s20166_s1 + $0xcd8] sm:$0xff] }
 0x393   :  { %5202 = vmatpush1.bf16.msra.mxu0 %v12921_v35  ;;  %5039 = vmatprep.subr.bf16.mxu1 %v12928_v20  ;;  %v12946_v46 = vcombine.high %v2267_v17, %v2271_v12  ;;  %v12945_v56 = vcombine.low %v2267_v17, %v2271_v12  ;;  %v2303_v32 = vld [vmem:[%s20166_s1 + $0xdf8] sm:$0xff]  ;;  %v5319_v17 = vld [vmem:[%s20169_s14 + $0x28] sm:$0xff] }
 0x394   :  { %5203 = vmatprep.subr.bf16.mxu0 %v12930_v23  ;;  %5069 = vmatprep.mubr.bf16.mxu1 %v15118_v2 }
 0x395   :  { %5233 = vmatprep.mubr.bf16.mxu0 %v15118_v2 }
 0x396   :  { %5040 = vmatpush1.bf16.msra.mxu1 %v12927_v40  ;;  %v12976_v40 = vcombine.high %v2298_v16, %v2302_v18 }
 0x397   :  { %5204 = vmatpush1.bf16.msra.mxu0 %v12929_v41  ;;  %5041 = vmatprep.subr.bf16.mxu1 %v12936_v49  ;;  %v12978_v49 = vcombine.high %v2299_v31, %v2303_v32 }
 0x398   :  { %5205 = vmatprep.subr.bf16.mxu0 %v12938_v42  ;;  %v5314_v42 = vld [vmem:[%s20169_s14] sm:$0xff] }
 0x39a   :  { %5042 = vmatpush1.bf16.msra.mxu1 %v12935_v45  ;;  %v12975_v45 = vcombine.low %v2298_v16, %v2302_v18  ;;  %v5346_v16 = vld [vmem:[%s20169_s14 + $0x100] sm:$0xff] }
 0x39b   :  { %5206 = vmatpush1.bf16.msra.mxu0 %v12937_v19  ;;  %5043 = vmatprep.subr.bf16.mxu1 %v12944_v22  ;;  %v12977_v19 = vcombine.low %v2299_v31, %v2303_v32  ;;  %v12988_v22 = vcombine.high %v5314_v42, %v5318_v43  ;;  %v5350_v18 = vld [vmem:[%s20169_s14 + $0x120] sm:$0xff]  ;;  %v5351_v31 = vld [vmem:[%s20169_s14 + $0x128] sm:$0xff] }
 0x39c   :  { %5207 = vmatprep.subr.bf16.mxu0 %v12946_v46  ;;  %v12990_v46 = vcombine.high %v5315_v44, %v5319_v17 }
 0x39e   :  { %5044 = vmatpush1.bf16.msra.mxu1 %v12943_v55  ;;  %v12987_v55 = vcombine.low %v5314_v42, %v5318_v43  ;;  %v5359_v42 = vld [vmem:[%s20169_s14 + $0x168] sm:$0xff] }
 0x39f   :  { %5208 = vmatpush1.bf16.msra.mxu0 %v12945_v56  ;;  %5045 = vmatprep.subr.bf16.mxu1 %v12952_v57  ;;  %v12989_v56 = vcombine.low %v5315_v44, %v5319_v17  ;;  %v12996_v57 = vcombine.high %v5322_v50, %v5326_v51 }
 0x3a0   :  { %5209 = vmatprep.subr.bf16.mxu0 %v12954_v58  ;;  %v12998_v58 = vcombine.high %v5323_v52, %v5327_v54 }
 0x3a2   :  { %5046 = vmatpush1.bf16.msra.mxu1 %v12951_v61  ;;  %v12995_v61 = vcombine.low %v5322_v50, %v5326_v51  ;;  %v2309_v51 = vrot.slane %v17353_v11, %v15548_v34 }
 0x3a3   :  { %5210 = vmatpush1.bf16.msra.mxu0 %v12953_v62  ;;  %5047 = vmatprep.subr.bf16.mxu1 %v12960_v63  ;;  %v12997_v62 = vcombine.low %v5323_v52, %v5327_v54  ;;  %v13004_v63 = vcombine.high %v5330_v59, %v5334_v15  ;;  %v5371_v59 = vld [vmem:[%s20169_s14 + $0x1c8] sm:$0xff] }
 0x3a4   :  { %v17369_v47 = vpop.f32.mrb[16].mxu1  ;;  %v17371_v14 = vpop.f32.mrb[12].mxu0  ;;  %5211 = vmatprep.subr.bf16.mxu0 %v12962_v3  ;;  %v13006_v3 = vcombine.high %v5331_v60, %v5335_v8  ;;  %v5375_v15 = vld [vmem:[%s20169_s14 + $0x1e8] sm:$0xff] }
 0x3a5   :  { %v4745_v24 = vpop.f32.mrb[17].mxu1  ;;  %v17379_v30 = vpop.f32.mrb[13].mxu0 }
 0x3a6   :  { %v17387_v35 = vadd.f32 %v4745_v24, %v2313_v9  ;;  %v4747_v20 = vpop.f32.mrb[18].mxu1  ;;  %v4911_v23 = vpop.f32.mrb[14].mxu0  ;;  %5048 = vmatpush1.bf16.msra.mxu1 %v12959_v10  ;;  %v13005_v10 = vcombine.low %v5331_v60, %v5335_v8  ;;  %v5347_v24 = vld [vmem:[%s20169_s14 + $0x108] sm:$0xff]  ;;  %v17499_v8 = vadd.f32 %v17369_v47, %v2309_v51  ;;  %v5410_v51 = vld [vmem:[%s20169_s14 + $0x300] sm:$0xff] }
 0x3a7   :  { %5212 = vmatpush1.bf16.msra.mxu0 %v12961_v5  ;;  %v4748_v29 = vpop.f32.mrb[19].mxu1  ;;  %v4912_v38 = vpop.f32.mrb[15].mxu0  ;;  %5049 = vmatprep.subr.bf16.mxu1 %v12968_v13  ;;  %v13012_v5 = vcombine.high %v5338_v4, %v5342_v37  ;;  %v13011_v20 = vcombine.low %v5338_v4, %v5342_v37  ;;  %v13021_v44 = vcombine.low %v5347_v24, %v5351_v31  ;;  %v5382_v4 = vld [vmem:[%s20169_s14 + $0x220] sm:$0xff]  ;;  %v5379_v47 = vld [vmem:[%s20169_s14 + $0x208] sm:$0xff] }
 0x3a8   :  { %v5243_v41 = vmin.f32 %v17387_v35, 0.0  ;;  %5213 = vmatprep.subr.bf16.mxu0 %v12970_v25  ;;  %vm5283_vm11 = vcmp.gt.f32.partialorder %v17387_v35, 0.0  ;;  %v13022_v38 = vcombine.high %v5347_v24, %v5351_v31  ;;  %vm5282_vm12 = vcmp.gt.f32.partialorder %v17499_v8, 0.0 }
 0x3aa   :  { %v5252_v12 = vmul.f32 1.442695, %v5243_v41  ;;  %5050 = vmatpush1.bf16.msra.mxu1 %v12967_v26  ;;  %v13020_v26 = vcombine.high %v5346_v16, %v5350_v18 }
 0x3ab   :  { %5214 = vmatpush1.bf16.msra.mxu0 %v12969_v39  ;;  %5051 = vmatprep.subr.bf16.mxu1 %v12976_v40  ;;  %v5354_v39 = vld [vmem:[%s20169_s14 + $0x140] sm:$0xff] }
 0x3ac   :  { %5215 = vmatprep.subr.bf16.mxu0 %v12978_v49  ;;  %15052 = vpow2.f32 %v5252_v12  ;;  %v5358_v40 = vld [vmem:[%s20169_s14 + $0x160] sm:$0xff]  ;;  %v5355_v49 = vld [vmem:[%s20169_s14 + $0x148] sm:$0xff] }
 0x3ad   :  { %v13028_v17 = vcombine.high %v5354_v39, %v5358_v40  ;;  %v13030_v12 = vcombine.high %v5355_v49, %v5359_v42  ;;  %v13027_v50 = vcombine.low %v5354_v39, %v5358_v40  ;;  %v13029_v52 = vcombine.low %v5355_v49, %v5359_v42  ;;  %v5395_v39 = vld [vmem:[%s20169_s14 + $0x288] sm:$0xff] }
 0x3ae   :  { %5052 = vmatpush1.bf16.msra.mxu1 %v12975_v45  ;;  %v5362_v45 = vld [vmem:[%s20169_s14 + $0x180] sm:$0xff]  ;;  %v5399_v40 = vld [vmem:[%s20169_s14 + $0x2a8] sm:$0xff] }
 0x3af   :  { %5216 = vmatpush1.bf16.msra.mxu0 %v12977_v19  ;;  %8428 = vmatprep.subr.bf16.mxu1 %v12988_v22  ;;  %v5366_v19 = vld [vmem:[%s20169_s14 + $0x1a0] sm:$0xff]  ;;  %v5363_v22 = vld [vmem:[%s20169_s14 + $0x188] sm:$0xff] }
 0x3b0   :  { %8592 = vmatprep.subr.bf16.mxu0 %v12990_v46  ;;  %v5367_v46 = vld [vmem:[%s20169_s14 + $0x1a8] sm:$0xff]  ;;  %v13036_v54 = vcombine.high %v5362_v45, %v5366_v19  ;;  %v13035_v60 = vcombine.low %v5362_v45, %v5366_v19 }
 0x3b1   :  { %5070 = vmatmul.mubr.bf16.vlgmr.msra.gmra.mrb[20].mxu1 %v16708_v48  ;;  %v5407_v45 = vld [vmem:[%s20169_s14 + $0x2e8] sm:$0xff] }
 0x3b2   :  { %5234 = vmatmul.mubr.bf16.vlgmr.msra.gmra.mrb[16].mxu0 %v16708_v48  ;;  %8429 = vmatpush1.bf16.msra.mxu1 %v12987_v55  ;;  %v5339_v48 = vld [vmem:[%s20169_s14 + $0xc8] sm:$0xff]  ;;  %v13038_v55 = vcombine.high %v5363_v22, %v5367_v46 }
 0x3b3   :  { %8593 = vmatpush1.bf16.msra.mxu0 %v12989_v56  ;;  %8430 = vmatprep.subr.bf16.mxu1 %v12996_v57  ;;  %v13014_v25 = vcombine.high %v5339_v48, %v5343_v6  ;;  %v13013_v23 = vcombine.low %v5339_v48, %v5343_v6  ;;  %v5370_v56 = vld [vmem:[%s20169_s14 + $0x1c0] sm:$0xff]  ;;  %v5383_v48 = vld [vmem:[%s20169_s14 + $0x228] sm:$0xff] }
 0x3b4   :  { %8594 = vmatprep.subr.bf16.mxu0 %v12998_v58  ;;  %v5374_v57 = vld [vmem:[%s20169_s14 + $0x1e0] sm:$0xff]  ;;  %v2321_v58 = vrot.slane %v17353_v11, %v16130_v27 }
 0x3b5   :  { %v13043_v6 = vcombine.low %v5370_v56, %v5374_v57 }
 0x3b6   :  { %8431 = vmatpush1.bf16.msra.mxu1 %v12995_v61  ;;  %v15053_v9 = vpop.eup %15052  ;;  %v13037_v61 = vcombine.low %v5363_v22, %v5367_v46  ;;  %v17508_v37 = vadd.f32 %v17379_v30, %v2321_v58  ;;  %v5386_v30 = vld [vmem:[%s20169_s14 + $0x240] sm:$0xff]  ;;  %v13069_v22 = vcombine.low %v5395_v39, %v5399_v40 }
 0x3b7   :  { %8595 = vmatpush1.bf16.msra.mxu0 %v12997_v62  ;;  %8432 = vmatprep.subr.bf16.mxu1 %v13004_v63  ;;  %v12980_v13 = vadd.f32 -1.0, %v15053_v9  ;;  %v13044_v62 = vcombine.high %v5370_v56, %v5374_v57  ;;  %v13046_v63 = vcombine.high %v5371_v59, %v5375_v15  ;;  %v13045_v9 = vcombine.low %v5371_v59, %v5375_v15  ;;  %v5418_v15 = vld [vmem:[%s20169_s14 + $0x340] sm:$0xff] }
 0x3b8   :  { %8596 = vmatprep.subr.bf16.mxu0 %v13006_v3  ;;  %v5378_v3 = vld [vmem:[%s20169_s14 + $0x200] sm:$0xff]  ;;  %vm5285_vm13 = vcmp.gt.f32.partialorder %v17508_v37, 0.0 }
 0x3b9   :  { %v5275_v32 = vmul.f32 1.6732632, %v12980_v13  ;;  %v5390_v13 = vld [vmem:[%s20169_s14 + $0x260] sm:$0xff]  ;;  %v13051_v24 = vcombine.low %v5378_v3, %v5382_v4 }
 0x3ba   :  { %8433 = vmatpush1.bf16.msra.mxu1 %v13003_v7  ;;  %v5242_v7 = vmin.f32 %v17499_v8, 0.0 }
 0x3bb   :  { %8597 = vmatpush1.bf16.msra.mxu0 %v13005_v10  ;;  %8434 = vmatprep.subr.bf16.mxu1 %v13012_v5  ;;  %v5291_v29 = vsel %vm5283_vm11, %v17387_v35, %v5275_v32  ;;  %v13019_v35 = vcombine.low %v5346_v16, %v5350_v18  ;;  %v13052_v10 = vcombine.high %v5378_v3, %v5382_v4  ;;  %v5387_v16 = vld [vmem:[%s20169_s14 + $0x248] sm:$0xff] }
 0x3bc   :  { %8598 = vmatprep.subr.bf16.mxu0 %v13014_v25  ;;  %v5299_v41 = vmul.f32 1.050701, %v5291_v29  ;;  %v13054_v5 = vcombine.high %v5379_v47, %v5383_v48  ;;  %v5245_v25 = vmin.f32 %v17508_v37, 0.0  ;;  %v5391_v18 = vld [vmem:[%s20169_s14 + $0x268] sm:$0xff]  ;;  %v5250_v31 = vmul.f32 1.442695, %v5242_v7 }
 0x3bd   :  { %v13053_v32 = vcombine.low %v5379_v47, %v5383_v48  ;;  %v5398_v29 = vld [vmem:[%s20169_s14 + $0x2a0] sm:$0xff]  ;;  %v13061_v49 = vcombine.low %v5387_v16, %v5391_v18 }
 0x3be   :  { %8435 = vmatpush1.bf16.msra.mxu1 %v13011_v20  ;;  %v17466_v43 = vpack.c.bf16 %v5299_v41, %v5299_v41  ;;  %v13060_v20 = vcombine.high %v5386_v30, %v5390_v13  ;;  %v13059_v41 = vcombine.low %v5386_v30, %v5390_v13  ;;  %15054 = vpow2.f32 %v5250_v31  ;;  %v5431_v30 = vld [vmem:[%s20169_s14 + $0x3a8] sm:$0xff] }
 0x3bf   :  { %8599 = vmatpush1.bf16.msra.mxu0 %v13013_v23  ;;  %8436 = vmatprep.subr.bf16.mxu1 %v13020_v26  ;;  %v13062_v23 = vcombine.high %v5387_v16, %v5391_v18  ;;  %v5394_v26 = vld [vmem:[%s20169_s14 + $0x280] sm:$0xff] }
 0x3c0   :  { %8600 = vmatprep.subr.bf16.mxu0 %v13022_v38  ;;  %8460 = vmatprep.mubr.bf16.mxu1 %v17466_v43  ;;  %v5256_v38 = vmul.f32 1.442695, %v5245_v25  ;;  %v13068_v42 = vcombine.high %v5394_v26, %v5398_v29  ;;  %v13067_v19 = vcombine.low %v5394_v26, %v5398_v29  ;;  %v5439_v26 = vld [vmem:[%s20169_s14 + $0x3e8] sm:$0xff] }
 0x3c1   :  { %8624 = vmatprep.mubr.bf16.mxu0 %v17466_v43 }
 0x3c2   :  { %8437 = vmatpush1.bf16.msra.mxu1 %v13019_v35  ;;  %v13070_v35 = vcombine.high %v5395_v39, %v5399_v40  ;;  %15056 = vpow2.f32 %v5256_v38 }
 0x3c3   :  { %8601 = vmatpush1.bf16.msra.mxu0 %v13021_v44  ;;  %8438 = vmatprep.subr.bf16.mxu1 %v13028_v17  ;;  %v5402_v44 = vld [vmem:[%s20169_s14 + $0x2c0] sm:$0xff] }
 0x3c4   :  { %8602 = vmatprep.subr.bf16.mxu0 %v13030_v12  ;;  %v5406_v17 = vld [vmem:[%s20169_s14 + $0x2e0] sm:$0xff]  ;;  %v5403_v12 = vld [vmem:[%s20169_s14 + $0x2c8] sm:$0xff] }
 0x3c5   :  { %v13076_v46 = vcombine.high %v5402_v44, %v5406_v17  ;;  %v13075_v56 = vcombine.low %v5402_v44, %v5406_v17  ;;  %v13077_v57 = vcombine.low %v5403_v12, %v5407_v45  ;;  %v5443_v44 = vld [vmem:[%s20169_s14 + $0x408] sm:$0xff] }
 0x3c6   :  { %8439 = vmatpush1.bf16.msra.mxu1 %v13027_v50  ;;  %v13078_v50 = vcombine.high %v5403_v12, %v5407_v45 }
 0x3c7   :  { %8603 = vmatpush1.bf16.msra.mxu0 %v13029_v52  ;;  %8440 = vmatprep.subr.bf16.mxu1 %v13036_v54  ;;  %v5414_v52 = vld [vmem:[%s20169_s14 + $0x320] sm:$0xff]  ;;  %v5411_v54 = vld [vmem:[%s20169_s14 + $0x308] sm:$0xff] }
 0x3c8   :  { %8604 = vmatprep.subr.bf16.mxu0 %v13038_v55  ;;  %v5415_v55 = vld [vmem:[%s20169_s14 + $0x328] sm:$0xff]  ;;  %v13084_v58 = vcombine.high %v5410_v51, %v5414_v52  ;;  %v13083_v3 = vcombine.low %v5410_v51, %v5414_v52  ;;  %v5450_v51 = vld [vmem:[%s20169_s14 + $0x440] sm:$0xff] }
 0x3c9   :  { %v13086_v59 = vcombine.high %v5411_v54, %v5415_v55  ;;  %v13085_v47 = vcombine.low %v5411_v54, %v5415_v55  ;;  %v5454_v52 = vld [vmem:[%s20169_s14 + $0x460] sm:$0xff]  ;;  %v5451_v54 = vld [vmem:[%s20169_s14 + $0x448] sm:$0xff] }
 0x3ca   :  { %8441 = vmatpush1.bf16.msra.mxu1 %v13035_v60  ;;  %v5422_v60 = vld [vmem:[%s20169_s14 + $0x360] sm:$0xff]  ;;  %v5455_v55 = vld [vmem:[%s20169_s14 + $0x468] sm:$0xff] }
 0x3cb   :  { %8605 = vmatpush1.bf16.msra.mxu0 %v13037_v61  ;;  %8442 = vmatprep.subr.bf16.mxu1 %v13044_v62  ;;  %v15055_v61 = vpop.eup %15054  ;;  %v5419_v62 = vld [vmem:[%s20169_s14 + $0x348] sm:$0xff]  ;;  %v13092_v48 = vcombine.high %v5418_v15, %v5422_v60  ;;  %v13091_v25 = vcombine.low %v5418_v15, %v5422_v60  ;;  %v5462_v15 = vld [vmem:[%s20169_s14 + $0x4a0] sm:$0xff] }
 0x3cc   :  { %8606 = vmatprep.subr.bf16.mxu0 %v13046_v63  ;;  %v5423_v63 = vld [vmem:[%s20169_s14 + $0x368] sm:$0xff]  ;;  %v15057_v4 = vpop.eup %15056 }
 0x3cd   :  { %v13094_v7 = vcombine.high %v5419_v62, %v5423_v63  ;;  %v12982_v13 = vadd.f32 -1.0, %v15057_v4  ;;  %v13093_v16 = vcombine.low %v5419_v62, %v5423_v63  ;;  %v5459_v62 = vld [vmem:[%s20169_s14 + $0x488] sm:$0xff]  ;;  %v13125_v4 = vcombine.low %v5451_v54, %v5455_v55 }
 0x3ce   :  { %8443 = vmatpush1.bf16.msra.mxu1 %v13043_v6  ;;  %v12979_v6 = vadd.f32 -1.0, %v15055_v61  ;;  %v13126_v61 = vcombine.high %v5451_v54, %v5455_v55  ;;  %v5463_v63 = vld [vmem:[%s20169_s14 + $0x4a8] sm:$0xff] }
 0x3cf   :  { %8607 = vmatpush1.bf16.msra.mxu0 %v13045_v9  ;;  %8444 = vmatprep.subr.bf16.mxu1 %v13052_v10  ;;  %v5426_v9 = vld [vmem:[%s20169_s14 + $0x380] sm:$0xff]  ;;  %v5277_v29 = vmul.f32 1.6732632, %v12982_v13 }
 0x3d0   :  { %8608 = vmatprep.subr.bf16.mxu0 %v13054_v5  ;;  %v5430_v10 = vld [vmem:[%s20169_s14 + $0x3a0] sm:$0xff]  ;;  %v5427_v5 = vld [vmem:[%s20169_s14 + $0x388] sm:$0xff] }
 0x3d1   :  { %v13100_v18 = vcombine.high %v5426_v9, %v5430_v10  ;;  %v13102_v31 = vcombine.high %v5427_v5, %v5431_v30  ;;  %v13099_v38 = vcombine.low %v5426_v9, %v5430_v10  ;;  %v13101_v39 = vcombine.low %v5427_v5, %v5431_v30  ;;  %v5467_v9 = vld [vmem:[%s20169_s14 + $0x4c8] sm:$0xff] }
 0x3d2   :  { %8445 = vmatpush1.bf16.msra.mxu1 %v13051_v24  ;;  %v5274_v24 = vmul.f32 1.6732632, %v12979_v6  ;;  %v5293_v17 = vsel %vm5285_vm13, %v17508_v37, %v5277_v29  ;;  %v5466_v6 = vld [vmem:[%s20169_s14 + $0x4c0] sm:$0xff]  ;;  %v5471_v10 = vld [vmem:[%s20169_s14 + $0x4e8] sm:$0xff]  ;;  %v13133_v30 = vcombine.low %v5459_v62, %v5463_v63 }
 0x3d3   :  { %8609 = vmatpush1.bf16.msra.mxu0 %v13053_v32  ;;  %8446 = vmatprep.subr.bf16.mxu1 %v13060_v20  ;;  %v5434_v32 = vld [vmem:[%s20169_s14 + $0x3c0] sm:$0xff] }
 0x3d4   :  { %8610 = vmatprep.subr.bf16.mxu0 %v13062_v23  ;;  %v5438_v20 = vld [vmem:[%s20169_s14 + $0x3e0] sm:$0xff]  ;;  %v5435_v23 = vld [vmem:[%s20169_s14 + $0x3c8] sm:$0xff] }
 0x3d5   :  { %v13108_v40 = vcombine.high %v5434_v32, %v5438_v20  ;;  %v13107_v12 = vcombine.low %v5434_v32, %v5438_v20  ;;  %v13141_v20 = vcombine.low %v5467_v9, %v5471_v10  ;;  %v5482_v29 = vld [vmem:[%s20169_s14 + $0x540] sm:$0xff] }
 0x3d6   :  { %8447 = vmatpush1.bf16.msra.mxu1 %v13059_v41  ;;  %v5290_v41 = vsel %vm5282_vm12, %v17499_v8, %v5274_v24  ;;  %v5447_v8 = vld [vmem:[%s20169_s14 + $0x428] sm:$0xff] }
 0x3d7   :  { %8611 = vmatpush1.bf16.msra.mxu0 %v13061_v49  ;;  %8448 = vmatprep.subr.bf16.mxu1 %v13068_v42  ;;  %v13110_v49 = vcombine.high %v5435_v23, %v5439_v26  ;;  %v5442_v42 = vld [vmem:[%s20169_s14 + $0x400] sm:$0xff]  ;;  %v5298_v45 = vmul.f32 1.050701, %v5290_v41  ;;  %v5475_v24 = vld [vmem:[%s20169_s14 + $0x508] sm:$0xff] }
 0x3d8   :  { %8612 = vmatprep.subr.bf16.mxu0 %v13070_v35  ;;  %v5446_v35 = vld [vmem:[%s20169_s14 + $0x420] sm:$0xff] }
 0x3d9   :  { %v13115_v37 = vcombine.low %v5442_v42, %v5446_v35 }
 0x3da   :  { %8449 = vmatpush1.bf16.msra.mxu1 %v13067_v19  ;;  %v13109_v19 = vcombine.low %v5435_v23, %v5439_v26 }
 0x3db   :  { %8613 = vmatpush1.bf16.msra.mxu0 %v13069_v22  ;;  %8450 = vmatprep.subr.bf16.mxu1 %v13076_v46  ;;  %v13116_v22 = vcombine.high %v5442_v42, %v5446_v35  ;;  %v13118_v46 = vcombine.high %v5443_v44, %v5447_v8 }
 0x3dc   :  { %8614 = vmatprep.subr.bf16.mxu0 %v13078_v50  ;;  %v5301_v50 = vmul.f32 1.050701, %v5293_v17  ;;  %v5491_v17 = vld [vmem:[%s20169_s14 + $0x588] sm:$0xff] }
 0x3de   :  { %8451 = vmatpush1.bf16.msra.mxu1 %v13075_v56  ;;  %v17630_v56 = vpack.c.bf16 %v5298_v45, %v5298_v45  ;;  %v17638_v60 = vpack.c.bf16 %v5301_v50, %v5301_v50 }
 0x3df   :  { %8615 = vmatpush1.bf16.msra.mxu0 %v13077_v57  ;;  %8452 = vmatprep.subr.bf16.mxu1 %v13084_v58  ;;  %v13117_v57 = vcombine.low %v5443_v44, %v5447_v8  ;;  %v13124_v58 = vcombine.high %v5450_v51, %v5454_v52  ;;  %v5490_v44 = vld [vmem:[%s20169_s14 + $0x580] sm:$0xff] }
 0x3e0   :  { %8616 = vmatprep.subr.bf16.mxu0 %v13086_v59  ;;  %v5458_v59 = vld [vmem:[%s20169_s14 + $0x480] sm:$0xff] }
 0x3e1   :  { %v13131_v5 = vcombine.low %v5458_v59, %v5462_v15  ;;  %v5494_v8 = vld [vmem:[%s20169_s14 + $0x5a0] sm:$0xff] }
 0x3e2   :  { %8453 = vmatpush1.bf16.msra.mxu1 %v13083_v3  ;;  %v13123_v3 = vcombine.low %v5450_v51, %v5454_v52  ;;  %v5498_v51 = vld [vmem:[%s20169_s14 + $0x5c0] sm:$0xff]  ;;  %v13163_v54 = vcombine.low %v5490_v44, %v5494_v8 }
 0x3e3   :  { %8617 = vmatpush1.bf16.msra.mxu0 %v13085_v47  ;;  %8454 = vmatprep.subr.bf16.mxu1 %v13092_v48  ;;  %v13132_v47 = vcombine.high %v5458_v59, %v5462_v15  ;;  %v13134_v48 = vcombine.high %v5459_v62, %v5463_v63  ;;  %v5502_v52 = vld [vmem:[%s20169_s14 + $0x5e0] sm:$0xff]  ;;  %v5507_v62 = vld [vmem:[%s20169_s14 + $0x608] sm:$0xff] }
 0x3e4   :  { %8618 = vmatprep.subr.bf16.mxu0 %v13094_v7  ;;  %v5470_v7 = vld [vmem:[%s20169_s14 + $0x4e0] sm:$0xff]  ;;  %v13171_v63 = vcombine.low %v5498_v51, %v5502_v52 }
 0x3e5   :  { %v13140_v13 = vcombine.high %v5466_v6, %v5470_v7  ;;  %v13139_v32 = vcombine.low %v5466_v6, %v5470_v7  ;;  %v5506_v15 = vld [vmem:[%s20169_s14 + $0x600] sm:$0xff] }
 0x3e6   :  { %8455 = vmatpush1.bf16.msra.mxu1 %v13091_v25  ;;  %v13142_v25 = vcombine.high %v5467_v9, %v5471_v10  ;;  %v5514_v6 = vld [vmem:[%s20169_s14 + $0x640] sm:$0xff]  ;;  %v5515_v9 = vld [vmem:[%s20169_s14 + $0x648] sm:$0xff] }
 0x3e7   :  { %8619 = vmatpush1.bf16.msra.mxu0 %v13093_v16  ;;  %8456 = vmatprep.subr.bf16.mxu1 %v13100_v18  ;;  %v5474_v16 = vld [vmem:[%s20169_s14 + $0x500] sm:$0xff]  ;;  %v5519_v10 = vld [vmem:[%s20169_s14 + $0x668] sm:$0xff] }
 0x3e8   :  { %8620 = vmatprep.subr.bf16.mxu0 %v13102_v31  ;;  %v5478_v18 = vld [vmem:[%s20169_s14 + $0x520] sm:$0xff]  ;;  %v5479_v31 = vld [vmem:[%s20169_s14 + $0x528] sm:$0xff] }
 0x3e9   :  { %v13148_v23 = vcombine.high %v5474_v16, %v5478_v18  ;;  %v13150_v26 = vcombine.high %v5475_v24, %v5479_v31  ;;  %v13147_v41 = vcombine.low %v5474_v16, %v5478_v18  ;;  %v5518_v7 = vld [vmem:[%s20169_s14 + $0x660] sm:$0xff]  ;;  %v13190_v16 = vcombine.high %v5515_v9, %v5519_v10 }
 0x3ea   :  { %8457 = vmatpush1.bf16.msra.mxu1 %v13099_v38  ;;  %v5486_v38 = vld [vmem:[%s20169_s14 + $0x560] sm:$0xff] }
 0x3eb   :  { %8621 = vmatpush1.bf16.msra.mxu0 %v13101_v39  ;;  %8458 = vmatprep.subr.bf16.mxu1 %v13108_v40  ;;  %v5483_v39 = vld [vmem:[%s20169_s14 + $0x548] sm:$0xff]  ;;  %v13156_v42 = vcombine.high %v5482_v29, %v5486_v38  ;;  %v13155_v45 = vcombine.low %v5482_v29, %v5486_v38  ;;  %v5522_v18 = vld [vmem:[%s20169_s14 + $0x680] sm:$0xff] }
 0x3ec   :  { %8622 = vmatprep.subr.bf16.mxu0 %v13110_v49  ;;  %v5487_v40 = vld [vmem:[%s20169_s14 + $0x568] sm:$0xff]  ;;  %v13149_v49 = vcombine.low %v5475_v24, %v5479_v31  ;;  %v5526_v24 = vld [vmem:[%s20169_s14 + $0x6a0] sm:$0xff] }
 0x3ed   :  { %v13158_v35 = vcombine.high %v5483_v39, %v5487_v40  ;;  %v5523_v31 = vld [vmem:[%s20169_s14 + $0x688] sm:$0xff]  ;;  %v5530_v38 = vld [vmem:[%s20169_s14 + $0x6c0] sm:$0xff] }
 0x3ee   :  { %8459 = vmatpush1.bf16.msra.mxu1 %v13107_v12  ;;  %v5495_v12 = vld [vmem:[%s20169_s14 + $0x5a8] sm:$0xff] }
 0x3ef   :  { %8623 = vmatpush1.bf16.msra.mxu0 %v13109_v19  ;;  %8469 = vmatprep.subr.bf16.mxu1 %v13116_v22  ;;  %v2317_v19 = vrot.slane %v17353_v11, %v15559_v53  ;;  %v13157_v22 = vcombine.low %v5483_v39, %v5487_v40  ;;  %v13166_v50 = vcombine.high %v5491_v17, %v5495_v12  ;;  %v5503_v11 = vld [vmem:[%s20169_s14 + $0x5e8] sm:$0xff]  ;;  %v5534_v39 = vld [vmem:[%s20169_s14 + $0x6e0] sm:$0xff] }
 0x3f0   :  { %8633 = vmatprep.subr.bf16.mxu0 %v13118_v46  ;;  %v13164_v46 = vcombine.high %v5490_v44, %v5494_v8  ;;  %v5531_v40 = vld [vmem:[%s20169_s14 + $0x6c8] sm:$0xff]  ;;  %v5538_v8 = vld [vmem:[%s20169_s14 + $0x700] sm:$0xff] }
 0x3f1   :  { %8461 = vmatmul.mubr.bf16.vlgmr.msra.gmra.mrb[24].mxu1 %v17630_v56  ;;  %v17713_v55 = vadd.f32 %v17371_v14, %v2317_v19  ;;  %v5511_v14 = vld [vmem:[%s20169_s14 + $0x628] sm:$0xff]  ;;  %v13203_v19 = vcombine.low %v5530_v38, %v5534_v39 }
 0x3f2   :  { %8625 = vmatmul.mubr.bf16.vlgmr.msra.gmra.mrb[20].mxu0 %v17630_v56  ;;  %8470 = vmatpush1.bf16.msra.mxu1 %v13115_v37  ;;  %v5499_v37 = vld [vmem:[%s20169_s14 + $0x5c8] sm:$0xff] }
 0x3f3   :  { %8501 = vmatprep.mubr.bf16.mxu1 %v17638_v60  ;;  %8634 = vmatpush1.bf16.msra.mxu0 %v13117_v57  ;;  %v13165_v57 = vcombine.low %v5491_v17, %v5495_v12  ;;  %v13174_v59 = vcombine.high %v5499_v37, %v5503_v11  ;;  %v5542_v17 = vld [vmem:[%s20169_s14 + $0x720] sm:$0xff]  ;;  %v5539_v12 = vld [vmem:[%s20169_s14 + $0x708] sm:$0xff]  ;;  %vm5284_vm14 = vcmp.gt.f32.partialorder %v17713_v55, 0.0 }
 0x3f4   :  { %8665 = vmatprep.mubr.bf16.mxu0 %v17638_v60  ;;  %8471 = vmatprep.subr.bf16.mxu1 %v13124_v58  ;;  %v13172_v58 = vcombine.high %v5498_v51, %v5502_v52  ;;  %v5546_v51 = vld [vmem:[%s20169_s14 + $0x740] sm:$0xff] }
 0x3f5   :  { %8635 = vmatprep.subr.bf16.mxu0 %v13126_v61  ;;  %v5510_v61 = vld [vmem:[%s20169_s14 + $0x620] sm:$0xff] }
 0x3f6   :  { %8472 = vmatpush1.bf16.msra.mxu1 %v13123_v3  ;;  %v5244_v3 = vmin.f32 %v17713_v55, 0.0  ;;  %v5550_v52 = vld [vmem:[%s20169_s14 + $0x760] sm:$0xff] }
 0x3f7   :  { %8636 = vmatpush1.bf16.msra.mxu0 %v13125_v4  ;;  %8473 = vmatprep.subr.bf16.mxu1 %v13132_v47  ;;  %v13173_v4 = vcombine.low %v5499_v37, %v5503_v11  ;;  %v13180_v47 = vcombine.high %v5506_v15, %v5510_v61  ;;  %v5547_v11 = vld [vmem:[%s20169_s14 + $0x748] sm:$0xff] }
 0x3f8   :  { %8637 = vmatprep.subr.bf16.mxu0 %v13134_v48  ;;  %v13182_v48 = vcombine.high %v5507_v62, %v5511_v14 }
 0x3fa   :  { %8474 = vmatpush1.bf16.msra.mxu1 %v13131_v5  ;;  %v13179_v5 = vcombine.low %v5506_v15, %v5510_v61 }
 0x3fb   :  { %8638 = vmatpush1.bf16.msra.mxu0 %v13133_v30  ;;  %8475 = vmatprep.subr.bf16.mxu1 %v13140_v13  ;;  %v5254_v30 = vmul.f32 1.442695, %v5244_v3  ;;  %v13181_v13 = vcombine.low %v5507_v62, %v5511_v14  ;;  %v5554_v62 = vld [vmem:[%s20169_s14 + $0x780] sm:$0xff]  ;;  %v5559_v3 = vld [vmem:[%s20169_s14 + $0x7a8] sm:$0xff] }
 0x3fc   :  { %8639 = vmatprep.subr.bf16.mxu0 %v13142_v25  ;;  %v13188_v25 = vcombine.high %v5514_v6, %v5518_v7  ;;  %v5558_v14 = vld [vmem:[%s20169_s14 + $0x7a0] sm:$0xff] }
 0x3fd   :  { %15058 = vpow2.f32 %v5254_v30  ;;  %v5567_v30 = vld [vmem:[%s20169_s14 + $0x7e8] sm:$0xff] }
 0x3fe   :  { %8476 = vmatpush1.bf16.msra.mxu1 %v13139_v32  ;;  %v5527_v32 = vld [vmem:[%s20169_s14 + $0x6a8] sm:$0xff] }
 0x3ff   :  { %8640 = vmatpush1.bf16.msra.mxu0 %v13141_v20  ;;  %8477 = vmatprep.subr.bf16.mxu1 %v13148_v23  ;;  %v13187_v20 = vcombine.low %v5514_v6, %v5518_v7  ;;  %v13189_v23 = vcombine.low %v5515_v9, %v5519_v10  ;;  %v13198_v29 = vcombine.high %v5523_v31, %v5527_v32  ;;  %v5562_v9 = vld [vmem:[%s20169_s14 + $0x7c0] sm:$0xff] }
 0x400   :  { %8641 = vmatprep.subr.bf16.mxu0 %v13150_v26  ;;  %v13196_v26 = vcombine.high %v5522_v18, %v5526_v24  ;;  %v5566_v10 = vld [vmem:[%s20169_s14 + $0x7e0] sm:$0xff] }
 0x402   :  { %8478 = vmatpush1.bf16.msra.mxu1 %v13147_v41  ;;  %v5535_v41 = vld [vmem:[%s20169_s14 + $0x6e8] sm:$0xff] }
 0x403   :  { %8642 = vmatpush1.bf16.msra.mxu0 %v13149_v49  ;;  %8479 = vmatprep.subr.bf16.mxu1 %v13156_v42  ;;  %v13195_v49 = vcombine.low %v5522_v18, %v5526_v24  ;;  %v13197_v42 = vcombine.low %v5523_v31, %v5527_v32  ;;  %v13206_v44 = vcombine.high %v5531_v40, %v5535_v41  ;;  %v5570_v31 = vld [vmem:[%s20169_s14 + $0x800] sm:$0xff] }
 0x404   :  { %8643 = vmatprep.subr.bf16.mxu0 %v13158_v35  ;;  %v13204_v35 = vcombine.high %v5530_v38, %v5534_v39  ;;  %v5574_v32 = vld [vmem:[%s20169_s14 + $0x820] sm:$0xff] }
 0x405   :  { %v13244_v38 = vcombine.high %v5570_v31, %v5574_v32 }
 0x406   :  { %8480 = vmatpush1.bf16.msra.mxu1 %v13155_v45  ;;  %v5543_v45 = vld [vmem:[%s20169_s14 + $0x728] sm:$0xff] }
 0x407   :  { %8644 = vmatpush1.bf16.msra.mxu0 %v13157_v22  ;;  %8481 = vmatprep.subr.bf16.mxu1 %v13164_v46  ;;  %v13205_v22 = vcombine.low %v5531_v40, %v5535_v41  ;;  %v13212_v46 = vcombine.high %v5538_v8, %v5542_v17  ;;  %v15059_v37 = vpop.eup %15058  ;;  %v5578_v40 = vld [vmem:[%s20169_s14 + $0x840] sm:$0xff] }
 0x408   :  { %8645 = vmatprep.subr.bf16.mxu0 %v13166_v50  ;;  %v13214_v50 = vcombine.high %v5539_v12, %v5543_v45  ;;  %v12981_v15 = vadd.f32 -1.0, %v15059_v37  ;;  %v5582_v41 = vld [vmem:[%s20169_s14 + $0x860] sm:$0xff] }
 0x40a   :  { %8482 = vmatpush1.bf16.msra.mxu1 %v13163_v54  ;;  %v5551_v54 = vld [vmem:[%s20169_s14 + $0x768] sm:$0xff]  ;;  %v5276_v6 = vmul.f32 1.6732632, %v12981_v15 }
 0x40b   :  { %8646 = vmatpush1.bf16.msra.mxu0 %v13165_v57  ;;  %8483 = vmatprep.subr.bf16.mxu1 %v13172_v58  ;;  %v13211_v57 = vcombine.low %v5538_v8, %v5542_v17  ;;  %v13213_v58 = vcombine.low %v5539_v12, %v5543_v45  ;;  %v13222_v61 = vcombine.high %v5547_v11, %v5551_v54  ;;  %v5586_v45 = vld [vmem:[%s20169_s14 + $0x880] sm:$0xff] }
 0x40c   :  { %8647 = vmatprep.subr.bf16.mxu0 %v13174_v59  ;;  %v13220_v59 = vcombine.high %v5546_v51, %v5550_v52  ;;  %v5292_v18 = vsel %vm5284_vm14, %v17713_v55, %v5276_v6  ;;  %v13235_v55 = vcombine.low %v5562_v9, %v5566_v10  ;;  %v13252_v17 = vcombine.high %v5578_v40, %v5582_v41 }
 0x40e   :  { %8484 = vmatpush1.bf16.msra.mxu1 %v13171_v63  ;;  %v5555_v63 = vld [vmem:[%s20169_s14 + $0x788] sm:$0xff] }
 0x40f   :  { %8648 = vmatpush1.bf16.msra.mxu0 %v13173_v4  ;;  %8485 = vmatprep.subr.bf16.mxu1 %v13180_v47  ;;  %v13219_v4 = vcombine.low %v5546_v51, %v5550_v52  ;;  %v13221_v47 = vcombine.low %v5547_v11, %v5551_v54  ;;  %v13230_v7 = vcombine.high %v5555_v63, %v5559_v3  ;;  %v5594_v11 = vld [vmem:[%s20169_s14 + $0x8c0] sm:$0xff] }
 0x410   :  { %8649 = vmatprep.subr.bf16.mxu0 %v13182_v48  ;;  %v13228_v48 = vcombine.high %v5554_v62, %v5558_v14  ;;  %v5598_v54 = vld [vmem:[%s20169_s14 + $0x8e0] sm:$0xff] }
 0x412   :  { %8486 = vmatpush1.bf16.msra.mxu1 %v13179_v5  ;;  %v5563_v5 = vld [vmem:[%s20169_s14 + $0x7c8] sm:$0xff] }
 0x413   :  { %8650 = vmatpush1.bf16.msra.mxu0 %v13181_v13  ;;  %8487 = vmatprep.subr.bf16.mxu1 %v13188_v25  ;;  %v13227_v13 = vcombine.low %v5554_v62, %v5558_v14  ;;  %v13229_v25 = vcombine.low %v5555_v63, %v5559_v3  ;;  %v13238_v24 = vcombine.high %v5563_v5, %v5567_v30  ;;  %v5602_v14 = vld [vmem:[%s20169_s14 + $0x900] sm:$0xff]  ;;  %v5603_v3 = vld [vmem:[%s20169_s14 + $0x908] sm:$0xff] }
 0x414   :  { %8651 = vmatprep.subr.bf16.mxu0 %v13190_v16  ;;  %v13236_v16 = vcombine.high %v5562_v9, %v5566_v10  ;;  %v5606_v63 = vld [vmem:[%s20169_s14 + $0x920] sm:$0xff] }
 0x415   :  { %v13276_v6 = vcombine.high %v5602_v14, %v5606_v63  ;;  %v5610_v9 = vld [vmem:[%s20169_s14 + $0x940] sm:$0xff] }
 0x416   :  { %8488 = vmatpush1.bf16.msra.mxu1 %v13187_v20  ;;  %v5571_v20 = vld [vmem:[%s20169_s14 + $0x808] sm:$0xff]  ;;  %v5614_v10 = vld [vmem:[%s20169_s14 + $0x960] sm:$0xff] }
 0x417   :  { %8652 = vmatpush1.bf16.msra.mxu0 %v13189_v23  ;;  %8489 = vmatprep.subr.bf16.mxu1 %v13196_v26  ;;  %v5575_v23 = vld [vmem:[%s20169_s14 + $0x828] sm:$0xff]  ;;  %v5300_v26 = vmul.f32 1.050701, %v5292_v18 }
 0x418   :  { %8653 = vmatprep.subr.bf16.mxu0 %v13198_v29  ;;  %v13237_v29 = vcombine.low %v5563_v5, %v5567_v30  ;;  %v13246_v39 = vcombine.high %v5571_v20, %v5575_v23  ;;  %v13245_v8 = vcombine.low %v5571_v20, %v5575_v23  ;;  %v5611_v5 = vld [vmem:[%s20169_s14 + $0x948] sm:$0xff]  ;;  %v13283_v23 = vcombine.low %v5610_v9, %v5614_v10 }
 0x419   :  { %v5615_v30 = vld [vmem:[%s20169_s14 + $0x968] sm:$0xff] }
 0x41a   :  { %8490 = vmatpush1.bf16.msra.mxu1 %v13195_v49  ;;  %v5579_v49 = vld [vmem:[%s20169_s14 + $0x848] sm:$0xff]  ;;  %v13286_v18 = vcombine.high %v5611_v5, %v5615_v30 }
 0x41b   :  { %8654 = vmatpush1.bf16.msra.mxu0 %v13197_v42  ;;  %8491 = vmatprep.subr.bf16.mxu1 %v13204_v35  ;;  %v5583_v42 = vld [vmem:[%s20169_s14 + $0x868] sm:$0xff]  ;;  %v13243_v35 = vcombine.low %v5570_v31, %v5574_v32  ;;  %v5622_v31 = vld [vmem:[%s20169_s14 + $0x9a0] sm:$0xff] }
 0x41c   :  { %8655 = vmatprep.subr.bf16.mxu0 %v13206_v44  ;;  %v17838_v44 = vpack.c.bf16 %v5300_v26, %v5300_v26  ;;  %v13254_v12 = vcombine.high %v5579_v49, %v5583_v42  ;;  %v13253_v51 = vcombine.low %v5579_v49, %v5583_v42  ;;  %v5619_v32 = vld [vmem:[%s20169_s14 + $0x988] sm:$0xff] }
 0x41d   :  { %v5623_v20 = vld [vmem:[%s20169_s14 + $0x9a8] sm:$0xff] }
 0x41e   :  { %8492 = vmatpush1.bf16.msra.mxu1 %v13203_v19  ;;  %v5590_v19 = vld [vmem:[%s20169_s14 + $0x8a0] sm:$0xff]  ;;  %v13293_v42 = vcombine.low %v5619_v32, %v5623_v20 }
 0x41f   :  { %8656 = vmatpush1.bf16.msra.mxu0 %v13205_v22  ;;  %8493 = vmatprep.subr.bf16.mxu1 %v13212_v46  ;;  %v5587_v22 = vld [vmem:[%s20169_s14 + $0x888] sm:$0xff]  ;;  %v13260_v52 = vcombine.high %v5586_v45, %v5590_v19 }
 0x420   :  { %8657 = vmatprep.subr.bf16.mxu0 %v13214_v50  ;;  %v5591_v46 = vld [vmem:[%s20169_s14 + $0x8a8] sm:$0xff]  ;;  %v13251_v50 = vcombine.low %v5578_v40, %v5582_v41 }
 0x421   :  { %v13262_v37 = vcombine.high %v5587_v22, %v5591_v46  ;;  %v13261_v15 = vcombine.low %v5587_v22, %v5591_v46  ;;  %v5627_v40 = vld [vmem:[%s20169_s14 + $0x9c8] sm:$0xff] }
 0x422   :  { %8494 = vmatpush1.bf16.msra.mxu1 %v13211_v57  ;;  %v5595_v57 = vld [vmem:[%s20169_s14 + $0x8c8] sm:$0xff] }
 0x423   :  { %8658 = vmatpush1.bf16.msra.mxu0 %v13213_v58  ;;  %8495 = vmatprep.subr.bf16.mxu1 %v13220_v59  ;;  %v5599_v58 = vld [vmem:[%s20169_s14 + $0x8e8] sm:$0xff]  ;;  %v13259_v59 = vcombine.low %v5586_v45, %v5590_v19 }
 0x424   :  { %8659 = vmatprep.subr.bf16.mxu0 %v13222_v61  ;;  %v13268_v61 = vcombine.high %v5594_v11, %v5598_v54  ;;  %v13270_v62 = vcombine.high %v5595_v57, %v5599_v58  ;;  %v5631_v41 = vld [vmem:[%s20169_s14 + $0x9e8] sm:$0xff] }
 0x425   :  { %v5635_v45 = vld [vmem:[%s20169_s14 + $0xa08] sm:$0xff]  ;;  %v13301_v46 = vcombine.low %v5627_v40, %v5631_v41 }
 0x426   :  { %8496 = vmatpush1.bf16.msra.mxu1 %v13219_v4  ;;  %v5607_v4 = vld [vmem:[%s20169_s14 + $0x928] sm:$0xff] }
 0x427   :  { %8660 = vmatpush1.bf16.msra.mxu0 %v13221_v47  ;;  %8497 = vmatprep.subr.bf16.mxu1 %v13228_v48  ;;  %v13267_v47 = vcombine.low %v5594_v11, %v5598_v54  ;;  %v13269_v48 = vcombine.low %v5595_v57, %v5599_v58  ;;  %v5639_v19 = vld [vmem:[%s20169_s14 + $0xa28] sm:$0xff] }
 0x428   :  { %8661 = vmatprep.subr.bf16.mxu0 %v13230_v7  ;;  %v13278_v7 = vcombine.high %v5603_v3, %v5607_v4  ;;  %v5643_v11 = vld [vmem:[%s20169_s14 + $0xa48] sm:$0xff]  ;;  %v13309_v58 = vcombine.low %v5635_v45, %v5639_v19 }
 0x429   :  { %v5647_v54 = vld [vmem:[%s20169_s14 + $0xa68] sm:$0xff] }
 0x42a   :  { %8498 = vmatpush1.bf16.msra.mxu1 %v13227_v13  ;;  %v13275_v13 = vcombine.low %v5602_v14, %v5606_v63  ;;  %v5651_v14 = vld [vmem:[%s20169_s14 + $0xa88] sm:$0xff] }
 0x42b   :  { %8662 = vmatpush1.bf16.msra.mxu0 %v13229_v25  ;;  %8499 = vmatprep.subr.bf16.mxu1 %v13236_v16  ;;  %v13277_v25 = vcombine.low %v5603_v3, %v5607_v4  ;;  %v13284_v16 = vcombine.high %v5610_v9, %v5614_v10  ;;  %v5655_v63 = vld [vmem:[%s20169_s14 + $0xaa8] sm:$0xff]  ;;  %v13317_v4 = vcombine.low %v5643_v11, %v5647_v54 }
 0x42c   :  { %8663 = vmatprep.subr.bf16.mxu0 %v13238_v24  ;;  %v5618_v24 = vld [vmem:[%s20169_s14 + $0x980] sm:$0xff]  ;;  %v5659_v9 = vld [vmem:[%s20169_s14 + $0xac8] sm:$0xff] }
 0x42d   :  { %v13292_v26 = vcombine.high %v5618_v24, %v5622_v31  ;;  %v13291_v49 = vcombine.low %v5618_v24, %v5622_v31  ;;  %v5663_v10 = vld [vmem:[%s20169_s14 + $0xae8] sm:$0xff] }
 0x42e   :  { %8500 = vmatpush1.bf16.msra.mxu1 %v13235_v55  ;;  %v13285_v55 = vcombine.low %v5611_v5, %v5615_v30  ;;  %v13325_v30 = vcombine.low %v5651_v14, %v5655_v63  ;;  %v5667_v24 = vld [vmem:[%s20169_s14 + $0xb08] sm:$0xff] }
 0x42f   :  { %8664 = vmatpush1.bf16.msra.mxu0 %v13237_v29  ;;  %8510 = vmatprep.subr.bf16.mxu1 %v13244_v38  ;;  %v13294_v29 = vcombine.high %v5619_v32, %v5623_v20  ;;  %v5626_v38 = vld [vmem:[%s20169_s14 + $0x9c0] sm:$0xff]  ;;  %v5671_v31 = vld [vmem:[%s20169_s14 + $0xb28] sm:$0xff]  ;;  %v13333_v20 = vcombine.low %v5659_v9, %v5663_v10 }
 0x430   :  { %8674 = vmatprep.subr.bf16.mxu0 %v13246_v39  ;;  %v5630_v39 = vld [vmem:[%s20169_s14 + $0x9e0] sm:$0xff] }
 0x431   :  { %8502 = vmatmul.mubr.bf16.vlgmr.msra.gmra.mrb[24].mxu1 %v17838_v44  ;;  %v13299_v22 = vcombine.low %v5626_v38, %v5630_v39 }
 0x432   :  { %8666 = vmatmul.mubr.bf16.vlgmr.msra.gmra.mrb[20].mxu0 %v17838_v44  ;;  %8511 = vmatpush1.bf16.msra.mxu1 %v13243_v35  ;;  %v13300_v35 = vcombine.high %v5626_v38, %v5630_v39  ;;  %v5675_v38 = vld [vmem:[%s20169_s14 + $0xb48] sm:$0xff] }
 0x433   :  { %8675 = vmatpush1.bf16.msra.mxu0 %v13245_v8  ;;  %8512 = vmatprep.subr.bf16.mxu1 %v13252_v17  ;;  %v13302_v8 = vcombine.high %v5627_v40, %v5631_v41  ;;  %v5634_v17 = vld [vmem:[%s20169_s14 + $0xa00] sm:$0xff]  ;;  %v5679_v39 = vld [vmem:[%s20169_s14 + $0xb68] sm:$0xff]  ;;  %v13341_v41 = vcombine.low %v5667_v24, %v5671_v31 }
 0x434   :  { %8676 = vmatprep.subr.bf16.mxu0 %v13254_v12  ;;  %v5638_v12 = vld [vmem:[%s20169_s14 + $0xa20] sm:$0xff] }
 0x435   :  { %v13307_v57 = vcombine.low %v5634_v17, %v5638_v12 }
 0x436   :  { %8513 = vmatpush1.bf16.msra.mxu1 %v13251_v50  ;;  %v13308_v50 = vcombine.high %v5634_v17, %v5638_v12  ;;  %v5683_v17 = vld [vmem:[%s20169_s14 + $0xb88] sm:$0xff] }
 0x437   :  { %8677 = vmatpush1.bf16.msra.mxu0 %v13253_v51  ;;  %8514 = vmatprep.subr.bf16.mxu1 %v13260_v52  ;;  %v13310_v51 = vcombine.high %v5635_v45, %v5639_v19  ;;  %v5642_v52 = vld [vmem:[%s20169_s14 + $0xa40] sm:$0xff]  ;;  %v5687_v12 = vld [vmem:[%s20169_s14 + $0xba8] sm:$0xff]  ;;  %v13349_v19 = vcombine.low %v5675_v38, %v5679_v39 }
 0x438   :  { %8678 = vmatprep.subr.bf16.mxu0 %v13262_v37  ;;  %v5646_v37 = vld [vmem:[%s20169_s14 + $0xa60] sm:$0xff] }
 0x439   :  { %v13315_v3 = vcombine.low %v5642_v52, %v5646_v37 }
 0x43a   :  { %8515 = vmatpush1.bf16.msra.mxu1 %v13259_v59  ;;  %v13316_v59 = vcombine.high %v5642_v52, %v5646_v37  ;;  %v5691_v52 = vld [vmem:[%s20169_s14 + $0xbc8] sm:$0xff] }
 0x43b   :  { %8679 = vmatpush1.bf16.msra.mxu0 %v13261_v15  ;;  %8516 = vmatprep.subr.bf16.mxu1 %v13268_v61  ;;  %v13318_v15 = vcombine.high %v5643_v11, %v5647_v54  ;;  %v5650_v61 = vld [vmem:[%s20169_s14 + $0xa80] sm:$0xff]  ;;  %v5695_v37 = vld [vmem:[%s20169_s14 + $0xbe8] sm:$0xff]  ;;  %v13357_v54 = vcombine.low %v5683_v17, %v5687_v12 }
 0x43c   :  { %8680 = vmatprep.subr.bf16.mxu0 %v13270_v62  ;;  %v5654_v62 = vld [vmem:[%s20169_s14 + $0xaa0] sm:$0xff] }
 0x43d   :  { %v13323_v5 = vcombine.low %v5650_v61, %v5654_v62 }
 0x43e   :  { %8517 = vmatpush1.bf16.msra.mxu1 %v13267_v47  ;;  %v13324_v47 = vcombine.high %v5650_v61, %v5654_v62  ;;  %v18023_v61 = vld [vmem:[%s20169_s14 + $0xc08] sm:$0xff] }
 0x43f   :  { %8681 = vmatpush1.bf16.msra.mxu0 %v13269_v48  ;;  %8518 = vmatprep.subr.bf16.mxu1 %v13276_v6  ;;  %v13326_v48 = vcombine.high %v5651_v14, %v5655_v63  ;;  %v5658_v6 = vld [vmem:[%s20169_s14 + $0xac0] sm:$0xff]  ;;  %v18028_v62 = vld [vmem:[%s20169_s14 + $0xc28] sm:$0xff]  ;;  %v13365_v63 = vcombine.low %v5691_v52, %v5695_v37 }
 0x440   :  { %8682 = vmatprep.subr.bf16.mxu0 %v13278_v7  ;;  %v5662_v7 = vld [vmem:[%s20169_s14 + $0xae0] sm:$0xff] }
 0x441   :  { %v13331_v32 = vcombine.low %v5658_v6, %v5662_v7 }
 0x442   :  { %8519 = vmatpush1.bf16.msra.mxu1 %v13275_v13  ;;  %v13332_v13 = vcombine.high %v5658_v6, %v5662_v7 }
 0x443   :  { %8683 = vmatpush1.bf16.msra.mxu0 %v13277_v25  ;;  %8520 = vmatprep.subr.bf16.mxu1 %v13284_v16  ;;  %v13334_v25 = vcombine.high %v5659_v9, %v5663_v10  ;;  %v5666_v16 = vld [vmem:[%s20169_s14 + $0xb00] sm:$0xff] }
 0x444   :  { %8684 = vmatprep.subr.bf16.mxu0 %v13286_v18  ;;  %v5670_v18 = vld [vmem:[%s20169_s14 + $0xb20] sm:$0xff] }
 0x445   :  { %v13339_v40 = vcombine.low %v5666_v16, %v5670_v18 }
 0x446   :  { %8521 = vmatpush1.bf16.msra.mxu1 %v13283_v23  ;;  %v13340_v23 = vcombine.high %v5666_v16, %v5670_v18 }
 0x447   :  { %8685 = vmatpush1.bf16.msra.mxu0 %v13285_v55  ;;  %8522 = vmatprep.subr.bf16.mxu1 %v13292_v26  ;;  %v13342_v55 = vcombine.high %v5667_v24, %v5671_v31  ;;  %v5674_v26 = vld [vmem:[%s20169_s14 + $0xb40] sm:$0xff] }
 0x448   :  { %8686 = vmatprep.subr.bf16.mxu0 %v13294_v29  ;;  %v5678_v29 = vld [vmem:[%s20169_s14 + $0xb60] sm:$0xff] }
 0x449   :  { %v13347_v45 = vcombine.low %v5674_v26, %v5678_v29 }
 0x44a   :  { %8523 = vmatpush1.bf16.msra.mxu1 %v13291_v49  ;;  %v13348_v49 = vcombine.high %v5674_v26, %v5678_v29 }
 0x44b   :  { %8687 = vmatpush1.bf16.msra.mxu0 %v13293_v42  ;;  %8524 = vmatprep.subr.bf16.mxu1 %v13300_v35  ;;  %v13350_v42 = vcombine.high %v5675_v38, %v5679_v39  ;;  %v5682_v35 = vld [vmem:[%s20169_s14 + $0xb80] sm:$0xff] }
 0x44c   :  { %8688 = vmatprep.subr.bf16.mxu0 %v13302_v8  ;;  %v5686_v8 = vld [vmem:[%s20169_s14 + $0xba0] sm:$0xff] }
 0x44d   :  { %v13355_v11 = vcombine.low %v5682_v35, %v5686_v8 }
 0x44e   :  { %8525 = vmatpush1.bf16.msra.mxu1 %v13299_v22  ;;  %v13356_v22 = vcombine.high %v5682_v35, %v5686_v8 }
 0x44f   :  { %8689 = vmatpush1.bf16.msra.mxu0 %v13301_v46  ;;  %8526 = vmatprep.subr.bf16.mxu1 %v13308_v50  ;;  %v13358_v46 = vcombine.high %v5683_v17, %v5687_v12  ;;  %v5690_v50 = vld [vmem:[%s20169_s14 + $0xbc0] sm:$0xff] }
 0x450   :  { %8690 = vmatprep.subr.bf16.mxu0 %v13310_v51  ;;  %v5694_v51 = vld [vmem:[%s20169_s14 + $0xbe0] sm:$0xff] }
 0x451   :  { %v13363_v14 = vcombine.low %v5690_v50, %v5694_v51 }
 0x452   :  { %8527 = vmatpush1.bf16.msra.mxu1 %v13307_v57  ;;  %v13364_v57 = vcombine.high %v5690_v50, %v5694_v51 }
 0x453   :  { %8691 = vmatpush1.bf16.msra.mxu0 %v13309_v58  ;;  %8528 = vmatprep.subr.bf16.mxu1 %v13316_v59  ;;  %v13366_v58 = vcombine.high %v5691_v52, %v5695_v37  ;;  %v18013_v59 = vld [vmem:[%s20169_s14 + $0xc00] sm:$0xff] }
 0x454   :  { %8692 = vmatprep.subr.bf16.mxu0 %v13318_v15  ;;  %v18018_v15 = vld [vmem:[%s20169_s14 + $0xc20] sm:$0xff] }
 0x455   :  { %v5706_v52 = vld [vmem:[%s20169_s14 + $0xc40] sm:$0xff] }
 0x456   :  { %8529 = vmatpush1.bf16.msra.mxu1 %v13315_v3  ;;  %v13372_v3 = vcombine.high %v18013_v59, %v18018_v15 }
 0x457   :  { %8693 = vmatpush1.bf16.msra.mxu0 %v13317_v4  ;;  %8530 = vmatprep.subr.bf16.mxu1 %v13324_v47  ;;  %v13374_v4 = vcombine.high %v18023_v61, %v18028_v62  ;;  %v2336_v47 = vsub.s32 7, %v15545_v33 }
 0x458   :  { %8694 = vmatprep.subr.bf16.mxu0 %v13326_v48  ;;  %v18038_v48 = vld [vmem:[%s20168_s18] sm:$0xff] }
 0x459   :  { %v2325_v6 = vrot.slane %v18038_v48, %v16443_v28  ;;  %v2329_v7 = vrot.slane %v18038_v48, %v16381_v0  ;;  %v2337_v9 = vrot.slane %v18038_v48, %v2336_v47 }
 0x45a   :  { %8531 = vmatpush1.bf16.msra.mxu1 %v13323_v5 }
 0x45b   :  { %8695 = vmatpush1.bf16.msra.mxu0 %v13325_v30  ;;  %8532 = vmatprep.subr.bf16.mxu1 %v13332_v13 }
 0x45c   :  { %8696 = vmatprep.subr.bf16.mxu0 %v13334_v25 }
 0x45e   :  { %8533 = vmatpush1.bf16.msra.mxu1 %v13331_v32 }
 0x45f   :  { %8697 = vmatpush1.bf16.msra.mxu0 %v13333_v20  ;;  %8534 = vmatprep.subr.bf16.mxu1 %v13340_v23 }
 0x460   :  { %8698 = vmatprep.subr.bf16.mxu0 %v13342_v55 }
 0x462   :  { %8535 = vmatpush1.bf16.msra.mxu1 %v13339_v40 }
 0x463   :  { %8699 = vmatpush1.bf16.msra.mxu0 %v13341_v41  ;;  %8536 = vmatprep.subr.bf16.mxu1 %v13348_v49 }
 0x464   :  { %8700 = vmatprep.subr.bf16.mxu0 %v13350_v42 }
 0x466   :  { %8537 = vmatpush1.bf16.msra.mxu1 %v13347_v45 }
 0x467   :  { %8701 = vmatpush1.bf16.msra.mxu0 %v13349_v19  ;;  %8538 = vmatprep.subr.bf16.mxu1 %v13356_v22 }
 0x468   :  { %8702 = vmatprep.subr.bf16.mxu0 %v13358_v46 }
 0x46a   :  { %8539 = vmatpush1.bf16.msra.mxu1 %v13355_v11  ;;  %v5710_v11 = vld [vmem:[%s20169_s14 + $0xc60] sm:$0xff] }
 0x46b   :  { %8703 = vmatpush1.bf16.msra.mxu0 %v13357_v54  ;;  %8540 = vmatprep.subr.bf16.mxu1 %v13364_v57  ;;  %v5707_v54 = vld [vmem:[%s20169_s14 + $0xc48] sm:$0xff] }
 0x46c   :  { %8704 = vmatprep.subr.bf16.mxu0 %v13366_v58  ;;  %v5711_v57 = vld [vmem:[%s20169_s14 + $0xc68] sm:$0xff] }
 0x46e   :  { %8541 = vmatpush1.bf16.msra.mxu1 %v13363_v14  ;;  %v13371_v14 = vcombine.low %v18013_v59, %v18018_v15  ;;  %v5715_v59 = vld [vmem:[%s20169_s14 + $0xc88] sm:$0xff] }
 0x46f   :  { %8705 = vmatpush1.bf16.msra.mxu0 %v13365_v63  ;;  %8551 = vmatprep.subr.bf16.mxu1 %v13372_v3  ;;  %v13373_v63 = vcombine.low %v18023_v61, %v18028_v62  ;;  %v5719_v15 = vld [vmem:[%s20169_s14 + $0xca8] sm:$0xff]  ;;  %v13379_v62 = vcombine.low %v5706_v52, %v5710_v11 }
 0x470   :  { %8715 = vmatprep.subr.bf16.mxu0 %v13374_v4  ;;  %v5714_v4 = vld [vmem:[%s20169_s14 + $0xc80] sm:$0xff] }
 0x484   :  { %v5071_v10 = vpop.f32.mrb[20].mxu1 }
 0x485   :  { %v14248_v5 = vadd.f32 %v5071_v10, %v2325_v6  ;;  %v18047_v30 = vpop.f32.mrb[16].mxu0  ;;  %v5073_v13 = vpop.f32.mrb[21].mxu1  ;;  %v13380_v6 = vcombine.high %v5706_v52, %v5710_v11  ;;  %v13381_v10 = vcombine.low %v5707_v54, %v5711_v57  ;;  %v5751_v52 = vld [vmem:[%s20169_s14 + $0xda8] sm:$0xff] }
 0x486   :  { %v14249_v25 = vadd.f32 %v5073_v13, %v2329_v7  ;;  %v5237_v16 = vpop.f32.mrb[17].mxu0  ;;  %v5075_v18 = vpop.f32.mrb[22].mxu1  ;;  %v13382_v7 = vcombine.high %v5707_v54, %v5711_v57  ;;  %v13390_v13 = vcombine.high %v5715_v59, %v5719_v15  ;;  %v2333_v54 = vrot.slane %v18038_v48, %v16263_v21  ;;  %v5759_v48 = vld [vmem:[%s20169_s14 + $0xde8] sm:$0xff] }
 0x487   :  { %v5246_v24 = vmin.f32 %v14248_v5, 0.0  ;;  %v14251_v31 = vadd.f32 %v5237_v16, %v2337_v9  ;;  %v5239_v32 = vpop.f32.mrb[18].mxu0  ;;  %v5076_v20 = vpop.f32.mrb[23].mxu1  ;;  %vm5286_vm15 = vcmp.gt.f32.partialorder %v14248_v5, 0.0  ;;  %v5718_v9 = vld [vmem:[%s20169_s14 + $0xca0] sm:$0xff]  ;;  %v5723_v18 = vld [vmem:[%s20169_s14 + $0xcc8] sm:$0xff] }
 0x488   :  { %v5247_v23 = vmin.f32 %v14249_v25, 0.0  ;;  %v5240_v55 = vpop.f32.mrb[19].mxu0  ;;  %vm5287_vm1 = vcmp.gt.f32.partialorder %v14249_v25, 0.0  ;;  %v5726_v16 = vld [vmem:[%s20169_s14 + $0xce0] sm:$0xff]  ;;  %v13389_v32 = vcombine.low %v5715_v59, %v5719_v15  ;;  %v18152_v59 = vadd.f32 %v18047_v30, %v2333_v54  ;;  %v5767_v30 = vld [vmem:[%s20169_s14 + $0xe28] sm:$0xff] }
 0x489   :  { %v5258_v26 = vmul.f32 1.442695, %v5246_v24  ;;  %v5249_v29 = vmin.f32 %v14251_v31, 0.0  ;;  %vm5289_vm2 = vcmp.gt.f32.partialorder %v14251_v31, 0.0  ;;  %v5727_v24 = vld [vmem:[%s20169_s14 + $0xce8] sm:$0xff]  ;;  %v5730_v55 = vld [vmem:[%s20169_s14 + $0xd00] sm:$0xff] }
 0x48a   :  { %v5260_v38 = vmul.f32 1.442695, %v5247_v23  ;;  %v13398_v23 = vcombine.high %v5723_v18, %v5727_v24  ;;  %v5794_v54 = vld [vmem:[%s20169_s14 + $0xf00] sm:$0xff]  ;;  %vm5288_vm3 = vcmp.gt.f32.partialorder %v18152_v59, 0.0 }
 0x48b   :  { %15060 = vpow2.f32 %v5258_v26  ;;  %v5264_v39 = vmul.f32 1.442695, %v5249_v29  ;;  %v5734_v26 = vld [vmem:[%s20169_s14 + $0xd20] sm:$0xff]  ;;  %v5731_v29 = vld [vmem:[%s20169_s14 + $0xd08] sm:$0xff] }
 0x48c   :  { %15062 = vpow2.f32 %v5260_v38  ;;  %v5735_v38 = vld [vmem:[%s20169_s14 + $0xd28] sm:$0xff] }
 0x48d   :  { %15064 = vpow2.f32 %v5264_v39 }
 0x495   :  { %v15061_v40 = vpop.eup %15060 }
 0x496   :  { %v12983_v41 = vadd.f32 -1.0, %v15061_v40  ;;  %v15063_v49 = vpop.eup %15062  ;;  %v13397_v40 = vcombine.low %v5723_v18, %v5727_v24  ;;  %v5248_v18 = vmin.f32 %v18152_v59, 0.0 }
 0x497   :  { %v15065_v42 = vpop.eup %15064  ;;  %v12984_v8 = vadd.f32 -1.0, %v15063_v49  ;;  %v13406_v49 = vcombine.high %v5731_v29, %v5735_v38 }
 0x498   :  { %v5278_v35 = vmul.f32 1.6732632, %v12983_v41  ;;  %v12986_v17 = vadd.f32 -1.0, %v15065_v42  ;;  %v13404_v41 = vcombine.high %v5730_v55, %v5734_v26  ;;  %v5738_v42 = vld [vmem:[%s20169_s14 + $0xd40] sm:$0xff] }
 0x499   :  { %v5279_v45 = vmul.f32 1.6732632, %v12984_v8  ;;  %v5739_v8 = vld [vmem:[%s20169_s14 + $0xd48] sm:$0xff] }
 0x49a   :  { %v5294_v12 = vsel %vm5286_vm15, %v14248_v5, %v5278_v35  ;;  %v5281_v19 = vmul.f32 1.6732632, %v12986_v17  ;;  %v13388_v5 = vcombine.high %v5714_v4, %v5718_v9  ;;  %v5742_v35 = vld [vmem:[%s20169_s14 + $0xd60] sm:$0xff]  ;;  %v5743_v17 = vld [vmem:[%s20169_s14 + $0xd68] sm:$0xff] }
 0x49b   :  { %v5302_v22 = vmul.f32 1.050701, %v5294_v12  ;;  %v5295_v46 = vsel %vm5287_vm1, %v14249_v25, %v5279_v45  ;;  %v5722_v25 = vld [vmem:[%s20169_s14 + $0xcc0] sm:$0xff]  ;;  %v13403_v12 = vcombine.low %v5730_v55, %v5734_v26  ;;  %v13405_v45 = vcombine.low %v5731_v29, %v5735_v38  ;;  %v5775_v55 = vld [vmem:[%s20169_s14 + $0xe68] sm:$0xff] }
 0x49c   :  { %v5303_v50 = vmul.f32 1.050701, %v5295_v46  ;;  %v5297_v51 = vsel %vm5289_vm2, %v14251_v31, %v5281_v19  ;;  %v13387_v31 = vcombine.low %v5714_v4, %v5718_v9  ;;  %v13396_v20 = vcombine.high %v5722_v25, %v5726_v16  ;;  %v5746_v46 = vld [vmem:[%s20169_s14 + $0xd80] sm:$0xff] }
 0x49d   :  { %v5305_v37 = vmul.f32 1.050701, %v5297_v51  ;;  %v18067_v3 = vpack.c.bf16 %v5302_v22, %v5302_v22  ;;  %v13395_v39 = vcombine.low %v5722_v25, %v5726_v16  ;;  %v13412_v19 = vcombine.high %v5738_v42, %v5742_v35  ;;  %v5747_v51 = vld [vmem:[%s20169_s14 + $0xd88] sm:$0xff]  ;;  %v5758_v4 = vld [vmem:[%s20169_s14 + $0xde0] sm:$0xff] }
 0x49e   :  { %v18061_v58 = vpack.c.bf16 %v5303_v50, %v5303_v50  ;;  %v13414_v22 = vcombine.high %v5739_v8, %v5743_v17  ;;  %v5750_v50 = vld [vmem:[%s20169_s14 + $0xda0] sm:$0xff]  ;;  %v13413_v11 = vcombine.low %v5739_v8, %v5743_v17  ;;  %v13421_v9 = vcombine.low %v5747_v51, %v5751_v52 }
 0x49f   :  { %v18083_v61 = vpack.c.bf16 %v5305_v37, %v5305_v37  ;;  %v13411_v37 = vcombine.low %v5738_v42, %v5742_v35  ;;  %v13420_v57 = vcombine.high %v5746_v46, %v5750_v50  ;;  %v5262_v38 = vmul.f32 1.442695, %v5248_v18  ;;  %v5779_v42 = vld [vmem:[%s20169_s14 + $0xe88] sm:$0xff]  ;;  %v5810_v18 = vld [vmem:[%s20169_s14 + $0xf80] sm:$0xff] }
 0x4a0   :  { %8542 = vmatprep.mubr.bf16.mxu1 %v18061_v58  ;;  %8706 = vmatprep.mubr.bf16.mxu0 %v18061_v58  ;;  %v5783_v35 = vld [vmem:[%s20169_s14 + $0xea8] sm:$0xff] }
 0x4a1   :  { %8543 = vmatmul.mubr.bf16.vlgmr.msra.gmra.mrb[24].mxu1 %v18067_v3  ;;  %8707 = vmatmul.mubr.bf16.vlgmr.msra.gmra.mrb[20].mxu0 %v18067_v3  ;;  %15066 = vpow2.f32 %v5262_v38  ;;  %v5818_v38 = vld [vmem:[%s20169_s14 + $0xfc0] sm:$0xff] }
 0x4a2   :  { %8552 = vmatpush1.bf16.msra.mxu1 %v13371_v14  ;;  %8716 = vmatpush1.bf16.msra.mxu0 %v13373_v63  ;;  %v13422_v14 = vcombine.high %v5747_v51, %v5751_v52  ;;  %v5754_v63 = vld [vmem:[%s20169_s14 + $0xdc0] sm:$0xff]  ;;  %v13453_v52 = vcombine.low %v5779_v42, %v5783_v35 }
 0x4a3   :  { %8583 = vmatprep.mubr.bf16.mxu1 %v18083_v61  ;;  %8747 = vmatprep.mubr.bf16.mxu0 %v18083_v61  ;;  %v13428_v15 = vcombine.high %v5754_v63, %v5758_v4  ;;  %v13427_v25 = vcombine.low %v5754_v63, %v5758_v4  ;;  %v5799_v63 = vld [vmem:[%s20169_s14 + $0xf28] sm:$0xff] }
 0x4a4   :  { %8553 = vmatprep.subr.bf16.mxu1 %v13380_v6  ;;  %8717 = vmatprep.subr.bf16.mxu0 %v13382_v7  ;;  %v5755_v6 = vld [vmem:[%s20169_s14 + $0xdc8] sm:$0xff]  ;;  %v13419_v7 = vcombine.low %v5746_v46, %v5750_v50 }
 0x4a5   :  { %v13429_v16 = vcombine.low %v5755_v6, %v5759_v48  ;;  %v5787_v46 = vld [vmem:[%s20169_s14 + $0xec8] sm:$0xff] }
 0x4a6   :  { %8554 = vmatpush1.bf16.msra.mxu1 %v13379_v62  ;;  %8718 = vmatpush1.bf16.msra.mxu0 %v13381_v10  ;;  %v13430_v62 = vcombine.high %v5755_v6, %v5759_v48  ;;  %v5762_v10 = vld [vmem:[%s20169_s14 + $0xe00] sm:$0xff]  ;;  %v5791_v50 = vld [vmem:[%s20169_s14 + $0xee8] sm:$0xff] }
 0x4a7   :  { %8555 = vmatprep.subr.bf16.mxu1 %v13388_v5  ;;  %8719 = vmatprep.subr.bf16.mxu0 %v13390_v13  ;;  %v5766_v5 = vld [vmem:[%s20169_s14 + $0xe20] sm:$0xff]  ;;  %v5763_v13 = vld [vmem:[%s20169_s14 + $0xe08] sm:$0xff]  ;;  %v13461_v6 = vcombine.low %v5787_v46, %v5791_v50 }
 0x4a8   :  { %v13436_v24 = vcombine.high %v5762_v10, %v5766_v5  ;;  %v13435_v26 = vcombine.low %v5762_v10, %v5766_v5  ;;  %v13437_v29 = vcombine.low %v5763_v13, %v5767_v30  ;;  %v5807_v10 = vld [vmem:[%s20169_s14 + $0xf68] sm:$0xff] }
 0x4aa   :  { %8556 = vmatpush1.bf16.msra.mxu1 %v13387_v31  ;;  %8720 = vmatpush1.bf16.msra.mxu0 %v13389_v32  ;;  %v13438_v31 = vcombine.high %v5763_v13, %v5767_v30  ;;  %v5770_v32 = vld [vmem:[%s20169_s14 + $0xe40] sm:$0xff] }
 0x4ab   :  { %8557 = vmatprep.subr.bf16.mxu1 %v13396_v20  ;;  %8721 = vmatprep.subr.bf16.mxu0 %v13398_v23  ;;  %v5774_v20 = vld [vmem:[%s20169_s14 + $0xe60] sm:$0xff]  ;;  %v5771_v23 = vld [vmem:[%s20169_s14 + $0xe48] sm:$0xff]  ;;  %v15067_v5 = vpop.eup %15066 }
 0x4ac   :  { %v13443_v8 = vcombine.low %v5770_v32, %v5774_v20  ;;  %v13445_v17 = vcombine.low %v5771_v23, %v5775_v55 }
 0x4ae   :  { %8558 = vmatpush1.bf16.msra.mxu1 %v13395_v39  ;;  %8722 = vmatpush1.bf16.msra.mxu0 %v13397_v40  ;;  %v13444_v39 = vcombine.high %v5770_v32, %v5774_v20  ;;  %v13446_v40 = vcombine.high %v5771_v23, %v5775_v55  ;;  %v5811_v32 = vld [vmem:[%s20169_s14 + $0xf88] sm:$0xff] }
 0x4af   :  { %8559 = vmatprep.subr.bf16.mxu1 %v13404_v41  ;;  %8723 = vmatprep.subr.bf16.mxu0 %v13406_v49  ;;  %v5778_v41 = vld [vmem:[%s20169_s14 + $0xe80] sm:$0xff]  ;;  %v5815_v20 = vld [vmem:[%s20169_s14 + $0xfa8] sm:$0xff] }
 0x4b0   :  { %v5782_v49 = vld [vmem:[%s20169_s14 + $0xea0] sm:$0xff] }
 0x4b1   :  { %v13451_v51 = vcombine.low %v5778_v41, %v5782_v49 }
 0x4b2   :  { %8560 = vmatpush1.bf16.msra.mxu1 %v13403_v12  ;;  %8724 = vmatpush1.bf16.msra.mxu0 %v13405_v45  ;;  %v13452_v12 = vcombine.high %v5778_v41, %v5782_v49  ;;  %v13454_v45 = vcombine.high %v5779_v42, %v5783_v35  ;;  %v5819_v41 = vld [vmem:[%s20169_s14 + $0xfc8] sm:$0xff]  ;;  %v13485_v35 = vcombine.low %v5811_v32, %v5815_v20 }
 0x4b3   :  { %8561 = vmatprep.subr.bf16.mxu1 %v13412_v19  ;;  %8725 = vmatprep.subr.bf16.mxu0 %v13414_v22  ;;  %v5786_v19 = vld [vmem:[%s20169_s14 + $0xec0] sm:$0xff]  ;;  %v5823_v49 = vld [vmem:[%s20169_s14 + $0xfe8] sm:$0xff] }
 0x4b4   :  { %v5790_v22 = vld [vmem:[%s20169_s14 + $0xee0] sm:$0xff] }
 0x4b5   :  { %v13459_v4 = vcombine.low %v5786_v19, %v5790_v22 }
 0x4b6   :  { %8562 = vmatpush1.bf16.msra.mxu1 %v13411_v37  ;;  %8726 = vmatpush1.bf16.msra.mxu0 %v13413_v11  ;;  %v13460_v37 = vcombine.high %v5786_v19, %v5790_v22  ;;  %v13462_v11 = vcombine.high %v5787_v46, %v5791_v50  ;;  %v5320_v19 = vld [vmem:[%s20169_s14 + $0x30] sm:$0xff]  ;;  %v5317_v22 = vld [vmem:[%s20169_s14 + $0x18] sm:$0xff] }
 0x4b7   :  { %8563 = vmatprep.subr.bf16.mxu1 %v13420_v57  ;;  %8727 = vmatprep.subr.bf16.mxu0 %v13422_v14  ;;  %v5798_v57 = vld [vmem:[%s20169_s14 + $0xf20] sm:$0xff]  ;;  %v5795_v14 = vld [vmem:[%s20169_s14 + $0xf08] sm:$0xff]  ;;  %v5321_v46 = vld [vmem:[%s20169_s14 + $0x38] sm:$0xff] }
 0x4b8   :  { %v13468_v48 = vcombine.high %v5794_v54, %v5798_v57  ;;  %v13467_v13 = vcombine.low %v5794_v54, %v5798_v57  ;;  %v13469_v30 = vcombine.low %v5795_v14, %v5799_v63  ;;  %v5328_v54 = vld [vmem:[%s20169_s14 + $0x70] sm:$0xff]  ;;  %v5325_v57 = vld [vmem:[%s20169_s14 + $0x58] sm:$0xff] }
 0x4ba   :  { %8564 = vmatpush1.bf16.msra.mxu1 %v13419_v7  ;;  %8728 = vmatpush1.bf16.msra.mxu0 %v13421_v9  ;;  %v13470_v7 = vcombine.high %v5795_v14, %v5799_v63  ;;  %v5802_v9 = vld [vmem:[%s20169_s14 + $0xf40] sm:$0xff]  ;;  %v5329_v14 = vld [vmem:[%s20169_s14 + $0x78] sm:$0xff] }
 0x4bb   :  { %8565 = vmatprep.subr.bf16.mxu1 %v13428_v15  ;;  %8729 = vmatprep.subr.bf16.mxu0 %v13430_v62  ;;  %v5806_v15 = vld [vmem:[%s20169_s14 + $0xf60] sm:$0xff]  ;;  %v5803_v62 = vld [vmem:[%s20169_s14 + $0xf48] sm:$0xff] }
 0x4bc   :  { %v13475_v23 = vcombine.low %v5802_v9, %v5806_v15  ;;  %v13477_v55 = vcombine.low %v5803_v62, %v5807_v10 }
 0x4be   :  { %8566 = vmatpush1.bf16.msra.mxu1 %v13427_v25  ;;  %8730 = vmatpush1.bf16.msra.mxu0 %v13429_v16  ;;  %v13476_v25 = vcombine.high %v5802_v9, %v5806_v15  ;;  %v13478_v16 = vcombine.high %v5803_v62, %v5807_v10  ;;  %v5332_v9 = vld [vmem:[%s20169_s14 + $0x90] sm:$0xff]  ;;  %v5333_v62 = vld [vmem:[%s20169_s14 + $0x98] sm:$0xff] }
 0x4bf   :  { %8567 = vmatprep.subr.bf16.mxu1 %v13436_v24  ;;  %8731 = vmatprep.subr.bf16.mxu0 %v13438_v31  ;;  %v12985_v24 = vadd.f32 -1.0, %v15067_v5  ;;  %v5814_v31 = vld [vmem:[%s20169_s14 + $0xfa0] sm:$0xff]  ;;  %v5336_v15 = vld [vmem:[%s20169_s14 + $0xb0] sm:$0xff]  ;;  %v5337_v10 = vld [vmem:[%s20169_s14 + $0xb8] sm:$0xff] }
 0x4c0   :  { %v13483_v42 = vcombine.low %v5810_v18, %v5814_v31 }
 0x4c2   :  { %8568 = vmatpush1.bf16.msra.mxu1 %v13435_v26  ;;  %8732 = vmatpush1.bf16.msra.mxu0 %v13437_v29  ;;  %v13484_v26 = vcombine.high %v5810_v18, %v5814_v31  ;;  %v13486_v29 = vcombine.high %v5811_v32, %v5815_v20  ;;  %v5344_v18 = vld [vmem:[%s20169_s14 + $0xf0] sm:$0xff]  ;;  %v13007_v31 = vcombine.low %v5332_v9, %v5336_v15 }
 0x4c3   :  { %8569 = vmatprep.subr.bf16.mxu1 %v13444_v39  ;;  %8733 = vmatprep.subr.bf16.mxu0 %v13446_v40  ;;  %v5280_v39 = vmul.f32 1.6732632, %v12985_v24  ;;  %v5822_v40 = vld [vmem:[%s20169_s14 + $0xfe0] sm:$0xff]  ;;  %v5341_v24 = vld [vmem:[%s20169_s14 + $0xd8] sm:$0xff]  ;;  %v13009_v32 = vcombine.low %v5333_v62, %v5337_v10 }
 0x4c4   :  { %v13491_v50 = vcombine.low %v5818_v38, %v5822_v40 }
 0x4c6   :  { %8570 = vmatpush1.bf16.msra.mxu1 %v13443_v8  ;;  %8734 = vmatpush1.bf16.msra.mxu0 %v13445_v17  ;;  %v13492_v8 = vcombine.high %v5818_v38, %v5822_v40  ;;  %v13494_v17 = vcombine.high %v5819_v41, %v5823_v49  ;;  %v5353_v38 = vld [vmem:[%s20169_s14 + $0x138] sm:$0xff] }
 0x4c7   :  { %8571 = vmatprep.subr.bf16.mxu1 %v13452_v12  ;;  %8735 = vmatprep.subr.bf16.mxu0 %v13454_v45  ;;  %v5316_v12 = vld [vmem:[%s20169_s14 + $0x10] sm:$0xff]  ;;  %v5296_v45 = vsel %vm5288_vm3, %v18152_v59, %v5280_v39 }
 0x4c8   :  { %v12992_v59 = vcombine.high %v5316_v12, %v5320_v19  ;;  %v12991_v63 = vcombine.low %v5316_v12, %v5320_v19 }
 0x4ca   :  { %8572 = vmatpush1.bf16.msra.mxu1 %v13451_v51  ;;  %8736 = vmatpush1.bf16.msra.mxu0 %v13453_v52  ;;  %v13493_v51 = vcombine.low %v5819_v41, %v5823_v49  ;;  %v5304_v52 = vmul.f32 1.050701, %v5296_v45 }
 0x4cb   :  { %8573 = vmatprep.subr.bf16.mxu1 %v13460_v37  ;;  %8737 = vmatprep.subr.bf16.mxu0 %v13462_v11  ;;  %v12994_v37 = vcombine.high %v5317_v22, %v5321_v46  ;;  %v5324_v11 = vld [vmem:[%s20169_s14 + $0x50] sm:$0xff] }
 0x4cc   :  { %v12999_v5 = vcombine.low %v5324_v11, %v5328_v54 }
 0x4ce   :  { %8574 = vmatpush1.bf16.msra.mxu1 %v13459_v4  ;;  %8738 = vmatpush1.bf16.msra.mxu0 %v13461_v6  ;;  %v18277_v4 = vpack.c.bf16 %v5304_v52, %v5304_v52  ;;  %v12993_v6 = vcombine.low %v5317_v22, %v5321_v46  ;;  %v5364_v46 = vld [vmem:[%s20169_s14 + $0x190] sm:$0xff]  ;;  %v5369_v52 = vld [vmem:[%s20169_s14 + $0x1b8] sm:$0xff] }
 0x4cf   :  { %8575 = vmatprep.subr.bf16.mxu1 %v13468_v48  ;;  %8739 = vmatprep.subr.bf16.mxu0 %v13470_v7  ;;  %v13000_v48 = vcombine.high %v5324_v11, %v5328_v54  ;;  %v13002_v7 = vcombine.high %v5325_v57, %v5329_v14 }
 0x4d2   :  { %8576 = vmatpush1.bf16.msra.mxu1 %v13467_v13  ;;  %8740 = vmatpush1.bf16.msra.mxu0 %v13469_v30  ;;  %v13001_v13 = vcombine.low %v5325_v57, %v5329_v14  ;;  %v13008_v30 = vcombine.high %v5332_v9, %v5336_v15  ;;  %v5372_v57 = vld [vmem:[%s20169_s14 + $0x1d0] sm:$0xff] }
 0x4d3   :  { %8577 = vmatprep.subr.bf16.mxu1 %v13476_v25  ;;  %8741 = vmatprep.subr.bf16.mxu0 %v13478_v16  ;;  %v13010_v25 = vcombine.high %v5333_v62, %v5337_v10  ;;  %v5340_v16 = vld [vmem:[%s20169_s14 + $0xd0] sm:$0xff] }
 0x4d4   :  { %v13016_v20 = vcombine.high %v5340_v16, %v5344_v18  ;;  %v13015_v39 = vcombine.low %v5340_v16, %v5344_v18  ;;  %v5376_v14 = vld [vmem:[%s20169_s14 + $0x1f0] sm:$0xff] }
 0x4d5   :  { %v13048_v9 = vcombine.high %v5372_v57, %v5376_v14  ;;  %v5380_v62 = vld [vmem:[%s20169_s14 + $0x210] sm:$0xff] }
 0x4d6   :  { %8578 = vmatpush1.bf16.msra.mxu1 %v13475_v23  ;;  %8742 = vmatpush1.bf16.msra.mxu0 %v13477_v55  ;;  %v5348_v55 = vld [vmem:[%s20169_s14 + $0x110] sm:$0xff] }
 0x4d7   :  { %8579 = vmatprep.subr.bf16.mxu1 %v13484_v26  ;;  %8743 = vmatprep.subr.bf16.mxu0 %v13486_v29  ;;  %v5352_v26 = vld [vmem:[%s20169_s14 + $0x130] sm:$0xff]  ;;  %v5349_v29 = vld [vmem:[%s20169_s14 + $0x118] sm:$0xff] }
 0x4d8   :  { %v13024_v41 = vcombine.high %v5348_v55, %v5352_v26  ;;  %v13026_v49 = vcombine.high %v5349_v29, %v5353_v38  ;;  %v13023_v12 = vcombine.low %v5348_v55, %v5352_v26  ;;  %v13025_v45 = vcombine.low %v5349_v29, %v5353_v38  ;;  %v5384_v10 = vld [vmem:[%s20169_s14 + $0x230] sm:$0xff] }
 0x4d9   :  { %v13056_v16 = vcombine.high %v5380_v62, %v5384_v10  ;;  %v5396_v29 = vld [vmem:[%s20169_s14 + $0x290] sm:$0xff] }
 0x4da   :  { %8580 = vmatpush1.bf16.msra.mxu1 %v13483_v42  ;;  %8744 = vmatpush1.bf16.msra.mxu0 %v13485_v35  ;;  %v5356_v42 = vld [vmem:[%s20169_s14 + $0x150] sm:$0xff] }
 0x4db   :  { %8581 = vmatprep.subr.bf16.mxu1 %v13492_v8  ;;  %8745 = vmatprep.subr.bf16.mxu0 %v13494_v17  ;;  %v5360_v35 = vld [vmem:[%s20169_s14 + $0x170] sm:$0xff]  ;;  %v5357_v8 = vld [vmem:[%s20169_s14 + $0x158] sm:$0xff] }
 0x4dc   :  { %v5361_v17 = vld [vmem:[%s20169_s14 + $0x178] sm:$0xff]  ;;  %v13032_v19 = vcombine.high %v5356_v42, %v5360_v35  ;;  %v5400_v38 = vld [vmem:[%s20169_s14 + $0x2b0] sm:$0xff] }
 0x4dd   :  { %v13034_v22 = vcombine.high %v5357_v8, %v5361_v17 }
 0x4de   :  { %8582 = vmatpush1.bf16.msra.mxu1 %v13491_v50  ;;  %8746 = vmatpush1.bf16.msra.mxu0 %v13493_v51  ;;  %v5368_v50 = vld [vmem:[%s20169_s14 + $0x1b0] sm:$0xff]  ;;  %v5365_v51 = vld [vmem:[%s20169_s14 + $0x198] sm:$0xff] }
 0x4df   :  { %8756 = vmatprep.subr.bf16.mxu1 %v12992_v59  ;;  %8920 = vmatprep.subr.bf16.mxu0 %v12994_v37  ;;  %v13031_v59 = vcombine.low %v5356_v42, %v5360_v35  ;;  %v13033_v37 = vcombine.low %v5357_v8, %v5361_v17  ;;  %v13040_v11 = vcombine.high %v5364_v46, %v5368_v50  ;;  %v5404_v8 = vld [vmem:[%s20169_s14 + $0x2d0] sm:$0xff] }
 0x4e0   :  { %v13042_v54 = vcombine.high %v5365_v51, %v5369_v52  ;;  %v13072_v42 = vcombine.high %v5396_v29, %v5400_v38  ;;  %v5408_v17 = vld [vmem:[%s20169_s14 + $0x2f0] sm:$0xff] }
 0x4e1   :  { %8584 = vmatmul.mubr.bf16.vlgmr.msra.gmra.mrb[24].mxu1 %v18277_v4  ;;  %8748 = vmatmul.mubr.bf16.vlgmr.msra.gmra.mrb[20].mxu0 %v18277_v4 }
 0x4e2   :  { %8757 = vmatpush1.bf16.msra.mxu1 %v12991_v63  ;;  %8788 = vmatprep.mubr.bf16.mxu1 %v17466_v43  ;;  %v5373_v63 = vld [vmem:[%s20169_s14 + $0x1d8] sm:$0xff] }
 0x4e3   :  { %8921 = vmatpush1.bf16.msra.mxu0 %v12993_v6  ;;  %8952 = vmatprep.mubr.bf16.mxu0 %v17466_v43  ;;  %v5345_v43 = vld [vmem:[%s20169_s14 + $0xf8] sm:$0xff] }
 0x4e4   :  { %8758 = vmatprep.subr.bf16.mxu1 %v13000_v48  ;;  %8922 = vmatprep.subr.bf16.mxu0 %v13002_v7  ;;  %v13018_v23 = vcombine.high %v5341_v24, %v5345_v43  ;;  %v13017_v40 = vcombine.low %v5341_v24, %v5345_v43  ;;  %v5377_v6 = vld [vmem:[%s20169_s14 + $0x1f8] sm:$0xff]  ;;  %v13039_v48 = vcombine.low %v5364_v46, %v5368_v50  ;;  %v5388_v24 = vld [vmem:[%s20169_s14 + $0x250] sm:$0xff] }
 0x4e5   :  { %v13041_v7 = vcombine.low %v5365_v51, %v5369_v52  ;;  %v13050_v15 = vcombine.high %v5373_v63, %v5377_v6  ;;  %v5392_v43 = vld [vmem:[%s20169_s14 + $0x270] sm:$0xff]  ;;  %v13080_v46 = vcombine.high %v5404_v8, %v5408_v17 }
 0x4e6   :  { %8759 = vmatpush1.bf16.msra.mxu1 %v12999_v5  ;;  %v5381_v5 = vld [vmem:[%s20169_s14 + $0x218] sm:$0xff]  ;;  %v13064_v55 = vcombine.high %v5388_v24, %v5392_v43  ;;  %v5412_v51 = vld [vmem:[%s20169_s14 + $0x310] sm:$0xff] }
 0x4e7   :  { %8923 = vmatpush1.bf16.msra.mxu0 %v13001_v13  ;;  %8760 = vmatprep.subr.bf16.mxu1 %v13008_v30  ;;  %v5385_v13 = vld [vmem:[%s20169_s14 + $0x238] sm:$0xff]  ;;  %v13047_v30 = vcombine.low %v5372_v57, %v5376_v14  ;;  %v5416_v52 = vld [vmem:[%s20169_s14 + $0x330] sm:$0xff] }
 0x4e8   :  { %8924 = vmatprep.subr.bf16.mxu0 %v13010_v25  ;;  %v13049_v25 = vcombine.low %v5373_v63, %v5377_v6  ;;  %v13058_v18 = vcombine.high %v5381_v5, %v5385_v13  ;;  %v13088_v57 = vcombine.high %v5412_v51, %v5416_v52  ;;  %v5420_v63 = vld [vmem:[%s20169_s14 + $0x350] sm:$0xff] }
 0x4e9   :  { %v5424_v6 = vld [vmem:[%s20169_s14 + $0x370] sm:$0xff] }
 0x4ea   :  { %8761 = vmatpush1.bf16.msra.mxu1 %v13007_v31  ;;  %v5389_v31 = vld [vmem:[%s20169_s14 + $0x258] sm:$0xff] }
 0x4eb   :  { %8925 = vmatpush1.bf16.msra.mxu0 %v13009_v32  ;;  %8762 = vmatprep.subr.bf16.mxu1 %v13016_v20  ;;  %v5393_v32 = vld [vmem:[%s20169_s14 + $0x278] sm:$0xff]  ;;  %v13055_v20 = vcombine.low %v5380_v62, %v5384_v10  ;;  %v13096_v62 = vcombine.high %v5420_v63, %v5424_v6 }
 0x4ec   :  { %8926 = vmatprep.subr.bf16.mxu0 %v13018_v23  ;;  %v13057_v23 = vcombine.low %v5381_v5, %v5385_v13  ;;  %v13066_v26 = vcombine.high %v5389_v31, %v5393_v32  ;;  %v5428_v5 = vld [vmem:[%s20169_s14 + $0x390] sm:$0xff] }
 0x4ed   :  { %v5432_v13 = vld [vmem:[%s20169_s14 + $0x3b0] sm:$0xff] }
 0x4ee   :  { %8763 = vmatpush1.bf16.msra.mxu1 %v13015_v39  ;;  %v5397_v39 = vld [vmem:[%s20169_s14 + $0x298] sm:$0xff] }
 0x4ef   :  { %8927 = vmatpush1.bf16.msra.mxu0 %v13017_v40  ;;  %8764 = vmatprep.subr.bf16.mxu1 %v13024_v41  ;;  %v5401_v40 = vld [vmem:[%s20169_s14 + $0x2b8] sm:$0xff]  ;;  %v13063_v41 = vcombine.low %v5388_v24, %v5392_v43  ;;  %v13104_v24 = vcombine.high %v5428_v5, %v5432_v13 }
 0x4f0   :  { %8928 = vmatprep.subr.bf16.mxu0 %v13026_v49  ;;  %v13065_v49 = vcombine.low %v5389_v31, %v5393_v32  ;;  %v13074_v35 = vcombine.high %v5397_v39, %v5401_v40  ;;  %v5436_v31 = vld [vmem:[%s20169_s14 + $0x3d0] sm:$0xff] }
 0x4f1   :  { %v5440_v32 = vld [vmem:[%s20169_s14 + $0x3f0] sm:$0xff] }
 0x4f2   :  { %8765 = vmatpush1.bf16.msra.mxu1 %v13023_v12  ;;  %v5405_v12 = vld [vmem:[%s20169_s14 + $0x2d8] sm:$0xff] }
 0x4f3   :  { %8929 = vmatpush1.bf16.msra.mxu0 %v13025_v45  ;;  %8766 = vmatprep.subr.bf16.mxu1 %v13032_v19  ;;  %v5409_v45 = vld [vmem:[%s20169_s14 + $0x2f8] sm:$0xff]  ;;  %v13071_v19 = vcombine.low %v5396_v29, %v5400_v38  ;;  %v13112_v29 = vcombine.high %v5436_v31, %v5440_v32 }
 0x4f4   :  { %8930 = vmatprep.subr.bf16.mxu0 %v13034_v22  ;;  %v13073_v22 = vcombine.low %v5397_v39, %v5401_v40  ;;  %v13082_v50 = vcombine.high %v5405_v12, %v5409_v45  ;;  %v5444_v39 = vld [vmem:[%s20169_s14 + $0x410] sm:$0xff] }
 0x4f5   :  { %v5448_v40 = vld [vmem:[%s20169_s14 + $0x430] sm:$0xff] }
 0x4f6   :  { %8767 = vmatpush1.bf16.msra.mxu1 %v13031_v59  ;;  %v5413_v59 = vld [vmem:[%s20169_s14 + $0x318] sm:$0xff] }
 0x4f7   :  { %8931 = vmatpush1.bf16.msra.mxu0 %v13033_v37  ;;  %8768 = vmatprep.subr.bf16.mxu1 %v13040_v11  ;;  %v5417_v37 = vld [vmem:[%s20169_s14 + $0x338] sm:$0xff]  ;;  %v13079_v11 = vcombine.low %v5404_v8, %v5408_v17  ;;  %v13120_v8 = vcombine.high %v5444_v39, %v5448_v40 }
 0x4f8   :  { %8932 = vmatprep.subr.bf16.mxu0 %v13042_v54  ;;  %v13081_v54 = vcombine.low %v5405_v12, %v5409_v45  ;;  %v13090_v14 = vcombine.high %v5413_v59, %v5417_v37  ;;  %v5452_v12 = vld [vmem:[%s20169_s14 + $0x450] sm:$0xff] }
 0x4f9   :  { %v5456_v45 = vld [vmem:[%s20169_s14 + $0x470] sm:$0xff] }
 0x4fa   :  { %8769 = vmatpush1.bf16.msra.mxu1 %v13039_v48  ;;  %v5421_v48 = vld [vmem:[%s20169_s14 + $0x358] sm:$0xff] }
 0x4fb   :  { %8933 = vmatpush1.bf16.msra.mxu0 %v13041_v7  ;;  %8770 = vmatprep.subr.bf16.mxu1 %v13048_v9  ;;  %v5425_v7 = vld [vmem:[%s20169_s14 + $0x378] sm:$0xff]  ;;  %v13087_v9 = vcombine.low %v5412_v51, %v5416_v52  ;;  %v13128_v51 = vcombine.high %v5452_v12, %v5456_v45  ;;  %v5460_v52 = vld [vmem:[%s20169_s14 + $0x490] sm:$0xff] }
 0x4fc   :  { %8934 = vmatprep.subr.bf16.mxu0 %v13050_v15  ;;  %v13089_v15 = vcombine.low %v5413_v59, %v5417_v37  ;;  %v13098_v10 = vcombine.high %v5421_v48, %v5425_v7  ;;  %v5464_v59 = vld [vmem:[%s20169_s14 + $0x4b0] sm:$0xff] }
 0x4fe   :  { %8771 = vmatpush1.bf16.msra.mxu1 %v13047_v30  ;;  %v5429_v30 = vld [vmem:[%s20169_s14 + $0x398] sm:$0xff] }
 0x4ff   :  { %8935 = vmatpush1.bf16.msra.mxu0 %v13049_v25  ;;  %8772 = vmatprep.subr.bf16.mxu1 %v13056_v16  ;;  %v5433_v25 = vld [vmem:[%s20169_s14 + $0x3b8] sm:$0xff]  ;;  %v13095_v16 = vcombine.low %v5420_v63, %v5424_v6  ;;  %v13136_v63 = vcombine.high %v5460_v52, %v5464_v59 }
 0x500   :  { %8936 = vmatprep.subr.bf16.mxu0 %v13058_v18  ;;  %v13097_v18 = vcombine.low %v5421_v48, %v5425_v7  ;;  %v13106_v43 = vcombine.high %v5429_v30, %v5433_v25  ;;  %v5468_v48 = vld [vmem:[%s20169_s14 + $0x4d0] sm:$0xff] }
 0x501   :  { %v5472_v7 = vld [vmem:[%s20169_s14 + $0x4f0] sm:$0xff] }
 0x502   :  { %8773 = vmatpush1.bf16.msra.mxu1 %v13055_v20  ;;  %v5437_v20 = vld [vmem:[%s20169_s14 + $0x3d8] sm:$0xff] }
 0x503   :  { %8937 = vmatpush1.bf16.msra.mxu0 %v13057_v23  ;;  %8774 = vmatprep.subr.bf16.mxu1 %v13064_v55  ;;  %v5441_v23 = vld [vmem:[%s20169_s14 + $0x3f8] sm:$0xff]  ;;  %v13103_v55 = vcombine.low %v5428_v5, %v5432_v13  ;;  %v5476_v5 = vld [vmem:[%s20169_s14 + $0x510] sm:$0xff] }
 0x504   :  { %8938 = vmatprep.subr.bf16.mxu0 %v13066_v26  ;;  %v13105_v26 = vcombine.low %v5429_v30, %v5433_v25  ;;  %v13114_v38 = vcombine.high %v5437_v20, %v5441_v23  ;;  %v5480_v13 = vld [vmem:[%s20169_s14 + $0x530] sm:$0xff]  ;;  %v5477_v30 = vld [vmem:[%s20169_s14 + $0x518] sm:$0xff] }
 0x505   :  { %v5481_v25 = vld [vmem:[%s20169_s14 + $0x538] sm:$0xff] }
 0x506   :  { %8775 = vmatpush1.bf16.msra.mxu1 %v13063_v41  ;;  %v5445_v41 = vld [vmem:[%s20169_s14 + $0x418] sm:$0xff] }
 0x507   :  { %8939 = vmatpush1.bf16.msra.mxu0 %v13065_v49  ;;  %8776 = vmatprep.subr.bf16.mxu1 %v13072_v42  ;;  %v5449_v49 = vld [vmem:[%s20169_s14 + $0x438] sm:$0xff]  ;;  %v13111_v42 = vcombine.low %v5436_v31, %v5440_v32  ;;  %v5484_v31 = vld [vmem:[%s20169_s14 + $0x550] sm:$0xff] }
 0x508   :  { %8940 = vmatprep.subr.bf16.mxu0 %v13074_v35  ;;  %v13113_v35 = vcombine.low %v5437_v20, %v5441_v23  ;;  %v13122_v17 = vcombine.high %v5445_v41, %v5449_v49  ;;  %v5488_v32 = vld [vmem:[%s20169_s14 + $0x570] sm:$0xff]  ;;  %v5485_v20 = vld [vmem:[%s20169_s14 + $0x558] sm:$0xff] }
 0x509   :  { %v5489_v23 = vld [vmem:[%s20169_s14 + $0x578] sm:$0xff] }
 0x50a   :  { %8777 = vmatpush1.bf16.msra.mxu1 %v13071_v19  ;;  %v13119_v19 = vcombine.low %v5444_v39, %v5448_v40  ;;  %v5492_v39 = vld [vmem:[%s20169_s14 + $0x590] sm:$0xff] }
 0x50b   :  { %8941 = vmatpush1.bf16.msra.mxu0 %v13073_v22  ;;  %8778 = vmatprep.subr.bf16.mxu1 %v13080_v46  ;;  %v5453_v22 = vld [vmem:[%s20169_s14 + $0x458] sm:$0xff]  ;;  %v5496_v40 = vld [vmem:[%s20169_s14 + $0x5b0] sm:$0xff] }
 0x50c   :  { %8942 = vmatprep.subr.bf16.mxu0 %v13082_v50  ;;  %v5457_v46 = vld [vmem:[%s20169_s14 + $0x478] sm:$0xff]  ;;  %v13121_v50 = vcombine.low %v5445_v41, %v5449_v49 }
 0x50d   :  { %v13130_v37 = vcombine.high %v5453_v22, %v5457_v46  ;;  %v5493_v41 = vld [vmem:[%s20169_s14 + $0x598] sm:$0xff] }
 0x50e   :  { %8779 = vmatpush1.bf16.msra.mxu1 %v13079_v11  ;;  %v5461_v11 = vld [vmem:[%s20169_s14 + $0x498] sm:$0xff] }
 0x50f   :  { %8943 = vmatpush1.bf16.msra.mxu0 %v13081_v54  ;;  %8780 = vmatprep.subr.bf16.mxu1 %v13088_v57  ;;  %v5465_v54 = vld [vmem:[%s20169_s14 + $0x4b8] sm:$0xff]  ;;  %v13127_v57 = vcombine.low %v5452_v12, %v5456_v45  ;;  %v5500_v12 = vld [vmem:[%s20169_s14 + $0x5d0] sm:$0xff] }
 0x510   :  { %8944 = vmatprep.subr.bf16.mxu0 %v13090_v14  ;;  %v13129_v14 = vcombine.low %v5453_v22, %v5457_v46  ;;  %v13138_v6 = vcombine.high %v5461_v11, %v5465_v54  ;;  %v5497_v49 = vld [vmem:[%s20169_s14 + $0x5b8] sm:$0xff]  ;;  %v5504_v45 = vld [vmem:[%s20169_s14 + $0x5f0] sm:$0xff]  ;;  %v13167_v46 = vcombine.low %v5492_v39, %v5496_v40 }
 0x511   :  { %v5505_v22 = vld [vmem:[%s20169_s14 + $0x5f8] sm:$0xff] }
 0x512   :  { %8781 = vmatpush1.bf16.msra.mxu1 %v13087_v9  ;;  %v5473_v9 = vld [vmem:[%s20169_s14 + $0x4f8] sm:$0xff] }
 0x513   :  { %8945 = vmatpush1.bf16.msra.mxu0 %v13089_v15  ;;  %8782 = vmatprep.subr.bf16.mxu1 %v13096_v62  ;;  %v13137_v15 = vcombine.low %v5461_v11, %v5465_v54  ;;  %v13144_v62 = vcombine.high %v5468_v48, %v5472_v7  ;;  %v5509_v11 = vld [vmem:[%s20169_s14 + $0x618] sm:$0xff] }
 0x514   :  { %8946 = vmatprep.subr.bf16.mxu0 %v13098_v10  ;;  %v5513_v54 = vld [vmem:[%s20169_s14 + $0x638] sm:$0xff] }
 0x516   :  { %8783 = vmatpush1.bf16.msra.mxu1 %v13095_v16  ;;  %v13143_v16 = vcombine.low %v5468_v48, %v5472_v7  ;;  %v5516_v48 = vld [vmem:[%s20169_s14 + $0x650] sm:$0xff] }
 0x517   :  { %8947 = vmatpush1.bf16.msra.mxu0 %v13097_v18  ;;  %8784 = vmatprep.subr.bf16.mxu1 %v13104_v24  ;;  %v13152_v24 = vcombine.high %v5476_v5, %v5480_v13  ;;  %v5520_v7 = vld [vmem:[%s20169_s14 + $0x670] sm:$0xff] }
 0x518   :  { %8948 = vmatprep.subr.bf16.mxu0 %v13106_v43  ;;  %v13154_v43 = vcombine.high %v5477_v30, %v5481_v25 }
 0x51a   :  { %8785 = vmatpush1.bf16.msra.mxu1 %v13103_v55  ;;  %v13151_v55 = vcombine.low %v5476_v5, %v5480_v13  ;;  %v5524_v5 = vld [vmem:[%s20169_s14 + $0x690] sm:$0xff] }
 0x51b   :  { %8949 = vmatpush1.bf16.msra.mxu0 %v13105_v26  ;;  %8786 = vmatprep.subr.bf16.mxu1 %v13112_v29  ;;  %v13153_v26 = vcombine.low %v5477_v30, %v5481_v25  ;;  %v13160_v29 = vcombine.high %v5484_v31, %v5488_v32  ;;  %v5528_v13 = vld [vmem:[%s20169_s14 + $0x6b0] sm:$0xff]  ;;  %v5525_v30 = vld [vmem:[%s20169_s14 + $0x698] sm:$0xff] }
 0x51c   :  { %8950 = vmatprep.subr.bf16.mxu0 %v13114_v38  ;;  %v13162_v38 = vcombine.high %v5485_v20, %v5489_v23  ;;  %v5529_v25 = vld [vmem:[%s20169_s14 + $0x6b8] sm:$0xff] }
 0x51e   :  { %8787 = vmatpush1.bf16.msra.mxu1 %v13111_v42  ;;  %v13159_v42 = vcombine.low %v5484_v31, %v5488_v32  ;;  %v5532_v31 = vld [vmem:[%s20169_s14 + $0x6d0] sm:$0xff] }
 0x51f   :  { %8951 = vmatpush1.bf16.msra.mxu0 %v13113_v35  ;;  %8797 = vmatprep.subr.bf16.mxu1 %v13120_v8  ;;  %v13161_v35 = vcombine.low %v5485_v20, %v5489_v23  ;;  %v13168_v8 = vcombine.high %v5492_v39, %v5496_v40  ;;  %v5536_v32 = vld [vmem:[%s20169_s14 + $0x6f0] sm:$0xff]  ;;  %v5533_v20 = vld [vmem:[%s20169_s14 + $0x6d8] sm:$0xff] }
 0x520   :  { %8961 = vmatprep.subr.bf16.mxu0 %v13122_v17  ;;  %v13170_v17 = vcombine.high %v5493_v41, %v5497_v49  ;;  %v5537_v23 = vld [vmem:[%s20169_s14 + $0x6f8] sm:$0xff]  ;;  %v5540_v39 = vld [vmem:[%s20169_s14 + $0x710] sm:$0xff] }
 0x521   :  { %8789 = vmatmul.mubr.bf16.vlgmr.msra.gmra.mrb[28].mxu1 %v17630_v56  ;;  %v5544_v40 = vld [vmem:[%s20169_s14 + $0x730] sm:$0xff] }
 0x522   :  { %8953 = vmatmul.mubr.bf16.vlgmr.msra.gmra.mrb[24].mxu0 %v17630_v56  ;;  %8798 = vmatpush1.bf16.msra.mxu1 %v13119_v19  ;;  %v5469_v56 = vld [vmem:[%s20169_s14 + $0x4d8] sm:$0xff] }
 0x523   :  { %8829 = vmatprep.mubr.bf16.mxu1 %v17638_v60  ;;  %8962 = vmatpush1.bf16.msra.mxu0 %v13121_v50  ;;  %v13146_v10 = vcombine.high %v5469_v56, %v5473_v9  ;;  %v13145_v18 = vcombine.low %v5469_v56, %v5473_v9  ;;  %v5501_v19 = vld [vmem:[%s20169_s14 + $0x5d8] sm:$0xff]  ;;  %v13169_v50 = vcombine.low %v5493_v41, %v5497_v49 }
 0x524   :  { %8993 = vmatprep.mubr.bf16.mxu0 %v17638_v60  ;;  %8799 = vmatprep.subr.bf16.mxu1 %v13128_v51  ;;  %v13135_v60 = vcombine.low %v5460_v52, %v5464_v59  ;;  %v13176_v51 = vcombine.high %v5500_v12, %v5504_v45  ;;  %v13178_v52 = vcombine.high %v5501_v19, %v5505_v22  ;;  %v5508_v59 = vld [vmem:[%s20169_s14 + $0x610] sm:$0xff]  ;;  %v5517_v56 = vld [vmem:[%s20169_s14 + $0x658] sm:$0xff] }
 0x525   :  { %8963 = vmatprep.subr.bf16.mxu0 %v13130_v37  ;;  %v5512_v37 = vld [vmem:[%s20169_s14 + $0x630] sm:$0xff]  ;;  %v5521_v9 = vld [vmem:[%s20169_s14 + $0x678] sm:$0xff] }
 0x526   :  { %8800 = vmatpush1.bf16.msra.mxu1 %v13127_v57  ;;  %v13175_v57 = vcombine.low %v5500_v12, %v5504_v45  ;;  %v5541_v41 = vld [vmem:[%s20169_s14 + $0x718] sm:$0xff]  ;;  %v5548_v12 = vld [vmem:[%s20169_s14 + $0x750] sm:$0xff] }
 0x527   :  { %8964 = vmatpush1.bf16.msra.mxu0 %v13129_v14  ;;  %8801 = vmatprep.subr.bf16.mxu1 %v13136_v63  ;;  %v13177_v14 = vcombine.low %v5501_v19, %v5505_v22  ;;  %v13184_v63 = vcombine.high %v5508_v59, %v5512_v37  ;;  %v5545_v49 = vld [vmem:[%s20169_s14 + $0x738] sm:$0xff]  ;;  %v5552_v45 = vld [vmem:[%s20169_s14 + $0x770] sm:$0xff] }
 0x528   :  { %8965 = vmatprep.subr.bf16.mxu0 %v13138_v6  ;;  %v13186_v6 = vcombine.high %v5509_v11, %v5513_v54  ;;  %v5549_v19 = vld [vmem:[%s20169_s14 + $0x758] sm:$0xff] }
 0x529   :  { %v5553_v22 = vld [vmem:[%s20169_s14 + $0x778] sm:$0xff] }
 0x52a   :  { %8802 = vmatpush1.bf16.msra.mxu1 %v13135_v60  ;;  %v13183_v60 = vcombine.low %v5508_v59, %v5512_v37  ;;  %v5556_v59 = vld [vmem:[%s20169_s14 + $0x790] sm:$0xff] }
 0x52b   :  { %8966 = vmatpush1.bf16.msra.mxu0 %v13137_v15  ;;  %8803 = vmatprep.subr.bf16.mxu1 %v13144_v62  ;;  %v13185_v15 = vcombine.low %v5509_v11, %v5513_v54  ;;  %v13192_v62 = vcombine.high %v5516_v48, %v5520_v7  ;;  %v5560_v37 = vld [vmem:[%s20169_s14 + $0x7b0] sm:$0xff]  ;;  %v5557_v11 = vld [vmem:[%s20169_s14 + $0x798] sm:$0xff] }
 0x52c   :  { %8967 = vmatprep.subr.bf16.mxu0 %v13146_v10  ;;  %v13194_v10 = vcombine.high %v5517_v56, %v5521_v9  ;;  %v5561_v54 = vld [vmem:[%s20169_s14 + $0x7b8] sm:$0xff] }
 0x52e   :  { %8804 = vmatpush1.bf16.msra.mxu1 %v13143_v16  ;;  %v13191_v16 = vcombine.low %v5516_v48, %v5520_v7  ;;  %v5564_v48 = vld [vmem:[%s20169_s14 + $0x7d0] sm:$0xff] }
 0x52f   :  { %8968 = vmatpush1.bf16.msra.mxu0 %v13145_v18  ;;  %8805 = vmatprep.subr.bf16.mxu1 %v13152_v24  ;;  %v13193_v18 = vcombine.low %v5517_v56, %v5521_v9  ;;  %v13200_v24 = vcombine.high %v5524_v5, %v5528_v13  ;;  %v5568_v7 = vld [vmem:[%s20169_s14 + $0x7f0] sm:$0xff]  ;;  %v5565_v56 = vld [vmem:[%s20169_s14 + $0x7d8] sm:$0xff] }
 0x530   :  { %8969 = vmatprep.subr.bf16.mxu0 %v13154_v43  ;;  %v13202_v43 = vcombine.high %v5525_v30, %v5529_v25  ;;  %v5569_v9 = vld [vmem:[%s20169_s14 + $0x7f8] sm:$0xff] }
 0x532   :  { %8806 = vmatpush1.bf16.msra.mxu1 %v13151_v55  ;;  %v13199_v55 = vcombine.low %v5524_v5, %v5528_v13  ;;  %v5572_v5 = vld [vmem:[%s20169_s14 + $0x810] sm:$0xff] }
 0x533   :  { %8970 = vmatpush1.bf16.msra.mxu0 %v13153_v26  ;;  %8807 = vmatprep.subr.bf16.mxu1 %v13160_v29  ;;  %v13201_v26 = vcombine.low %v5525_v30, %v5529_v25  ;;  %v13208_v29 = vcombine.high %v5532_v31, %v5536_v32  ;;  %v5576_v13 = vld [vmem:[%s20169_s14 + $0x830] sm:$0xff]  ;;  %v5573_v30 = vld [vmem:[%s20169_s14 + $0x818] sm:$0xff] }
 0x534   :  { %8971 = vmatprep.subr.bf16.mxu0 %v13162_v38  ;;  %v13210_v38 = vcombine.high %v5533_v20, %v5537_v23  ;;  %v5577_v25 = vld [vmem:[%s20169_s14 + $0x838] sm:$0xff] }
 0x536   :  { %8808 = vmatpush1.bf16.msra.mxu1 %v13159_v42  ;;  %v13207_v42 = vcombine.low %v5532_v31, %v5536_v32  ;;  %v5580_v31 = vld [vmem:[%s20169_s14 + $0x850] sm:$0xff] }
 0x537   :  { %8972 = vmatpush1.bf16.msra.mxu0 %v13161_v35  ;;  %8809 = vmatprep.subr.bf16.mxu1 %v13168_v8  ;;  %v13209_v35 = vcombine.low %v5533_v20, %v5537_v23  ;;  %v13216_v8 = vcombine.high %v5540_v39, %v5544_v40  ;;  %v5584_v32 = vld [vmem:[%s20169_s14 + $0x870] sm:$0xff]  ;;  %v13247_v20 = vcombine.low %v5572_v5, %v5576_v13  ;;  %v5581_v23 = vld [vmem:[%s20169_s14 + $0x858] sm:$0xff] }
 0x538   :  { %8973 = vmatprep.subr.bf16.mxu0 %v13170_v17  ;;  %v13218_v17 = vcombine.high %v5541_v41, %v5545_v49 }
 0x53a   :  { %8810 = vmatpush1.bf16.msra.mxu1 %v13167_v46  ;;  %v13215_v46 = vcombine.low %v5540_v39, %v5544_v40  ;;  %v5592_v39 = vld [vmem:[%s20169_s14 + $0x8b0] sm:$0xff]  ;;  %v5589_v40 = vld [vmem:[%s20169_s14 + $0x898] sm:$0xff] }
 0x53b   :  { %8974 = vmatpush1.bf16.msra.mxu0 %v13169_v50  ;;  %8811 = vmatprep.subr.bf16.mxu1 %v13176_v51  ;;  %v13217_v50 = vcombine.low %v5541_v41, %v5545_v49  ;;  %v13224_v51 = vcombine.high %v5548_v12, %v5552_v45  ;;  %v5593_v49 = vld [vmem:[%s20169_s14 + $0x8b8] sm:$0xff] }
 0x53c   :  { %8975 = vmatprep.subr.bf16.mxu0 %v13178_v52  ;;  %v13226_v52 = vcombine.high %v5549_v19, %v5553_v22 }
 0x53e   :  { %8812 = vmatpush1.bf16.msra.mxu1 %v13175_v57  ;;  %v13223_v57 = vcombine.low %v5548_v12, %v5552_v45  ;;  %v5600_v12 = vld [vmem:[%s20169_s14 + $0x8f0] sm:$0xff]  ;;  %v13266_v45 = vcombine.high %v5589_v40, %v5593_v49 }
 0x53f   :  { %8976 = vmatpush1.bf16.msra.mxu0 %v13177_v14  ;;  %8813 = vmatprep.subr.bf16.mxu1 %v13184_v63  ;;  %v13225_v14 = vcombine.low %v5549_v19, %v5553_v22  ;;  %v13232_v63 = vcombine.high %v5556_v59, %v5560_v37  ;;  %v5601_v19 = vld [vmem:[%s20169_s14 + $0x8f8] sm:$0xff] }
 0x540   :  { %8977 = vmatprep.subr.bf16.mxu0 %v13186_v6  ;;  %v13234_v6 = vcombine.high %v5557_v11, %v5561_v54 }
 0x542   :  { %8814 = vmatpush1.bf16.msra.mxu1 %v13183_v60  ;;  %v13231_v60 = vcombine.low %v5556_v59, %v5560_v37  ;;  %v5605_v59 = vld [vmem:[%s20169_s14 + $0x918] sm:$0xff] }
 0x543   :  { %8978 = vmatpush1.bf16.msra.mxu0 %v13185_v15  ;;  %8815 = vmatprep.subr.bf16.mxu1 %v13192_v62  ;;  %v13233_v15 = vcombine.low %v5557_v11, %v5561_v54  ;;  %v13240_v62 = vcombine.high %v5564_v48, %v5568_v7  ;;  %v5609_v37 = vld [vmem:[%s20169_s14 + $0x938] sm:$0xff]  ;;  %v5612_v54 = vld [vmem:[%s20169_s14 + $0x950] sm:$0xff] }
 0x544   :  { %8979 = vmatprep.subr.bf16.mxu0 %v13194_v10  ;;  %v13242_v10 = vcombine.high %v5565_v56, %v5569_v9 }
 0x546   :  { %8816 = vmatpush1.bf16.msra.mxu1 %v13191_v16  ;;  %v13239_v16 = vcombine.low %v5564_v48, %v5568_v7  ;;  %v5613_v48 = vld [vmem:[%s20169_s14 + $0x958] sm:$0xff] }
 0x547   :  { %8980 = vmatpush1.bf16.msra.mxu0 %v13193_v18  ;;  %8817 = vmatprep.subr.bf16.mxu1 %v13200_v24  ;;  %v13241_v18 = vcombine.low %v5565_v56, %v5569_v9  ;;  %v13248_v24 = vcombine.high %v5572_v5, %v5576_v13  ;;  %v5617_v7 = vld [vmem:[%s20169_s14 + $0x978] sm:$0xff]  ;;  %v5620_v9 = vld [vmem:[%s20169_s14 + $0x990] sm:$0xff] }
 0x548   :  { %8981 = vmatprep.subr.bf16.mxu0 %v13202_v43  ;;  %v13250_v43 = vcombine.high %v5573_v30, %v5577_v25  ;;  %v5621_v5 = vld [vmem:[%s20169_s14 + $0x998] sm:$0xff] }
 0x549   :  { %v5625_v13 = vld [vmem:[%s20169_s14 + $0x9b8] sm:$0xff] }
 0x54a   :  { %8818 = vmatpush1.bf16.msra.mxu1 %v13199_v55  ;;  %v5585_v55 = vld [vmem:[%s20169_s14 + $0x878] sm:$0xff] }
 0x54b   :  { %8982 = vmatpush1.bf16.msra.mxu0 %v13201_v26  ;;  %8819 = vmatprep.subr.bf16.mxu1 %v13208_v29  ;;  %v13249_v26 = vcombine.low %v5573_v30, %v5577_v25  ;;  %v13256_v29 = vcombine.high %v5580_v31, %v5584_v32  ;;  %v13258_v41 = vcombine.high %v5581_v23, %v5585_v55  ;;  %v5628_v25 = vld [vmem:[%s20169_s14 + $0x9d0] sm:$0xff] }
 0x54c   :  { %8983 = vmatprep.subr.bf16.mxu0 %v13210_v38  ;;  %v5588_v38 = vld [vmem:[%s20169_s14 + $0x890] sm:$0xff] }
 0x54d   :  { %v13263_v22 = vcombine.low %v5588_v38, %v5592_v39 }
 0x54e   :  { %8820 = vmatpush1.bf16.msra.mxu1 %v13207_v42  ;;  %v13255_v42 = vcombine.low %v5580_v31, %v5584_v32  ;;  %v5629_v31 = vld [vmem:[%s20169_s14 + $0x9d8] sm:$0xff] }
 0x54f   :  { %8984 = vmatpush1.bf16.msra.mxu0 %v13209_v35  ;;  %8821 = vmatprep.subr.bf16.mxu1 %v13216_v8  ;;  %v5596_v35 = vld [vmem:[%s20169_s14 + $0x8d0] sm:$0xff]  ;;  %v13257_v8 = vcombine.low %v5581_v23, %v5585_v55  ;;  %v5633_v32 = vld [vmem:[%s20169_s14 + $0x9f8] sm:$0xff]  ;;  %v13297_v55 = vcombine.low %v5621_v5, %v5625_v13 }
 0x550   :  { %8985 = vmatprep.subr.bf16.mxu0 %v13218_v17  ;;  %v13264_v17 = vcombine.high %v5588_v38, %v5592_v39  ;;  %v13271_v11 = vcombine.low %v5596_v35, %v5600_v12  ;;  %v5636_v23 = vld [vmem:[%s20169_s14 + $0xa10] sm:$0xff]  ;;  %v13306_v38 = vcombine.high %v5629_v31, %v5633_v32  ;;  %v5637_v39 = vld [vmem:[%s20169_s14 + $0xa18] sm:$0xff] }
 0x552   :  { %8822 = vmatpush1.bf16.msra.mxu1 %v13215_v46  ;;  %v5604_v46 = vld [vmem:[%s20169_s14 + $0x910] sm:$0xff] }
 0x553   :  { %8986 = vmatpush1.bf16.msra.mxu0 %v13217_v50  ;;  %8823 = vmatprep.subr.bf16.mxu1 %v13224_v51  ;;  %v13272_v50 = vcombine.high %v5596_v35, %v5600_v12  ;;  %v5608_v51 = vld [vmem:[%s20169_s14 + $0x930] sm:$0xff]  ;;  %v5645_v12 = vld [vmem:[%s20169_s14 + $0xa58] sm:$0xff] }
 0x554   :  { %8987 = vmatprep.subr.bf16.mxu0 %v13226_v52  ;;  %v13279_v56 = vcombine.low %v5604_v46, %v5608_v51 }
 0x556   :  { %8824 = vmatpush1.bf16.msra.mxu1 %v13223_v57 }
 0x557   :  { %8988 = vmatpush1.bf16.msra.mxu0 %v13225_v14  ;;  %8825 = vmatprep.subr.bf16.mxu1 %v13232_v63  ;;  %v13280_v14 = vcombine.high %v5604_v46, %v5608_v51  ;;  %v5616_v63 = vld [vmem:[%s20169_s14 + $0x970] sm:$0xff] }
 0x558   :  { %8989 = vmatprep.subr.bf16.mxu0 %v13234_v6  ;;  %v13282_v6 = vcombine.high %v5605_v59, %v5609_v37  ;;  %v13287_v30 = vcombine.low %v5612_v54, %v5616_v63 }
 0x55a   :  { %8826 = vmatpush1.bf16.msra.mxu1 %v13231_v60  ;;  %v13281_v60 = vcombine.low %v5605_v59, %v5609_v37  ;;  %v5660_v37 = vld [vmem:[%s20169_s14 + $0xad0] sm:$0xff] }
 0x55b   :  { %8990 = vmatpush1.bf16.msra.mxu0 %v13233_v15  ;;  %8827 = vmatprep.subr.bf16.mxu1 %v13240_v62  ;;  %v13288_v15 = vcombine.high %v5612_v54, %v5616_v63  ;;  %v5624_v62 = vld [vmem:[%s20169_s14 + $0x9b0] sm:$0xff] }
 0x55c   :  { %8991 = vmatprep.subr.bf16.mxu0 %v13242_v10  ;;  %v13290_v10 = vcombine.high %v5613_v48, %v5617_v7 }
 0x55e   :  { %8828 = vmatpush1.bf16.msra.mxu1 %v13239_v16  ;;  %v13289_v16 = vcombine.low %v5613_v48, %v5617_v7  ;;  %v5668_v7 = vld [vmem:[%s20169_s14 + $0xb10] sm:$0xff] }
 0x55f   :  { %8992 = vmatpush1.bf16.msra.mxu0 %v13241_v18  ;;  %8838 = vmatprep.subr.bf16.mxu1 %v13248_v24  ;;  %v13296_v18 = vcombine.high %v5620_v9, %v5624_v62  ;;  %v5632_v24 = vld [vmem:[%s20169_s14 + $0x9f0] sm:$0xff] }
 0x560   :  { %9002 = vmatprep.subr.bf16.mxu0 %v13250_v43  ;;  %v13298_v43 = vcombine.high %v5621_v5, %v5625_v13  ;;  %v5676_v13 = vld [vmem:[%s20169_s14 + $0xb50] sm:$0xff] }
 0x561   :  { %8830 = vmatmul.mubr.bf16.vlgmr.msra.gmra.mrb[28].mxu1 %v17838_v44 }
 0x562   :  { %8994 = vmatmul.mubr.bf16.vlgmr.msra.gmra.mrb[24].mxu0 %v17838_v44  ;;  %8839 = vmatpush1.bf16.msra.mxu1 %v13247_v20  ;;  %v5597_v44 = vld [vmem:[%s20169_s14 + $0x8d8] sm:$0xff]  ;;  %v13295_v20 = vcombine.low %v5620_v9, %v5624_v62 }
 0x563   :  { %8870 = vmatprep.mubr.bf16.mxu1 %v18061_v58  ;;  %9003 = vmatpush1.bf16.msra.mxu0 %v13249_v26  ;;  %v13274_v52 = vcombine.high %v5597_v44, %v5601_v19  ;;  %v13273_v57 = vcombine.low %v5597_v44, %v5601_v19  ;;  %v13304_v26 = vcombine.high %v5628_v25, %v5632_v24  ;;  %v5652_v19 = vld [vmem:[%s20169_s14 + $0xa90] sm:$0xff]  ;;  %v5673_v62 = vld [vmem:[%s20169_s14 + $0xb38] sm:$0xff] }
 0x564   :  { %9034 = vmatprep.mubr.bf16.mxu0 %v18061_v58  ;;  %8840 = vmatprep.subr.bf16.mxu1 %v13256_v29  ;;  %v13265_v58 = vcombine.low %v5589_v40, %v5593_v49  ;;  %v5640_v29 = vld [vmem:[%s20169_s14 + $0xa30] sm:$0xff]  ;;  %v5641_v40 = vld [vmem:[%s20169_s14 + $0xa38] sm:$0xff] }
 0x565   :  { %9004 = vmatprep.subr.bf16.mxu0 %v13258_v41  ;;  %v13303_v41 = vcombine.low %v5628_v25, %v5632_v24  ;;  %v5644_v49 = vld [vmem:[%s20169_s14 + $0xa50] sm:$0xff]  ;;  %v13312_v35 = vcombine.high %v5636_v23, %v5640_v29  ;;  %v13311_v44 = vcombine.low %v5636_v23, %v5640_v29  ;;  %v13313_v46 = vcombine.low %v5637_v39, %v5641_v40  ;;  %v5681_v24 = vld [vmem:[%s20169_s14 + $0xb78] sm:$0xff] }
 0x566   :  { %8841 = vmatpush1.bf16.msra.mxu1 %v13255_v42  ;;  %v13305_v42 = vcombine.low %v5629_v31, %v5633_v32  ;;  %v5684_v32 = vld [vmem:[%s20169_s14 + $0xb90] sm:$0xff]  ;;  %v5689_v29 = vld [vmem:[%s20169_s14 + $0xbb8] sm:$0xff] }
 0x567   :  { %9005 = vmatpush1.bf16.msra.mxu0 %v13257_v8  ;;  %8842 = vmatprep.subr.bf16.mxu1 %v13264_v17  ;;  %v5648_v8 = vld [vmem:[%s20169_s14 + $0xa70] sm:$0xff]  ;;  %v13314_v17 = vcombine.high %v5637_v39, %v5641_v40 }
 0x568   :  { %9006 = vmatprep.subr.bf16.mxu0 %v13266_v45  ;;  %v5649_v45 = vld [vmem:[%s20169_s14 + $0xa78] sm:$0xff]  ;;  %v13319_v59 = vcombine.low %v5644_v49, %v5648_v8  ;;  %v5692_v40 = vld [vmem:[%s20169_s14 + $0xbd0] sm:$0xff] }
 0x569   :  { %v13322_v51 = vcombine.high %v5645_v12, %v5649_v45  ;;  %v13321_v54 = vcombine.low %v5645_v12, %v5649_v45 }
 0x56a   :  { %8843 = vmatpush1.bf16.msra.mxu1 %v13263_v22  ;;  %v5656_v22 = vld [vmem:[%s20169_s14 + $0xab0] sm:$0xff] }
 0x56b   :  { %9007 = vmatpush1.bf16.msra.mxu0 %v13265_v58  ;;  %8844 = vmatprep.subr.bf16.mxu1 %v13272_v50  ;;  %v13320_v58 = vcombine.high %v5644_v49, %v5648_v8  ;;  %v5653_v50 = vld [vmem:[%s20169_s14 + $0xa98] sm:$0xff]  ;;  %v13327_v48 = vcombine.low %v5652_v19, %v5656_v22 }
 0x56c   :  { %9008 = vmatprep.subr.bf16.mxu0 %v13274_v52  ;;  %v5657_v52 = vld [vmem:[%s20169_s14 + $0xab8] sm:$0xff] }
 0x56d   :  { %v13330_v63 = vcombine.high %v5653_v50, %v5657_v52  ;;  %v13329_v9 = vcombine.low %v5653_v50, %v5657_v52  ;;  %v5697_v8 = vld [vmem:[%s20169_s14 + $0xbf8] sm:$0xff] }
 0x56e   :  { %8845 = vmatpush1.bf16.msra.mxu1 %v13271_v11  ;;  %v5664_v11 = vld [vmem:[%s20169_s14 + $0xaf0] sm:$0xff]  ;;  %v5705_v50 = vld [vmem:[%s20169_s14 + $0xc38] sm:$0xff] }
 0x56f   :  { %9009 = vmatpush1.bf16.msra.mxu0 %v13273_v57  ;;  %8846 = vmatprep.subr.bf16.mxu1 %v13280_v14  ;;  %v13328_v57 = vcombine.high %v5652_v19, %v5656_v22  ;;  %v5661_v14 = vld [vmem:[%s20169_s14 + $0xad8] sm:$0xff]  ;;  %v13335_v5 = vcombine.low %v5660_v37, %v5664_v11  ;;  %v5700_v22 = vld [vmem:[%s20169_s14 + $0xc10] sm:$0xff] }
 0x570   :  { %9010 = vmatprep.subr.bf16.mxu0 %v13282_v6  ;;  %v5665_v6 = vld [vmem:[%s20169_s14 + $0xaf8] sm:$0xff] }
 0x571   :  { %v13337_v25 = vcombine.low %v5661_v14, %v5665_v6 }
 0x572   :  { %8847 = vmatpush1.bf16.msra.mxu1 %v13279_v56  ;;  %v5672_v56 = vld [vmem:[%s20169_s14 + $0xb30] sm:$0xff] }
 0x573   :  { %9011 = vmatpush1.bf16.msra.mxu0 %v13281_v60  ;;  %8848 = vmatprep.subr.bf16.mxu1 %v13288_v15  ;;  %v13336_v60 = vcombine.high %v5660_v37, %v5664_v11  ;;  %v5669_v15 = vld [vmem:[%s20169_s14 + $0xb18] sm:$0xff]  ;;  %v13343_v31 = vcombine.low %v5668_v7, %v5672_v56  ;;  %v5708_v11 = vld [vmem:[%s20169_s14 + $0xc50] sm:$0xff] }
 0x574   :  { %9012 = vmatprep.subr.bf16.mxu0 %v13290_v10  ;;  %v13338_v10 = vcombine.high %v5661_v14, %v5665_v6  ;;  %v13345_v23 = vcombine.low %v5669_v15, %v5673_v62  ;;  %v5709_v14 = vld [vmem:[%s20169_s14 + $0xc58] sm:$0xff] }
 0x576   :  { %8849 = vmatpush1.bf16.msra.mxu1 %v13287_v30  ;;  %v5680_v30 = vld [vmem:[%s20169_s14 + $0xb70] sm:$0xff] }
 0x577   :  { %9013 = vmatpush1.bf16.msra.mxu0 %v13289_v16  ;;  %8850 = vmatprep.subr.bf16.mxu1 %v13296_v18  ;;  %v13344_v16 = vcombine.high %v5668_v7, %v5672_v56  ;;  %v5677_v18 = vld [vmem:[%s20169_s14 + $0xb58] sm:$0xff]  ;;  %v13351_v39 = vcombine.low %v5676_v13, %v5680_v30  ;;  %v5716_v7 = vld [vmem:[%s20169_s14 + $0xc90] sm:$0xff] }
 0x578   :  { %9014 = vmatprep.subr.bf16.mxu0 %v13298_v43  ;;  %v13346_v43 = vcombine.high %v5669_v15, %v5673_v62  ;;  %v13353_v49 = vcombine.low %v5677_v18, %v5681_v24  ;;  %v5720_v56 = vld [vmem:[%s20169_s14 + $0xcb0] sm:$0xff]  ;;  %v5721_v15 = vld [vmem:[%s20169_s14 + $0xcb8] sm:$0xff] }
 0x57a   :  { %8851 = vmatpush1.bf16.msra.mxu1 %v13295_v20  ;;  %v5688_v20 = vld [vmem:[%s20169_s14 + $0xbb0] sm:$0xff] }
 0x57b   :  { %9015 = vmatpush1.bf16.msra.mxu0 %v13297_v55  ;;  %8852 = vmatprep.subr.bf16.mxu1 %v13304_v26  ;;  %v13352_v55 = vcombine.high %v5676_v13, %v5680_v30  ;;  %v5685_v26 = vld [vmem:[%s20169_s14 + $0xb98] sm:$0xff]  ;;  %v13359_v12 = vcombine.low %v5684_v32, %v5688_v20  ;;  %v5724_v30 = vld [vmem:[%s20169_s14 + $0xcd0] sm:$0xff] }
 0x57c   :  { %9016 = vmatprep.subr.bf16.mxu0 %v13306_v38  ;;  %v13354_v38 = vcombine.high %v5677_v18, %v5681_v24  ;;  %v13361_v45 = vcombine.low %v5685_v26, %v5689_v29 }
 0x57e   :  { %8853 = vmatpush1.bf16.msra.mxu1 %v13303_v41  ;;  %v5696_v41 = vld [vmem:[%s20169_s14 + $0xbf0] sm:$0xff] }
 0x57f   :  { %9017 = vmatpush1.bf16.msra.mxu0 %v13305_v42  ;;  %8854 = vmatprep.subr.bf16.mxu1 %v13312_v35  ;;  %v13360_v42 = vcombine.high %v5684_v32, %v5688_v20  ;;  %v5693_v35 = vld [vmem:[%s20169_s14 + $0xbd8] sm:$0xff]  ;;  %v5736_v32 = vld [vmem:[%s20169_s14 + $0xd30] sm:$0xff] }
 0x580   :  { %9018 = vmatprep.subr.bf16.mxu0 %v13314_v17  ;;  %v13362_v17 = vcombine.high %v5685_v26, %v5689_v29  ;;  %v13370_v19 = vcombine.high %v5693_v35, %v5697_v8  ;;  %v13369_v52 = vcombine.low %v5693_v35, %v5697_v8  ;;  %v5733_v20 = vld [vmem:[%s20169_s14 + $0xd18] sm:$0xff] }
 0x582   :  { %8855 = vmatpush1.bf16.msra.mxu1 %v13311_v44  ;;  %v13368_v44 = vcombine.high %v5692_v40, %v5696_v41 }
 0x583   :  { %9019 = vmatpush1.bf16.msra.mxu0 %v13313_v46  ;;  %8856 = vmatprep.subr.bf16.mxu1 %v13320_v58  ;;  %v5704_v46 = vld [vmem:[%s20169_s14 + $0xc30] sm:$0xff]  ;;  %v5701_v58 = vld [vmem:[%s20169_s14 + $0xc18] sm:$0xff] }
 0x584   :  { %9020 = vmatprep.subr.bf16.mxu0 %v13322_v51  ;;  %v13367_v51 = vcombine.low %v5692_v40, %v5696_v41  ;;  %v13378_v37 = vcombine.high %v5701_v58, %v5705_v50  ;;  %v13377_v6 = vcombine.low %v5701_v58, %v5705_v50  ;;  %v5744_v40 = vld [vmem:[%s20169_s14 + $0xd70] sm:$0xff]  ;;  %v5741_v41 = vld [vmem:[%s20169_s14 + $0xd58] sm:$0xff] }
 0x586   :  { %8857 = vmatpush1.bf16.msra.mxu1 %v13319_v59  ;;  %v13376_v59 = vcombine.high %v5700_v22, %v5704_v46 }
 0x587   :  { %9021 = vmatpush1.bf16.msra.mxu0 %v13321_v54  ;;  %8858 = vmatprep.subr.bf16.mxu1 %v13328_v57  ;;  %v5712_v54 = vld [vmem:[%s20169_s14 + $0xc70] sm:$0xff]  ;;  %v13375_v57 = vcombine.low %v5700_v22, %v5704_v46  ;;  %v18934_v22 = vld [vmem:[%s20170_s17] sm:$0xff] }
 0x588   :  { %9022 = vmatprep.subr.bf16.mxu0 %v13330_v63  ;;  %v5713_v63 = vld [vmem:[%s20169_s14 + $0xc78] sm:$0xff]  ;;  %v13383_v62 = vcombine.low %v5708_v11, %v5712_v54 }
 0x58a   :  { %8859 = vmatpush1.bf16.msra.mxu1 %v13327_v48  ;;  %v13384_v48 = vcombine.high %v5708_v11, %v5712_v54  ;;  %v5760_v11 = vld [vmem:[%s20169_s14 + $0xdf0] sm:$0xff]  ;;  %v5835_v54 = vrot.slane %v18934_v22, %v15554_v36 }
 0x58b   :  { %9023 = vmatpush1.bf16.msra.mxu0 %v13329_v9  ;;  %8860 = vmatprep.subr.bf16.mxu1 %v13336_v60  ;;  %v13386_v9 = vcombine.high %v5709_v14, %v5713_v63  ;;  %v5717_v60 = vld [vmem:[%s20169_s14 + $0xc98] sm:$0xff] }
 0x58c   :  { %9024 = vmatprep.subr.bf16.mxu0 %v13338_v10  ;;  %v13385_v10 = vcombine.low %v5709_v14, %v5713_v63  ;;  %v13394_v13 = vcombine.high %v5717_v60, %v5721_v15  ;;  %v13393_v18 = vcombine.low %v5717_v60, %v5721_v15  ;;  %v5757_v63 = vld [vmem:[%s20169_s14 + $0xdd8] sm:$0xff] }
 0x58e   :  { %8861 = vmatpush1.bf16.msra.mxu1 %v13335_v5  ;;  %v13392_v5 = vcombine.high %v5716_v7, %v5720_v56 }
 0x58f   :  { %9025 = vmatpush1.bf16.msra.mxu0 %v13337_v25  ;;  %8862 = vmatprep.subr.bf16.mxu1 %v13344_v16  ;;  %v5728_v25 = vld [vmem:[%s20169_s14 + $0xcf0] sm:$0xff]  ;;  %v5729_v16 = vld [vmem:[%s20169_s14 + $0xcf8] sm:$0xff] }
 0x590   :  { %9026 = vmatprep.subr.bf16.mxu0 %v13346_v43  ;;  %v13400_v24 = vcombine.high %v5724_v30, %v5728_v25 }
 0x592   :  { %8863 = vmatpush1.bf16.msra.mxu1 %v13343_v31  ;;  %v5732_v31 = vld [vmem:[%s20169_s14 + $0xd10] sm:$0xff] }
 0x593   :  { %9027 = vmatpush1.bf16.msra.mxu0 %v13345_v23  ;;  %8864 = vmatprep.subr.bf16.mxu1 %v13352_v55  ;;  %v5737_v23 = vld [vmem:[%s20169_s14 + $0xd38] sm:$0xff]  ;;  %v13399_v55 = vcombine.low %v5724_v30, %v5728_v25  ;;  %v13408_v29 = vcombine.high %v5732_v31, %v5736_v32 }
 0x594   :  { %9028 = vmatprep.subr.bf16.mxu0 %v13354_v38  ;;  %v13410_v38 = vcombine.high %v5733_v20, %v5737_v23  ;;  %v13409_v35 = vcombine.low %v5733_v20, %v5737_v23  ;;  %v5765_v25 = vld [vmem:[%s20169_s14 + $0xe18] sm:$0xff] }
 0x595   :  { %v5773_v23 = vld [vmem:[%s20169_s14 + $0xe58] sm:$0xff] }
 0x596   :  { %8865 = vmatpush1.bf16.msra.mxu1 %v13351_v39  ;;  %v5740_v39 = vld [vmem:[%s20169_s14 + $0xd50] sm:$0xff] }
 0x597   :  { %9029 = vmatpush1.bf16.msra.mxu0 %v13353_v49  ;;  %8866 = vmatprep.subr.bf16.mxu1 %v13360_v42  ;;  %v5745_v49 = vld [vmem:[%s20169_s14 + $0xd78] sm:$0xff]  ;;  %v13407_v42 = vcombine.low %v5732_v31, %v5736_v32  ;;  %v13416_v8 = vcombine.high %v5740_v39, %v5744_v40  ;;  %v13415_v46 = vcombine.low %v5740_v39, %v5744_v40  ;;  %v5772_v31 = vld [vmem:[%s20169_s14 + $0xe50] sm:$0xff] }
 0x598   :  { %9030 = vmatprep.subr.bf16.mxu0 %v13362_v17  ;;  %v13418_v17 = vcombine.high %v5741_v41, %v5745_v49  ;;  %v13417_v58 = vcombine.low %v5741_v41, %v5745_v49  ;;  %v5776_v32 = vld [vmem:[%s20169_s14 + $0xe70] sm:$0xff] }
 0x599   :  { %v13448_v39 = vcombine.high %v5772_v31, %v5776_v32  ;;  %v5780_v41 = vld [vmem:[%s20169_s14 + $0xe90] sm:$0xff] }
 0x59a   :  { %8867 = vmatpush1.bf16.msra.mxu1 %v13359_v12  ;;  %v5748_v12 = vld [vmem:[%s20169_s14 + $0xd90] sm:$0xff] }
 0x59b   :  { %9031 = vmatpush1.bf16.msra.mxu0 %v13361_v45  ;;  %8868 = vmatprep.subr.bf16.mxu1 %v13368_v44  ;;  %v5752_v45 = vld [vmem:[%s20169_s14 + $0xdb0] sm:$0xff]  ;;  %v5749_v44 = vld [vmem:[%s20169_s14 + $0xd98] sm:$0xff] }
 0x59c   :  { %9032 = vmatprep.subr.bf16.mxu0 %v13370_v19  ;;  %v5753_v19 = vld [vmem:[%s20169_s14 + $0xdb8] sm:$0xff]  ;;  %v13424_v50 = vcombine.high %v5748_v12, %v5752_v45  ;;  %v5784_v49 = vld [vmem:[%s20169_s14 + $0xeb0] sm:$0xff] }
 0x59e   :  { %8869 = vmatpush1.bf16.msra.mxu1 %v13367_v51 }
 0x59f   :  { %9033 = vmatpush1.bf16.msra.mxu0 %v13369_v52  ;;  %8879 = vmatprep.subr.bf16.mxu1 %v13376_v59  ;;  %v13426_v59 = vcombine.high %v5749_v44, %v5753_v19 }
 0x5a0   :  { %9043 = vmatprep.subr.bf16.mxu0 %v13378_v37  ;;  %v5756_v37 = vld [vmem:[%s20169_s14 + $0xdd0] sm:$0xff] }
 0x5a1   :  { %8871 = vmatmul.mubr.bf16.vlgmr.msra.gmra.mrb[28].mxu1 %v18067_v3 }
 0x5a2   :  { %9035 = vmatmul.mubr.bf16.vlgmr.msra.gmra.mrb[24].mxu0 %v18067_v3  ;;  %8880 = vmatpush1.bf16.msra.mxu1 %v13375_v57  ;;  %v5725_v3 = vld [vmem:[%s20169_s14 + $0xcd8] sm:$0xff] }
 0x5a3   :  { %8911 = vmatprep.mubr.bf16.mxu1 %v18083_v61  ;;  %9044 = vmatpush1.bf16.msra.mxu0 %v13377_v6  ;;  %v13402_v43 = vcombine.high %v5725_v3, %v5729_v16  ;;  %v13401_v26 = vcombine.low %v5725_v3, %v5729_v16  ;;  %v5761_v6 = vld [vmem:[%s20169_s14 + $0xdf8] sm:$0xff] }
 0x5a4   :  { %9075 = vmatprep.mubr.bf16.mxu0 %v18083_v61  ;;  %8881 = vmatprep.subr.bf16.mxu1 %v13384_v48  ;;  %v13391_v61 = vcombine.low %v5716_v7, %v5720_v56  ;;  %v5843_v48 = vrot.slane %v18934_v22, %v16130_v27  ;;  %v5768_v27 = vld [vmem:[%s20169_s14 + $0xe30] sm:$0xff]  ;;  %v5769_v3 = vld [vmem:[%s20169_s14 + $0xe38] sm:$0xff] }
 0x5a5   :  { %9045 = vmatprep.subr.bf16.mxu0 %v13386_v9  ;;  %v13423_v9 = vcombine.low %v5748_v12, %v5752_v45  ;;  %v13447_v12 = vcombine.low %v5772_v31, %v5776_v32  ;;  %v5813_v31 = vld [vmem:[%s20169_s14 + $0xf98] sm:$0xff] }
 0x5a6   :  { %8882 = vmatpush1.bf16.msra.mxu1 %v13383_v62  ;;  %v13425_v62 = vcombine.low %v5749_v44, %v5753_v19  ;;  %v13456_v44 = vcombine.high %v5780_v41, %v5784_v49  ;;  %v5817_v32 = vld [vmem:[%s20169_s14 + $0xfb8] sm:$0xff] }
 0x5a7   :  { %9046 = vmatpush1.bf16.msra.mxu0 %v13385_v10  ;;  %8883 = vmatprep.subr.bf16.mxu1 %v13392_v5  ;;  %v13432_v10 = vcombine.high %v5756_v37, %v5760_v11  ;;  %v13434_v5 = vcombine.high %v5757_v63, %v5761_v6 }
 0x5a8   :  { %9047 = vmatprep.subr.bf16.mxu0 %v13394_v13  ;;  %v5764_v13 = vld [vmem:[%s20169_s14 + $0xe10] sm:$0xff] }
 0x5aa   :  { %8884 = vmatpush1.bf16.msra.mxu1 %v13391_v61  ;;  %v13431_v61 = vcombine.low %v5756_v37, %v5760_v11  ;;  %v13455_v37 = vcombine.low %v5780_v41, %v5784_v49  ;;  %v5820_v41 = vld [vmem:[%s20169_s14 + $0xfd0] sm:$0xff] }
 0x5ab   :  { %9048 = vmatpush1.bf16.msra.mxu0 %v13393_v18  ;;  %8885 = vmatprep.subr.bf16.mxu1 %v13400_v24  ;;  %v13433_v18 = vcombine.low %v5757_v63, %v5761_v6  ;;  %v13440_v24 = vcombine.high %v5764_v13, %v5768_v27  ;;  %v5800_v63 = vld [vmem:[%s20169_s14 + $0xf30] sm:$0xff]  ;;  %v5797_v6 = vld [vmem:[%s20169_s14 + $0xf18] sm:$0xff] }
 0x5ac   :  { %9049 = vmatprep.subr.bf16.mxu0 %v13402_v43  ;;  %v13442_v43 = vcombine.high %v5765_v25, %v5769_v3  ;;  %v5824_v49 = vld [vmem:[%s20169_s14 + $0xff0] sm:$0xff] }
 0x5ae   :  { %8886 = vmatpush1.bf16.msra.mxu1 %v13399_v55  ;;  %v5777_v55 = vld [vmem:[%s20169_s14 + $0xe78] sm:$0xff] }
 0x5af   :  { %9050 = vmatpush1.bf16.msra.mxu0 %v13401_v26  ;;  %8887 = vmatprep.subr.bf16.mxu1 %v13408_v29  ;;  %v13439_v29 = vcombine.low %v5764_v13, %v5768_v27  ;;  %v13450_v40 = vcombine.high %v5773_v23, %v5777_v55  ;;  %v13449_v45 = vcombine.low %v5773_v23, %v5777_v55 }
 0x5b0   :  { %9051 = vmatprep.subr.bf16.mxu0 %v13410_v38  ;;  %v13441_v38 = vcombine.low %v5765_v25, %v5769_v3  ;;  %v5831_v55 = vrot.slane %v18934_v22, %v15548_v34 }
 0x5b2   :  { %8888 = vmatpush1.bf16.msra.mxu1 %v13407_v42 }
 0x5b3   :  { %9052 = vmatpush1.bf16.msra.mxu0 %v13409_v35  ;;  %8889 = vmatprep.subr.bf16.mxu1 %v13416_v8  ;;  %v5781_v35 = vld [vmem:[%s20169_s14 + $0xe98] sm:$0xff] }
 0x5b4   :  { %v18936_v51 = vpop.f32.mrb[24].mxu1  ;;  %v18938_v52 = vpop.f32.mrb[20].mxu0  ;;  %9053 = vmatprep.subr.bf16.mxu0 %v13418_v17  ;;  %v5785_v8 = vld [vmem:[%s20169_s14 + $0xeb8] sm:$0xff] }
 0x5b5   :  { %v8587_v57 = vpop.f32.mrb[25].mxu1  ;;  %v8751_v14 = vpop.f32.mrb[21].mxu0  ;;  %v13458_v19 = vcombine.high %v5781_v35, %v5785_v8  ;;  %v13457_v11 = vcombine.low %v5781_v35, %v5785_v8  ;;  %v5825_v35 = vld [vmem:[%s20169_s14 + $0xff8] sm:$0xff] }
 0x5b6   :  { %v8589_v7 = vpop.f32.mrb[26].mxu1  ;;  %v8753_v56 = vpop.f32.mrb[22].mxu0  ;;  %8890 = vmatpush1.bf16.msra.mxu1 %v13415_v46  ;;  %v18962_v30 = vadd.f32 %v8587_v57, %v5835_v54  ;;  %v18970_v16 = vadd.f32 %v8751_v14, %v5843_v48  ;;  %v5788_v46 = vld [vmem:[%s20169_s14 + $0xed0] sm:$0xff]  ;;  %v5801_v48 = vld [vmem:[%s20169_s14 + $0xf38] sm:$0xff] }
 0x5b7   :  { %9054 = vmatpush1.bf16.msra.mxu0 %v13417_v58  ;;  %v8590_v60 = vpop.f32.mrb[27].mxu1  ;;  %v8754_v15 = vpop.f32.mrb[23].mxu0  ;;  %8891 = vmatprep.subr.bf16.mxu1 %v13424_v50  ;;  %v5792_v58 = vld [vmem:[%s20169_s14 + $0xef0] sm:$0xff]  ;;  %v5789_v50 = vld [vmem:[%s20169_s14 + $0xed8] sm:$0xff]  ;;  %v13473_v25 = vcombine.low %v5797_v6, %v5801_v48 }
 0x5b8   :  { %9055 = vmatprep.subr.bf16.mxu0 %v13426_v59  ;;  %v9085_v20 = vmin.f32 %v18962_v30, 0.0  ;;  %v9087_v26 = vmin.f32 %v18970_v16, 0.0  ;;  %v5793_v59 = vld [vmem:[%s20169_s14 + $0xef8] sm:$0xff]  ;;  %v13464_v54 = vcombine.high %v5788_v46, %v5792_v58  ;;  %v5796_v14 = vld [vmem:[%s20169_s14 + $0xf10] sm:$0xff]  ;;  %v13463_v7 = vcombine.low %v5788_v46, %v5792_v58 }
 0x5b9   :  { %v13466_v57 = vcombine.high %v5789_v50, %v5793_v59  ;;  %v13465_v56 = vcombine.low %v5789_v50, %v5793_v59  ;;  %v13474_v60 = vcombine.high %v5797_v6, %v5801_v48  ;;  %v5804_v15 = vld [vmem:[%s20169_s14 + $0xf50] sm:$0xff]  ;;  %v13471_v13 = vcombine.low %v5796_v14, %v5800_v63 }
 0x5ba   :  { %8892 = vmatpush1.bf16.msra.mxu1 %v13423_v9  ;;  %v9094_v42 = vmul.f32 1.442695, %v9085_v20  ;;  %v9098_v17 = vmul.f32 1.442695, %v9087_v26  ;;  %v13472_v9 = vcombine.high %v5796_v14, %v5800_v63  ;;  %vm9125_vm4 = vcmp.gt.f32.partialorder %v18962_v30, 0.0 }
 0x5bb   :  { %9056 = vmatpush1.bf16.msra.mxu0 %v13425_v62  ;;  %8893 = vmatprep.subr.bf16.mxu1 %v13432_v10  ;;  %v5808_v62 = vld [vmem:[%s20169_s14 + $0xf70] sm:$0xff]  ;;  %v5805_v10 = vld [vmem:[%s20169_s14 + $0xf58] sm:$0xff]  ;;  %vm9127_vm5 = vcmp.gt.f32.partialorder %v18970_v16, 0.0  ;;  %v13495_v50 = vcombine.low %v5820_v41, %v5824_v49 }
 0x5bc   :  { %9057 = vmatprep.subr.bf16.mxu0 %v13434_v5  ;;  %15068 = vpow2.f32 %v9094_v42  ;;  %v5809_v5 = vld [vmem:[%s20169_s14 + $0xf78] sm:$0xff]  ;;  %v13480_v3 = vcombine.high %v5804_v15, %v5808_v62  ;;  %v13479_v23 = vcombine.low %v5804_v15, %v5808_v62  ;;  %v14662_v15 = vld [vmem:[%s20171_s2 + $0x8] sm:$0xff]  }
 0x5bd   :  { %15070 = vpow2.f32 %v9098_v17  ;;  %v5821_v42 = vld [vmem:[%s20169_s14 + $0xfd8] sm:$0xff]  ;;  %v14663_v62 = vld [vmem:[%s20171_s2 + $0x88] sm:$0xff]  }
 0x5be   :  { %8894 = vmatpush1.bf16.msra.mxu1 %v13431_v61  ;;  %v13498_v58 = vcombine.high %v5821_v42, %v5825_v35 }
 0x5bf   :  { %9058 = vmatpush1.bf16.msra.mxu0 %v13433_v18  ;;  %8895 = vmatprep.subr.bf16.mxu1 %v13440_v24  ;;  %v13482_v18 = vcombine.high %v5805_v10, %v5809_v5  ;;  %v5812_v24 = vld [vmem:[%s20169_s14 + $0xf90] sm:$0xff] }
 0x5c0   :  { %9059 = vmatprep.subr.bf16.mxu0 %v13442_v43  ;;  %v5816_v43 = vld [vmem:[%s20169_s14 + $0xfb0] sm:$0xff] }
 0x5c1   :  { %v13487_v8 = vcombine.low %v5812_v24, %v5816_v43 }
 0x5c2   :  { %8896 = vmatpush1.bf16.msra.mxu1 %v13439_v29  ;;  %v13481_v29 = vcombine.low %v5805_v10, %v5809_v5  ;;  %v14664_v10 = vld [vmem:[%s20171_s2 + $0x50] sm:$0xff]  }
 0x5c3   :  { %9060 = vmatpush1.bf16.msra.mxu0 %v13441_v38  ;;  %8897 = vmatprep.subr.bf16.mxu1 %v13448_v39  ;;  %v13488_v38 = vcombine.high %v5812_v24, %v5816_v43  ;;  %v5839_v39 = vrot.slane %v18934_v22, %v15559_v53  ;;  %v14666_v5 = vld [vmem:[%s20171_s2 + $0x10] sm:$0xff]   ;;  %v14673_v24 = vld [vmem:[%s20171_s2 + $0xe0] sm:$0xff]  }
 0x5c4   :  { %9061 = vmatprep.subr.bf16.mxu0 %v13450_v40  ;;  %v13490_v40 = vcombine.high %v5813_v31, %v5817_v32 }
 0x5c5   :  { %v19066_v46 = vadd.f32 %v18938_v52, %v5839_v39  ;;  %v14656_v52 = vld [vmem:[%s20171_s2 + $0x40] sm:$0xff]   ;;  %v14679_v39 = vld [vmem:[%s20171_s2 + $0xa8] sm:$0xff]  }
 0x5c6   :  { %8898 = vmatpush1.bf16.msra.mxu1 %v13447_v12  ;;  %v15069_v27 = vpop.eup %15068  ;;  %v19063_v12 = vadd.f32 %v18936_v51, %v5831_v55 }
 0x5c7   :  { %9062 = vmatpush1.bf16.msra.mxu0 %v13449_v45  ;;  %8899 = vmatprep.subr.bf16.mxu1 %v13456_v44  ;;  %v15071_v61 = vpop.eup %15070  ;;  %v13500_v20 = vadd.f32 -1.0, %v15069_v27  ;;  %v13489_v45 = vcombine.low %v5813_v31, %v5817_v32  ;;  %v13496_v44 = vcombine.high %v5820_v41, %v5824_v49  ;;  %v14668_v27 = vld [vmem:[%s20171_s2 + $0x58] sm:$0xff]   ;;  %v14674_v32 = vld [vmem:[%s20171_s2 + $0x20] sm:$0xff]   ;;  %v14681_v49 = vld [vmem:[%s20171_s2 + $0xf0] sm:$0xff]   ;;  %vm9126_vm7 = vcmp.gt.f32.partialorder %v19066_v46, 0.0 }
 0x5c8   :  { %9063 = vmatprep.subr.bf16.mxu0 %v13458_v19  ;;  %v13502_v26 = vadd.f32 -1.0, %v15071_v61  ;;  %v9084_v51 = vmin.f32 %v19063_v12, 0.0  ;;  %v14671_v61 = vld [vmem:[%s20171_s2 + $0x98] sm:$0xff]   ;;  %vm9124_vm6 = vcmp.gt.f32.partialorder %v19063_v12, 0.0 }
 0x5c9   :  { %v9117_v17 = vmul.f32 1.6732632, %v13500_v20  ;;  %v14675_v20 = vld [vmem:[%s20171_s2 + $0xa0] sm:$0xff]  }
 0x5ca   :  { %8900 = vmatpush1.bf16.msra.mxu1 %v13455_v37  ;;  %v9119_v19 = vmul.f32 1.6732632, %v13502_v26  ;;  %v13497_v37 = vcombine.low %v5821_v42, %v5825_v35  ;;  %v9092_v6 = vmul.f32 1.442695, %v9084_v51  ;;  %v14677_v26 = vld [vmem:[%s20171_s2 + $0xe8] sm:$0xff]   ;;  %v14682_v35 = vld [vmem:[%s20171_s2 + $0x30] sm:$0xff]  }
 0x5cb   :  { %9064 = vmatpush1.bf16.msra.mxu0 %v13457_v11  ;;  %8901 = vmatprep.subr.bf16.mxu1 %v13464_v54  ;;  %v9133_v59 = vsel %vm9125_vm4, %v18962_v30, %v9117_v17  ;;  %v9086_v54 = vmin.f32 %v19066_v46, 0.0  ;;  %v14658_v30 = vld [vmem:[%s20171_s2] sm:$0xff]   ;;  %v14684_v17 = vld [vmem:[%s20171_s2 + $0x78] sm:$0xff]  }
 0x5cc   :  { %9065 = vmatprep.subr.bf16.mxu0 %v13466_v57  ;;  %v9135_v11 = vsel %vm9127_vm5, %v18970_v16, %v9119_v19  ;;  %v14657_v57 = vld [vmem:[%s20171_s2 + $0xc0] sm:$0xff]   ;;  %v9141_v14 = vmul.f32 1.050701, %v9133_v59  ;;  %15072 = vpow2.f32 %v9092_v6  ;;  %v14696_v6 = vld [vmem:[%s20171_s2 + $0x150] sm:$0xff]  }
 0x5cd   :  { %v9143_v63 = vmul.f32 1.050701, %v9135_v11  ;;  %v14659_v16 = vld [vmem:[%s20171_s2 + $0x80] sm:$0xff]   ;;  %v9096_v48 = vmul.f32 1.442695, %v9086_v54 }
 0x5ce   :  { %8902 = vmatpush1.bf16.msra.mxu1 %v13463_v7  ;;  %v14660_v7 = vld [vmem:[%s20171_s2 + $0x48] sm:$0xff]   ;;  %v14688_v59 = vld [vmem:[%s20171_s2 + $0x140] sm:$0xff]  }
 0x5cf   :  { %9066 = vmatpush1.bf16.msra.mxu0 %v13465_v56  ;;  %8903 = vmatprep.subr.bf16.mxu1 %v13472_v9  ;;  %v9149_v56 = vpack.c.bf16 %v9141_v14, %v9141_v14  ;;  %v14661_v9 = vld [vmem:[%s20171_s2 + $0xc8] sm:$0xff]   ;;  %15074 = vpow2.f32 %v9096_v48  ;;  %v14691_v11 = vld [vmem:[%s20171_s2 + $0x180] sm:$0xff]   ;;  %v14698_v48 = vld [vmem:[%s20171_s2 + $0x110] sm:$0xff]  }
 0x5d0   :  { %9067 = vmatprep.subr.bf16.mxu0 %v13474_v60  ;;  %v9151_v60 = vpack.c.bf16 %v9143_v63, %v9143_v63  ;;  %v14693_v14 = vld [vmem:[%s20171_s2 + $0x1c8] sm:$0xff]  }
 0x5d1   :  { %v14695_v63 = vld [vmem:[%s20171_s2 + $0x188] sm:$0xff]  }
 0x5d2   :  { %8904 = vmatpush1.bf16.msra.mxu1 %v13471_v13  ;;  %v14667_v13 = vld [vmem:[%s20171_s2 + $0x90] sm:$0xff]  }
 0x5d3   :  { %9068 = vmatpush1.bf16.msra.mxu0 %v13473_v25  ;;  %8905 = vmatprep.subr.bf16.mxu1 %v13480_v3  ;;  %v14669_v25 = vld [vmem:[%s20171_s2 + $0xd8] sm:$0xff]  }
 0x5d4   :  { %9069 = vmatprep.subr.bf16.mxu0 %v13482_v18  ;;  %v14670_v3 = vld [vmem:[%s20171_s2 + $0x18] sm:$0xff]   ;;  %v14672_v18 = vld [vmem:[%s20171_s2 + $0x60] sm:$0xff]  }
 0x5d6   :  { %8906 = vmatpush1.bf16.msra.mxu1 %v13479_v23  ;;  %v15073_v43 = vpop.eup %15072  ;;  %v14676_v23 = vld [vmem:[%s20171_s2 + $0x68] sm:$0xff]  }
 0x5d7   :  { %9070 = vmatpush1.bf16.msra.mxu0 %v13481_v29  ;;  %8907 = vmatprep.subr.bf16.mxu1 %v13488_v38  ;;  %v13499_v55 = vadd.f32 -1.0, %v15073_v43  ;;  %v14678_v38 = vld [vmem:[%s20171_s2 + $0x28] sm:$0xff]   ;;  %v14715_v43 = vld [vmem:[%s20171_s2 + $0x1b0] sm:$0xff]  }
 0x5d8   :  { %9071 = vmatprep.subr.bf16.mxu0 %v13490_v40  ;;  %v14680_v40 = vld [vmem:[%s20171_s2 + $0x70] sm:$0xff]  }
 0x5d9   :  { %v15075_v31 = vpop.eup %15074  ;;  %v9116_v41 = vmul.f32 1.6732632, %v13499_v55  ;;  %v5847_v55 = vrot.slane %v18934_v22, %v16443_v28 }
 0x5da   :  { %8908 = vmatpush1.bf16.msra.mxu1 %v13487_v8  ;;  %v13501_v29 = vadd.f32 -1.0, %v15075_v31  ;;  %v14683_v8 = vld [vmem:[%s20171_s2 + $0xb0] sm:$0xff]   ;;  %v14716_v31 = vld [vmem:[%s20171_s2 + $0x178] sm:$0xff]  }
 0x5db   :  { %9072 = vmatpush1.bf16.msra.mxu0 %v13489_v45  ;;  %8909 = vmatprep.subr.bf16.mxu1 %v13496_v44  ;;  %v9132_v45 = vsel %vm9124_vm6, %v19063_v12, %v9116_v41  ;;  %v14685_v44 = vld [vmem:[%s20171_s2 + $0xf8] sm:$0xff]  }
 0x5dc   :  { %9073 = vmatprep.subr.bf16.mxu0 %v13498_v58  ;;  %v9118_v42 = vmul.f32 1.6732632, %v13501_v29  ;;  %v14686_v58 = vld [vmem:[%s20171_s2 + $0x38] sm:$0xff]   ;;  %v5851_v29 = vrot.slane %v18934_v22, %v16381_v0 }
 0x5dd   :  { %v14687_v12 = vld [vmem:[%s20171_s2 + $0xb8] sm:$0xff]  }
 0x5de   :  { %8910 = vmatpush1.bf16.msra.mxu1 %v13495_v50  ;;  %v9134_v19 = vsel %vm9126_vm7, %v19066_v46, %v9118_v42  ;;  %v9140_v50 = vmul.f32 1.050701, %v9132_v45  ;;  %v14689_v46 = vld [vmem:[%s20171_s2 + $0x1c0] sm:$0xff]  }
 0x5df   :  { %9074 = vmatpush1.bf16.msra.mxu0 %v13497_v37  ;;  %13870 = vmatprep.subr.bf16.mxu1 %v14656_v52  ;;  %v9142_v51 = vmul.f32 1.050701, %v9134_v19  ;;  %v14690_v37 = vld [vmem:[%s20171_s2 + $0x100] sm:$0xff]  }
 0x5e0   :  { %13892 = vmatprep.subr.bf16.mxu0 %v14657_v57  ;;  %v9148_v52 = vpack.c.bf16 %v9140_v50, %v9140_v50  ;;  %v14692_v57 = vld [vmem:[%s20171_s2 + $0x148] sm:$0xff]  }
 0x5e1   :  { %8912 = vmatmul.mubr.bf16.vlgmr.msra.gmra.mrb[28].mxu1 %v18277_v4  ;;  %v9150_v54 = vpack.c.bf16 %v9142_v51, %v9142_v51 }
 0x5e2   :  { %9076 = vmatmul.mubr.bf16.vlgmr.msra.gmra.mrb[24].mxu0 %v18277_v4  ;;  %13871 = vmatpush3.bf16.msra.mxu1 %v14658_v30  ;;  %v14665_v4 = vld [vmem:[%s20171_s2 + $0xd0] sm:$0xff]   ;;  %v14694_v30 = vld [vmem:[%s20171_s2 + $0x108] sm:$0xff]  }
 0x5e3   :  { %9707 = vmatprep.mubr.bf16.mxu1 %v9149_v56  ;;  %13893 = vmatpush3.bf16.msra.mxu0 %v14659_v16  ;;  %v14697_v16 = vld [vmem:[%s20171_s2 + $0x1d0] sm:$0xff]   ;;  %v14700_v56 = vld [vmem:[%s20171_s2 + $0x158] sm:$0xff]  }
 0x5e4   :  { %9747 = vmatprep.mubr.bf16.mxu0 %v9151_v60  ;;  %13872 = vmatprep.subr.bf16.mxu1 %v14660_v7  ;;  %v14699_v7 = vld [vmem:[%s20171_s2 + $0x190] sm:$0xff]   ;;  %v14702_v60 = vld [vmem:[%s20171_s2 + $0x118] sm:$0xff]  }
 0x5e5   :  { %13894 = vmatprep.subr.bf16.mxu0 %v14661_v9  ;;  %v14701_v9 = vld [vmem:[%s20171_s2 + $0x1d8] sm:$0xff]  }
 0x5e6   :  { %13873 = vmatpush3.bf16.msra.mxu1 %v14662_v15  ;;  %v14703_v15 = vld [vmem:[%s20171_s2 + $0x198] sm:$0xff]  }
 0x5e7   :  { %13895 = vmatpush3.bf16.msra.mxu0 %v14663_v62  ;;  %13874 = vmatprep.subr.bf16.mxu1 %v14664_v10  ;;  %v14704_v62 = vld [vmem:[%s20171_s2 + $0x160] sm:$0xff]  }
 0x5e8   :  { %13896 = vmatprep.subr.bf16.mxu0 %v14665_v4  ;;  %v14705_v10 = vld [vmem:[%s20171_s2 + $0x1e0] sm:$0xff]  }
 0x5e9   :  { %v14706_v4 = vld [vmem:[%s20171_s2 + $0x120] sm:$0xff]  }
 0x5ea   :  { %13875 = vmatpush3.bf16.msra.mxu1 %v14666_v5  ;;  %v14707_v5 = vld [vmem:[%s20171_s2 + $0x1a0] sm:$0xff]  }
 0x5eb   :  { %13897 = vmatpush3.bf16.msra.mxu0 %v14667_v13  ;;  %13876 = vmatprep.subr.bf16.mxu1 %v14668_v27  ;;  %v14708_v13 = vld [vmem:[%s20171_s2 + $0x168] sm:$0xff]  }
 0x5ec   :  { %13898 = vmatprep.subr.bf16.mxu0 %v14669_v25  ;;  %v14709_v27 = vld [vmem:[%s20171_s2 + $0x1e8] sm:$0xff]  }
 0x5ed   :  { %v14710_v25 = vld [vmem:[%s20171_s2 + $0x128] sm:$0xff]  }
 0x5ee   :  { %13877 = vmatpush3.bf16.msra.mxu1 %v14670_v3  ;;  %v14711_v3 = vld [vmem:[%s20171_s2 + $0x1a8] sm:$0xff]  }
 0x5ef   :  { %13899 = vmatpush3.bf16.msra.mxu0 %v14671_v61  ;;  %13878 = vmatprep.subr.bf16.mxu1 %v14672_v18  ;;  %v14712_v61 = vld [vmem:[%s20171_s2 + $0x170] sm:$0xff]  }
 0x5f0   :  { %13900 = vmatprep.subr.bf16.mxu0 %v14673_v24  ;;  %v14713_v18 = vld [vmem:[%s20171_s2 + $0x1f0] sm:$0xff]  }
 0x5f1   :  { %v14714_v24 = vld [vmem:[%s20171_s2 + $0x130] sm:$0xff]  }
 0x5f2   :  { %13879 = vmatpush3.bf16.msra.mxu1 %v14674_v32  ;;  %v14717_v32 = vld [vmem:[%s20171_s2 + $0x1f8] sm:$0xff]  }
 0x5f3   :  { %13901 = vmatpush3.bf16.msra.mxu0 %v14675_v20  ;;  %13880 = vmatprep.subr.bf16.mxu1 %v14676_v23  ;;  %v14718_v20 = vld [vmem:[%s20171_s2 + $0x138] sm:$0xff]  }
 0x5f4   :  { %13902 = vmatprep.subr.bf16.mxu0 %v14677_v26  ;;  %v14719_v23 = vld [vmem:[%s20171_s2 + $0x1b8] sm:$0xff]   ;;  %v5855_v26 = vrot.slane %v18934_v22, %v16263_v21 }
 0x5f6   :  { %13881 = vmatpush3.bf16.msra.mxu1 %v14678_v38  ;;  %v5859_v38 = vrot.slane %v18934_v22, %v2336_v47 }
 0x5f7   :  { %13903 = vmatpush3.bf16.msra.mxu0 %v14679_v39  ;;  %13882 = vmatprep.subr.bf16.mxu1 %v14680_v40 }
 0x5f8   :  { %13904 = vmatprep.subr.bf16.mxu0 %v14681_v49 }
 0x5fa   :  { %13883 = vmatpush3.bf16.msra.mxu1 %v14682_v35 }
 0x5fb   :  { %13905 = vmatpush3.bf16.msra.mxu0 %v14683_v8  ;;  %13884 = vmatprep.subr.bf16.mxu1 %v14684_v17 }
 0x5fc   :  { %13906 = vmatprep.subr.bf16.mxu0 %v14685_v44 }
 0x5fe   :  { %13885 = vmatpush3.bf16.msra.mxu1 %v14686_v58 }
 0x5ff   :  { %13907 = vmatpush3.bf16.msra.mxu0 %v14687_v12  ;;  %13914 = vmatprep.subr.bf16.mxu1 %v14688_v59 }
 0x600   :  { %13936 = vmatprep.subr.bf16.mxu0 %v14689_v46 }
 0x601   :  { %9708 = vmatmul.mubr.bf16.vlgmr.msra.gmra.mrb[32].mxu1 %v9148_v52 }
 0x602   :  { %9748 = vmatmul.mubr.bf16.vlgmr.msra.gmra.mrb[28].mxu0 %v9150_v54  ;;  %13915 = vmatpush3.bf16.msra.mxu1 %v14690_v37 }
 0x603   :  { %13937 = vmatpush3.bf16.msra.mxu0 %v14691_v11  ;;  %13916 = vmatprep.subr.bf16.mxu1 %v14692_v57 }
 0x604   :  { %13938 = vmatprep.subr.bf16.mxu0 %v14693_v14 }
 0x606   :  { %13917 = vmatpush3.bf16.msra.mxu1 %v14694_v30 }
 0x607   :  { %13939 = vmatpush3.bf16.msra.mxu0 %v14695_v63  ;;  %13918 = vmatprep.subr.bf16.mxu1 %v14696_v6 }
 0x608   :  { %13940 = vmatprep.subr.bf16.mxu0 %v14697_v16 }
 0x60a   :  { %13919 = vmatpush3.bf16.msra.mxu1 %v14698_v48 }
 0x60b   :  { %13941 = vmatpush3.bf16.msra.mxu0 %v14699_v7  ;;  %13920 = vmatprep.subr.bf16.mxu1 %v14700_v56 }
 0x60c   :  { %13942 = vmatprep.subr.bf16.mxu0 %v14701_v9 }
 0x60e   :  { %13921 = vmatpush3.bf16.msra.mxu1 %v14702_v60 }
 0x60f   :  { %13943 = vmatpush3.bf16.msra.mxu0 %v14703_v15  ;;  %13922 = vmatprep.subr.bf16.mxu1 %v14704_v62 }
 0x610   :  { %13944 = vmatprep.subr.bf16.mxu0 %v14705_v10 }
 0x612   :  { %13923 = vmatpush3.bf16.msra.mxu1 %v14706_v4 }
 0x613   :  { %13945 = vmatpush3.bf16.msra.mxu0 %v14707_v5  ;;  %13924 = vmatprep.subr.bf16.mxu1 %v14708_v13 }
 0x614   :  { %13946 = vmatprep.subr.bf16.mxu0 %v14709_v27 }
 0x616   :  { %13925 = vmatpush3.bf16.msra.mxu1 %v14710_v25 }
 0x617   :  { %13947 = vmatpush3.bf16.msra.mxu0 %v14711_v3  ;;  %13926 = vmatprep.subr.bf16.mxu1 %v14712_v61  ;;  %v13507_v3 = vld [vmem:[%s20172_s16] ss:$0 sm:$0xff] }
 0x618   :  { %13948 = vmatprep.subr.bf16.mxu0 %v14713_v18 }
 0x61a   :  { %13927 = vmatpush3.bf16.msra.mxu1 %v14714_v24 }
 0x61b   :  { %13949 = vmatpush3.bf16.msra.mxu0 %v14715_v43  ;;  %13928 = vmatprep.subr.bf16.mxu1 %v14716_v31 }
 0x61c   :  { %13950 = vmatprep.subr.bf16.mxu0 %v14717_v32 }
 0x61e   :  { %13929 = vmatpush3.bf16.msra.mxu1 %v14718_v20 }
 0x61f   :  { %13951 = vmatpush3.bf16.msra.mxu0 %v14719_v23  ;;  %14118 = vmatprep.subr.bf16.mxu1 %v15117_v1 }
 0x620   :  { %14138 = vmatprep.subr.bf16.mxu0 %v15117_v1 }
 0x6b4   :  { %v8913_v39 = vpop.f32.mrb[28].mxu1 }
 0x6b5   :  { %v14256_v40 = vadd.f32 %v8913_v39, %v5847_v55  ;;  %v9077_v41 = vpop.f32.mrb[24].mxu0  ;;  %v8915_v49 = vpop.f32.mrb[29].mxu1  ;;  %v14722_v39 = vld [vmem:[%s20173_s0 + $0x10] sm:$0xff]  }
 0x6b6   :  { %v14258_v42 = vadd.f32 %v9077_v41, %v5855_v26  ;;  %v14257_v35 = vadd.f32 %v8915_v49, %v5851_v29  ;;  %v9079_v8 = vpop.f32.mrb[25].mxu0  ;;  %v8917_v17 = vpop.f32.mrb[30].mxu1  ;;  %v14720_v29 = vld [vmem:[%s20173_s0] sm:$0xff]   ;;  %v14725_v49 = vld [vmem:[%s20173_s0 + $0x28] sm:$0xff]  }
 0x6b7   :  { %v9088_v45 = vmin.f32 %v14256_v40, 0.0  ;;  %v14259_v28 = vadd.f32 %v9079_v8, %v5859_v38  ;;  %v9081_v44 = vpop.f32.mrb[26].mxu0  ;;  %v8918_v19 = vpop.f32.mrb[31].mxu1  ;;  %vm9128_vm8 = vcmp.gt.f32.partialorder %v14256_v40, 0.0  ;;  %v14721_v38 = vld [vmem:[%s20173_s0 + $0x8] sm:$0xff]   ;;  %v14724_v41 = vld [vmem:[%s20173_s0 + $0x20] sm:$0xff]  }
 0x6b8   :  { %v9090_v21 = vmin.f32 %v14258_v42, 0.0  ;;  %v9089_v58 = vmin.f32 %v14257_v35, 0.0  ;;  %v9082_v50 = vpop.f32.mrb[27].mxu0  ;;  %vm9130_vm9 = vcmp.gt.f32.partialorder %v14258_v42, 0.0  ;;  %vm9129_vm10 = vcmp.gt.f32.partialorder %v14257_v35, 0.0  ;;  %v14728_v8 = vld [vmem:[%s20127_s7] sm:$0xff]  }
 0x6b9   :  { %v9100_v0 = vmul.f32 1.442695, %v9088_v45  ;;  %v9091_v12 = vmin.f32 %v14259_v28, 0.0  ;;  %vm9131_vm11 = vcmp.gt.f32.partialorder %v14259_v28, 0.0  ;;  %v14729_v17 = vld [vmem:[%s20127_s7 + $0x8] sm:$0xff]   ;;  %v14730_v45 = vld [vmem:[%s20127_s7 + $0x10] sm:$0xff]  }
 0x6ba   :  { %v9104_v33 = vmul.f32 1.442695, %v9090_v21  ;;  %v9102_v59 = vmul.f32 1.442695, %v9089_v58  ;;  %v14732_v44 = vld [vmem:[%s20127_s7 + $0x20] sm:$0xff]   ;;  %v14733_v19 = vld [vmem:[%s20127_s7 + $0x28] sm:$0xff]  }
 0x6bb   :  { %15076 = vpow2.f32 %v9100_v0  ;;  %v9106_v47 = vmul.f32 1.442695, %v9091_v12  ;;  %v14734_v21 = vld [vmem:[%s20127_s7 + $0x30] sm:$0xff]  }
 0x6bc   :  { %15078 = vpow2.f32 %v9104_v33 }
 0x6bd   :  { %15080 = vpow2.f32 %v9102_v59 }
 0x6be   :  { %15082 = vpow2.f32 %v9106_v47 }
 0x6c5   :  { %v15077_v22 = vpop.eup %15076 }
 0x6c6   :  { %v15079_v51 = vpop.eup %15078  ;;  %v13503_v46 = vadd.f32 -1.0, %v15077_v22 }
 0x6c7   :  { %v15081_v37 = vpop.eup %15080  ;;  %v13505_v52 = vadd.f32 -1.0, %v15079_v51 }
 0x6c8   :  { %v15083_v11 = vpop.eup %15082  ;;  %v9120_v54 = vmul.f32 1.6732632, %v13503_v46  ;;  %v13504_v57 = vadd.f32 -1.0, %v15081_v37 }
 0x6c9   :  { %v9122_v14 = vmul.f32 1.6732632, %v13505_v52  ;;  %v13506_v30 = vadd.f32 -1.0, %v15083_v11 }
 0x6ca   :  { %v9136_v63 = vsel %vm9128_vm8, %v14256_v40, %v9120_v54  ;;  %v9121_v6 = vmul.f32 1.6732632, %v13504_v57  ;;  %v14723_v40 = vld [vmem:[%s20173_s0 + $0x18] sm:$0xff]  }
 0x6cb   :  { %v9138_v16 = vsel %vm9130_vm9, %v14258_v42, %v9122_v14  ;;  %v9123_v48 = vmul.f32 1.6732632, %v13506_v30  ;;  %v9144_v7 = vmul.f32 1.050701, %v9136_v63  ;;  %v14726_v42 = vld [vmem:[%s20173_s0 + $0x30] sm:$0xff]  }
 0x6cc   :  { %v9137_v56 = vsel %vm9129_vm10, %v14257_v35, %v9121_v6  ;;  %v9146_v9 = vmul.f32 1.050701, %v9138_v16  ;;  %v14727_v35 = vld [vmem:[%s20173_s0 + $0x38] sm:$0xff]   ;;  %vm12322_vm10 = vcmask 523264  }
 0x6cd   :  { %v9145_v60 = vmul.f32 1.050701, %v9137_v56  ;;  %v9139_v15 = vsel %vm9131_vm11, %v14259_v28, %v9123_v48  ;;  %v9152_v4 = vpack.c.bf16 %v9144_v7, %v9144_v7  ;;  %v14731_v28 = vld [vmem:[%s20127_s7 + $0x18] sm:$0xff]   ;;  %v14736_v7 = vld [vmem:[%s20128_s8] ss:$12 sps:$4 sm:$0xff]  }
 0x6ce   :  { %v9147_v62 = vmul.f32 1.050701, %v9139_v15  ;;  %v9154_v13 = vpack.c.bf16 %v9146_v9, %v9146_v9  ;;  %v14735_v48 = vld [vmem:[%s20127_s7 + $0x38] sm:$0xff]   ;;  %v14738_v56 = vld [vmem:[%s20128_s8 + $0x4] ss:$12 sps:$4 sm:$0xff]  }
 0x6cf   :  { %v9153_v10 = vpack.c.bf16 %v9145_v60, %v9145_v60  ;;  %v14740_v9 = vld [vmem:[%s20128_s8 + $0x18] ss:$12 sps:$4 sm:$0xff]   ;;  %v14742_v60 = vld [vmem:[%s20128_s8 + $0x1c] ss:$12 sps:$4 sm:$0xff]   ;;  %v13573_v15 = vld [vmem:[%s20129_s19] ss:$0 sm:$0xff] }
 0x6d0   :  { %v9155_v5 = vpack.c.bf16 %v9147_v62, %v9147_v62 }
 0x6d1   :  { %9787 = vmatprep.mubr.bf16.mxu1 %v9153_v10 }
 0x6d2   :  { %9827 = vmatprep.mubr.bf16.mxu0 %v9155_v5  ;;  %9788 = vmatmul.mubr.bf16.vlgmr.msra.gmra.mrb[36].mxu1 %v9152_v4 }
 0x6d3   :  { %9828 = vmatmul.mubr.bf16.vlgmr.msra.gmra.mrb[32].mxu0 %v9154_v13  ;;  %14134 = vmatprep.mubr.msk.bf16.mxu1 %vm15119_vm0, %v15117_v1  ;;  %v14739_v13 = vld [vmem:[%s20128_s8 + $0x8] ss:$12 sps:$4 sm:$0xff]  }
 0x6d4   :  { %v13886_v27 = vpop.f32.mrb[32].mxu1  ;;  %14154 = vmatprep.mubr.msk.bf16.mxu0 %vm15119_vm0, %v15117_v1  ;;  %14119 = vmatpush3.bf16.msra.mxu1 %v14720_v29  ;;  %v14756_v29 = vld [vmem:[%s20128_s8 + $0x78] ss:$12 sps:$4 sm:$0xff]  }
 0x6d5   :  { %v13908_v25 = vpop.f32.mrb[28].mxu0  ;;  %v13887_v61 = vpop.f32.mrb[33].mxu1  ;;  %14120 = vmatprep.subr.bf16.mxu1 %v15117_v1  ;;  %14139 = vmatpush3.bf16.msra.mxu0 %v14728_v8  ;;  %v14770_v8 = vld [vmem:[%s20130_s9 + $0x4] ss:$12 sps:$4 sm:$0xff]  }
 0x6d6   :  { %v13888_v18 = vadd.f32 %v13887_v61, %v13886_v27  ;;  %v13909_v24 = vpop.f32.mrb[29].mxu0  ;;  %v13889_v43 = vpop.f32.mrb[34].mxu1  ;;  %14140 = vmatprep.subr.bf16.mxu0 %v15117_v1  ;;  %v14746_v61 = vld [vmem:[%s20128_s8 + $0x34] ss:$12 sps:$4 sm:$0xff]  }
 0x6d7   :  { %v13910_v31 = vadd.f32 %v13909_v24, %v13908_v25  ;;  %v13911_v32 = vpop.f32.mrb[30].mxu0  ;;  %v13890_v20 = vpop.f32.mrb[35].mxu1  ;;  %v14747_v24 = vld [vmem:[%s20128_s8 + $0x38] ss:$12 sps:$4 sm:$0xff]  }
 0x6d8   :  { %v9710_v23 = vadd.f32 %v13888_v18, %v13507_v3  ;;  %v13912_v55 = vpop.f32.mrb[31].mxu0  ;;  %14121 = vmatpush3.bf16.msra.mxu1 %v14721_v38  ;;  %v14743_v3 = vld [vmem:[%s20128_s8 + $0x20] ss:$12 sps:$4 sm:$0xff]   ;;  %v14744_v18 = vld [vmem:[%s20128_s8 + $0x30] ss:$12 sps:$4 sm:$0xff]  }
 0x6d9   :  { %14122 = vmatprep.subr.bf16.mxu1 %v15117_v1  ;;  %14141 = vmatpush3.bf16.msra.mxu0 %v14729_v17  ;;  %v14750_v43 = vld [vmem:[%s20128_s8 + $0x4c] ss:$12 sps:$4 sm:$0xff]   ;;  %v14751_v32 = vld [vmem:[%s20128_s8 + $0x50] ss:$12 sps:$4 sm:$0xff]   ;;  %v14755_v55 = vld [vmem:[%s20128_s8 + $0x68] ss:$12 sps:$4 sm:$0xff]  }
 0x6da   :  { %v9750_v26 = vadd.f32 %v13910_v31, %v9710_v23  ;;  %14142 = vmatprep.subr.bf16.mxu0 %v15117_v1  ;;  %v14748_v31 = vld [vmem:[%s20128_s8 + $0x48] ss:$12 sps:$4 sm:$0xff]   ;;  %v14754_v20 = vld [vmem:[%s20128_s8 + $0x64] ss:$12 sps:$4 sm:$0xff]   ;;  %v14752_v23 = vld [vmem:[%s20128_s8 + $0x60] ss:$12 sps:$4 sm:$0xff]  }
 0x6db   :  { %v14759_v38 = vld [vmem:[%s20128_s8 + $0x80] ss:$12 sps:$4 sm:$0xff]   ;;  %v14795_v17 = vld [vmem:[%s20130_s9 + $0xc8] ss:$12 sps:$4 sm:$0xff]  }
 0x6dc   :  { %14123 = vmatpush3.bf16.msra.mxu1 %v14722_v39  ;;  %v14762_v39 = vld [vmem:[%s20128_s8 + $0x94] ss:$12 sps:$4 sm:$0xff]  }
 0x6dd   :  { %14124 = vmatprep.subr.bf16.mxu1 %v15117_v1  ;;  %14143 = vmatpush3.bf16.msra.mxu0 %v14730_v45  ;;  %v13582_v45 = vld [vmem:[%s20131_s20] ss:$0 sm:$0xff] }
 0x6de   :  { %14144 = vmatprep.subr.bf16.mxu0 %v15117_v1 }
 0x6e0   :  { %14125 = vmatpush3.bf16.msra.mxu1 %v14723_v40  ;;  %v14760_v40 = vld [vmem:[%s20128_s8 + $0x90] ss:$12 sps:$4 sm:$0xff]  }
 0x6e1   :  { %14126 = vmatprep.subr.bf16.mxu1 %v15117_v1  ;;  %14145 = vmatpush3.bf16.msra.mxu0 %v14731_v28 }
 0x6e2   :  { %14146 = vmatprep.subr.bf16.mxu0 %v15117_v1 }
 0x6e4   :  { %14127 = vmatpush3.bf16.msra.mxu1 %v14724_v41  ;;  %v14763_v41 = vld [vmem:[%s20128_s8 + $0x98] ss:$12 sps:$4 sm:$0xff]  }
 0x6e5   :  { %14128 = vmatprep.subr.bf16.mxu1 %v15117_v1  ;;  %14147 = vmatpush3.bf16.msra.mxu0 %v14732_v44 }
 0x6e6   :  { %14148 = vmatprep.subr.bf16.mxu0 %v15117_v1 }
 0x6e8   :  { %14129 = vmatpush3.bf16.msra.mxu1 %v14725_v49  ;;  %v14766_v49 = vld [vmem:[%s20128_s8 + $0xac] ss:$12 sps:$4 sm:$0xff]  }
 0x6e9   :  { %14130 = vmatprep.subr.bf16.mxu1 %v15117_v1  ;;  %14149 = vmatpush3.bf16.msra.mxu0 %v14733_v19 }
 0x6ea   :  { %14150 = vmatprep.subr.bf16.mxu0 %v15117_v1 }
 0x6ec   :  { %14131 = vmatpush3.bf16.msra.mxu1 %v14726_v42  ;;  %v14764_v42 = vld [vmem:[%s20128_s8 + $0xa8] ss:$12 sps:$4 sm:$0xff]  }
 0x6ed   :  { %14132 = vmatprep.subr.bf16.mxu1 %v15117_v1  ;;  %14151 = vmatpush3.bf16.msra.mxu0 %v14734_v21 }
 0x6ee   :  { %14152 = vmatprep.subr.bf16.mxu0 %v15117_v1 }
 0x6f0   :  { %14133 = vmatpush3.bf16.msra.mxu1 %v14727_v35  ;;  %v14767_v35 = vld [vmem:[%s20128_s8 + $0xb0] ss:$12 sps:$4 sm:$0xff]  }
 0x6f1   :  { %14153 = vmatpush3.bf16.msra.mxu0 %v14735_v48  ;;  %10253 = vmatprep.subr.bf16.mxu1 %v14738_v56  ;;  %v14783_v48 = vld [vmem:[%s20130_s9 + $0x78] ss:$12 sps:$4 sm:$0xff]   ;;  %v14786_v56 = vld [vmem:[%s20130_s9 + $0x90] ss:$12 sps:$4 sm:$0xff]  }
 0x6f2   :  { %14158 = vmatprep.subr.bf16.mxu0 %v15117_v1 }
 0x7a5   :  { %v13930_v58 = vpop.f32.mrb[36].mxu1 }
 0x7a6   :  { %v13952_v50 = vpop.f32.mrb[32].mxu0  ;;  %v13931_v0 = vpop.f32.mrb[37].mxu1 }
 0x7a7   :  { %v13932_v12 = vadd.f32 %v13931_v0, %v13930_v58  ;;  %v13953_v33 = vpop.f32.mrb[33].mxu0  ;;  %v13933_v59 = vpop.f32.mrb[38].mxu1 }
 0x7a8   :  { %v13954_v47 = vadd.f32 %v13953_v33, %v13952_v50  ;;  %v13955_v22 = vpop.f32.mrb[34].mxu0  ;;  %v13934_v51 = vpop.f32.mrb[39].mxu1 }
 0x7a9   :  { %v9790_v46 = vadd.f32 %v13932_v12, %v9750_v26  ;;  %v13956_v37 = vpop.f32.mrb[35].mxu0  ;;  %v14758_v26 = vld [vmem:[%s20128_s8 + $0x7c] ss:$12 sps:$4 sm:$0xff]   ;;  %v14768_v51 = vld [vmem:[%s20130_s9] ss:$12 sps:$4 sm:$0xff]  }
 0x7ab   :  { %v9830_v52 = vadd.f32 %v13954_v47, %v9790_v46  ;;  %v14796_v46 = vld [vmem:[%s20130_s9 + $0x8] ss:$12 sps:$4 sm:$0xff]  }
 0x7ad   :  { %v9835_v11 = vmin.f32 %v9830_v52, 0.0  ;;  %vm9840_vm12 = vcmp.gt.f32.partialorder %v9830_v52, 0.0 }
 0x7af   :  { %v9836_v54 = vmul.f32 1.442695, %v9835_v11  ;;  %v14771_v11 = vld [vmem:[%s20130_s9 + $0x18] ss:$12 sps:$4 sm:$0xff]  }
 0x7b1   :  { %15084 = vpow2.f32 %v9836_v54  ;;  %v14776_v54 = vld [vmem:[%s20130_s9 + $0x34] ss:$12 sps:$4 sm:$0xff]  }
 0x7bb   :  { %v15085_v57 = vpop.eup %15084 }
 0x7bc   :  { %v13572_v14 = vadd.f32 -1.0, %v15085_v57  ;;  %v14774_v57 = vld [vmem:[%s20130_s9 + $0x30] ss:$12 sps:$4 sm:$0xff]  }
 0x7be   :  { %v9839_v30 = vmul.f32 1.6732632, %v13572_v14  ;;  %v14779_v14 = vld [vmem:[%s20130_s9 + $0x4c] ss:$12 sps:$4 sm:$0xff]  }
 0x7c0   :  { %v9841_v63 = vsel %vm9840_vm12, %v9830_v52, %v9839_v30  ;;  %v14773_v52 = vld [vmem:[%s20130_s9 + $0x1c] ss:$12 sps:$4 sm:$0xff]  }
 0x7c1   :  { %v9842_v6 = vmul.f32 1.050701, %v9841_v63  ;;  %v14777_v30 = vld [vmem:[%s20130_s9 + $0x48] ss:$12 sps:$4 sm:$0xff]   ;;  %v14782_v63 = vld [vmem:[%s20130_s9 + $0x64] ss:$12 sps:$4 sm:$0xff]  }
 0x7c3   :  { %v9843_v16 = vpack.c.bf16 %v9842_v6, %v9842_v6  ;;  %v14780_v6 = vld [vmem:[%s20130_s9 + $0x60] ss:$12 sps:$4 sm:$0xff]  }
 0x7c5   :  { %14135 = vmatmul.mubr.bf16.vlgmr.msra.gmra.mrb[40].mxu1 %v9843_v16  ;;  %v14785_v16 = vld [vmem:[%s20130_s9 + $0x7c] ss:$12 sps:$4 sm:$0xff]  }
 0x7c6   :  { %10285 = vmatprep.mubr.bf16.mxu1 %v15118_v2  ;;  %10254 = vmatpush1.bf16.msra.mxu1 %v14736_v7  ;;  %v14788_v7 = vld [vmem:[%s20130_s9 + $0x94] ss:$12 sps:$4 sm:$0xff]  }
 0x7c7   :  { %10255 = vmatprep.subr.bf16.mxu1 %v14742_v60  ;;  %v14789_v60 = vld [vmem:[%s20130_s9 + $0xa8] ss:$12 sps:$4 sm:$0xff]  }
 0x7ca   :  { %10256 = vmatpush1.bf16.msra.mxu1 %v14740_v9  ;;  %v14791_v9 = vld [vmem:[%s20130_s9 + $0xac] ss:$12 sps:$4 sm:$0xff]  }
 0x7cb   :  { %10257 = vmatprep.subr.bf16.mxu1 %v14746_v61  ;;  %v14806_v61 = vld [vmem:[%s20130_s9 + $0x38] ss:$12 sps:$4 sm:$0xff]  }
 0x7ce   :  { %10258 = vmatpush1.bf16.msra.mxu1 %v14744_v18  ;;  %v14809_v18 = vld [vmem:[%s20130_s9 + $0x10c] ss:$12 sps:$4 sm:$0xff]  }
 0x7cf   :  { %10259 = vmatprep.subr.bf16.mxu1 %v14750_v43  ;;  %v14807_v43 = vld [vmem:[%s20130_s9 + $0x108] ss:$12 sps:$4 sm:$0xff]  }
 0x7d2   :  { %10260 = vmatpush1.bf16.msra.mxu1 %v14748_v31  ;;  %v14811_v31 = vld [vmem:[%s20130_s9 + $0x50] ss:$12 sps:$4 sm:$0xff]  }
 0x7d3   :  { %10261 = vmatprep.subr.bf16.mxu1 %v14754_v20  ;;  %v14815_v20 = vld [vmem:[%s20130_s9 + $0x128] ss:$12 sps:$4 sm:$0xff]  }
 0x7d6   :  { %10262 = vmatpush1.bf16.msra.mxu1 %v14752_v23  ;;  %v14812_v23 = vld [vmem:[%s20130_s9 + $0x120] ss:$12 sps:$4 sm:$0xff]  }
 0x7d7   :  { %10263 = vmatprep.subr.bf16.mxu1 %v14758_v26  ;;  %v14819_v26 = vld [vmem:[%s20130_s9 + $0x13c] ss:$12 sps:$4 sm:$0xff]  }
 0x7da   :  { %10264 = vmatpush1.bf16.msra.mxu1 %v14756_v29  ;;  %v14820_v29 = vld [vmem:[%s20130_s9 + $0x140] ss:$12 sps:$4 sm:$0xff]  }
 0x7db   :  { %10265 = vmatprep.subr.bf16.mxu1 %v14762_v39  ;;  %v14821_v39 = vld [vmem:[%s20130_s9 + $0x80] ss:$12 sps:$4 sm:$0xff]  }
 0x7de   :  { %10266 = vmatpush1.bf16.msra.mxu1 %v14760_v40  ;;  %v14824_v40 = vld [vmem:[%s20130_s9 + $0x154] ss:$12 sps:$4 sm:$0xff]  }
 0x7df   :  { %10267 = vmatprep.subr.bf16.mxu1 %v14766_v49  ;;  %v14822_v49 = vld [vmem:[%s20130_s9 + $0x150] ss:$12 sps:$4 sm:$0xff]  }
 0x7e2   :  { %10268 = vmatpush1.bf16.msra.mxu1 %v14764_v42  ;;  %v14826_v42 = vld [vmem:[%s20130_s9 + $0x98] ss:$12 sps:$4 sm:$0xff]  }
 0x7e3   :  { %10858 = vmatprep.subr.bf16.mxu1 %v14770_v8  ;;  %v14830_v8 = vld [vmem:[%s20130_s9 + $0x170] ss:$12 sps:$4 sm:$0xff]  }
 0x898   :  { %v9949_v62 = vpop.f32.mrb[40].mxu1 }
 0x899   :  { %v9950_v10 = vadd.f32 %v13573_v15, %v9949_v62  ;;  %v14136_v4 = vpop.f32.mrb[41].mxu1  ;;  %v14794_v15 = vld [vmem:[%s20130_s9 + $0xc4] ss:$12 sps:$4 sm:$0xff]   ;;  %v14792_v62 = vld [vmem:[%s20130_s9 + $0xc0] ss:$12 sps:$4 sm:$0xff]  }
 0x89a   :  { %v9952_v5 = vpop.f32.mrb[42].mxu1  ;;  %v14800_v4 = vld [vmem:[%s20130_s9 + $0xe0] ss:$12 sps:$4 sm:$0xff]  }
 0x89b   :  { %v9955_v27 = vpack.c.bf16 %v9950_v10, %v9950_v10  ;;  %v14137_v25 = vpop.f32.mrb[43].mxu1  ;;  %v14799_v10 = vld [vmem:[%s20130_s9 + $0xdc] ss:$12 sps:$4 sm:$0xff]   ;;  %v14797_v5 = vld [vmem:[%s20130_s9 + $0xd8] ss:$12 sps:$4 sm:$0xff]  }
 0x89c   :  { %v14805_v25 = vld [vmem:[%s20130_s9 + $0xf8] ss:$12 sps:$4 sm:$0xff]  }
 0x89d   :  { %14155 = vmatmul.mubr.bf16.vlgmr.msra.gmra.mrb[36].mxu0 %v9955_v27  ;;  %v14804_v27 = vld [vmem:[%s20130_s9 + $0xf4] ss:$12 sps:$4 sm:$0xff]  }
 0x89e   :  { %14159 = vmatpush3.bf16.msra.mxu0 %v14739_v13  ;;  %14174 = vmatprep.mubr.msk.bf16.mxu0 %vm15119_vm0, %v15117_v1  ;;  %v14801_v13 = vld [vmem:[%s20130_s9 + $0x20] ss:$12 sps:$4 sm:$0xff]  }
 0x89f   :  { %14160 = vmatprep.subr.bf16.mxu0 %v15117_v1 }
 0x8a2   :  { %14161 = vmatpush3.bf16.msra.mxu0 %v14743_v3  ;;  %v14802_v3 = vld [vmem:[%s20130_s9 + $0xf0] ss:$12 sps:$4 sm:$0xff]  }
 0x8a3   :  { %14162 = vmatprep.subr.bf16.mxu0 %v15117_v1 }
 0x8a6   :  { %14163 = vmatpush3.bf16.msra.mxu0 %v14747_v24  ;;  %v14810_v24 = vld [vmem:[%s20130_s9 + $0x110] ss:$12 sps:$4 sm:$0xff]  }
 0x8a7   :  { %14164 = vmatprep.subr.bf16.mxu0 %v15117_v1 }
 0x8aa   :  { %14165 = vmatpush3.bf16.msra.mxu0 %v14751_v32  ;;  %v14814_v32 = vld [vmem:[%s20130_s9 + $0x124] ss:$12 sps:$4 sm:$0xff]  }
 0x8ab   :  { %14166 = vmatprep.subr.bf16.mxu0 %v15117_v1 }
 0x8ae   :  { %14167 = vmatpush3.bf16.msra.mxu0 %v14755_v55  ;;  %v14816_v55 = vld [vmem:[%s20130_s9 + $0x68] ss:$12 sps:$4 sm:$0xff]  }
 0x8af   :  { %14168 = vmatprep.subr.bf16.mxu0 %v15117_v1 }
 0x8b2   :  { %14169 = vmatpush3.bf16.msra.mxu0 %v14759_v38  ;;  %v14817_v38 = vld [vmem:[%s20130_s9 + $0x138] ss:$12 sps:$4 sm:$0xff]  }
 0x8b3   :  { %14170 = vmatprep.subr.bf16.mxu0 %v15117_v1 }
 0x8b6   :  { %14171 = vmatpush3.bf16.msra.mxu0 %v14763_v41  ;;  %v14825_v41 = vld [vmem:[%s20130_s9 + $0x158] ss:$12 sps:$4 sm:$0xff]  }
 0x8b7   :  { %14172 = vmatprep.subr.bf16.mxu0 %v15117_v1 }
 0x8ba   :  { %14173 = vmatpush3.bf16.msra.mxu0 %v14767_v35  ;;  %v14829_v35 = vld [vmem:[%s20130_s9 + $0x16c] ss:$12 sps:$4 sm:$0xff]  }
 0x8bb   :  { %13985 = vmatprep.subr.bf16.mxu0 %v14795_v17  ;;  %v14827_v17 = vld [vmem:[%s20130_s9 + $0x168] ss:$12 sps:$4 sm:$0xff]  }
 0x970   :  { %v10061_v28 = vpop.f32.mrb[36].mxu0 }
 0x971   :  { %v10062_v44 = vadd.f32 %v13582_v45, %v10061_v28  ;;  %v14156_v19 = vpop.f32.mrb[37].mxu0  ;;  %v14831_v45 = vld [vmem:[%s20130_s9 + $0xb0] ss:$12 sps:$4 sm:$0xff]  }
 0x972   :  { %v10064_v21 = vpop.f32.mrb[38].mxu0  ;;  %v14834_v28 = vld [vmem:[%s20130_s9 + $0x184] ss:$12 sps:$4 sm:$0xff]  }
 0x973   :  { %v10067_v58 = vmin.f32 %v10062_v44, 0.0  ;;  %v14157_v50 = vpop.f32.mrb[39].mxu0  ;;  %vm10072_vm13 = vcmp.gt.f32.partialorder %v10062_v44, 0.0 }
 0x975   :  { %v10068_v0 = vmul.f32 1.442695, %v10067_v58 }
 0x977   :  { %15086 = vpow2.f32 %v10068_v0 }
 0x981   :  { %v15087_v12 = vpop.eup %15086 }
 0x982   :  { %v13591_v33 = vadd.f32 -1.0, %v15087_v12 }
 0x984   :  { %v10071_v59 = vmul.f32 1.6732632, %v13591_v33 }
 0x986   :  { %v10073_v47 = vsel %vm10072_vm13, %v10062_v44, %v10071_v59  ;;  %v10108_v44 = vld [vmem:[%s20133_s21] sm:$0x7] }
 0x987   :  { %v10074_v22 = vmul.f32 1.050701, %v10073_v47  ;;  %v10113_v19 = vrot.slane %v10108_v44, %v15548_v34  ;;  %v10117_v21 = vrot.slane %v10108_v44, %v15554_v36 }
 0x989   :  { %v10075_v37 = vpack.c.bf16 %v10074_v22, %v10074_v22 }
 0x98b   :  { %10286 = vmatmul.mubr.bf16.vlgmr.msra.gmra.mrb[44].mxu1 %v10075_v37  ;;  %14175 = vmatmul.mubr.bf16.vlgmr.msra.gmra.mrb[40].mxu0 %v10075_v37 }
 0x98c   :  { %10859 = vmatpush1.bf16.msra.mxu1 %v14768_v51  ;;  %13986 = vmatpush3.bf16.msra.mxu0 %v14796_v46 }
 0x98d   :  { %10860 = vmatprep.subr.bf16.mxu1 %v14773_v52  ;;  %13987 = vmatprep.subr.bf16.mxu0 %v14800_v4  ;;  %v14832_v4 = vld [vmem:[%s20130_s9 + $0x180] ss:$12 sps:$4 sm:$0xff]  }
 0x990   :  { %10861 = vmatpush1.bf16.msra.mxu1 %v14771_v11  ;;  %13988 = vmatpush3.bf16.msra.mxu0 %v14801_v13 }
 0x991   :  { %10862 = vmatprep.subr.bf16.mxu1 %v14776_v54  ;;  %13989 = vmatprep.subr.bf16.mxu0 %v14805_v25  ;;  %v14838_v25 = vld [vmem:[%s20130_s9 + $0x19c] ss:$12 sps:$4 sm:$0xff]  }
 0x994   :  { %10863 = vmatpush1.bf16.msra.mxu1 %v14774_v57  ;;  %13990 = vmatpush3.bf16.msra.mxu0 %v14806_v61  ;;  %v10121_v57 = vrot.slane %v10108_v44, %v15559_v53  ;;  %v14839_v61 = vld [vmem:[%s20130_s9 + $0x1a0] ss:$12 sps:$4 sm:$0xff]   ;;  %v14863_v44 = vld [vmem:[%s20130_s9 + $0x230] ss:$12 sps:$4 sm:$0xff]  }
 0x995   :  { %10864 = vmatprep.subr.bf16.mxu1 %v14779_v14  ;;  %13991 = vmatprep.subr.bf16.mxu0 %v14810_v24  ;;  %v14840_v24 = vld [vmem:[%s20130_s9 + $0x1b0] ss:$12 sps:$4 sm:$0xff]  }
 0x998   :  { %10865 = vmatpush1.bf16.msra.mxu1 %v14777_v30  ;;  %13992 = vmatpush3.bf16.msra.mxu0 %v14811_v31  ;;  %v14846_v31 = vld [vmem:[%s20130_s9 + $0x1cc] ss:$12 sps:$4 sm:$0xff]  }
 0x999   :  { %10866 = vmatprep.subr.bf16.mxu1 %v14782_v63  ;;  %13993 = vmatprep.subr.bf16.mxu0 %v14815_v20  ;;  %v14847_v20 = vld [vmem:[%s20130_s9 + $0x1d0] ss:$12 sps:$4 sm:$0xff]  }
 0x99c   :  { %10867 = vmatpush1.bf16.msra.mxu1 %v14780_v6  ;;  %13994 = vmatpush3.bf16.msra.mxu0 %v14816_v55 }
 0x99d   :  { %10868 = vmatprep.subr.bf16.mxu1 %v14785_v16  ;;  %13995 = vmatprep.subr.bf16.mxu0 %v14820_v29  ;;  %v14851_v29 = vld [vmem:[%s20130_s9 + $0x1e8] ss:$12 sps:$4 sm:$0xff]  }
 0x9a0   :  { %10869 = vmatpush1.bf16.msra.mxu1 %v14783_v48  ;;  %13996 = vmatpush3.bf16.msra.mxu0 %v14821_v39 }
 0x9a1   :  { %10870 = vmatprep.subr.bf16.mxu1 %v14788_v7  ;;  %13997 = vmatprep.subr.bf16.mxu0 %v14825_v41  ;;  %v14855_v41 = vld [vmem:[%s20130_s9 + $0x200] ss:$12 sps:$4 sm:$0xff]  }
 0x9a4   :  { %10871 = vmatpush1.bf16.msra.mxu1 %v14786_v56  ;;  %13998 = vmatpush3.bf16.msra.mxu0 %v14826_v42 }
 0x9a5   :  { %10872 = vmatprep.subr.bf16.mxu1 %v14791_v9  ;;  %13999 = vmatprep.subr.bf16.mxu0 %v14830_v8  ;;  %v14859_v8 = vld [vmem:[%s20130_s9 + $0x218] ss:$12 sps:$4 sm:$0xff]  }
 0x9a8   :  { %10873 = vmatpush1.bf16.msra.mxu1 %v14789_v60  ;;  %14000 = vmatpush3.bf16.msra.mxu0 %v14831_v45 }
 0x9a9   :  { %10874 = vmatprep.subr.bf16.mxu1 %v14794_v15  ;;  %14178 = vmatprep.subr.bf16.mxu0 %v15117_v1 }
 0x9ac   :  { %10875 = vmatpush1.bf16.msra.mxu1 %v14792_v62 }
 0x9ad   :  { %10876 = vmatprep.subr.bf16.mxu1 %v14799_v10 }
 0x9b0   :  { %10877 = vmatpush1.bf16.msra.mxu1 %v14797_v5  ;;  %v14835_v5 = vld [vmem:[%s20130_s9 + $0x188] ss:$12 sps:$4 sm:$0xff]  }
 0x9b1   :  { %10878 = vmatprep.subr.bf16.mxu1 %v14804_v27 }
 0x9b4   :  { %10879 = vmatpush1.bf16.msra.mxu1 %v14802_v3  ;;  %v14836_v3 = vld [vmem:[%s20130_s9 + $0x198] ss:$12 sps:$4 sm:$0xff]  }
 0x9b5   :  { %10880 = vmatprep.subr.bf16.mxu1 %v14809_v18  ;;  %v14842_v18 = vld [vmem:[%s20130_s9 + $0x1b4] ss:$12 sps:$4 sm:$0xff]  }
 0x9b8   :  { %10881 = vmatpush1.bf16.msra.mxu1 %v14807_v43  ;;  %v14843_v43 = vld [vmem:[%s20130_s9 + $0x1b8] ss:$12 sps:$4 sm:$0xff]  }
 0x9b9   :  { %10882 = vmatprep.subr.bf16.mxu1 %v14814_v32  ;;  %v14844_v32 = vld [vmem:[%s20130_s9 + $0x1c8] ss:$12 sps:$4 sm:$0xff]  }
 0x9bc   :  { %10883 = vmatpush1.bf16.msra.mxu1 %v14812_v23  ;;  %v14850_v23 = vld [vmem:[%s20130_s9 + $0x1e4] ss:$12 sps:$4 sm:$0xff]  }
 0x9bd   :  { %10884 = vmatprep.subr.bf16.mxu1 %v14819_v26  ;;  %v14848_v26 = vld [vmem:[%s20130_s9 + $0x1e0] ss:$12 sps:$4 sm:$0xff]  }
 0x9c0   :  { %10885 = vmatpush1.bf16.msra.mxu1 %v14817_v38  ;;  %v14854_v38 = vld [vmem:[%s20130_s9 + $0x1fc] ss:$12 sps:$4 sm:$0xff]  }
 0x9c1   :  { %10886 = vmatprep.subr.bf16.mxu1 %v14824_v40  ;;  %v14852_v40 = vld [vmem:[%s20130_s9 + $0x1f8] ss:$12 sps:$4 sm:$0xff]  }
 0x9c4   :  { %10887 = vmatpush1.bf16.msra.mxu1 %v14822_v49  ;;  %v14858_v49 = vld [vmem:[%s20130_s9 + $0x214] ss:$12 sps:$4 sm:$0xff]  }
 0x9c5   :  { %10888 = vmatprep.subr.bf16.mxu1 %v14829_v35  ;;  %v14856_v35 = vld [vmem:[%s20130_s9 + $0x210] ss:$12 sps:$4 sm:$0xff]  }
 0x9c8   :  { %10889 = vmatpush1.bf16.msra.mxu1 %v14827_v17  ;;  %v14862_v17 = vld [vmem:[%s20130_s9 + $0x22c] ss:$12 sps:$4 sm:$0xff]  }
 0x9c9   :  { %10899 = vmatprep.subr.bf16.mxu1 %v14834_v28  ;;  %v14860_v28 = vld [vmem:[%s20130_s9 + $0x228] ss:$12 sps:$4 sm:$0xff]  }
 0xa5e   :  { %v10287_v58 = vpop.f32.mrb[44].mxu1  ;;  %v10328_v50 = vpop.f32.mrb[40].mxu0 }
 0xa5f   :  { %v10288_v0 = vadd.f32 %v10287_v58, %v10113_v19  ;;  %v10289_v12 = vpop.f32.mrb[45].mxu1  ;;  %v14176_v33 = vpop.f32.mrb[41].mxu0  ;;  %v19595_v16 = vadd.f32 %v10328_v50, %v10121_v57  ;;  %v14864_v58 = vld [vmem:[%s20132_s10] ss:$8 sps:$4 sm:$0xff]   ;;  %v14887_v57 = vld [vmem:[%s20132_s10 + $0x74] ss:$8 sps:$4 sm:$0xff]  }
 0xa60   :  { %v10290_v59 = vadd.f32 %v10289_v12, %v10117_v21  ;;  %v10291_v47 = vpop.f32.mrb[46].mxu1  ;;  %v10331_v22 = vpop.f32.mrb[42].mxu0  ;;  %v14866_v21 = vld [vmem:[%s20132_s10 + $0x4] ss:$8 sps:$4 sm:$0xff]   ;;  %v14867_v12 = vld [vmem:[%s20132_s10 + $0x10] ss:$8 sps:$4 sm:$0xff]  }
 0xa61   :  { %v10334_v51 = vmin.f32 %v10288_v0, 0.0  ;;  %v10292_v46 = vpop.f32.mrb[47].mxu1  ;;  %v14177_v37 = vpop.f32.mrb[43].mxu0  ;;  %vm10349_vm14 = vcmp.gt.f32.partialorder %v10288_v0, 0.0  ;;  %v10336_v60 = vmin.f32 %v19595_v16, 0.0  ;;  %vm10351_vm1 = vcmp.gt.f32.partialorder %v19595_v16, 0.0 }
 0xa62   :  { %v10335_v52 = vmin.f32 %v10290_v59, 0.0  ;;  %vm10350_vm15 = vcmp.gt.f32.partialorder %v10290_v59, 0.0  ;;  %v14872_v33 = vld [vmem:[%s20132_s10 + $0x24] ss:$8 sps:$4 sm:$0xff]   ;;  %v14875_v47 = vld [vmem:[%s20132_s10 + $0x34] ss:$8 sps:$4 sm:$0xff]  }
 0xa63   :  { %v10337_v11 = vmul.f32 1.442695, %v10334_v51  ;;  %v10341_v27 = vmul.f32 1.442695, %v10336_v60  ;;  %v14873_v22 = vld [vmem:[%s20132_s10 + $0x30] ss:$8 sps:$4 sm:$0xff]  }
 0xa64   :  { %v10339_v54 = vmul.f32 1.442695, %v10335_v52  ;;  %v14878_v51 = vld [vmem:[%s20132_s10 + $0x44] ss:$8 sps:$4 sm:$0xff]   ;;  %v14876_v46 = vld [vmem:[%s20132_s10 + $0x40] ss:$8 sps:$4 sm:$0xff]  }
 0xa65   :  { %15088 = vpow2.f32 %v10337_v11  ;;  %v14881_v37 = vld [vmem:[%s20132_s10 + $0x54] ss:$8 sps:$4 sm:$0xff]   ;;  %v14879_v52 = vld [vmem:[%s20132_s10 + $0x50] ss:$8 sps:$4 sm:$0xff]   ;;  %v14884_v11 = vld [vmem:[%s20132_s10 + $0x64] ss:$8 sps:$4 sm:$0xff]  }
 0xa66   :  { %15090 = vpow2.f32 %v10339_v54  ;;  %v14882_v54 = vld [vmem:[%s20132_s10 + $0x60] ss:$8 sps:$4 sm:$0xff]   ;;  %v14902_v60 = vld [vmem:[%s20132_s10 + $0xc4] ss:$8 sps:$4 sm:$0xff]  }
 0xa67   :  { %15092 = vpow2.f32 %v10341_v27  ;;  %v14909_v27 = vld [vmem:[%s20132_s10 + $0xf0] ss:$8 sps:$4 sm:$0xff]  }
 0xa6f   :  { %v15089_v14 = vpop.eup %15088 }
 0xa70   :  { %v13616_v30 = vadd.f32 -1.0, %v15089_v14  ;;  %v15091_v63 = vpop.eup %15090  ;;  %v14885_v14 = vld [vmem:[%s20132_s10 + $0x70] ss:$8 sps:$4 sm:$0xff]  }
 0xa71   :  { %v13617_v48 = vadd.f32 -1.0, %v15091_v63  ;;  %v15093_v55 = vpop.eup %15092  ;;  %v14888_v63 = vld [vmem:[%s20132_s10 + $0x80] ss:$8 sps:$4 sm:$0xff]  }
 0xa72   :  { %v10346_v6 = vmul.f32 1.6732632, %v13616_v30  ;;  %v13618_v39 = vadd.f32 -1.0, %v15093_v55  ;;  %v14890_v30 = vld [vmem:[%s20132_s10 + $0x84] ss:$8 sps:$4 sm:$0xff]  }
 0xa73   :  { %v10347_v56 = vmul.f32 1.6732632, %v13617_v48  ;;  %v14896_v48 = vld [vmem:[%s20132_s10 + $0xa4] ss:$8 sps:$4 sm:$0xff]  }
 0xa74   :  { %v10352_v7 = vsel %vm10349_vm14, %v10288_v0, %v10346_v6  ;;  %v10348_v42 = vmul.f32 1.6732632, %v13618_v39  ;;  %v14869_v0 = vld [vmem:[%s20132_s10 + $0x14] ss:$8 sps:$4 sm:$0xff]   ;;  %v14948_v55 = vld [vmem:[%s20134_s11 + $0x60] ss:$12 sps:$4 sm:$0xff]  }
 0xa75   :  { %v10355_v9 = vmul.f32 1.050701, %v10352_v7  ;;  %v10353_v15 = vsel %vm10350_vm15, %v10290_v59, %v10347_v56  ;;  %v14870_v59 = vld [vmem:[%s20132_s10 + $0x20] ss:$8 sps:$4 sm:$0xff]   ;;  %v14893_v6 = vld [vmem:[%s20132_s10 + $0x94] ss:$8 sps:$4 sm:$0xff]  }
 0xa76   :  { %v10356_v62 = vmul.f32 1.050701, %v10353_v15  ;;  %v10354_v45 = vsel %vm10351_vm1, %v19595_v16, %v10348_v42  ;;  %v14891_v16 = vld [vmem:[%s20132_s10 + $0x90] ss:$8 sps:$4 sm:$0xff]   ;;  %v14894_v7 = vld [vmem:[%s20132_s10 + $0xa0] ss:$8 sps:$4 sm:$0xff]  }
 0xa77   :  { %v10358_v13 = vpack.c.bf16 %v10355_v9, %v10355_v9  ;;  %v10357_v19 = vmul.f32 1.050701, %v10354_v45  ;;  %v14899_v56 = vld [vmem:[%s20132_s10 + $0xb4] ss:$8 sps:$4 sm:$0xff]   ;;  %v14897_v9 = vld [vmem:[%s20132_s10 + $0xb0] ss:$8 sps:$4 sm:$0xff]  }
 0xa78   :  { %v10359_v10 = vpack.c.bf16 %v10356_v62, %v10356_v62  ;;  %v14900_v15 = vld [vmem:[%s20132_s10 + $0xc0] ss:$8 sps:$4 sm:$0xff]   ;;  %v14905_v62 = vld [vmem:[%s20132_s10 + $0xd4] ss:$8 sps:$4 sm:$0xff]  }
 0xa79   :  { %v10360_v50 = vpack.c.bf16 %v10357_v19, %v10357_v19  ;;  %v14954_v39 = vld [vmem:[%s20134_s11 + $0x90] ss:$12 sps:$4 sm:$0xff]   ;;  %v14960_v42 = vld [vmem:[%s20134_s11 + $0xc0] ss:$12 sps:$4 sm:$0xff]  }
 0xa7a   :  { %10890 = vmatprep.mubr.bf16.mxu1 %v10359_v10  ;;  %10972 = vmatprep.mubr.bf16.mxu0 %v10359_v10  ;;  %v14903_v10 = vld [vmem:[%s20132_s10 + $0xd0] ss:$8 sps:$4 sm:$0xff]  }
 0xa7b   :  { %10891 = vmatmul.mubr.bf16.vlgmr.msra.gmra.mrb[48].mxu1 %v10358_v13  ;;  %10973 = vmatmul.mubr.bf16.vlgmr.msra.gmra.mrb[44].mxu0 %v10358_v13  ;;  %v14911_v13 = vld [vmem:[%s20132_s10 + $0xf4] ss:$8 sps:$4 sm:$0xff]  }
 0xa7c   :  { %10900 = vmatpush1.bf16.msra.mxu1 %v14832_v4  ;;  %14179 = vmatpush3.bf16.msra.mxu0 %v14835_v5  ;;  %v14908_v4 = vld [vmem:[%s20132_s10 + $0xe4] ss:$8 sps:$4 sm:$0xff]   ;;  %v14906_v5 = vld [vmem:[%s20132_s10 + $0xe0] ss:$8 sps:$4 sm:$0xff]  }
 0xa7d   :  { %10901 = vmatprep.subr.bf16.mxu1 %v14838_v25  ;;  %14180 = vmatprep.subr.bf16.mxu0 %v15117_v1  ;;  %v14914_v25 = vld [vmem:[%s20132_s10 + $0x104] ss:$8 sps:$4 sm:$0xff]  }
 0xa7e   :  { %10931 = vmatprep.mubr.bf16.mxu1 %v15118_v2  ;;  %14194 = vmatprep.mubr.msk.bf16.mxu0 %vm15119_vm0, %v15117_v1 }
 0xa80   :  { %10902 = vmatpush1.bf16.msra.mxu1 %v14836_v3  ;;  %14181 = vmatpush3.bf16.msra.mxu0 %v14839_v61  ;;  %v14936_v3 = vld [vmem:[%s20134_s11] ss:$12 sps:$4 sm:$0xff]   ;;  %v14938_v61 = vld [vmem:[%s20134_s11 + $0x4] ss:$12 sps:$4 sm:$0xff]  }
 0xa81   :  { %10903 = vmatprep.subr.bf16.mxu1 %v14842_v18  ;;  %14182 = vmatprep.subr.bf16.mxu0 %v15117_v1  ;;  %v14941_v18 = vld [vmem:[%s20134_s11 + $0x1c] ss:$12 sps:$4 sm:$0xff]  }
 0xa84   :  { %10904 = vmatpush1.bf16.msra.mxu1 %v14840_v24  ;;  %14183 = vmatpush3.bf16.msra.mxu0 %v14843_v43  ;;  %v14939_v24 = vld [vmem:[%s20134_s11 + $0x18] ss:$12 sps:$4 sm:$0xff]   ;;  %v14944_v43 = vld [vmem:[%s20134_s11 + $0x34] ss:$12 sps:$4 sm:$0xff]  }
 0xa85   :  { %10905 = vmatprep.subr.bf16.mxu1 %v14846_v31  ;;  %14184 = vmatprep.subr.bf16.mxu0 %v15117_v1  ;;  %v14942_v31 = vld [vmem:[%s20134_s11 + $0x30] ss:$12 sps:$4 sm:$0xff]  }
 0xa88   :  { %10906 = vmatpush1.bf16.msra.mxu1 %v14844_v32  ;;  %14185 = vmatpush3.bf16.msra.mxu0 %v14847_v20  ;;  %v14947_v32 = vld [vmem:[%s20134_s11 + $0x4c] ss:$12 sps:$4 sm:$0xff]   ;;  %v14945_v20 = vld [vmem:[%s20134_s11 + $0x48] ss:$12 sps:$4 sm:$0xff]  }
 0xa89   :  { %10907 = vmatprep.subr.bf16.mxu1 %v14850_v23  ;;  %14186 = vmatprep.subr.bf16.mxu0 %v15117_v1  ;;  %v14950_v23 = vld [vmem:[%s20134_s11 + $0x64] ss:$12 sps:$4 sm:$0xff]  }
 0xa8c   :  { %10908 = vmatpush1.bf16.msra.mxu1 %v14848_v26  ;;  %14187 = vmatpush3.bf16.msra.mxu0 %v14851_v29  ;;  %v14953_v26 = vld [vmem:[%s20134_s11 + $0x7c] ss:$12 sps:$4 sm:$0xff]   ;;  %v14951_v29 = vld [vmem:[%s20134_s11 + $0x78] ss:$12 sps:$4 sm:$0xff]  }
 0xa8d   :  { %10909 = vmatprep.subr.bf16.mxu1 %v14854_v38  ;;  %14188 = vmatprep.subr.bf16.mxu0 %v15117_v1  ;;  %v14956_v38 = vld [vmem:[%s20134_s11 + $0x94] ss:$12 sps:$4 sm:$0xff]  }
 0xa90   :  { %10910 = vmatpush1.bf16.msra.mxu1 %v14852_v40  ;;  %14189 = vmatpush3.bf16.msra.mxu0 %v14855_v41  ;;  %v14959_v40 = vld [vmem:[%s20134_s11 + $0xac] ss:$12 sps:$4 sm:$0xff]   ;;  %v14957_v41 = vld [vmem:[%s20134_s11 + $0xa8] ss:$12 sps:$4 sm:$0xff]  }
 0xa91   :  { %10911 = vmatprep.subr.bf16.mxu1 %v14858_v49  ;;  %14190 = vmatprep.subr.bf16.mxu0 %v15117_v1  ;;  %v14962_v49 = vld [vmem:[%s20134_s11 + $0xc4] ss:$12 sps:$4 sm:$0xff]  }
 0xa94   :  { %10912 = vmatpush1.bf16.msra.mxu1 %v14856_v35  ;;  %14191 = vmatpush3.bf16.msra.mxu0 %v14859_v8 }
 0xa95   :  { %10913 = vmatprep.subr.bf16.mxu1 %v14862_v17  ;;  %14192 = vmatprep.subr.bf16.mxu0 %v15117_v1 }
 0xa98   :  { %10914 = vmatpush1.bf16.msra.mxu1 %v14860_v28  ;;  %14193 = vmatpush3.bf16.msra.mxu0 %v14863_v44  ;;  %v10457_v44 = vld [vmem:[%s20135_s22] sm:$0x7] }
 0xa99   :  { %11347 = vmatprep.subr.bf16.mxu0 %v14866_v21  ;;  %11784 = vmatprep.subr.bf16.mxu1 %v14938_v61  ;;  %v10470_v19 = vrot.slane %v10457_v44, %v15559_v53  ;;  %v10462_v21 = vrot.slane %v10457_v44, %v15548_v34  ;;  %v14920_v61 = vld [vmem:[%s20132_s10 + $0x124] ss:$8 sps:$4 sm:$0xff]  }
 0xa9b   :  { %10932 = vmatmul.mubr.bf16.vlgmr.msra.gmra.mrb[48].mxu1 %v10360_v50  ;;  %14195 = vmatmul.mubr.bf16.vlgmr.msra.gmra.mrb[48].mxu0 %v10360_v50 }
 0xa9c   :  { %11348 = vmatpush1.bf16.msra.mxu0 %v14864_v58  ;;  %11785 = vmatpush1.bf16.msra.mxu1 %v14936_v3  ;;  %v10466_v58 = vrot.slane %v10457_v44, %v15554_v36  ;;  %v14915_v3 = vld [vmem:[%s20132_s10 + $0x110] ss:$8 sps:$4 sm:$0xff]   ;;  %v14969_v44 = vld [vmem:[%s20134_s11 + $0x108] ss:$12 sps:$4 sm:$0xff]  }
 0xa9d   :  { %11349 = vmatprep.subr.bf16.mxu0 %v14869_v0  ;;  %11786 = vmatprep.subr.bf16.mxu1 %v14941_v18  ;;  %v14918_v18 = vld [vmem:[%s20132_s10 + $0x120] ss:$8 sps:$4 sm:$0xff]  }
 0xaa0   :  { %11350 = vmatpush1.bf16.msra.mxu0 %v14867_v12  ;;  %11787 = vmatpush1.bf16.msra.mxu1 %v14939_v24  ;;  %v14923_v24 = vld [vmem:[%s20132_s10 + $0x134] ss:$8 sps:$4 sm:$0xff]  }
 0xaa1   :  { %11351 = vmatprep.subr.bf16.mxu0 %v14872_v33  ;;  %11788 = vmatprep.subr.bf16.mxu1 %v14944_v43  ;;  %v14926_v43 = vld [vmem:[%s20132_s10 + $0x144] ss:$8 sps:$4 sm:$0xff]  }
 0xaa4   :  { %11352 = vmatpush1.bf16.msra.mxu0 %v14870_v59  ;;  %11789 = vmatpush1.bf16.msra.mxu1 %v14942_v31 }
 0xaa5   :  { %11353 = vmatprep.subr.bf16.mxu0 %v14875_v47  ;;  %11790 = vmatprep.subr.bf16.mxu1 %v14947_v32  ;;  %v14924_v32 = vld [vmem:[%s20132_s10 + $0x140] ss:$8 sps:$4 sm:$0xff]  }
 0xaa8   :  { %11354 = vmatpush1.bf16.msra.mxu0 %v14873_v22  ;;  %11791 = vmatpush1.bf16.msra.mxu1 %v14945_v20  ;;  %v14929_v20 = vld [vmem:[%s20132_s10 + $0x154] ss:$8 sps:$4 sm:$0xff]  }
 0xaa9   :  { %11355 = vmatprep.subr.bf16.mxu0 %v14878_v51  ;;  %11792 = vmatprep.subr.bf16.mxu1 %v14950_v23 }
 0xaac   :  { %11356 = vmatpush1.bf16.msra.mxu0 %v14876_v46  ;;  %11793 = vmatpush1.bf16.msra.mxu1 %v14948_v55  ;;  %v14927_v55 = vld [vmem:[%s20132_s10 + $0x150] ss:$8 sps:$4 sm:$0xff]  }
 0xaad   :  { %11357 = vmatprep.subr.bf16.mxu0 %v14881_v37  ;;  %11794 = vmatprep.subr.bf16.mxu1 %v14953_v26  ;;  %v14932_v26 = vld [vmem:[%s20132_s10 + $0x164] ss:$8 sps:$4 sm:$0xff]  }
 0xab0   :  { %11358 = vmatpush1.bf16.msra.mxu0 %v14879_v52  ;;  %11795 = vmatpush1.bf16.msra.mxu1 %v14951_v29 }
 0xab1   :  { %11359 = vmatprep.subr.bf16.mxu0 %v14884_v11  ;;  %11796 = vmatprep.subr.bf16.mxu1 %v14956_v38  ;;  %v14930_v38 = vld [vmem:[%s20132_s10 + $0x160] ss:$8 sps:$4 sm:$0xff]  }
 0xab4   :  { %11360 = vmatpush1.bf16.msra.mxu0 %v14882_v54  ;;  %11797 = vmatpush1.bf16.msra.mxu1 %v14954_v39  ;;  %v14935_v39 = vld [vmem:[%s20132_s10 + $0x174] ss:$8 sps:$4 sm:$0xff]  }
 0xab5   :  { %11361 = vmatprep.subr.bf16.mxu0 %v14887_v57  ;;  %11798 = vmatprep.subr.bf16.mxu1 %v14959_v40 }
 0xab8   :  { %11362 = vmatpush1.bf16.msra.mxu0 %v14885_v14  ;;  %11799 = vmatpush1.bf16.msra.mxu1 %v14957_v41  ;;  %v14933_v41 = vld [vmem:[%s20132_s10 + $0x170] ss:$8 sps:$4 sm:$0xff]  }
 0xab9   :  { %11363 = vmatprep.subr.bf16.mxu0 %v14890_v30  ;;  %11800 = vmatprep.subr.bf16.mxu1 %v14962_v49 }
 0xabc   :  { %11364 = vmatpush1.bf16.msra.mxu0 %v14888_v63  ;;  %11801 = vmatpush1.bf16.msra.mxu1 %v14960_v42 }
 0xabd   :  { %11365 = vmatprep.subr.bf16.mxu0 %v14893_v6 }
 0xac0   :  { %11366 = vmatpush1.bf16.msra.mxu0 %v14891_v16 }
 0xac1   :  { %11367 = vmatprep.subr.bf16.mxu0 %v14896_v48 }
 0xac4   :  { %11368 = vmatpush1.bf16.msra.mxu0 %v14894_v7 }
 0xac5   :  { %11369 = vmatprep.subr.bf16.mxu0 %v14899_v56 }
 0xac8   :  { %11370 = vmatpush1.bf16.msra.mxu0 %v14897_v9 }
 0xac9   :  { %11371 = vmatprep.subr.bf16.mxu0 %v14902_v60 }
 0xacc   :  { %11372 = vmatpush1.bf16.msra.mxu0 %v14900_v15 }
 0xacd   :  { %11373 = vmatprep.subr.bf16.mxu0 %v14905_v62 }
 0xad0   :  { %11374 = vmatpush1.bf16.msra.mxu0 %v14903_v10 }
 0xad1   :  { %11375 = vmatprep.subr.bf16.mxu0 %v14908_v4 }
 0xad4   :  { %11376 = vmatpush1.bf16.msra.mxu0 %v14906_v5  ;;  %v14912_v5 = vld [vmem:[%s20132_s10 + $0x100] ss:$8 sps:$4 sm:$0xff]  }
 0xad5   :  { %11377 = vmatprep.subr.bf16.mxu0 %v14911_v13 }
 0xad8   :  { %11378 = vmatpush1.bf16.msra.mxu0 %v14909_v27 }
 0xad9   :  { %11388 = vmatprep.subr.bf16.mxu0 %v14914_v25  ;;  %v14917_v25 = vld [vmem:[%s20132_s10 + $0x114] ss:$8 sps:$4 sm:$0xff]  }
 0xb4e   :  { %v14001_v35 = vpop.f32.mrb[44].mxu0 }
 0xb4f   :  { %v14002_v8 = vpop.f32.mrb[45].mxu0 }
 0xb50   :  { %v14003_v17 = vadd.f32 %v14002_v8, %v14001_v35  ;;  %v14004_v45 = vpop.f32.mrb[46].mxu0  ;;  %v14965_v35 = vld [vmem:[%s20134_s11 + $0xdc] ss:$12 sps:$4 sm:$0xff]   ;;  %v14963_v8 = vld [vmem:[%s20134_s11 + $0xd8] ss:$12 sps:$4 sm:$0xff]  }
 0xb51   :  { %v14005_v28 = vpop.f32.mrb[47].mxu0  ;;  %11802 = vmatprep.subr.bf16.mxu1 %v14965_v35  ;;  %v14966_v45 = vld [vmem:[%s20134_s11 + $0xf0] ss:$12 sps:$4 sm:$0xff]  }
 0xb52   :  { %v10975_v50 = vadd.f32 %v14003_v17, %v10470_v19  ;;  %11803 = vmatpush1.bf16.msra.mxu1 %v14963_v8  ;;  %v14968_v17 = vld [vmem:[%s20134_s11 + $0xf4] ss:$12 sps:$4 sm:$0xff]   ;;  %v14971_v28 = vld [vmem:[%s20134_s11 + $0x10c] ss:$12 sps:$4 sm:$0xff]   ;;  %v14974_v19 = vld [vmem:[%s20134_s11 + $0x124] ss:$12 sps:$4 sm:$0xff]  }
 0xb53   :  { %11804 = vmatprep.subr.bf16.mxu1 %v14968_v17  ;;  %v15005_v35 = vld [vmem:[%s20136_s12 + $0x10] sm:$0xff]   ;;  %v15006_v8 = vld [vmem:[%s20136_s12 + $0x58] sm:$0xff]  }
 0xb54   :  { %v15007_v17 = vld [vmem:[%s20136_s12 + $0x18] sm:$0xff]  }
 0xb56   :  { %11805 = vmatpush1.bf16.msra.mxu1 %v14966_v45  ;;  %v15008_v45 = vld [vmem:[%s20136_s12 + $0x60] sm:$0xff]  }
 0xb57   :  { %11806 = vmatprep.subr.bf16.mxu1 %v14971_v28  ;;  %v15009_v28 = vld [vmem:[%s20136_s12 + $0x20] sm:$0xff]  }
 0xb5a   :  { %11807 = vmatpush1.bf16.msra.mxu1 %v14969_v44  ;;  %v15010_v44 = vld [vmem:[%s20136_s12 + $0x68] sm:$0xff]  }
 0xb5b   :  { %11808 = vmatprep.subr.bf16.mxu1 %v14974_v19  ;;  %v15011_v19 = vld [vmem:[%s20136_s12 + $0x28] sm:$0xff]  }
 0xb6e   :  { %v10933_v0 = vpop.f32.mrb[48].mxu1  ;;  %v11014_v12 = vpop.f32.mrb[48].mxu0 }
 0xb6f   :  { %v14260_v33 = vadd.f32 %v10933_v0, %v10462_v21  ;;  %v19838_v59 = vadd.f32 %v11014_v12, %v10975_v50  ;;  %v10935_v47 = vpop.f32.mrb[49].mxu1  ;;  %v14196_v22 = vpop.f32.mrb[49].mxu0  ;;  %v14972_v21 = vld [vmem:[%s20134_s11 + $0x120] ss:$12 sps:$4 sm:$0xff]   ;;  %v14975_v50 = vld [vmem:[%s20134_s11 + $0x138] ss:$12 sps:$4 sm:$0xff]  }
 0xb70   :  { %v14261_v51 = vadd.f32 %v10935_v47, %v10466_v58  ;;  %v10937_v46 = vpop.f32.mrb[50].mxu1  ;;  %v11017_v37 = vpop.f32.mrb[50].mxu0  ;;  %11809 = vmatpush1.bf16.msra.mxu1 %v14972_v21  ;;  %v14977_v58 = vld [vmem:[%s20134_s11 + $0x13c] ss:$12 sps:$4 sm:$0xff]   ;;  %v14980_v0 = vld [vmem:[%s20134_s11 + $0x154] ss:$12 sps:$4 sm:$0xff]  }
 0xb71   :  { %v11020_v52 = vmin.f32 %v14260_v33, 0.0  ;;  %v10938_v11 = vpop.f32.mrb[51].mxu1  ;;  %v14197_v54 = vpop.f32.mrb[51].mxu0  ;;  %vm11035_vm2 = vcmp.gt.f32.partialorder %v14260_v33, 0.0  ;;  %v11022_v15 = vmin.f32 %v19838_v59, 0.0  ;;  %vm11037_vm4 = vcmp.gt.f32.partialorder %v19838_v59, 0.0  ;;  %11810 = vmatprep.subr.bf16.mxu1 %v14977_v58 }
 0xb72   :  { %v11021_v57 = vmin.f32 %v14261_v51, 0.0  ;;  %vm11036_vm3 = vcmp.gt.f32.partialorder %v14261_v51, 0.0  ;;  %v14978_v12 = vld [vmem:[%s20134_s11 + $0x150] ss:$12 sps:$4 sm:$0xff]   ;;  %v14984_v47 = vld [vmem:[%s20134_s11 + $0xc8] ss:$12 sps:$4 sm:$0xff]  }
 0xb73   :  { %v11023_v14 = vmul.f32 1.442695, %v11020_v52  ;;  %v11027_v27 = vmul.f32 1.442695, %v11022_v15  ;;  %v15000_v22 = vld [vmem:[%s20136_s12 + $0x40] sm:$0xff]   ;;  %v15012_v21 = vld [vmem:[%s20136_s12 + $0x70] sm:$0xff]  }
 0xb74   :  { %v11025_v30 = vmul.f32 1.442695, %v11021_v57  ;;  %11811 = vmatpush1.bf16.msra.mxu1 %v14975_v50  ;;  %v11095_v46 = vld [vmem:[%s20137_s23] sm:$0x3]  ;;  %v15013_v58 = vld [vmem:[%s20136_s12 + $0x30] sm:$0xff]   ;;  %v15014_v50 = vld [vmem:[%s20136_s12 + $0x78] sm:$0xff]  }
 0xb75   :  { %15094 = vpow2.f32 %v11023_v14  ;;  %11812 = vmatprep.subr.bf16.mxu1 %v14980_v0  ;;  %v11100_v37 = vrot.slane %v11095_v46, %v15548_v34  ;;  %v11104_v52 = vrot.slane %v11095_v46, %v15554_v36  ;;  %v15015_v0 = vld [vmem:[%s20136_s12 + $0x38] sm:$0xff]   ;;  %v15022_v46 = vld [vmem:[%s20136_s12 + $0xb0] sm:$0xff]  }
 0xb76   :  { %15096 = vpow2.f32 %v11025_v30 }
 0xb77   :  { %15098 = vpow2.f32 %v11027_v27 }
 0xb78   :  { %11813 = vmatpush1.bf16.msra.mxu1 %v14978_v12  ;;  %v15016_v12 = vld [vmem:[%s20136_s12 + $0x80] sm:$0xff]  }
 0xb7f   :  { %v15095_v63 = vpop.eup %15094 }
 0xb80   :  { %v13691_v6 = vadd.f32 -1.0, %v15095_v63  ;;  %v15097_v16 = vpop.eup %15096 }
 0xb81   :  { %v13692_v7 = vadd.f32 -1.0, %v15097_v16  ;;  %v15099_v31 = vpop.eup %15098 }
 0xb82   :  { %v11032_v48 = vmul.f32 1.6732632, %v13691_v6  ;;  %v13693_v23 = vadd.f32 -1.0, %v15099_v31  ;;  %v14990_v31 = vld [vmem:[%s20134_s11 + $0x110] ss:$12 sps:$4 sm:$0xff]  }
 0xb83   :  { %v11033_v9 = vmul.f32 1.6732632, %v13692_v7 }
 0xb84   :  { %v11038_v56 = vsel %vm11035_vm2, %v14260_v33, %v11032_v48  ;;  %v11034_v29 = vmul.f32 1.6732632, %v13693_v23  ;;  %v14983_v33 = vld [vmem:[%s20134_s11 + $0x16c] ss:$12 sps:$4 sm:$0xff]   ;;  %v14993_v23 = vld [vmem:[%s20134_s11 + $0x68] ss:$12 sps:$4 sm:$0xff]  }
 0xb85   :  { %v11041_v60 = vmul.f32 1.050701, %v11038_v56  ;;  %v11039_v62 = vsel %vm11036_vm3, %v14261_v51, %v11033_v9  ;;  %11814 = vmatprep.subr.bf16.mxu1 %v14983_v33  ;;  %v15001_v51 = vld [vmem:[%s20136_s12] sm:$0xff]   ;;  %v15017_v33 = vld [vmem:[%s20136_s12 + $0x88] sm:$0xff]  }
 0xb86   :  { %v11042_v10 = vmul.f32 1.050701, %v11039_v62  ;;  %v11040_v40 = vsel %vm11037_vm4, %v19838_v59, %v11034_v29  ;;  %v14981_v59 = vld [vmem:[%s20134_s11 + $0x168] ss:$12 sps:$4 sm:$0xff]   ;;  %v14996_v29 = vld [vmem:[%s20134_s11 + $0x158] ss:$12 sps:$4 sm:$0xff]  }
 0xb87   :  { %v11044_v13 = vpack.c.bf16 %v11041_v60, %v11041_v60  ;;  %v11043_v49 = vmul.f32 1.050701, %v11040_v40  ;;  %11815 = vmatpush1.bf16.msra.mxu1 %v14981_v59  ;;  %v14999_v40 = vld [vmem:[%s20134_s11 + $0xb0] ss:$12 sps:$4 sm:$0xff]  }
 0xb88   :  { %v11045_v4 = vpack.c.bf16 %v11042_v10, %v11042_v10  ;;  %14016 = vmatprep.subr.bf16.mxu1 %v14984_v47  ;;  %v15018_v59 = vld [vmem:[%s20136_s12 + $0x90] sm:$0xff]   ;;  %v15019_v47 = vld [vmem:[%s20136_s12 + $0x98] sm:$0xff]  }
 0xb89   :  { %v11046_v42 = vpack.c.bf16 %v11043_v49, %v11043_v49  ;;  %v15003_v49 = vld [vmem:[%s20136_s12 + $0x8] sm:$0xff]  }
 0xb8a   :  { %11379 = vmatprep.mubr.bf16.mxu0 %v11045_v4 }
 0xb8b   :  { %11380 = vmatmul.mubr.bf16.vlgmr.msra.gmra.mrb[52].mxu0 %v11044_v13 }
 0xb8c   :  { %11389 = vmatpush1.bf16.msra.mxu0 %v14912_v5  ;;  %11420 = vmatprep.mubr.bf16.mxu0 %v15118_v2  ;;  %v14921_v2 = vld [vmem:[%s20132_s10 + $0x130] ss:$8 sps:$4 sm:$0xff]  }
 0xb8d   :  { %11390 = vmatprep.subr.bf16.mxu0 %v14917_v25 }
 0xb90   :  { %11391 = vmatpush1.bf16.msra.mxu0 %v14915_v3  ;;  %v14985_v3 = vld [vmem:[%s20134_s11 + $0x8] ss:$12 sps:$4 sm:$0xff]  }
 0xb91   :  { %11392 = vmatprep.subr.bf16.mxu0 %v14920_v61 }
 0xb94   :  { %11393 = vmatpush1.bf16.msra.mxu0 %v14918_v18  ;;  %v14986_v18 = vld [vmem:[%s20134_s11 + $0xe0] ss:$12 sps:$4 sm:$0xff]  }
 0xb95   :  { %11394 = vmatprep.subr.bf16.mxu0 %v14923_v24  ;;  %v14987_v24 = vld [vmem:[%s20134_s11 + $0x20] ss:$12 sps:$4 sm:$0xff]  }
 0xb98   :  { %11395 = vmatpush1.bf16.msra.mxu0 %v14921_v2  ;;  %v14988_v2 = vld [vmem:[%s20134_s11 + $0xf8] ss:$12 sps:$4 sm:$0xff]  }
 0xb99   :  { %11396 = vmatprep.subr.bf16.mxu0 %v14926_v43  ;;  %v14989_v43 = vld [vmem:[%s20134_s11 + $0x38] ss:$12 sps:$4 sm:$0xff]  }
 0xb9c   :  { %11397 = vmatpush1.bf16.msra.mxu0 %v14924_v32  ;;  %v14991_v32 = vld [vmem:[%s20134_s11 + $0x50] ss:$12 sps:$4 sm:$0xff]  }
 0xb9d   :  { %11398 = vmatprep.subr.bf16.mxu0 %v14929_v20  ;;  %v14992_v20 = vld [vmem:[%s20134_s11 + $0x128] ss:$12 sps:$4 sm:$0xff]  }
 0xba0   :  { %11399 = vmatpush1.bf16.msra.mxu0 %v14927_v55  ;;  %v14994_v55 = vld [vmem:[%s20134_s11 + $0x140] ss:$12 sps:$4 sm:$0xff]  }
 0xba1   :  { %11400 = vmatprep.subr.bf16.mxu0 %v14932_v26  ;;  %v14995_v26 = vld [vmem:[%s20134_s11 + $0x80] ss:$12 sps:$4 sm:$0xff]  }
 0xba4   :  { %11401 = vmatpush1.bf16.msra.mxu0 %v14930_v38  ;;  %v14997_v38 = vld [vmem:[%s20134_s11 + $0x98] ss:$12 sps:$4 sm:$0xff]  }
 0xba5   :  { %11402 = vmatprep.subr.bf16.mxu0 %v14935_v39  ;;  %v14998_v39 = vld [vmem:[%s20134_s11 + $0x170] ss:$12 sps:$4 sm:$0xff]  }
 0xba8   :  { %11403 = vmatpush1.bf16.msra.mxu0 %v14933_v41  ;;  %v15002_v41 = vld [vmem:[%s20136_s12 + $0x48] sm:$0xff]  }
 0xba9   :  { %14038 = vmatprep.subr.bf16.mxu0 %v15000_v22  ;;  %v15020_v22 = vld [vmem:[%s20136_s12 + $0xa0] sm:$0xff]  }
 0xbab   :  { %11421 = vmatmul.mubr.bf16.vlgmr.msra.gmra.mrb[52].mxu0 %v11046_v42  ;;  %v15004_v42 = vld [vmem:[%s20136_s12 + $0x50] sm:$0xff]  }
 0xbac   :  { %14039 = vmatpush3.bf16.msra.mxu0 %v15001_v51  ;;  %v15021_v51 = vld [vmem:[%s20136_s12 + $0xa8] sm:$0xff]  }
 0xbad   :  { %14040 = vmatprep.subr.bf16.mxu0 %v15002_v41  ;;  %v15025_v41 = vld [vmem:[%s20139_s13 + $0x8] sm:$0xff]  }
 0xbb0   :  { %14041 = vmatpush3.bf16.msra.mxu0 %v15003_v49  ;;  %v15026_v49 = vld [vmem:[%s20139_s13 + $0x10] sm:$0xff]  }
 0xbb1   :  { %14042 = vmatprep.subr.bf16.mxu0 %v15004_v42  ;;  %v15027_v42 = vld [vmem:[%s20139_s13 + $0x18] sm:$0xff]  }
 0xbb4   :  { %14043 = vmatpush3.bf16.msra.mxu0 %v15005_v35  ;;  %v15028_v35 = vld [vmem:[%s20139_s13 + $0x20] sm:$0xff]  }
 0xbb5   :  { %14044 = vmatprep.subr.bf16.mxu0 %v15006_v8  ;;  %v15029_v8 = vld [vmem:[%s20139_s13 + $0x28] sm:$0xff]  }
 0xbb8   :  { %14045 = vmatpush3.bf16.msra.mxu0 %v15007_v17  ;;  %v15030_v17 = vld [vmem:[%s20139_s13 + $0x30] sm:$0xff]  }
 0xbb9   :  { %14046 = vmatprep.subr.bf16.mxu0 %v15008_v45  ;;  %v15031_v45 = vld [vmem:[%s20139_s13 + $0x38] sm:$0xff]  }
 0xbbc   :  { %14047 = vmatpush3.bf16.msra.mxu0 %v15009_v28 }
 0xbbd   :  { %14048 = vmatprep.subr.bf16.mxu0 %v15010_v44 }
 0xbc0   :  { %14049 = vmatpush3.bf16.msra.mxu0 %v15011_v19 }
 0xbc1   :  { %14050 = vmatprep.subr.bf16.mxu0 %v15012_v21 }
 0xbc4   :  { %14051 = vmatpush3.bf16.msra.mxu0 %v15013_v58 }
 0xbc5   :  { %14052 = vmatprep.subr.bf16.mxu0 %v15014_v50  ;;  %v13795_v50 = vld [vmem:[%s20140_s25] ss:$0 sm:$0xff]  ;;  %s15120_s25 = smov 64  }
 0xbc8   :  { %14053 = vmatpush3.bf16.msra.mxu0 %v15015_v0 }
 0xbc9   :  { %14218 = vmatprep.subr.bf16.mxu0 %v15117_v1 }
 0xc7e   :  { %v11422_v11 = vpop.f32.mrb[52].mxu0 }
 0xc7f   :  { %v14262_v54 = vadd.f32 %v11422_v11, %v11100_v37  ;;  %v11424_v57 = vpop.f32.mrb[53].mxu0  ;;  %v15023_v37 = vld [vmem:[%s20136_s12 + $0xb8] sm:$0xff]  }
 0xc80   :  { %v14263_v14 = vadd.f32 %v11424_v57, %v11104_v52  ;;  %v11426_v30 = vpop.f32.mrb[54].mxu0  ;;  %v11511_v52 = vld [vmem:[%s20138_s24] sm:$0x7] }
 0xc81   :  { %v11429_v63 = vmin.f32 %v14262_v54, 0.0  ;;  %v11427_v6 = vpop.f32.mrb[55].mxu0  ;;  %vm11439_vm5 = vcmp.gt.f32.partialorder %v14262_v54, 0.0  ;;  %v11516_v11 = vrot.slane %v11511_v52, %v15548_v34 }
 0xc82   :  { %v11430_v16 = vmin.f32 %v14263_v14, 0.0  ;;  %vm11440_vm6 = vcmp.gt.f32.partialorder %v14263_v14, 0.0 }
 0xc83   :  { %v11431_v48 = vmul.f32 1.442695, %v11429_v63 }
 0xc84   :  { %v11433_v7 = vmul.f32 1.442695, %v11430_v16 }
 0xc85   :  { %15100 = vpow2.f32 %v11431_v48 }
 0xc86   :  { %15102 = vpow2.f32 %v11433_v7 }
 0xc8f   :  { %v15101_v56 = vpop.eup %15100 }
 0xc90   :  { %v15103_v9 = vpop.eup %15102  ;;  %v13742_v60 = vadd.f32 -1.0, %v15101_v56 }
 0xc91   :  { %v13743_v15 = vadd.f32 -1.0, %v15103_v9 }
 0xc92   :  { %v11437_v62 = vmul.f32 1.6732632, %v13742_v60 }
 0xc93   :  { %v11438_v10 = vmul.f32 1.6732632, %v13743_v15 }
 0xc94   :  { %v11441_v4 = vsel %vm11439_vm5, %v14262_v54, %v11437_v62  ;;  %v11520_v54 = vrot.slane %v11511_v52, %v15554_v36 }
 0xc95   :  { %v11443_v5 = vmul.f32 1.050701, %v11441_v4  ;;  %v11442_v13 = vsel %vm11440_vm6, %v14263_v14, %v11438_v10 }
 0xc96   :  { %v11444_v27 = vmul.f32 1.050701, %v11442_v13 }
 0xc97   :  { %v11445_v61 = vpack.c.bf16 %v11443_v5, %v11443_v5 }
 0xc98   :  { %v11446_v25 = vpack.c.bf16 %v11444_v27, %v11444_v27 }
 0xc9a   :  { %11816 = vmatprep.mubr.bf16.mxu1 %v11446_v25 }
 0xc9b   :  { %11817 = vmatmul.mubr.bf16.vlgmr.msra.gmra.mrb[52].mxu1 %v11445_v61 }
 0xc9c   :  { %14017 = vmatpush3.bf16.msra.mxu1 %v14985_v3  ;;  %11857 = vmatprep.mubr.bf16.mxu1 %v11446_v25 }
 0xc9d   :  { %14018 = vmatprep.subr.bf16.mxu1 %v14986_v18  ;;  %v11524_v18 = vrot.slane %v11511_v52, %v15559_v53  ;;  %v15024_v53 = vld [vmem:[%s20139_s13] sm:$0xff]  }
 0xca0   :  { %14019 = vmatpush3.bf16.msra.mxu1 %v14987_v24 }
 0xca1   :  { %14020 = vmatprep.subr.bf16.mxu1 %v14988_v2 }
 0xca4   :  { %14021 = vmatpush3.bf16.msra.mxu1 %v14989_v43 }
 0xca5   :  { %14022 = vmatprep.subr.bf16.mxu1 %v14990_v31 }
 0xca8   :  { %14023 = vmatpush3.bf16.msra.mxu1 %v14991_v32 }
 0xca9   :  { %14024 = vmatprep.subr.bf16.mxu1 %v14992_v20 }
 0xcac   :  { %14025 = vmatpush3.bf16.msra.mxu1 %v14993_v23 }
 0xcad   :  { %14026 = vmatprep.subr.bf16.mxu1 %v14994_v55 }
 0xcb0   :  { %14027 = vmatpush3.bf16.msra.mxu1 %v14995_v26 }
 0xcb1   :  { %14028 = vmatprep.subr.bf16.mxu1 %v14996_v29 }
 0xcb4   :  { %14029 = vmatpush3.bf16.msra.mxu1 %v14997_v38 }
 0xcb5   :  { %14030 = vmatprep.subr.bf16.mxu1 %v14998_v39 }
 0xcb8   :  { %14031 = vmatpush3.bf16.msra.mxu1 %v14999_v40 }
 0xcb9   :  { %14198 = vmatprep.subr.bf16.mxu1 %v15117_v1 }
 0xcbb   :  { %11858 = vmatmul.mubr.bf16.vlgmr.msra.gmra.mrb[56].mxu1 %v11445_v61 }
 0xcbc   :  { %14214 = vmatprep.mubr.msk.bf16.mxu1 %vm15119_vm0, %v15117_v1  ;;  %14199 = vmatpush3.bf16.msra.mxu1 %v15016_v12 }
 0xcbd   :  { %14200 = vmatprep.subr.bf16.mxu1 %v15117_v1 }
 0xcc0   :  { %14201 = vmatpush3.bf16.msra.mxu1 %v15017_v33 }
 0xcc1   :  { %14202 = vmatprep.subr.bf16.mxu1 %v15117_v1 }
 0xcc4   :  { %14203 = vmatpush3.bf16.msra.mxu1 %v15018_v59 }
 0xcc5   :  { %14204 = vmatprep.subr.bf16.mxu1 %v15117_v1 }
 0xcc8   :  { %14205 = vmatpush3.bf16.msra.mxu1 %v15019_v47 }
 0xcc9   :  { %14206 = vmatprep.subr.bf16.mxu1 %v15117_v1 }
 0xccc   :  { %14207 = vmatpush3.bf16.msra.mxu1 %v15020_v22 }
 0xccd   :  { %14208 = vmatprep.subr.bf16.mxu1 %v15117_v1 }
 0xcd0   :  { %14209 = vmatpush3.bf16.msra.mxu1 %v15021_v51 }
 0xcd1   :  { %14210 = vmatprep.subr.bf16.mxu1 %v15117_v1 }
 0xcd4   :  { %14211 = vmatpush3.bf16.msra.mxu1 %v15022_v46 }
 0xcd5   :  { %14212 = vmatprep.subr.bf16.mxu1 %v15117_v1 }
 0xcd8   :  { %14213 = vmatpush3.bf16.msra.mxu1 %v15023_v37 }
 0xd6e   :  { %v11818_v57 = vpop.f32.mrb[52].mxu1 }
 0xd6f   :  { %v11819_v14 = vadd.f32 %v11818_v57, %v11516_v11  ;;  %v11820_v30 = vpop.f32.mrb[53].mxu1 }
 0xd70   :  { %v11821_v63 = vadd.f32 %v11820_v30, %v11520_v54  ;;  %v11822_v6 = vpop.f32.mrb[54].mxu1 }
 0xd71   :  { %v11865_v16 = vmin.f32 %v11819_v14, 0.0  ;;  %v11823_v48 = vpop.f32.mrb[55].mxu1  ;;  %vm11880_vm7 = vcmp.gt.f32.partialorder %v11819_v14, 0.0 }
 0xd72   :  { %v11866_v7 = vmin.f32 %v11821_v63, 0.0  ;;  %vm11881_vm8 = vcmp.gt.f32.partialorder %v11821_v63, 0.0 }
 0xd73   :  { %v11868_v56 = vmul.f32 1.442695, %v11865_v16 }
 0xd74   :  { %v11870_v9 = vmul.f32 1.442695, %v11866_v7 }
 0xd75   :  { %15104 = vpow2.f32 %v11868_v56 }
 0xd76   :  { %15106 = vpow2.f32 %v11870_v9 }
 0xd7f   :  { %v15105_v60 = vpop.eup %15104 }
 0xd80   :  { %v15107_v15 = vpop.eup %15106  ;;  %v13792_v62 = vadd.f32 -1.0, %v15105_v60 }
 0xd81   :  { %v13793_v10 = vadd.f32 -1.0, %v15107_v15 }
 0xd82   :  { %v11877_v4 = vmul.f32 1.6732632, %v13792_v62 }
 0xd83   :  { %v11878_v34 = vmul.f32 1.6732632, %v13793_v10 }
 0xd84   :  { %v11883_v36 = vsel %vm11880_vm7, %v11819_v14, %v11877_v4  ;;  %v13821_v14 = vld [vmem:[%s20141_s26] ss:$0 sm:$0xff] }
 0xd85   :  { %v11886_v5 = vmul.f32 1.050701, %v11883_v36  ;;  %v11884_v13 = vsel %vm11881_vm8, %v11821_v63, %v11878_v34 }
 0xd86   :  { %v11887_v27 = vmul.f32 1.050701, %v11884_v13 }
 0xd87   :  { %v11889_v3 = vpack.c.bf16 %v11886_v5, %v11886_v5 }
 0xd88   :  { %v11890_v25 = vpack.c.bf16 %v11887_v27, %v11887_v27 }
 0xd8a   :  { %12123 = vmatprep.mubr.bf16.mxu0 %v11890_v25 }
 0xd8b   :  { %12124 = vmatmul.mubr.bf16.vlgmr.msra.gmra.mrb[56].mxu0 %v11889_v3 }
 0xd8c   :  { %14234 = vmatprep.mubr.msk.bf16.mxu0 %vm15119_vm0, %v15117_v1  ;;  %14219 = vmatpush3.bf16.msra.mxu0 %v15024_v53 }
 0xd8d   :  { %14220 = vmatprep.subr.bf16.mxu0 %v15117_v1 }
 0xd8e   :  { %v14032_v61 = vpop.f32.mrb[56].mxu1 }
 0xd8f   :  { %v14033_v24 = vpop.f32.mrb[57].mxu1 }
 0xd90   :  { %v14034_v2 = vadd.f32 %v14033_v24, %v14032_v61  ;;  %v14035_v43 = vpop.f32.mrb[58].mxu1  ;;  %14221 = vmatpush3.bf16.msra.mxu0 %v15025_v41 }
 0xd91   :  { %v14036_v31 = vpop.f32.mrb[59].mxu1  ;;  %14222 = vmatprep.subr.bf16.mxu0 %v15117_v1 }
 0xd92   :  { %v11860_v32 = vadd.f32 %v14034_v2, %v11524_v18 }
 0xd94   :  { %v11867_v20 = vmin.f32 %v11860_v32, 0.0  ;;  %vm11882_vm9 = vcmp.gt.f32.partialorder %v11860_v32, 0.0  ;;  %14223 = vmatpush3.bf16.msra.mxu0 %v15026_v49 }
 0xd95   :  { %14224 = vmatprep.subr.bf16.mxu0 %v15117_v1 }
 0xd96   :  { %v11872_v23 = vmul.f32 1.442695, %v11867_v20 }
 0xd98   :  { %15108 = vpow2.f32 %v11872_v23  ;;  %14225 = vmatpush3.bf16.msra.mxu0 %v15027_v42 }
 0xd99   :  { %14226 = vmatprep.subr.bf16.mxu0 %v15117_v1 }
 0xd9c   :  { %14227 = vmatpush3.bf16.msra.mxu0 %v15028_v35 }
 0xd9d   :  { %14228 = vmatprep.subr.bf16.mxu0 %v15117_v1 }
 0xda0   :  { %14229 = vmatpush3.bf16.msra.mxu0 %v15029_v8 }
 0xda1   :  { %14230 = vmatprep.subr.bf16.mxu0 %v15117_v1 }
 0xda2   :  { %v15109_v55 = vpop.eup %15108 }
 0xda3   :  { %v13794_v26 = vadd.f32 -1.0, %v15109_v55 }
 0xda4   :  { %14231 = vmatpush3.bf16.msra.mxu0 %v15030_v17 }
 0xda5   :  { %v11879_v29 = vmul.f32 1.6732632, %v13794_v26  ;;  %14232 = vmatprep.subr.bf16.mxu0 %v15117_v1 }
 0xda7   :  { %v11885_v38 = vsel %vm11882_vm9, %v11860_v32, %v11879_v29 }
 0xda8   :  { %v11888_v39 = vmul.f32 1.050701, %v11885_v38  ;;  %14233 = vmatpush3.bf16.msra.mxu0 %v15031_v45 }
 0xdaa   :  { %v11891_v40 = vpack.c.bf16 %v11888_v39, %v11888_v39 }
 0xdac   :  { %14215 = vmatmul.mubr.bf16.vlgmr.msra.gmra.mrb[60].mxu1 %v11891_v40 }
 0xe5e   :  { %v14054_v28 = vpop.f32.mrb[56].mxu0 }
 0xe5f   :  { %v14055_v44 = vpop.f32.mrb[57].mxu0 }
 0xe60   :  { %v14056_v19 = vadd.f32 %v14055_v44, %v14054_v28  ;;  %v14057_v21 = vpop.f32.mrb[58].mxu0 }
 0xe61   :  { %v14058_v58 = vpop.f32.mrb[59].mxu0 }
 0xe62   :  { %v12126_v0 = vadd.f32 %v14056_v19, %v13795_v50 }
 0xe7f   :  { %v12165_v12 = vpop.f32.mrb[60].mxu1 }
 0xe80   :  { %v12166_v33 = vadd.f32 %v12165_v12, %v12126_v0  ;;  %v14216_v59 = vpop.f32.mrb[61].mxu1 }
 0xe81   :  { %v12168_v47 = vpop.f32.mrb[62].mxu1 }
 0xe82   :  { %v12171_v1 = vmin.f32 %v12166_v33, 0.0  ;;  %v14217_v22 = vpop.f32.mrb[63].mxu1  ;;  %vm12176_vm0 = vcmp.gt.f32.partialorder %v12166_v33, 0.0 }
 0xe84   :  { %v12172_v51 = vmul.f32 1.442695, %v12171_v1 }
 0xe86   :  { %15110 = vpow2.f32 %v12172_v51 }
 0xe90   :  { %v15111_v46 = vpop.eup %15110 }
 0xe91   :  { %v13820_v37 = vadd.f32 -1.0, %v15111_v46 }
 0xe93   :  { %v12175_v52 = vmul.f32 1.6732632, %v13820_v37 }
 0xe95   :  { %v12177_v11 = vsel %vm12176_vm0, %v12166_v33, %v12175_v52 }
 0xe96   :  { %v12178_v54 = vmul.f32 1.050701, %v12177_v11 }
 0xe98   :  { %v12179_v57 = vpack.c.bf16 %v12178_v54, %v12178_v54 }
 0xe9a   :  { %14235 = vmatmul.mubr.bf16.vlgmr.msra.gmra.mrb[60].mxu0 %v12179_v57 }
 0xf6d   :  { %v12285_v30 = vpop.f32.mrb[60].mxu0 }
 0xf6e   :  { %v12286_v63 = vadd.f32 %v13821_v14, %v12285_v30  ;;  %v14236_v6 = vpop.f32.mrb[61].mxu0 }
 0xf6f   :  { %v12288_v16 = vpop.f32.mrb[62].mxu0 }
 0xf70   :  { %v14237_v48 = vpop.f32.mrb[63].mxu0  ;;  %v12291_v7 = vmul.f32 %v12286_v63, %v12286_v63 }
 0xf72   :  { %12293 = vrot.lane.b32.xlu0 %v12291_v7, %s15120_s25 }
 0xfe4   :  { %v12294_v56 = vpop.permute.xlu0 %12293 }
 0xfe5   :  { %v12296_v9 = vadd.f32 %v12294_v56, %v12291_v7 }
 0xfe7   :  { %15112 = vrsqrt.f32 %v12296_v9 }
 0xff1   :  { %v15113_v60 = vpop.eup %15112 }
 0xff2   :  { %12301 = vrot.lane.b32.xlu0 %v15113_v60, %s15120_s25  ;;  %v12298_v34 = vmul.f32 %v15113_v60, %v12286_v63 }
 0xff4   :  { %v12299_v36 = vadd.f32 1e-07, %v12298_v34 }
 0xff6   :  { %v12306_v5 = vmul.f32 %v12299_v36, %v12299_v36 }
0x1064   :  { %v12302_v15 = vpop.permute.xlu0 %12301 }
0x1065   :  { %v12304_v62 = vmul.f32 %v12302_v15, %v12286_v63 }
0x1067   :  { %v12305_v10 = vadd.f32 1e-07, %v12304_v62 }
0x1069   :  { %v12307_v4 = vmul.f32 %v12305_v10, %v12305_v10 }
0x106b   :  { %12309 = vrot.lane.b32.xlu1 %v12307_v4, %s15120_s25 }
0x10dd   :  { %v12310_v13 = vpop.permute.xlu1 %12309 }
0x10de   :  { %v12312_v27 = vadd.f32 %v12310_v13, %v12306_v5 }
0x10e0   :  { %15114 = vrsqrt.f32 %v12312_v27 }
0x10ea   :  { %v15115_v25 = vpop.eup %15114 }
0x10eb   :  { %12317 = vrot.lane.b32.xlu1 %v15115_v25, %s15120_s25  ;;  %v12314_v3 = vmul.f32 %v15115_v25, %v12299_v36 }
0x10ed   :  { %v12315_v24 = vadd.f32 1e-07, %v12314_v3 }
0x115d   :  { %v12318_v61 = vpop.permute.xlu1 %12317 }
0x115e   :  { %v12320_v18 = vmul.f32 %v12318_v61, %v12305_v10 }
0x1160   :  { %v12321_v2 = vadd.f32 1e-07, %v12320_v18 }
0x1162   :  { %v12323_v43 = vsel %vm12322_vm10, %v12315_v24, %v12321_v2 }
0x1163   :  { %12324 = vst [vmem:[%s20142_s27] sm:$0x3] %v12323_v43 }

</bundles_post_ra>
